<compile_context>
chip_gen: v6e
topology: v6e:2x2x1
jax: 0.10.0
libtpu: 0.0.40
codegen_flags: <defaults>
</compile_context>

<pallas_src>
import functools
import math

import jax
import jax.numpy as jnp
from jax.experimental import pallas as pl
from jax.experimental.pallas import tpu as pltpu

BN_EPS = 1e-5
# frozen eval-mode BN with running_mean=0, running_var=1, gamma=1, beta=0
BN_SCALE = 1.0 / math.sqrt(1.0 + BN_EPS)
HEADS = 4
EXPANSION = 4

# MXU-friendly tile targets: multiples of 128 (optimal on v5e's 128x128 MXU) and 256-wide
# output tiles to fill the 2x256x256 MXU on v6e/v7x.
_TM, _TN, _TK = 256, 256, 512
# Cap scoped VMEM well below v7x's 64 MiB physical capacity (double-buffer headroom).
_VMEM_LIMIT = 40 << 20


def _round_up(x, m):
    return ((x + m - 1) // m) * m


def _choose_tile(dim, target, align):
    """Pick tile <= target (target multiple of align) minimizing padding; return (tile, padded)."""
    nblk = max(1, -(-dim // target))
    tile = _round_up(-(-dim // nblk), align)
    return tile, tile * nblk


def _pad2(a, rows, cols):
    r, c = a.shape
    if r == rows and c == cols:
        return a
    return jnp.pad(a, ((0, rows - r), (0, cols - c)))


# ---------------------------------------------------------------------------
# Pallas kernels
# ---------------------------------------------------------------------------
def _matmul_affine_kernel(x_ref, w_ref, s_ref, b_ref, *rest, relu, n_k, has_res):
    if has_res:
        r_ref, o_ref, acc_ref = rest
    else:
        o_ref, acc_ref = rest

    @pl.when(pl.program_id(2) == 0)
    def _():
        acc_ref[...] = jnp.zeros_like(acc_ref)

    acc_ref[...] += jnp.dot(x_ref[...], w_ref[...], preferred_element_type=jnp.float32)

    @pl.when(pl.program_id(2) == n_k - 1)
    def _():
        out = acc_ref[...] * s_ref[...] + b_ref[...]
        if has_res:
            out = out + r_ref[...]
        if relu:
            out = jnp.maximum(out, 0.0)
        o_ref[...] = out.astype(o_ref.dtype)


def matmul_affine(x, w, scale, bias, relu, residual=None):
    """act((x @ w) * scale + bias [+ residual]); x:(M,K) w:(K,N) scale/bias:(N,) residual:(M,N).

    Tiled over (M, N, K) with an f32 accumulator; MXU inputs are bf16.
    """
    M, K = x.shape
    _, N = w.shape
    tm, Mp = _choose_tile(M, _TM, 8)
    tn, Np = _choose_tile(N, _TN, 128)
    tk, Kp = _choose_tile(K, _TK, 128)
    n_k = Kp // tk

    xp = _pad2(x, Mp, Kp).astype(jnp.bfloat16)
    wp = _pad2(w, Kp, Np).astype(jnp.bfloat16)
    sp = _pad2(scale.astype(jnp.float32).reshape(1, N), 1, Np)
    bp = _pad2(bias.astype(jnp.float32).reshape(1, N), 1, Np)

    in_specs = [
        pl.BlockSpec((tm, tk), lambda i, j, k: (i, k)),
        pl.BlockSpec((tk, tn), lambda i, j, k: (k, j)),
        pl.BlockSpec((1, tn), lambda i, j, k: (0, j)),
        pl.BlockSpec((1, tn), lambda i, j, k: (0, j)),
    ]
    args = [xp, wp, sp, bp]
    has_res = residual is not None
    if has_res:
        rp = _pad2(residual.astype(jnp.float32), Mp, Np)
        in_specs.append(pl.BlockSpec((tm, tn), lambda i, j, k: (i, j)))
        args.append(rp)

    out = pl.pallas_call(
        functools.partial(_matmul_affine_kernel, relu=relu, n_k=n_k, has_res=has_res),
        out_shape=jax.ShapeDtypeStruct((Mp, Np), jnp.float32),
        grid_spec=pltpu.PrefetchScalarGridSpec(
            num_scalar_prefetch=0,
            grid=(Mp // tm, Np // tn, n_k),
            in_specs=in_specs,
            out_specs=pl.BlockSpec((tm, tn), lambda i, j, k: (i, j)),
            scratch_shapes=[pltpu.VMEM((tm, tn), jnp.float32)],
        ),
        compiler_params=pltpu.CompilerParams(
            dimension_semantics=("parallel", "parallel", "arbitrary"),
            vmem_limit_bytes=_VMEM_LIMIT),
    )(*args)
    if Mp != M or Np != N:
        out = out[:M, :N]
    return out


def _max_reduce_kernel(*refs):
    o_ref = refs[-1]
    acc = refs[0][...]
    for r in refs[1:-1]:
        acc = jnp.maximum(acc, r[...])
    o_ref[...] = acc


def window_max(views):
    """Elementwise max over a list of (M, C) arrays, tiled over rows."""
    M, C = views[0].shape
    tm, Mp = _choose_tile(M, 1024, 8)
    if Mp != M:
        views = [jnp.pad(v, ((0, Mp - M), (0, 0))) for v in views]
    out = pl.pallas_call(
        _max_reduce_kernel,
        out_shape=jax.ShapeDtypeStruct((Mp, C), jnp.float32),
        grid=(Mp // tm,),
        in_specs=[pl.BlockSpec((tm, C), lambda i: (i, 0)) for _ in views],
        out_specs=pl.BlockSpec((tm, C), lambda i: (i, 0)),
        compiler_params=pltpu.CompilerParams(
            dimension_semantics=("parallel",),
            vmem_limit_bytes=_VMEM_LIMIT),
    )(*views)
    return out[:M] if Mp != M else out


def _mhsa_kernel(q_ref, k_ref, v_ref, p_ref, o_ref, *, out_scale):
    q = q_ref[...]   # (HW, dk) bf16
    k = k_ref[...]
    v = v_ref[...]
    p = p_ref[...]   # (HW, dk) relative-position term
    energy = (jnp.dot(q, k.T, preferred_element_type=jnp.float32) +
              jnp.dot(p, q.T, preferred_element_type=jnp.float32))
    energy = energy - jnp.max(energy, axis=-1, keepdims=True)
    w = jnp.exp(energy)
    attn = w * pl.reciprocal(jnp.sum(w, axis=-1, keepdims=True), approx=True)
    out = jnp.dot(attn.astype(v.dtype), v, preferred_element_type=jnp.float32)
    # folded frozen BN (bn2) + ReLU
    o_ref[...] = jnp.maximum(out * out_scale, 0.0).astype(o_ref.dtype)


def mhsa_attention(qkv, pos, heads):
    """qkv: (N, HW, 3*C) bf16 (fused Q|K|V); pos: (heads, HW, dk) bf16 -> (N, HW, C) f32.

    Heads are selected straight out of the fused tensor via BlockSpec index maps; no HBM
    transposes are needed.
    """
    # TODO(synk): for DeepLab-scale HW, tile over KV chunks with online softmax (flash-style)
    # so the (HW, HW) energy matrix never has to fit in VMEM (matters on v7x's 64 MiB VMEM).
    N, HW, C3 = qkv.shape
    C = C3 // 3
    dk = C // heads
    return pl.pallas_call(
        functools.partial(_mhsa_kernel, out_scale=BN_SCALE),
        out_shape=jax.ShapeDtypeStruct((N, HW, C), jnp.float32),
        grid=(N, heads),
        in_specs=[
            pl.BlockSpec((None, HW, dk), lambda n, h: (n, 0, h)),              # Q head h
            pl.BlockSpec((None, HW, dk), lambda n, h: (n, 0, heads + h)),      # K head h
            pl.BlockSpec((None, HW, dk), lambda n, h: (n, 0, 2 * heads + h)),  # V head h
            pl.BlockSpec((None, HW, dk), lambda n, h: (h, 0, 0)),              # rel-pos
        ],
        out_specs=pl.BlockSpec((None, HW, dk), lambda n, h: (n, 0, h)),
        compiler_params=pltpu.CompilerParams(
            dimension_semantics=("parallel", "parallel"),
            vmem_limit_bytes=_VMEM_LIMIT),
    )(qkv, qkv, qkv, pos)


# ---------------------------------------------------------------------------
# Glue: conv-as-matmul, pooling, blocks
# ---------------------------------------------------------------------------
def conv_out(h, k, s, p, d=1):
    return (h + 2 * p - d * (k - 1) - 1) // s + 1


def pool_out_ceil(h, k, s, p):
    o = -(-(h + 2 * p - k) // s) + 1          # ceil_mode
    if (o - 1) * s >= h + p:                  # PyTorch rule: window must start in-bounds
        o -= 1
    return o


def conv_bn_act(x, w, conv_bias, *, stride=1, padding=0, dilation=1, relu=False,
                bn=True, residual=None):
    """x: (N,H,W,Cin), w: (kh,kw,Cin,Cout) -> (N,Ho,Wo,Cout). Frozen BN folded; optional
    fused residual add (+ReLU) in the matmul epilogue."""
    N, H, W, Cin = x.shape
    kh, kw, _, Cout = w.shape
    Ho = conv_out(H, kh, stride, padding, dilation)
    Wo = conv_out(W, kw, stride, padding, dilation)

    if kh == 1 and kw == 1 and padding == 0:
        patches = x[:, ::stride, ::stride, :] if stride > 1 else x
    else:
        # TODO(synk): im2col still replicates the activation kh*kw times in HBM; a fully
        # fused conv would stream shifted windows of the padded input inside the kernel.
        # Mitigated by the bf16 cast inside matmul_affine (halves that traffic).
        xp = jnp.pad(x, ((0, 0), (padding, padding), (padding, padding), (0, 0)))
        cols = []
        for i in range(kh):
            for j in range(kw):
                hi, wi = i * dilation, j * dilation
                sl = jax.lax.slice(
                    xp, (0, hi, wi, 0),
                    (N, hi + (Ho - 1) * stride + 1, wi + (Wo - 1) * stride + 1, Cin),
                    (1, stride, stride, 1))
                cols.append(sl)
        patches = jnp.concatenate(cols, axis=-1)

    K = kh * kw * Cin
    xm = patches.reshape(N * Ho * Wo, K)
    wm = w.reshape(K, Cout)
    if bn:
        scale = jnp.full((Cout,), BN_SCALE, jnp.float32)
        bias = (conv_bias * BN_SCALE) if conv_bias is not None else jnp.zeros((Cout,), jnp.float32)
    else:
        scale = jnp.ones((Cout,), jnp.float32)
        bias = conv_bias if conv_bias is not None else jnp.zeros((Cout,), jnp.float32)
    out = matmul_affine(xm, wm, scale, bias, relu, residual=residual)
    return out.reshape(N, Ho, Wo, Cout)


def maxpool_3x3_s2_ceil(x):
    N, H, W, C = x.shape
    k, s, p = 3, 2, 1
    Ho = pool_out_ceil(H, k, s, p)
    Wo = pool_out_ceil(W, k, s, p)
    need_h = (Ho - 1) * s + k
    need_w = (Wo - 1) * s + k
    xp = jnp.pad(x, ((0, 0), (p, need_h - H - p), (p, need_w - W - p), (0, 0)),
                 constant_values=-jnp.inf)
    views = []
    for i in range(k):
        for j in range(k):
            sl = jax.lax.slice(
                xp, (0, i, j, 0),
                (N, i + (Ho - 1) * s + 1, j + (Wo - 1) * s + 1, C),
                (1, s, s, 1))
            views.append(sl.reshape(N * Ho * Wo, C))
    return window_max(views).reshape(N, Ho, Wo, C)


def mhsa_block(x, blk, heads):
    """BoTNet-style MHSA (replaces the 3x3 conv of the bottleneck). Includes bn2+ReLU."""
    N, H, W, C = x.shape
    dk = C // heads
    xf = x.reshape(N * H * W, C)
    # fused Q|K|V projection: one (M,C) x (C,3C) matmul instead of three.
    wqkv = jnp.concatenate([blk['wq'], blk['wk'], blk['wv']], axis=1)
    qkv = matmul_affine(xf, wqkv,
                        jnp.ones((3 * C,), jnp.float32),
                        jnp.zeros((3 * C,), jnp.float32),
                        relu=False)
    qkv = qkv.reshape(N, H * W, 3 * C).astype(jnp.bfloat16)

    # relative position term: (heads, dk, H, W) -> (heads, HW, dk)
    pos = (blk['rel_h'][:, :, None, :] + blk['rel_w'][:, :, :, None])
    pos = pos.reshape(heads, dk, H * W).transpose(0, 2, 1).astype(jnp.bfloat16)

    out = mhsa_attention(qkv, pos, heads)                  # (N, HW, C)
    return out.reshape(N, H, W, C)


def bottleneck(x, blk, stride, dilation, mhsa, heads):
    if 'ds_w' in blk:
        residual = conv_bn_act(x, blk['ds_w'], None, stride=stride, padding=0, relu=False)
    else:
        residual = x
    out = conv_bn_act(x, blk['w1'], None, stride=1, padding=0, relu=True)
    if mhsa:
        out = mhsa_block(out, blk, heads)                  # bn2 + relu folded in kernel
    else:
        out = conv_bn_act(out, blk['w2'], None, stride=stride,
                          padding=dilation, dilation=dilation, relu=True)
    # final 1x1 conv: folded bn3 + residual add + ReLU all fused in the matmul epilogue
    cout = blk['w3'].shape[-1]
    out = conv_bn_act(out, blk['w3'], None, stride=1, padding=0, relu=True,
                      residual=residual.reshape(-1, cout))
    return out


def run_layer(x, blocks, stride, dilation, mhsa, heads):
    for bi, blk in enumerate(blocks):
        s = stride if bi == 0 else 1
        x = bottleneck(x, blk, s, dilation, mhsa, heads)
    return x


# ---------------------------------------------------------------------------
# Parameter construction (deterministic)
# ---------------------------------------------------------------------------
class ParamGen:
    def __init__(self, seed=0):
        self.key = jax.random.PRNGKey(seed)
        self.i = 0

    def normal(self, shape, std=0.01):
        k = jax.random.fold_in(self.key, self.i)
        self.i += 1
        return std * jax.random.normal(k, shape, jnp.float32)


def build_params(input_channels, layers, num_labels, heads, in_hw):
    g = ParamGen(0)
    P = {}
    P['conv1_w'] = g.normal((7, 7, input_channels, 64))
    P['conv1_b'] = g.normal((64,))

    h = conv_out(in_hw[0], 7, 2, 3)
    w = conv_out(in_hw[1], 7, 2, 3)
    h = pool_out_ceil(h, 3, 2, 1)
    w = pool_out_ceil(w, 3, 2, 1)

    inplanes = 64

    def make_layer(name, planes, nblocks, stride, dilation, mhsa, h, w):
        nonlocal inplanes
        blocks = []
        need_ds = (stride != 1) or (inplanes != planes * EXPANSION) or dilation in (2, 4)
        for bi in range(nblocks):
            s = stride if bi == 0 else 1
            blk = {'w1': g.normal((1, 1, inplanes, planes))}
            if mhsa:
                dk = planes // heads
                blk['wq'] = g.normal((planes, planes))
                blk['wk'] = g.normal((planes, planes))
                blk['wv'] = g.normal((planes, planes))
                blk['rel_h'] = g.normal((heads, dk, w), std=0.02)
                blk['rel_w'] = g.normal((heads, dk, h), std=0.02)
            else:
                blk['w2'] = g.normal((3, 3, planes, planes))
            blk['w3'] = g.normal((1, 1, planes, planes * EXPANSION))
            if bi == 0 and need_ds:
                blk['ds_w'] = g.normal((1, 1, inplanes, planes * EXPANSION))
            blocks.append(blk)
            if s == 2:
                h = conv_out(h, 3, 2, 1)
                w = conv_out(w, 3, 2, 1)
            inplanes = planes * EXPANSION
        P[name] = blocks
        return h, w

    h, w = make_layer('layer1', 64,  layers[0], 1, 1, False, h, w)
    h, w = make_layer('layer2', 128, layers[1], 2, 1, False, h, w)
    h, w = make_layer('layer3', 256, layers[2], 1, 2, False, h, w)
    h, w = make_layer('layer4', 512, layers[3], 1, 4, True,  h, w)

    # TODO(synk): Layer5_Module is not specified in the reference; using a 1x1-conv
    # classifier + bilinear upsample to the input size as a stand-in.
    P['cls_w'] = g.normal((1, 1, 512 * EXPANSION, num_labels))
    return P


# ---------------------------------------------------------------------------
# Forward (accepts/returns NCHW like the PyTorch module)
# ---------------------------------------------------------------------------
def forward(params, x_nchw):
    x = jnp.transpose(x_nchw, (0, 2, 3, 1)).astype(jnp.float32)   # -> NHWC
    in_h, in_w = x.shape[1], x.shape[2]

    # stem: conv1 + bn1 + relu + maxpool
    x = conv_bn_act(x, params['conv1_w'], params['conv1_b'],
                    stride=2, padding=3, relu=True)
    x = maxpool_3x3_s2_ceil(x)

    x = run_layer(x, params['layer1'], stride=1, dilation=1, mhsa=False, heads=HEADS)
    x = run_layer(x, params['layer2'], stride=2, dilation=1, mhsa=False, heads=HEADS)
    x = run_layer(x, params['layer3'], stride=1, dilation=2, mhsa=False, heads=HEADS)
    x = run_layer(x, params['layer4'], stride=1, dilation=4, mhsa=True,  heads=HEADS)

    # layer5 stand-in: 1x1 conv classifier + bilinear resize to the input resolution
    logits = conv_bn_act(x, params['cls_w'], None, stride=1, padding=0, relu=False, bn=False)
    logits = jax.image.resize(
        logits, (logits.shape[0], in_h, in_w, logits.shape[-1]), method='bilinear')
    return jnp.transpose(logits, (0, 3, 1, 2))                      # -> NCHW


if __name__ == "__main__":
    N, C, H, W = 2, 4, 16, 16
    NUM_LABELS = 5
    LAYERS = (1, 1, 1, 1)

    key = jax.random.PRNGKey(0)
    x = jax.random.normal(key, (N, C, H, W), jnp.float32)

    params = build_params(input_channels=C, layers=LAYERS,
                          num_labels=NUM_LABELS, heads=HEADS, in_hw=(H, W))

    fwd = jax.jit(forward)
    out = fwd(params, x)
    jax.block_until_ready(out)
    assert out.shape == (N, NUM_LABELS, H, W), out.shape
    assert bool(jnp.all(jnp.isfinite(out)))
    print("KERNEL_OK")
</pallas_src>

<mosaic_0001>
module attributes {stable_mosaic.version = 11 : i64} {
  func.func @_matmul_affine_kernel(%arg0: i32, %arg1: i32, %arg2: i32, %arg3: memref<128x256xbf16, #tpu.memory_space<vmem>>, %arg4: memref<256x128xbf16, #tpu.memory_space<vmem>>, %arg5: memref<1x128xf32, #tpu.memory_space<vmem>>, %arg6: memref<1x128xf32, #tpu.memory_space<vmem>>, %arg7: memref<128x128xf32, #tpu.memory_space<vmem>>, %arg8: memref<128x128xf32, #tpu.memory_space<vmem>>) attributes {dimension_semantics = [#tpu.dimension_semantics<parallel>, #tpu.dimension_semantics<parallel>, #tpu.dimension_semantics<arbitrary>], iteration_bounds = array<i64: 1, 1, 1>, scalar_prefetch = 0 : i64, scratch_operands = 1 : i64, tpu.core_type = #tpu.core_type<tc>, window_params = [{transform_indices = @transform_0, window_bounds = array<i64: 128, 256>}, {transform_indices = @transform_1, window_bounds = array<i64: 256, 128>}, {transform_indices = @transform_2, window_bounds = array<i64: 1, 128>}, {transform_indices = @transform_3, window_bounds = array<i64: 1, 128>}, {transform_indices = @transform_4, window_bounds = array<i64: 128, 128>}]} {
    %c0_i32 = arith.constant 0 : i32
    %0 = arith.cmpi eq, %arg2, %c0_i32 : i32
    %1 = arith.extui %0 : i1 to i32
    %c0_i32_0 = arith.constant 0 : i32
    %2 = arith.cmpi ne, %1, %c0_i32_0 : i32
    scf.if %2 {
      %cst_10 = arith.constant 0.000000e+00 : f32
      %12 = vector.broadcast %cst_10 : f32 to vector<128x128xf32>
      %c0_11 = arith.constant 0 : index
      %c0_12 = arith.constant 0 : index
      %13 = vector.load %arg8[%c0_11, %c0_12] : memref<128x128xf32, #tpu.memory_space<vmem>>, vector<128x128xf32>
      tpu.vector_store %arg8[%c0_11, %c0_12], %12 {strides = array<i32>} : memref<128x128xf32, #tpu.memory_space<vmem>>, vector<128x128xf32>,
    } else {
    }
    %c0 = arith.constant 0 : index
    %c0_1 = arith.constant 0 : index
    %3 = vector.load %arg8[%c0, %c0_1] : memref<128x128xf32, #tpu.memory_space<vmem>>, vector<128x128xf32>
    %c0_2 = arith.constant 0 : index
    %c0_3 = arith.constant 0 : index
    %4 = vector.load %arg3[%c0_2, %c0_3] : memref<128x256xbf16, #tpu.memory_space<vmem>>, vector<128x256xbf16>
    %c0_4 = arith.constant 0 : index
    %c0_5 = arith.constant 0 : index
    %5 = vector.load %arg4[%c0_4, %c0_5] : memref<256x128xbf16, #tpu.memory_space<vmem>>, vector<256x128xbf16>
    %cst = arith.constant dense<0.000000e+00> : vector<128x128xf32>
    %6 = tpu.matmul %4, %5, %cst {dimension_numbers = #tpu.dot_dimension_numbers<[1], [0], [0], [1], [0, 0, 1, 1], [], []>} : vector<128x256xbf16>, vector<256x128xbf16>, vector<128x128xf32> -> vector<128x128xf32>
    %7 = arith.addf %3, %6 : vector<128x128xf32>
    %c0_6 = arith.constant 0 : index
    %c0_7 = arith.constant 0 : index
    %8 = vector.load %arg8[%c0_6, %c0_7] : memref<128x128xf32, #tpu.memory_space<vmem>>, vector<128x128xf32>
    tpu.vector_store %arg8[%c0_6, %c0_7], %7 {strides = array<i32>} : memref<128x128xf32, #tpu.memory_space<vmem>>, vector<128x128xf32>,
    %c0_i32_8 = arith.constant 0 : i32
    %9 = arith.cmpi eq, %arg2, %c0_i32_8 : i32
    %10 = arith.extui %9 : i1 to i32
    %c0_i32_9 = arith.constant 0 : i32
    %11 = arith.cmpi ne, %10, %c0_i32_9 : i32
    scf.if %11 {
      %c0_10 = arith.constant 0 : index
      %c0_11 = arith.constant 0 : index
      %12 = vector.load %arg8[%c0_10, %c0_11] : memref<128x128xf32, #tpu.memory_space<vmem>>, vector<128x128xf32>
      %c0_12 = arith.constant 0 : index
      %c0_13 = arith.constant 0 : index
      %13 = vector.load %arg5[%c0_12, %c0_13] : memref<1x128xf32, #tpu.memory_space<vmem>>, vector<1x128xf32>
      %14 = vector.broadcast %13 : vector<1x128xf32> to vector<128x128xf32>
      %15 = arith.mulf %12, %14 : vector<128x128xf32>
      %c0_14 = arith.constant 0 : index
      %c0_15 = arith.constant 0 : index
      %16 = vector.load %arg6[%c0_14, %c0_15] : memref<1x128xf32, #tpu.memory_space<vmem>>, vector<1x128xf32>
      %17 = vector.broadcast %16 : vector<1x128xf32> to vector<128x128xf32>
      %18 = arith.addf %15, %17 : vector<128x128xf32>
      %cst_16 = arith.constant 0.000000e+00 : f32
      %19 = vector.broadcast %cst_16 : f32 to vector<128x128xf32>
      %20 = arith.maximumf %18, %19 : vector<128x128xf32>
      %c0_17 = arith.constant 0 : index
      %c0_18 = arith.constant 0 : index
      %21 = vector.load %arg7[%c0_17, %c0_18] : memref<128x128xf32, #tpu.memory_space<vmem>>, vector<128x128xf32>
      tpu.vector_store %arg7[%c0_17, %c0_18], %20 {strides = array<i32>} : memref<128x128xf32, #tpu.memory_space<vmem>>, vector<128x128xf32>,
    } else {
    }
    return
  }
  func.func @transform_0(%arg0: i32, %arg1: i32, %arg2: i32) -> (i32, i32) {
    %c0_i32 = arith.constant 0 : i32
    return %arg0, %arg2 : i32, i32
  }
  func.func @transform_1(%arg0: i32, %arg1: i32, %arg2: i32) -> (i32, i32) {
    %c0_i32 = arith.constant 0 : i32
    return %arg2, %arg1 : i32, i32
  }
  func.func @transform_2(%arg0: i32, %arg1: i32, %arg2: i32) -> (i32, i32) {
    %c0_i32 = arith.constant 0 : i32
    %c0_i32_0 = arith.constant 0 : i32
    return %c0_i32, %arg1 : i32, i32
  }
  func.func @transform_3(%arg0: i32, %arg1: i32, %arg2: i32) -> (i32, i32) {
    %c0_i32 = arith.constant 0 : i32
    %c0_i32_0 = arith.constant 0 : i32
    return %c0_i32, %arg1 : i32, i32
  }
  func.func @transform_4(%arg0: i32, %arg1: i32, %arg2: i32) -> (i32, i32) {
    %c0_i32 = arith.constant 0 : i32
    return %arg0, %arg1 : i32, i32
  }
}

module attributes {stable_mosaic.version = 11 : i64} {
  func.func @_max_reduce_kernel(%arg0: i32, %arg1: memref<56x64xf32, #tpu.memory_space<vmem>>, %arg2: memref<56x64xf32, #tpu.memory_space<vmem>>, %arg3: memref<56x64xf32, #tpu.memory_space<vmem>>, %arg4: memref<56x64xf32, #tpu.memory_space<vmem>>, %arg5: memref<56x64xf32, #tpu.memory_space<vmem>>, %arg6: memref<56x64xf32, #tpu.memory_space<vmem>>, %arg7: memref<56x64xf32, #tpu.memory_space<vmem>>, %arg8: memref<56x64xf32, #tpu.memory_space<vmem>>, %arg9: memref<56x64xf32, #tpu.memory_space<vmem>>, %arg10: memref<56x64xf32, #tpu.memory_space<vmem>>) attributes {dimension_semantics = [#tpu.dimension_semantics<parallel>], iteration_bounds = array<i64: 1>, scalar_prefetch = 0 : i64, scratch_operands = 0 : i64, tpu.core_type = #tpu.core_type<tc>, window_params = [{transform_indices = @transform_0, window_bounds = array<i64: 56, 64>}, {transform_indices = @transform_1, window_bounds = array<i64: 56, 64>}, {transform_indices = @transform_2, window_bounds = array<i64: 56, 64>}, {transform_indices = @transform_3, window_bounds = array<i64: 56, 64>}, {transform_indices = @transform_4, window_bounds = array<i64: 56, 64>}, {transform_indices = @transform_5, window_bounds = array<i64: 56, 64>}, {transform_indices = @transform_6, window_bounds = array<i64: 56, 64>}, {transform_indices = @transform_7, window_bounds = array<i64: 56, 64>}, {transform_indices = @transform_8, window_bounds = array<i64: 56, 64>}, {transform_indices = @transform_9, window_bounds = array<i64: 56, 64>}]} {
    %c0 = arith.constant 0 : index
    %c0_0 = arith.constant 0 : index
    %0 = vector.load %arg1[%c0, %c0_0] : memref<56x64xf32, #tpu.memory_space<vmem>>, vector<56x64xf32>
    %c0_1 = arith.constant 0 : index
    %c0_2 = arith.constant 0 : index
    %1 = vector.load %arg2[%c0_1, %c0_2] : memref<56x64xf32, #tpu.memory_space<vmem>>, vector<56x64xf32>
    %2 = arith.maximumf %0, %1 : vector<56x64xf32>
    %c0_3 = arith.constant 0 : index
    %c0_4 = arith.constant 0 : index
    %3 = vector.load %arg3[%c0_3, %c0_4] : memref<56x64xf32, #tpu.memory_space<vmem>>, vector<56x64xf32>
    %4 = arith.maximumf %2, %3 : vector<56x64xf32>
    %c0_5 = arith.constant 0 : index
    %c0_6 = arith.constant 0 : index
    %5 = vector.load %arg4[%c0_5, %c0_6] : memref<56x64xf32, #tpu.memory_space<vmem>>, vector<56x64xf32>
    %6 = arith.maximumf %4, %5 : vector<56x64xf32>
    %c0_7 = arith.constant 0 : index
    %c0_8 = arith.constant 0 : index
    %7 = vector.load %arg5[%c0_7, %c0_8] : memref<56x64xf32, #tpu.memory_space<vmem>>, vector<56x64xf32>
    %8 = arith.maximumf %6, %7 : vector<56x64xf32>
    %c0_9 = arith.constant 0 : index
    %c0_10 = arith.constant 0 : index
    %9 = vector.load %arg6[%c0_9, %c0_10] : memref<56x64xf32, #tpu.memory_space<vmem>>, vector<56x64xf32>
    %10 = arith.maximumf %8, %9 : vector<56x64xf32>
    %c0_11 = arith.constant 0 : index
    %c0_12 = arith.constant 0 : index
    %11 = vector.load %arg7[%c0_11, %c0_12] : memref<56x64xf32, #tpu.memory_space<vmem>>, vector<56x64xf32>
    %12 = arith.maximumf %10, %11 : vector<56x64xf32>
    %c0_13 = arith.constant 0 : index
    %c0_14 = arith.constant 0 : index
    %13 = vector.load %arg8[%c0_13, %c0_14] : memref<56x64xf32, #tpu.memory_space<vmem>>, vector<56x64xf32>
    %14 = arith.maximumf %12, %13 : vector<56x64xf32>
    %c0_15 = arith.constant 0 : index
    %c0_16 = arith.constant 0 : index
    %15 = vector.load %arg9[%c0_15, %c0_16] : memref<56x64xf32, #tpu.memory_space<vmem>>, vector<56x64xf32>
    %16 = arith.maximumf %14, %15 : vector<56x64xf32>
    %c0_17 = arith.constant 0 : index
    %c0_18 = arith.constant 0 : index
    %17 = vector.load %arg10[%c0_17, %c0_18] : memref<56x64xf32, #tpu.memory_space<vmem>>, vector<56x64xf32>
    tpu.vector_store %arg10[%c0_17, %c0_18], %16 {strides = array<i32>} : memref<56x64xf32, #tpu.memory_space<vmem>>, vector<56x64xf32>,
    return
  }
  func.func @transform_0(%arg0: i32) -> (i32, i32) {
    %c0_i32 = arith.constant 0 : i32
    %c0_i32_0 = arith.constant 0 : i32
    return %arg0, %c0_i32 : i32, i32
  }
  func.func @transform_1(%arg0: i32) -> (i32, i32) {
    %c0_i32 = arith.constant 0 : i32
    %c0_i32_0 = arith.constant 0 : i32
    return %arg0, %c0_i32 : i32, i32
  }
  func.func @transform_2(%arg0: i32) -> (i32, i32) {
    %c0_i32 = arith.constant 0 : i32
    %c0_i32_0 = arith.constant 0 : i32
    return %arg0, %c0_i32 : i32, i32
  }
  func.func @transform_3(%arg0: i32) -> (i32, i32) {
    %c0_i32 = arith.constant 0 : i32
    %c0_i32_0 = arith.constant 0 : i32
    return %arg0, %c0_i32 : i32, i32
  }
  func.func @transform_4(%arg0: i32) -> (i32, i32) {
    %c0_i32 = arith.constant 0 : i32
    %c0_i32_0 = arith.constant 0 : i32
    return %arg0, %c0_i32 : i32, i32
  }
  func.func @transform_5(%arg0: i32) -> (i32, i32) {
    %c0_i32 = arith.constant 0 : i32
    %c0_i32_0 = arith.constant 0 : i32
    return %arg0, %c0_i32 : i32, i32
  }
  func.func @transform_6(%arg0: i32) -> (i32, i32) {
    %c0_i32 = arith.constant 0 : i32
    %c0_i32_0 = arith.constant 0 : i32
    return %arg0, %c0_i32 : i32, i32
  }
  func.func @transform_7(%arg0: i32) -> (i32, i32) {
    %c0_i32 = arith.constant 0 : i32
    %c0_i32_0 = arith.constant 0 : i32
    return %arg0, %c0_i32 : i32, i32
  }
  func.func @transform_8(%arg0: i32) -> (i32, i32) {
    %c0_i32 = arith.constant 0 : i32
    %c0_i32_0 = arith.constant 0 : i32
    return %arg0, %c0_i32 : i32, i32
  }
  func.func @transform_9(%arg0: i32) -> (i32, i32) {
    %c0_i32 = arith.constant 0 : i32
    %c0_i32_0 = arith.constant 0 : i32
    return %arg0, %c0_i32 : i32, i32
  }
}

module attributes {stable_mosaic.version = 11 : i64} {
  func.func @_matmul_affine_kernel(%arg0: i32, %arg1: i32, %arg2: i32, %arg3: memref<56x128xbf16, #tpu.memory_space<vmem>>, %arg4: memref<128x128xbf16, #tpu.memory_space<vmem>>, %arg5: memref<1x128xf32, #tpu.memory_space<vmem>>, %arg6: memref<1x128xf32, #tpu.memory_space<vmem>>, %arg7: memref<56x128xf32, #tpu.memory_space<vmem>>, %arg8: memref<56x128xf32, #tpu.memory_space<vmem>>) attributes {dimension_semantics = [#tpu.dimension_semantics<parallel>, #tpu.dimension_semantics<parallel>, #tpu.dimension_semantics<arbitrary>], iteration_bounds = array<i64: 1, 1, 1>, scalar_prefetch = 0 : i64, scratch_operands = 1 : i64, tpu.core_type = #tpu.core_type<tc>, window_params = [{transform_indices = @transform_0, window_bounds = array<i64: 56, 128>}, {transform_indices = @transform_1, window_bounds = array<i64: 128, 128>}, {transform_indices = @transform_2, window_bounds = array<i64: 1, 128>}, {transform_indices = @transform_3, window_bounds = array<i64: 1, 128>}, {transform_indices = @transform_4, window_bounds = array<i64: 56, 128>}]} {
    %c0_i32 = arith.constant 0 : i32
    %0 = arith.cmpi eq, %arg2, %c0_i32 : i32
    %1 = arith.extui %0 : i1 to i32
    %c0_i32_0 = arith.constant 0 : i32
    %2 = arith.cmpi ne, %1, %c0_i32_0 : i32
    scf.if %2 {
      %cst_10 = arith.constant 0.000000e+00 : f32
      %12 = vector.broadcast %cst_10 : f32 to vector<56x128xf32>
      %c0_11 = arith.constant 0 : index
      %c0_12 = arith.constant 0 : index
      %13 = vector.load %arg8[%c0_11, %c0_12] : memref<56x128xf32, #tpu.memory_space<vmem>>, vector<56x128xf32>
      tpu.vector_store %arg8[%c0_11, %c0_12], %12 {strides = array<i32>} : memref<56x128xf32, #tpu.memory_space<vmem>>, vector<56x128xf32>,
    } else {
    }
    %c0 = arith.constant 0 : index
    %c0_1 = arith.constant 0 : index
    %3 = vector.load %arg8[%c0, %c0_1] : memref<56x128xf32, #tpu.memory_space<vmem>>, vector<56x128xf32>
    %c0_2 = arith.constant 0 : index
    %c0_3 = arith.constant 0 : index
    %4 = vector.load %arg3[%c0_2, %c0_3] : memref<56x128xbf16, #tpu.memory_space<vmem>>, vector<56x128xbf16>
    %c0_4 = arith.constant 0 : index
    %c0_5 = arith.constant 0 : index
    %5 = vector.load %arg4[%c0_4, %c0_5] : memref<128x128xbf16, #tpu.memory_space<vmem>>, vector<128x128xbf16>
    %cst = arith.constant dense<0.000000e+00> : vector<56x128xf32>
    %6 = tpu.matmul %4, %5, %cst {dimension_numbers = #tpu.dot_dimension_numbers<[1], [0], [0], [1], [0, 0, 1, 1], [], []>} : vector<56x128xbf16>, vector<128x128xbf16>, vector<56x128xf32> -> vector<56x128xf32>
    %7 = arith.addf %3, %6 : vector<56x128xf32>
    %c0_6 = arith.constant 0 : index
    %c0_7 = arith.constant 0 : index
    %8 = vector.load %arg8[%c0_6, %c0_7] : memref<56x128xf32, #tpu.memory_space<vmem>>, vector<56x128xf32>
    tpu.vector_store %arg8[%c0_6, %c0_7], %7 {strides = array<i32>} : memref<56x128xf32, #tpu.memory_space<vmem>>, vector<56x128xf32>,
    %c0_i32_8 = arith.constant 0 : i32
    %9 = arith.cmpi eq, %arg2, %c0_i32_8 : i32
    %10 = arith.extui %9 : i1 to i32
    %c0_i32_9 = arith.constant 0 : i32
    %11 = arith.cmpi ne, %10, %c0_i32_9 : i32
    scf.if %11 {
      %c0_10 = arith.constant 0 : index
      %c0_11 = arith.constant 0 : index
      %12 = vector.load %arg8[%c0_10, %c0_11] : memref<56x128xf32, #tpu.memory_space<vmem>>, vector<56x128xf32>
      %c0_12 = arith.constant 0 : index
      %c0_13 = arith.constant 0 : index
      %13 = vector.load %arg5[%c0_12, %c0_13] : memref<1x128xf32, #tpu.memory_space<vmem>>, vector<1x128xf32>
      %14 = vector.broadcast %13 : vector<1x128xf32> to vector<56x128xf32>
      %15 = arith.mulf %12, %14 : vector<56x128xf32>
      %c0_14 = arith.constant 0 : index
      %c0_15 = arith.constant 0 : index
      %16 = vector.load %arg6[%c0_14, %c0_15] : memref<1x128xf32, #tpu.memory_space<vmem>>, vector<1x128xf32>
      %17 = vector.broadcast %16 : vector<1x128xf32> to vector<56x128xf32>
      %18 = arith.addf %15, %17 : vector<56x128xf32>
      %cst_16 = arith.constant 0.000000e+00 : f32
      %19 = vector.broadcast %cst_16 : f32 to vector<56x128xf32>
      %20 = arith.maximumf %18, %19 : vector<56x128xf32>
      %c0_17 = arith.constant 0 : index
      %c0_18 = arith.constant 0 : index
      %21 = vector.load %arg7[%c0_17, %c0_18] : memref<56x128xf32, #tpu.memory_space<vmem>>, vector<56x128xf32>
      tpu.vector_store %arg7[%c0_17, %c0_18], %20 {strides = array<i32>} : memref<56x128xf32, #tpu.memory_space<vmem>>, vector<56x128xf32>,
    } else {
    }
    return
  }
  func.func @transform_0(%arg0: i32, %arg1: i32, %arg2: i32) -> (i32, i32) {
    %c0_i32 = arith.constant 0 : i32
    return %arg0, %arg2 : i32, i32
  }
  func.func @transform_1(%arg0: i32, %arg1: i32, %arg2: i32) -> (i32, i32) {
    %c0_i32 = arith.constant 0 : i32
    return %arg2, %arg1 : i32, i32
  }
  func.func @transform_2(%arg0: i32, %arg1: i32, %arg2: i32) -> (i32, i32) {
    %c0_i32 = arith.constant 0 : i32
    %c0_i32_0 = arith.constant 0 : i32
    return %c0_i32, %arg1 : i32, i32
  }
  func.func @transform_3(%arg0: i32, %arg1: i32, %arg2: i32) -> (i32, i32) {
    %c0_i32 = arith.constant 0 : i32
    %c0_i32_0 = arith.constant 0 : i32
    return %c0_i32, %arg1 : i32, i32
  }
  func.func @transform_4(%arg0: i32, %arg1: i32, %arg2: i32) -> (i32, i32) {
    %c0_i32 = arith.constant 0 : i32
    return %arg0, %arg1 : i32, i32
  }
}

module attributes {stable_mosaic.version = 11 : i64} {
  func.func @_matmul_affine_kernel(%arg0: i32, %arg1: i32, %arg2: i32, %arg3: memref<56x384xbf16, #tpu.memory_space<vmem>>, %arg4: memref<384x128xbf16, #tpu.memory_space<vmem>>, %arg5: memref<1x128xf32, #tpu.memory_space<vmem>>, %arg6: memref<1x128xf32, #tpu.memory_space<vmem>>, %arg7: memref<56x128xf32, #tpu.memory_space<vmem>>, %arg8: memref<56x128xf32, #tpu.memory_space<vmem>>) attributes {dimension_semantics = [#tpu.dimension_semantics<parallel>, #tpu.dimension_semantics<parallel>, #tpu.dimension_semantics<arbitrary>], iteration_bounds = array<i64: 1, 1, 2>, scalar_prefetch = 0 : i64, scratch_operands = 1 : i64, tpu.core_type = #tpu.core_type<tc>, window_params = [{transform_indices = @transform_0, window_bounds = array<i64: 56, 384>}, {transform_indices = @transform_1, window_bounds = array<i64: 384, 128>}, {transform_indices = @transform_2, window_bounds = array<i64: 1, 128>}, {transform_indices = @transform_3, window_bounds = array<i64: 1, 128>}, {transform_indices = @transform_4, window_bounds = array<i64: 56, 128>}]} {
    %c0_i32 = arith.constant 0 : i32
    %0 = arith.cmpi eq, %arg2, %c0_i32 : i32
    %1 = arith.extui %0 : i1 to i32
    %c0_i32_0 = arith.constant 0 : i32
    %2 = arith.cmpi ne, %1, %c0_i32_0 : i32
    scf.if %2 {
      %cst_9 = arith.constant 0.000000e+00 : f32
      %12 = vector.broadcast %cst_9 : f32 to vector<56x128xf32>
      %c0_10 = arith.constant 0 : index
      %c0_11 = arith.constant 0 : index
      %13 = vector.load %arg8[%c0_10, %c0_11] : memref<56x128xf32, #tpu.memory_space<vmem>>, vector<56x128xf32>
      tpu.vector_store %arg8[%c0_10, %c0_11], %12 {strides = array<i32>} : memref<56x128xf32, #tpu.memory_space<vmem>>, vector<56x128xf32>,
    } else {
    }
    %c0 = arith.constant 0 : index
    %c0_1 = arith.constant 0 : index
    %3 = vector.load %arg8[%c0, %c0_1] : memref<56x128xf32, #tpu.memory_space<vmem>>, vector<56x128xf32>
    %c0_2 = arith.constant 0 : index
    %c0_3 = arith.constant 0 : index
    %4 = vector.load %arg3[%c0_2, %c0_3] : memref<56x384xbf16, #tpu.memory_space<vmem>>, vector<56x384xbf16>
    %c0_4 = arith.constant 0 : index
    %c0_5 = arith.constant 0 : index
    %5 = vector.load %arg4[%c0_4, %c0_5] : memref<384x128xbf16, #tpu.memory_space<vmem>>, vector<384x128xbf16>
    %cst = arith.constant dense<0.000000e+00> : vector<56x128xf32>
    %6 = tpu.matmul %4, %5, %cst {dimension_numbers = #tpu.dot_dimension_numbers<[1], [0], [0], [1], [0, 0, 1, 1], [], []>} : vector<56x384xbf16>, vector<384x128xbf16>, vector<56x128xf32> -> vector<56x128xf32>
    %7 = arith.addf %3, %6 : vector<56x128xf32>
    %c0_6 = arith.constant 0 : index
    %c0_7 = arith.constant 0 : index
    %8 = vector.load %arg8[%c0_6, %c0_7] : memref<56x128xf32, #tpu.memory_space<vmem>>, vector<56x128xf32>
    tpu.vector_store %arg8[%c0_6, %c0_7], %7 {strides = array<i32>} : memref<56x128xf32, #tpu.memory_space<vmem>>, vector<56x128xf32>,
    %c1_i32 = arith.constant 1 : i32
    %9 = arith.cmpi eq, %arg2, %c1_i32 : i32
    %10 = arith.extui %9 : i1 to i32
    %c0_i32_8 = arith.constant 0 : i32
    %11 = arith.cmpi ne, %10, %c0_i32_8 : i32
    scf.if %11 {
      %c0_9 = arith.constant 0 : index
      %c0_10 = arith.constant 0 : index
      %12 = vector.load %arg8[%c0_9, %c0_10] : memref<56x128xf32, #tpu.memory_space<vmem>>, vector<56x128xf32>
      %c0_11 = arith.constant 0 : index
      %c0_12 = arith.constant 0 : index
      %13 = vector.load %arg5[%c0_11, %c0_12] : memref<1x128xf32, #tpu.memory_space<vmem>>, vector<1x128xf32>
      %14 = vector.broadcast %13 : vector<1x128xf32> to vector<56x128xf32>
      %15 = arith.mulf %12, %14 : vector<56x128xf32>
      %c0_13 = arith.constant 0 : index
      %c0_14 = arith.constant 0 : index
      %16 = vector.load %arg6[%c0_13, %c0_14] : memref<1x128xf32, #tpu.memory_space<vmem>>, vector<1x128xf32>
      %17 = vector.broadcast %16 : vector<1x128xf32> to vector<56x128xf32>
      %18 = arith.addf %15, %17 : vector<56x128xf32>
      %cst_15 = arith.constant 0.000000e+00 : f32
      %19 = vector.broadcast %cst_15 : f32 to vector<56x128xf32>
      %20 = arith.maximumf %18, %19 : vector<56x128xf32>
      %c0_16 = arith.constant 0 : index
      %c0_17 = arith.constant 0 : index
      %21 = vector.load %arg7[%c0_16, %c0_17] : memref<56x128xf32, #tpu.memory_space<vmem>>, vector<56x128xf32>
      tpu.vector_store %arg7[%c0_16, %c0_17], %20 {strides = array<i32>} : memref<56x128xf32, #tpu.memory_space<vmem>>, vector<56x128xf32>,
    } else {
    }
    return
  }
  func.func @transform_0(%arg0: i32, %arg1: i32, %arg2: i32) -> (i32, i32) {
    %c0_i32 = arith.constant 0 : i32
    return %arg0, %arg2 : i32, i32
  }
  func.func @transform_1(%arg0: i32, %arg1: i32, %arg2: i32) -> (i32, i32) {
    %c0_i32 = arith.constant 0 : i32
    return %arg2, %arg1 : i32, i32
  }
  func.func @transform_2(%arg0: i32, %arg1: i32, %arg2: i32) -> (i32, i32) {
    %c0_i32 = arith.constant 0 : i32
    %c0_i32_0 = arith.constant 0 : i32
    return %c0_i32, %arg1 : i32, i32
  }
  func.func @transform_3(%arg0: i32, %arg1: i32, %arg2: i32) -> (i32, i32) {
    %c0_i32 = arith.constant 0 : i32
    %c0_i32_0 = arith.constant 0 : i32
    return %c0_i32, %arg1 : i32, i32
  }
  func.func @transform_4(%arg0: i32, %arg1: i32, %arg2: i32) -> (i32, i32) {
    %c0_i32 = arith.constant 0 : i32
    return %arg0, %arg1 : i32, i32
  }
}

module attributes {stable_mosaic.version = 11 : i64} {
  func.func @_matmul_affine_kernel(%arg0: i32, %arg1: i32, %arg2: i32, %arg3: memref<56x128xbf16, #tpu.memory_space<vmem>>, %arg4: memref<128x256xbf16, #tpu.memory_space<vmem>>, %arg5: memref<1x256xf32, #tpu.memory_space<vmem>>, %arg6: memref<1x256xf32, #tpu.memory_space<vmem>>, %arg7: memref<56x256xf32, #tpu.memory_space<vmem>>, %arg8: memref<56x256xf32, #tpu.memory_space<vmem>>, %arg9: memref<56x256xf32, #tpu.memory_space<vmem>>) attributes {dimension_semantics = [#tpu.dimension_semantics<parallel>, #tpu.dimension_semantics<parallel>, #tpu.dimension_semantics<arbitrary>], iteration_bounds = array<i64: 1, 1, 1>, scalar_prefetch = 0 : i64, scratch_operands = 1 : i64, tpu.core_type = #tpu.core_type<tc>, window_params = [{transform_indices = @transform_0, window_bounds = array<i64: 56, 128>}, {transform_indices = @transform_1, window_bounds = array<i64: 128, 256>}, {transform_indices = @transform_2, window_bounds = array<i64: 1, 256>}, {transform_indices = @transform_3, window_bounds = array<i64: 1, 256>}, {transform_indices = @transform_4, window_bounds = array<i64: 56, 256>}, {transform_indices = @transform_5, window_bounds = array<i64: 56, 256>}]} {
    %c0_i32 = arith.constant 0 : i32
    %0 = arith.cmpi eq, %arg2, %c0_i32 : i32
    %1 = arith.extui %0 : i1 to i32
    %c0_i32_0 = arith.constant 0 : i32
    %2 = arith.cmpi ne, %1, %c0_i32_0 : i32
    scf.if %2 {
      %cst_10 = arith.constant 0.000000e+00 : f32
      %12 = vector.broadcast %cst_10 : f32 to vector<56x256xf32>
      %c0_11 = arith.constant 0 : index
      %c0_12 = arith.constant 0 : index
      %13 = vector.load %arg9[%c0_11, %c0_12] : memref<56x256xf32, #tpu.memory_space<vmem>>, vector<56x256xf32>
      tpu.vector_store %arg9[%c0_11, %c0_12], %12 {strides = array<i32>} : memref<56x256xf32, #tpu.memory_space<vmem>>, vector<56x256xf32>,
    } else {
    }
    %c0 = arith.constant 0 : index
    %c0_1 = arith.constant 0 : index
    %3 = vector.load %arg9[%c0, %c0_1] : memref<56x256xf32, #tpu.memory_space<vmem>>, vector<56x256xf32>
    %c0_2 = arith.constant 0 : index
    %c0_3 = arith.constant 0 : index
    %4 = vector.load %arg3[%c0_2, %c0_3] : memref<56x128xbf16, #tpu.memory_space<vmem>>, vector<56x128xbf16>
    %c0_4 = arith.constant 0 : index
    %c0_5 = arith.constant 0 : index
    %5 = vector.load %arg4[%c0_4, %c0_5] : memref<128x256xbf16, #tpu.memory_space<vmem>>, vector<128x256xbf16>
    %cst = arith.constant dense<0.000000e+00> : vector<56x256xf32>
    %6 = tpu.matmul %4, %5, %cst {dimension_numbers = #tpu.dot_dimension_numbers<[1], [0], [0], [1], [0, 0, 1, 1], [], []>} : vector<56x128xbf16>, vector<128x256xbf16>, vector<56x256xf32> -> vector<56x256xf32>
    %7 = arith.addf %3, %6 : vector<56x256xf32>
    %c0_6 = arith.constant 0 : index
    %c0_7 = arith.constant 0 : index
    %8 = vector.load %arg9[%c0_6, %c0_7] : memref<56x256xf32, #tpu.memory_space<vmem>>, vector<56x256xf32>
    tpu.vector_store %arg9[%c0_6, %c0_7], %7 {strides = array<i32>} : memref<56x256xf32, #tpu.memory_space<vmem>>, vector<56x256xf32>,
    %c0_i32_8 = arith.constant 0 : i32
    %9 = arith.cmpi eq, %arg2, %c0_i32_8 : i32
    %10 = arith.extui %9 : i1 to i32
    %c0_i32_9 = arith.constant 0 : i32
    %11 = arith.cmpi ne, %10, %c0_i32_9 : i32
    scf.if %11 {
      %c0_10 = arith.constant 0 : index
      %c0_11 = arith.constant 0 : index
      %12 = vector.load %arg9[%c0_10, %c0_11] : memref<56x256xf32, #tpu.memory_space<vmem>>, vector<56x256xf32>
      %c0_12 = arith.constant 0 : index
      %c0_13 = arith.constant 0 : index
      %13 = vector.load %arg5[%c0_12, %c0_13] : memref<1x256xf32, #tpu.memory_space<vmem>>, vector<1x256xf32>
      %14 = vector.broadcast %13 : vector<1x256xf32> to vector<56x256xf32>
      %15 = arith.mulf %12, %14 : vector<56x256xf32>
      %c0_14 = arith.constant 0 : index
      %c0_15 = arith.constant 0 : index
      %16 = vector.load %arg6[%c0_14, %c0_15] : memref<1x256xf32, #tpu.memory_space<vmem>>, vector<1x256xf32>
      %17 = vector.broadcast %16 : vector<1x256xf32> to vector<56x256xf32>
      %18 = arith.addf %15, %17 : vector<56x256xf32>
      %c0_16 = arith.constant 0 : index
      %c0_17 = arith.constant 0 : index
      %19 = vector.load %arg7[%c0_16, %c0_17] : memref<56x256xf32, #tpu.memory_space<vmem>>, vector<56x256xf32>
      %20 = arith.addf %18, %19 : vector<56x256xf32>
      %cst_18 = arith.constant 0.000000e+00 : f32
      %21 = vector.broadcast %cst_18 : f32 to vector<56x256xf32>
      %22 = arith.maximumf %20, %21 : vector<56x256xf32>
      %c0_19 = arith.constant 0 : index
      %c0_20 = arith.constant 0 : index
      %23 = vector.load %arg8[%c0_19, %c0_20] : memref<56x256xf32, #tpu.memory_space<vmem>>, vector<56x256xf32>
      tpu.vector_store %arg8[%c0_19, %c0_20], %22 {strides = array<i32>} : memref<56x256xf32, #tpu.memory_space<vmem>>, vector<56x256xf32>,
    } else {
    }
    return
  }
  func.func @transform_0(%arg0: i32, %arg1: i32, %arg2: i32) -> (i32, i32) {
    %c0_i32 = arith.constant 0 : i32
    return %arg0, %arg2 : i32, i32
  }
  func.func @transform_1(%arg0: i32, %arg1: i32, %arg2: i32) -> (i32, i32) {
    %c0_i32 = arith.constant 0 : i32
    return %arg2, %arg1 : i32, i32
  }
  func.func @transform_2(%arg0: i32, %arg1: i32, %arg2: i32) -> (i32, i32) {
    %c0_i32 = arith.constant 0 : i32
    %c0_i32_0 = arith.constant 0 : i32
    return %c0_i32, %arg1 : i32, i32
  }
  func.func @transform_3(%arg0: i32, %arg1: i32, %arg2: i32) -> (i32, i32) {
    %c0_i32 = arith.constant 0 : i32
    %c0_i32_0 = arith.constant 0 : i32
    return %c0_i32, %arg1 : i32, i32
  }
  func.func @transform_4(%arg0: i32, %arg1: i32, %arg2: i32) -> (i32, i32) {
    %c0_i32 = arith.constant 0 : i32
    return %arg0, %arg1 : i32, i32
  }
  func.func @transform_5(%arg0: i32, %arg1: i32, %arg2: i32) -> (i32, i32) {
    %c0_i32 = arith.constant 0 : i32
    return %arg0, %arg1 : i32, i32
  }
}

module attributes {stable_mosaic.version = 11 : i64} {
  func.func @_matmul_affine_kernel(%arg0: i32, %arg1: i32, %arg2: i32, %arg3: memref<56x128xbf16, #tpu.memory_space<vmem>>, %arg4: memref<128x256xbf16, #tpu.memory_space<vmem>>, %arg5: memref<1x256xf32, #tpu.memory_space<vmem>>, %arg6: memref<1x256xf32, #tpu.memory_space<vmem>>, %arg7: memref<56x256xf32, #tpu.memory_space<vmem>>, %arg8: memref<56x256xf32, #tpu.memory_space<vmem>>) attributes {dimension_semantics = [#tpu.dimension_semantics<parallel>, #tpu.dimension_semantics<parallel>, #tpu.dimension_semantics<arbitrary>], iteration_bounds = array<i64: 1, 1, 1>, scalar_prefetch = 0 : i64, scratch_operands = 1 : i64, tpu.core_type = #tpu.core_type<tc>, window_params = [{transform_indices = @transform_0, window_bounds = array<i64: 56, 128>}, {transform_indices = @transform_1, window_bounds = array<i64: 128, 256>}, {transform_indices = @transform_2, window_bounds = array<i64: 1, 256>}, {transform_indices = @transform_3, window_bounds = array<i64: 1, 256>}, {transform_indices = @transform_4, window_bounds = array<i64: 56, 256>}]} {
    %c0_i32 = arith.constant 0 : i32
    %0 = arith.cmpi eq, %arg2, %c0_i32 : i32
    %1 = arith.extui %0 : i1 to i32
    %c0_i32_0 = arith.constant 0 : i32
    %2 = arith.cmpi ne, %1, %c0_i32_0 : i32
    scf.if %2 {
      %cst_10 = arith.constant 0.000000e+00 : f32
      %12 = vector.broadcast %cst_10 : f32 to vector<56x256xf32>
      %c0_11 = arith.constant 0 : index
      %c0_12 = arith.constant 0 : index
      %13 = vector.load %arg8[%c0_11, %c0_12] : memref<56x256xf32, #tpu.memory_space<vmem>>, vector<56x256xf32>
      tpu.vector_store %arg8[%c0_11, %c0_12], %12 {strides = array<i32>} : memref<56x256xf32, #tpu.memory_space<vmem>>, vector<56x256xf32>,
    } else {
    }
    %c0 = arith.constant 0 : index
    %c0_1 = arith.constant 0 : index
    %3 = vector.load %arg8[%c0, %c0_1] : memref<56x256xf32, #tpu.memory_space<vmem>>, vector<56x256xf32>
    %c0_2 = arith.constant 0 : index
    %c0_3 = arith.constant 0 : index
    %4 = vector.load %arg3[%c0_2, %c0_3] : memref<56x128xbf16, #tpu.memory_space<vmem>>, vector<56x128xbf16>
    %c0_4 = arith.constant 0 : index
    %c0_5 = arith.constant 0 : index
    %5 = vector.load %arg4[%c0_4, %c0_5] : memref<128x256xbf16, #tpu.memory_space<vmem>>, vector<128x256xbf16>
    %cst = arith.constant dense<0.000000e+00> : vector<56x256xf32>
    %6 = tpu.matmul %4, %5, %cst {dimension_numbers = #tpu.dot_dimension_numbers<[1], [0], [0], [1], [0, 0, 1, 1], [], []>} : vector<56x128xbf16>, vector<128x256xbf16>, vector<56x256xf32> -> vector<56x256xf32>
    %7 = arith.addf %3, %6 : vector<56x256xf32>
    %c0_6 = arith.constant 0 : index
    %c0_7 = arith.constant 0 : index
    %8 = vector.load %arg8[%c0_6, %c0_7] : memref<56x256xf32, #tpu.memory_space<vmem>>, vector<56x256xf32>
    tpu.vector_store %arg8[%c0_6, %c0_7], %7 {strides = array<i32>} : memref<56x256xf32, #tpu.memory_space<vmem>>, vector<56x256xf32>,
    %c0_i32_8 = arith.constant 0 : i32
    %9 = arith.cmpi eq, %arg2, %c0_i32_8 : i32
    %10 = arith.extui %9 : i1 to i32
    %c0_i32_9 = arith.constant 0 : i32
    %11 = arith.cmpi ne, %10, %c0_i32_9 : i32
    scf.if %11 {
      %c0_10 = arith.constant 0 : index
      %c0_11 = arith.constant 0 : index
      %12 = vector.load %arg8[%c0_10, %c0_11] : memref<56x256xf32, #tpu.memory_space<vmem>>, vector<56x256xf32>
      %c0_12 = arith.constant 0 : index
      %c0_13 = arith.constant 0 : index
      %13 = vector.load %arg5[%c0_12, %c0_13] : memref<1x256xf32, #tpu.memory_space<vmem>>, vector<1x256xf32>
      %14 = vector.broadcast %13 : vector<1x256xf32> to vector<56x256xf32>
      %15 = arith.mulf %12, %14 : vector<56x256xf32>
      %c0_14 = arith.constant 0 : index
      %c0_15 = arith.constant 0 : index
      %16 = vector.load %arg6[%c0_14, %c0_15] : memref<1x256xf32, #tpu.memory_space<vmem>>, vector<1x256xf32>
      %17 = vector.broadcast %16 : vector<1x256xf32> to vector<56x256xf32>
      %18 = arith.addf %15, %17 : vector<56x256xf32>
      %c0_16 = arith.constant 0 : index
      %c0_17 = arith.constant 0 : index
      %19 = vector.load %arg7[%c0_16, %c0_17] : memref<56x256xf32, #tpu.memory_space<vmem>>, vector<56x256xf32>
      tpu.vector_store %arg7[%c0_16, %c0_17], %18 {strides = array<i32>} : memref<56x256xf32, #tpu.memory_space<vmem>>, vector<56x256xf32>,
    } else {
    }
    return
  }
  func.func @transform_0(%arg0: i32, %arg1: i32, %arg2: i32) -> (i32, i32) {
    %c0_i32 = arith.constant 0 : i32
    return %arg0, %arg2 : i32, i32
  }
  func.func @transform_1(%arg0: i32, %arg1: i32, %arg2: i32) -> (i32, i32) {
    %c0_i32 = arith.constant 0 : i32
    return %arg2, %arg1 : i32, i32
  }
  func.func @transform_2(%arg0: i32, %arg1: i32, %arg2: i32) -> (i32, i32) {
    %c0_i32 = arith.constant 0 : i32
    %c0_i32_0 = arith.constant 0 : i32
    return %c0_i32, %arg1 : i32, i32
  }
  func.func @transform_3(%arg0: i32, %arg1: i32, %arg2: i32) -> (i32, i32) {
    %c0_i32 = arith.constant 0 : i32
    %c0_i32_0 = arith.constant 0 : i32
    return %c0_i32, %arg1 : i32, i32
  }
  func.func @transform_4(%arg0: i32, %arg1: i32, %arg2: i32) -> (i32, i32) {
    %c0_i32 = arith.constant 0 : i32
    return %arg0, %arg1 : i32, i32
  }
}

module attributes {stable_mosaic.version = 11 : i64} {
  func.func @_matmul_affine_kernel(%arg0: i32, %arg1: i32, %arg2: i32, %arg3: memref<56x256xbf16, #tpu.memory_space<vmem>>, %arg4: memref<256x128xbf16, #tpu.memory_space<vmem>>, %arg5: memref<1x128xf32, #tpu.memory_space<vmem>>, %arg6: memref<1x128xf32, #tpu.memory_space<vmem>>, %arg7: memref<56x128xf32, #tpu.memory_space<vmem>>, %arg8: memref<56x128xf32, #tpu.memory_space<vmem>>) attributes {dimension_semantics = [#tpu.dimension_semantics<parallel>, #tpu.dimension_semantics<parallel>, #tpu.dimension_semantics<arbitrary>], iteration_bounds = array<i64: 1, 1, 1>, scalar_prefetch = 0 : i64, scratch_operands = 1 : i64, tpu.core_type = #tpu.core_type<tc>, window_params = [{transform_indices = @transform_0, window_bounds = array<i64: 56, 256>}, {transform_indices = @transform_1, window_bounds = array<i64: 256, 128>}, {transform_indices = @transform_2, window_bounds = array<i64: 1, 128>}, {transform_indices = @transform_3, window_bounds = array<i64: 1, 128>}, {transform_indices = @transform_4, window_bounds = array<i64: 56, 128>}]} {
    %c0_i32 = arith.constant 0 : i32
    %0 = arith.cmpi eq, %arg2, %c0_i32 : i32
    %1 = arith.extui %0 : i1 to i32
    %c0_i32_0 = arith.constant 0 : i32
    %2 = arith.cmpi ne, %1, %c0_i32_0 : i32
    scf.if %2 {
      %cst_10 = arith.constant 0.000000e+00 : f32
      %12 = vector.broadcast %cst_10 : f32 to vector<56x128xf32>
      %c0_11 = arith.constant 0 : index
      %c0_12 = arith.constant 0 : index
      %13 = vector.load %arg8[%c0_11, %c0_12] : memref<56x128xf32, #tpu.memory_space<vmem>>, vector<56x128xf32>
      tpu.vector_store %arg8[%c0_11, %c0_12], %12 {strides = array<i32>} : memref<56x128xf32, #tpu.memory_space<vmem>>, vector<56x128xf32>,
    } else {
    }
    %c0 = arith.constant 0 : index
    %c0_1 = arith.constant 0 : index
    %3 = vector.load %arg8[%c0, %c0_1] : memref<56x128xf32, #tpu.memory_space<vmem>>, vector<56x128xf32>
    %c0_2 = arith.constant 0 : index
    %c0_3 = arith.constant 0 : index
    %4 = vector.load %arg3[%c0_2, %c0_3] : memref<56x256xbf16, #tpu.memory_space<vmem>>, vector<56x256xbf16>
    %c0_4 = arith.constant 0 : index
    %c0_5 = arith.constant 0 : index
    %5 = vector.load %arg4[%c0_4, %c0_5] : memref<256x128xbf16, #tpu.memory_space<vmem>>, vector<256x128xbf16>
    %cst = arith.constant dense<0.000000e+00> : vector<56x128xf32>
    %6 = tpu.matmul %4, %5, %cst {dimension_numbers = #tpu.dot_dimension_numbers<[1], [0], [0], [1], [0, 0, 1, 1], [], []>} : vector<56x256xbf16>, vector<256x128xbf16>, vector<56x128xf32> -> vector<56x128xf32>
    %7 = arith.addf %3, %6 : vector<56x128xf32>
    %c0_6 = arith.constant 0 : index
    %c0_7 = arith.constant 0 : index
    %8 = vector.load %arg8[%c0_6, %c0_7] : memref<56x128xf32, #tpu.memory_space<vmem>>, vector<56x128xf32>
    tpu.vector_store %arg8[%c0_6, %c0_7], %7 {strides = array<i32>} : memref<56x128xf32, #tpu.memory_space<vmem>>, vector<56x128xf32>,
    %c0_i32_8 = arith.constant 0 : i32
    %9 = arith.cmpi eq, %arg2, %c0_i32_8 : i32
    %10 = arith.extui %9 : i1 to i32
    %c0_i32_9 = arith.constant 0 : i32
    %11 = arith.cmpi ne, %10, %c0_i32_9 : i32
    scf.if %11 {
      %c0_10 = arith.constant 0 : index
      %c0_11 = arith.constant 0 : index
      %12 = vector.load %arg8[%c0_10, %c0_11] : memref<56x128xf32, #tpu.memory_space<vmem>>, vector<56x128xf32>
      %c0_12 = arith.constant 0 : index
      %c0_13 = arith.constant 0 : index
      %13 = vector.load %arg5[%c0_12, %c0_13] : memref<1x128xf32, #tpu.memory_space<vmem>>, vector<1x128xf32>
      %14 = vector.broadcast %13 : vector<1x128xf32> to vector<56x128xf32>
      %15 = arith.mulf %12, %14 : vector<56x128xf32>
      %c0_14 = arith.constant 0 : index
      %c0_15 = arith.constant 0 : index
      %16 = vector.load %arg6[%c0_14, %c0_15] : memref<1x128xf32, #tpu.memory_space<vmem>>, vector<1x128xf32>
      %17 = vector.broadcast %16 : vector<1x128xf32> to vector<56x128xf32>
      %18 = arith.addf %15, %17 : vector<56x128xf32>
      %cst_16 = arith.constant 0.000000e+00 : f32
      %19 = vector.broadcast %cst_16 : f32 to vector<56x128xf32>
      %20 = arith.maximumf %18, %19 : vector<56x128xf32>
      %c0_17 = arith.constant 0 : index
      %c0_18 = arith.constant 0 : index
      %21 = vector.load %arg7[%c0_17, %c0_18] : memref<56x128xf32, #tpu.memory_space<vmem>>, vector<56x128xf32>
      tpu.vector_store %arg7[%c0_17, %c0_18], %20 {strides = array<i32>} : memref<56x128xf32, #tpu.memory_space<vmem>>, vector<56x128xf32>,
    } else {
    }
    return
  }
  func.func @transform_0(%arg0: i32, %arg1: i32, %arg2: i32) -> (i32, i32) {
    %c0_i32 = arith.constant 0 : i32
    return %arg0, %arg2 : i32, i32
  }
  func.func @transform_1(%arg0: i32, %arg1: i32, %arg2: i32) -> (i32, i32) {
    %c0_i32 = arith.constant 0 : i32
    return %arg2, %arg1 : i32, i32
  }
  func.func @transform_2(%arg0: i32, %arg1: i32, %arg2: i32) -> (i32, i32) {
    %c0_i32 = arith.constant 0 : i32
    %c0_i32_0 = arith.constant 0 : i32
    return %c0_i32, %arg1 : i32, i32
  }
  func.func @transform_3(%arg0: i32, %arg1: i32, %arg2: i32) -> (i32, i32) {
    %c0_i32 = arith.constant 0 : i32
    %c0_i32_0 = arith.constant 0 : i32
    return %c0_i32, %arg1 : i32, i32
  }
  func.func @transform_4(%arg0: i32, %arg1: i32, %arg2: i32) -> (i32, i32) {
    %c0_i32 = arith.constant 0 : i32
    return %arg0, %arg1 : i32, i32
  }
}

module attributes {stable_mosaic.version = 11 : i64} {
  func.func @_matmul_affine_kernel(%arg0: i32, %arg1: i32, %arg2: i32, %arg3: memref<24x384xbf16, #tpu.memory_space<vmem>>, %arg4: memref<384x128xbf16, #tpu.memory_space<vmem>>, %arg5: memref<1x128xf32, #tpu.memory_space<vmem>>, %arg6: memref<1x128xf32, #tpu.memory_space<vmem>>, %arg7: memref<24x128xf32, #tpu.memory_space<vmem>>, %arg8: memref<24x128xf32, #tpu.memory_space<vmem>>) attributes {dimension_semantics = [#tpu.dimension_semantics<parallel>, #tpu.dimension_semantics<parallel>, #tpu.dimension_semantics<arbitrary>], iteration_bounds = array<i64: 1, 1, 3>, scalar_prefetch = 0 : i64, scratch_operands = 1 : i64, tpu.core_type = #tpu.core_type<tc>, window_params = [{transform_indices = @transform_0, window_bounds = array<i64: 24, 384>}, {transform_indices = @transform_1, window_bounds = array<i64: 384, 128>}, {transform_indices = @transform_2, window_bounds = array<i64: 1, 128>}, {transform_indices = @transform_3, window_bounds = array<i64: 1, 128>}, {transform_indices = @transform_4, window_bounds = array<i64: 24, 128>}]} {
    %c0_i32 = arith.constant 0 : i32
    %0 = arith.cmpi eq, %arg2, %c0_i32 : i32
    %1 = arith.extui %0 : i1 to i32
    %c0_i32_0 = arith.constant 0 : i32
    %2 = arith.cmpi ne, %1, %c0_i32_0 : i32
    scf.if %2 {
      %cst_9 = arith.constant 0.000000e+00 : f32
      %12 = vector.broadcast %cst_9 : f32 to vector<24x128xf32>
      %c0_10 = arith.constant 0 : index
      %c0_11 = arith.constant 0 : index
      %13 = vector.load %arg8[%c0_10, %c0_11] : memref<24x128xf32, #tpu.memory_space<vmem>>, vector<24x128xf32>
      tpu.vector_store %arg8[%c0_10, %c0_11], %12 {strides = array<i32>} : memref<24x128xf32, #tpu.memory_space<vmem>>, vector<24x128xf32>,
    } else {
    }
    %c0 = arith.constant 0 : index
    %c0_1 = arith.constant 0 : index
    %3 = vector.load %arg8[%c0, %c0_1] : memref<24x128xf32, #tpu.memory_space<vmem>>, vector<24x128xf32>
    %c0_2 = arith.constant 0 : index
    %c0_3 = arith.constant 0 : index
    %4 = vector.load %arg3[%c0_2, %c0_3] : memref<24x384xbf16, #tpu.memory_space<vmem>>, vector<24x384xbf16>
    %c0_4 = arith.constant 0 : index
    %c0_5 = arith.constant 0 : index
    %5 = vector.load %arg4[%c0_4, %c0_5] : memref<384x128xbf16, #tpu.memory_space<vmem>>, vector<384x128xbf16>
    %cst = arith.constant dense<0.000000e+00> : vector<24x128xf32>
    %6 = tpu.matmul %4, %5, %cst {dimension_numbers = #tpu.dot_dimension_numbers<[1], [0], [0], [1], [0, 0, 1, 1], [], []>} : vector<24x384xbf16>, vector<384x128xbf16>, vector<24x128xf32> -> vector<24x128xf32>
    %7 = arith.addf %3, %6 : vector<24x128xf32>
    %c0_6 = arith.constant 0 : index
    %c0_7 = arith.constant 0 : index
    %8 = vector.load %arg8[%c0_6, %c0_7] : memref<24x128xf32, #tpu.memory_space<vmem>>, vector<24x128xf32>
    tpu.vector_store %arg8[%c0_6, %c0_7], %7 {strides = array<i32>} : memref<24x128xf32, #tpu.memory_space<vmem>>, vector<24x128xf32>,
    %c2_i32 = arith.constant 2 : i32
    %9 = arith.cmpi eq, %arg2, %c2_i32 : i32
    %10 = arith.extui %9 : i1 to i32
    %c0_i32_8 = arith.constant 0 : i32
    %11 = arith.cmpi ne, %10, %c0_i32_8 : i32
    scf.if %11 {
      %c0_9 = arith.constant 0 : index
      %c0_10 = arith.constant 0 : index
      %12 = vector.load %arg8[%c0_9, %c0_10] : memref<24x128xf32, #tpu.memory_space<vmem>>, vector<24x128xf32>
      %c0_11 = arith.constant 0 : index
      %c0_12 = arith.constant 0 : index
      %13 = vector.load %arg5[%c0_11, %c0_12] : memref<1x128xf32, #tpu.memory_space<vmem>>, vector<1x128xf32>
      %14 = vector.broadcast %13 : vector<1x128xf32> to vector<24x128xf32>
      %15 = arith.mulf %12, %14 : vector<24x128xf32>
      %c0_13 = arith.constant 0 : index
      %c0_14 = arith.constant 0 : index
      %16 = vector.load %arg6[%c0_13, %c0_14] : memref<1x128xf32, #tpu.memory_space<vmem>>, vector<1x128xf32>
      %17 = vector.broadcast %16 : vector<1x128xf32> to vector<24x128xf32>
      %18 = arith.addf %15, %17 : vector<24x128xf32>
      %cst_15 = arith.constant 0.000000e+00 : f32
      %19 = vector.broadcast %cst_15 : f32 to vector<24x128xf32>
      %20 = arith.maximumf %18, %19 : vector<24x128xf32>
      %c0_16 = arith.constant 0 : index
      %c0_17 = arith.constant 0 : index
      %21 = vector.load %arg7[%c0_16, %c0_17] : memref<24x128xf32, #tpu.memory_space<vmem>>, vector<24x128xf32>
      tpu.vector_store %arg7[%c0_16, %c0_17], %20 {strides = array<i32>} : memref<24x128xf32, #tpu.memory_space<vmem>>, vector<24x128xf32>,
    } else {
    }
    return
  }
  func.func @transform_0(%arg0: i32, %arg1: i32, %arg2: i32) -> (i32, i32) {
    %c0_i32 = arith.constant 0 : i32
    return %arg0, %arg2 : i32, i32
  }
  func.func @transform_1(%arg0: i32, %arg1: i32, %arg2: i32) -> (i32, i32) {
    %c0_i32 = arith.constant 0 : i32
    return %arg2, %arg1 : i32, i32
  }
  func.func @transform_2(%arg0: i32, %arg1: i32, %arg2: i32) -> (i32, i32) {
    %c0_i32 = arith.constant 0 : i32
    %c0_i32_0 = arith.constant 0 : i32
    return %c0_i32, %arg1 : i32, i32
  }
  func.func @transform_3(%arg0: i32, %arg1: i32, %arg2: i32) -> (i32, i32) {
    %c0_i32 = arith.constant 0 : i32
    %c0_i32_0 = arith.constant 0 : i32
    return %c0_i32, %arg1 : i32, i32
  }
  func.func @transform_4(%arg0: i32, %arg1: i32, %arg2: i32) -> (i32, i32) {
    %c0_i32 = arith.constant 0 : i32
    return %arg0, %arg1 : i32, i32
  }
}

module attributes {stable_mosaic.version = 11 : i64} {
  func.func @_matmul_affine_kernel(%arg0: i32, %arg1: i32, %arg2: i32, %arg3: memref<24x256xbf16, #tpu.memory_space<vmem>>, %arg4: memref<256x256xbf16, #tpu.memory_space<vmem>>, %arg5: memref<1x256xf32, #tpu.memory_space<vmem>>, %arg6: memref<1x256xf32, #tpu.memory_space<vmem>>, %arg7: memref<24x256xf32, #tpu.memory_space<vmem>>, %arg8: memref<24x256xf32, #tpu.memory_space<vmem>>) attributes {dimension_semantics = [#tpu.dimension_semantics<parallel>, #tpu.dimension_semantics<parallel>, #tpu.dimension_semantics<arbitrary>], iteration_bounds = array<i64: 1, 2, 1>, scalar_prefetch = 0 : i64, scratch_operands = 1 : i64, tpu.core_type = #tpu.core_type<tc>, window_params = [{transform_indices = @transform_0, window_bounds = array<i64: 24, 256>}, {transform_indices = @transform_1, window_bounds = array<i64: 256, 256>}, {transform_indices = @transform_2, window_bounds = array<i64: 1, 256>}, {transform_indices = @transform_3, window_bounds = array<i64: 1, 256>}, {transform_indices = @transform_4, window_bounds = array<i64: 24, 256>}]} {
    %c0_i32 = arith.constant 0 : i32
    %0 = arith.cmpi eq, %arg2, %c0_i32 : i32
    %1 = arith.extui %0 : i1 to i32
    %c0_i32_0 = arith.constant 0 : i32
    %2 = arith.cmpi ne, %1, %c0_i32_0 : i32
    scf.if %2 {
      %cst_10 = arith.constant 0.000000e+00 : f32
      %12 = vector.broadcast %cst_10 : f32 to vector<24x256xf32>
      %c0_11 = arith.constant 0 : index
      %c0_12 = arith.constant 0 : index
      %13 = vector.load %arg8[%c0_11, %c0_12] : memref<24x256xf32, #tpu.memory_space<vmem>>, vector<24x256xf32>
      tpu.vector_store %arg8[%c0_11, %c0_12], %12 {strides = array<i32>} : memref<24x256xf32, #tpu.memory_space<vmem>>, vector<24x256xf32>,
    } else {
    }
    %c0 = arith.constant 0 : index
    %c0_1 = arith.constant 0 : index
    %3 = vector.load %arg8[%c0, %c0_1] : memref<24x256xf32, #tpu.memory_space<vmem>>, vector<24x256xf32>
    %c0_2 = arith.constant 0 : index
    %c0_3 = arith.constant 0 : index
    %4 = vector.load %arg3[%c0_2, %c0_3] : memref<24x256xbf16, #tpu.memory_space<vmem>>, vector<24x256xbf16>
    %c0_4 = arith.constant 0 : index
    %c0_5 = arith.constant 0 : index
    %5 = vector.load %arg4[%c0_4, %c0_5] : memref<256x256xbf16, #tpu.memory_space<vmem>>, vector<256x256xbf16>
    %cst = arith.constant dense<0.000000e+00> : vector<24x256xf32>
    %6 = tpu.matmul %4, %5, %cst {dimension_numbers = #tpu.dot_dimension_numbers<[1], [0], [0], [1], [0, 0, 1, 1], [], []>} : vector<24x256xbf16>, vector<256x256xbf16>, vector<24x256xf32> -> vector<24x256xf32>
    %7 = arith.addf %3, %6 : vector<24x256xf32>
    %c0_6 = arith.constant 0 : index
    %c0_7 = arith.constant 0 : index
    %8 = vector.load %arg8[%c0_6, %c0_7] : memref<24x256xf32, #tpu.memory_space<vmem>>, vector<24x256xf32>
    tpu.vector_store %arg8[%c0_6, %c0_7], %7 {strides = array<i32>} : memref<24x256xf32, #tpu.memory_space<vmem>>, vector<24x256xf32>,
    %c0_i32_8 = arith.constant 0 : i32
    %9 = arith.cmpi eq, %arg2, %c0_i32_8 : i32
    %10 = arith.extui %9 : i1 to i32
    %c0_i32_9 = arith.constant 0 : i32
    %11 = arith.cmpi ne, %10, %c0_i32_9 : i32
    scf.if %11 {
      %c0_10 = arith.constant 0 : index
      %c0_11 = arith.constant 0 : index
      %12 = vector.load %arg8[%c0_10, %c0_11] : memref<24x256xf32, #tpu.memory_space<vmem>>, vector<24x256xf32>
      %c0_12 = arith.constant 0 : index
      %c0_13 = arith.constant 0 : index
      %13 = vector.load %arg5[%c0_12, %c0_13] : memref<1x256xf32, #tpu.memory_space<vmem>>, vector<1x256xf32>
      %14 = vector.broadcast %13 : vector<1x256xf32> to vector<24x256xf32>
      %15 = arith.mulf %12, %14 : vector<24x256xf32>
      %c0_14 = arith.constant 0 : index
      %c0_15 = arith.constant 0 : index
      %16 = vector.load %arg6[%c0_14, %c0_15] : memref<1x256xf32, #tpu.memory_space<vmem>>, vector<1x256xf32>
      %17 = vector.broadcast %16 : vector<1x256xf32> to vector<24x256xf32>
      %18 = arith.addf %15, %17 : vector<24x256xf32>
      %c0_16 = arith.constant 0 : index
      %c0_17 = arith.constant 0 : index
      %19 = vector.load %arg7[%c0_16, %c0_17] : memref<24x256xf32, #tpu.memory_space<vmem>>, vector<24x256xf32>
      tpu.vector_store %arg7[%c0_16, %c0_17], %18 {strides = array<i32>} : memref<24x256xf32, #tpu.memory_space<vmem>>, vector<24x256xf32>,
    } else {
    }
    return
  }
  func.func @transform_0(%arg0: i32, %arg1: i32, %arg2: i32) -> (i32, i32) {
    %c0_i32 = arith.constant 0 : i32
    return %arg0, %arg2 : i32, i32
  }
  func.func @transform_1(%arg0: i32, %arg1: i32, %arg2: i32) -> (i32, i32) {
    %c0_i32 = arith.constant 0 : i32
    return %arg2, %arg1 : i32, i32
  }
  func.func @transform_2(%arg0: i32, %arg1: i32, %arg2: i32) -> (i32, i32) {
    %c0_i32 = arith.constant 0 : i32
    %c0_i32_0 = arith.constant 0 : i32
    return %c0_i32, %arg1 : i32, i32
  }
  func.func @transform_3(%arg0: i32, %arg1: i32, %arg2: i32) -> (i32, i32) {
    %c0_i32 = arith.constant 0 : i32
    %c0_i32_0 = arith.constant 0 : i32
    return %c0_i32, %arg1 : i32, i32
  }
  func.func @transform_4(%arg0: i32, %arg1: i32, %arg2: i32) -> (i32, i32) {
    %c0_i32 = arith.constant 0 : i32
    return %arg0, %arg1 : i32, i32
  }
}

module attributes {stable_mosaic.version = 11 : i64} {
  func.func @_matmul_affine_kernel(%arg0: i32, %arg1: i32, %arg2: i32, %arg3: memref<24x128xbf16, #tpu.memory_space<vmem>>, %arg4: memref<128x256xbf16, #tpu.memory_space<vmem>>, %arg5: memref<1x256xf32, #tpu.memory_space<vmem>>, %arg6: memref<1x256xf32, #tpu.memory_space<vmem>>, %arg7: memref<24x256xf32, #tpu.memory_space<vmem>>, %arg8: memref<24x256xf32, #tpu.memory_space<vmem>>, %arg9: memref<24x256xf32, #tpu.memory_space<vmem>>) attributes {dimension_semantics = [#tpu.dimension_semantics<parallel>, #tpu.dimension_semantics<parallel>, #tpu.dimension_semantics<arbitrary>], iteration_bounds = array<i64: 1, 2, 1>, scalar_prefetch = 0 : i64, scratch_operands = 1 : i64, tpu.core_type = #tpu.core_type<tc>, window_params = [{transform_indices = @transform_0, window_bounds = array<i64: 24, 128>}, {transform_indices = @transform_1, window_bounds = array<i64: 128, 256>}, {transform_indices = @transform_2, window_bounds = array<i64: 1, 256>}, {transform_indices = @transform_3, window_bounds = array<i64: 1, 256>}, {transform_indices = @transform_4, window_bounds = array<i64: 24, 256>}, {transform_indices = @transform_5, window_bounds = array<i64: 24, 256>}]} {
    %c0_i32 = arith.constant 0 : i32
    %0 = arith.cmpi eq, %arg2, %c0_i32 : i32
    %1 = arith.extui %0 : i1 to i32
    %c0_i32_0 = arith.constant 0 : i32
    %2 = arith.cmpi ne, %1, %c0_i32_0 : i32
    scf.if %2 {
      %cst_10 = arith.constant 0.000000e+00 : f32
      %12 = vector.broadcast %cst_10 : f32 to vector<24x256xf32>
      %c0_11 = arith.constant 0 : index
      %c0_12 = arith.constant 0 : index
      %13 = vector.load %arg9[%c0_11, %c0_12] : memref<24x256xf32, #tpu.memory_space<vmem>>, vector<24x256xf32>
      tpu.vector_store %arg9[%c0_11, %c0_12], %12 {strides = array<i32>} : memref<24x256xf32, #tpu.memory_space<vmem>>, vector<24x256xf32>,
    } else {
    }
    %c0 = arith.constant 0 : index
    %c0_1 = arith.constant 0 : index
    %3 = vector.load %arg9[%c0, %c0_1] : memref<24x256xf32, #tpu.memory_space<vmem>>, vector<24x256xf32>
    %c0_2 = arith.constant 0 : index
    %c0_3 = arith.constant 0 : index
    %4 = vector.load %arg3[%c0_2, %c0_3] : memref<24x128xbf16, #tpu.memory_space<vmem>>, vector<24x128xbf16>
    %c0_4 = arith.constant 0 : index
    %c0_5 = arith.constant 0 : index
    %5 = vector.load %arg4[%c0_4, %c0_5] : memref<128x256xbf16, #tpu.memory_space<vmem>>, vector<128x256xbf16>
    %cst = arith.constant dense<0.000000e+00> : vector<24x256xf32>
    %6 = tpu.matmul %4, %5, %cst {dimension_numbers = #tpu.dot_dimension_numbers<[1], [0], [0], [1], [0, 0, 1, 1], [], []>} : vector<24x128xbf16>, vector<128x256xbf16>, vector<24x256xf32> -> vector<24x256xf32>
    %7 = arith.addf %3, %6 : vector<24x256xf32>
    %c0_6 = arith.constant 0 : index
    %c0_7 = arith.constant 0 : index
    %8 = vector.load %arg9[%c0_6, %c0_7] : memref<24x256xf32, #tpu.memory_space<vmem>>, vector<24x256xf32>
    tpu.vector_store %arg9[%c0_6, %c0_7], %7 {strides = array<i32>} : memref<24x256xf32, #tpu.memory_space<vmem>>, vector<24x256xf32>,
    %c0_i32_8 = arith.constant 0 : i32
    %9 = arith.cmpi eq, %arg2, %c0_i32_8 : i32
    %10 = arith.extui %9 : i1 to i32
    %c0_i32_9 = arith.constant 0 : i32
    %11 = arith.cmpi ne, %10, %c0_i32_9 : i32
    scf.if %11 {
      %c0_10 = arith.constant 0 : index
      %c0_11 = arith.constant 0 : index
      %12 = vector.load %arg9[%c0_10, %c0_11] : memref<24x256xf32, #tpu.memory_space<vmem>>, vector<24x256xf32>
      %c0_12 = arith.constant 0 : index
      %c0_13 = arith.constant 0 : index
      %13 = vector.load %arg5[%c0_12, %c0_13] : memref<1x256xf32, #tpu.memory_space<vmem>>, vector<1x256xf32>
      %14 = vector.broadcast %13 : vector<1x256xf32> to vector<24x256xf32>
      %15 = arith.mulf %12, %14 : vector<24x256xf32>
      %c0_14 = arith.constant 0 : index
      %c0_15 = arith.constant 0 : index
      %16 = vector.load %arg6[%c0_14, %c0_15] : memref<1x256xf32, #tpu.memory_space<vmem>>, vector<1x256xf32>
      %17 = vector.broadcast %16 : vector<1x256xf32> to vector<24x256xf32>
      %18 = arith.addf %15, %17 : vector<24x256xf32>
      %c0_16 = arith.constant 0 : index
      %c0_17 = arith.constant 0 : index
      %19 = vector.load %arg7[%c0_16, %c0_17] : memref<24x256xf32, #tpu.memory_space<vmem>>, vector<24x256xf32>
      %20 = arith.addf %18, %19 : vector<24x256xf32>
      %cst_18 = arith.constant 0.000000e+00 : f32
      %21 = vector.broadcast %cst_18 : f32 to vector<24x256xf32>
      %22 = arith.maximumf %20, %21 : vector<24x256xf32>
      %c0_19 = arith.constant 0 : index
      %c0_20 = arith.constant 0 : index
      %23 = vector.load %arg8[%c0_19, %c0_20] : memref<24x256xf32, #tpu.memory_space<vmem>>, vector<24x256xf32>
      tpu.vector_store %arg8[%c0_19, %c0_20], %22 {strides = array<i32>} : memref<24x256xf32, #tpu.memory_space<vmem>>, vector<24x256xf32>,
    } else {
    }
    return
  }
  func.func @transform_0(%arg0: i32, %arg1: i32, %arg2: i32) -> (i32, i32) {
    %c0_i32 = arith.constant 0 : i32
    return %arg0, %arg2 : i32, i32
  }
  func.func @transform_1(%arg0: i32, %arg1: i32, %arg2: i32) -> (i32, i32) {
    %c0_i32 = arith.constant 0 : i32
    return %arg2, %arg1 : i32, i32
  }
  func.func @transform_2(%arg0: i32, %arg1: i32, %arg2: i32) -> (i32, i32) {
    %c0_i32 = arith.constant 0 : i32
    %c0_i32_0 = arith.constant 0 : i32
    return %c0_i32, %arg1 : i32, i32
  }
  func.func @transform_3(%arg0: i32, %arg1: i32, %arg2: i32) -> (i32, i32) {
    %c0_i32 = arith.constant 0 : i32
    %c0_i32_0 = arith.constant 0 : i32
    return %c0_i32, %arg1 : i32, i32
  }
  func.func @transform_4(%arg0: i32, %arg1: i32, %arg2: i32) -> (i32, i32) {
    %c0_i32 = arith.constant 0 : i32
    return %arg0, %arg1 : i32, i32
  }
  func.func @transform_5(%arg0: i32, %arg1: i32, %arg2: i32) -> (i32, i32) {
    %c0_i32 = arith.constant 0 : i32
    return %arg0, %arg1 : i32, i32
  }
}

module attributes {stable_mosaic.version = 11 : i64} {
  func.func @_matmul_affine_kernel(%arg0: i32, %arg1: i32, %arg2: i32, %arg3: memref<24x512xbf16, #tpu.memory_space<vmem>>, %arg4: memref<512x256xbf16, #tpu.memory_space<vmem>>, %arg5: memref<1x256xf32, #tpu.memory_space<vmem>>, %arg6: memref<1x256xf32, #tpu.memory_space<vmem>>, %arg7: memref<24x256xf32, #tpu.memory_space<vmem>>, %arg8: memref<24x256xf32, #tpu.memory_space<vmem>>) attributes {dimension_semantics = [#tpu.dimension_semantics<parallel>, #tpu.dimension_semantics<parallel>, #tpu.dimension_semantics<arbitrary>], iteration_bounds = array<i64: 1, 1, 1>, scalar_prefetch = 0 : i64, scratch_operands = 1 : i64, tpu.core_type = #tpu.core_type<tc>, window_params = [{transform_indices = @transform_0, window_bounds = array<i64: 24, 512>}, {transform_indices = @transform_1, window_bounds = array<i64: 512, 256>}, {transform_indices = @transform_2, window_bounds = array<i64: 1, 256>}, {transform_indices = @transform_3, window_bounds = array<i64: 1, 256>}, {transform_indices = @transform_4, window_bounds = array<i64: 24, 256>}]} {
    %c0_i32 = arith.constant 0 : i32
    %0 = arith.cmpi eq, %arg2, %c0_i32 : i32
    %1 = arith.extui %0 : i1 to i32
    %c0_i32_0 = arith.constant 0 : i32
    %2 = arith.cmpi ne, %1, %c0_i32_0 : i32
    scf.if %2 {
      %cst_10 = arith.constant 0.000000e+00 : f32
      %12 = vector.broadcast %cst_10 : f32 to vector<24x256xf32>
      %c0_11 = arith.constant 0 : index
      %c0_12 = arith.constant 0 : index
      %13 = vector.load %arg8[%c0_11, %c0_12] : memref<24x256xf32, #tpu.memory_space<vmem>>, vector<24x256xf32>
      tpu.vector_store %arg8[%c0_11, %c0_12], %12 {strides = array<i32>} : memref<24x256xf32, #tpu.memory_space<vmem>>, vector<24x256xf32>,
    } else {
    }
    %c0 = arith.constant 0 : index
    %c0_1 = arith.constant 0 : index
    %3 = vector.load %arg8[%c0, %c0_1] : memref<24x256xf32, #tpu.memory_space<vmem>>, vector<24x256xf32>
    %c0_2 = arith.constant 0 : index
    %c0_3 = arith.constant 0 : index
    %4 = vector.load %arg3[%c0_2, %c0_3] : memref<24x512xbf16, #tpu.memory_space<vmem>>, vector<24x512xbf16>
    %c0_4 = arith.constant 0 : index
    %c0_5 = arith.constant 0 : index
    %5 = vector.load %arg4[%c0_4, %c0_5] : memref<512x256xbf16, #tpu.memory_space<vmem>>, vector<512x256xbf16>
    %cst = arith.constant dense<0.000000e+00> : vector<24x256xf32>
    %6 = tpu.matmul %4, %5, %cst {dimension_numbers = #tpu.dot_dimension_numbers<[1], [0], [0], [1], [0, 0, 1, 1], [], []>} : vector<24x512xbf16>, vector<512x256xbf16>, vector<24x256xf32> -> vector<24x256xf32>
    %7 = arith.addf %3, %6 : vector<24x256xf32>
    %c0_6 = arith.constant 0 : index
    %c0_7 = arith.constant 0 : index
    %8 = vector.load %arg8[%c0_6, %c0_7] : memref<24x256xf32, #tpu.memory_space<vmem>>, vector<24x256xf32>
    tpu.vector_store %arg8[%c0_6, %c0_7], %7 {strides = array<i32>} : memref<24x256xf32, #tpu.memory_space<vmem>>, vector<24x256xf32>,
    %c0_i32_8 = arith.constant 0 : i32
    %9 = arith.cmpi eq, %arg2, %c0_i32_8 : i32
    %10 = arith.extui %9 : i1 to i32
    %c0_i32_9 = arith.constant 0 : i32
    %11 = arith.cmpi ne, %10, %c0_i32_9 : i32
    scf.if %11 {
      %c0_10 = arith.constant 0 : index
      %c0_11 = arith.constant 0 : index
      %12 = vector.load %arg8[%c0_10, %c0_11] : memref<24x256xf32, #tpu.memory_space<vmem>>, vector<24x256xf32>
      %c0_12 = arith.constant 0 : index
      %c0_13 = arith.constant 0 : index
      %13 = vector.load %arg5[%c0_12, %c0_13] : memref<1x256xf32, #tpu.memory_space<vmem>>, vector<1x256xf32>
      %14 = vector.broadcast %13 : vector<1x256xf32> to vector<24x256xf32>
      %15 = arith.mulf %12, %14 : vector<24x256xf32>
      %c0_14 = arith.constant 0 : index
      %c0_15 = arith.constant 0 : index
      %16 = vector.load %arg6[%c0_14, %c0_15] : memref<1x256xf32, #tpu.memory_space<vmem>>, vector<1x256xf32>
      %17 = vector.broadcast %16 : vector<1x256xf32> to vector<24x256xf32>
      %18 = arith.addf %15, %17 : vector<24x256xf32>
      %cst_16 = arith.constant 0.000000e+00 : f32
      %19 = vector.broadcast %cst_16 : f32 to vector<24x256xf32>
      %20 = arith.maximumf %18, %19 : vector<24x256xf32>
      %c0_17 = arith.constant 0 : index
      %c0_18 = arith.constant 0 : index
      %21 = vector.load %arg7[%c0_17, %c0_18] : memref<24x256xf32, #tpu.memory_space<vmem>>, vector<24x256xf32>
      tpu.vector_store %arg7[%c0_17, %c0_18], %20 {strides = array<i32>} : memref<24x256xf32, #tpu.memory_space<vmem>>, vector<24x256xf32>,
    } else {
    }
    return
  }
  func.func @transform_0(%arg0: i32, %arg1: i32, %arg2: i32) -> (i32, i32) {
    %c0_i32 = arith.constant 0 : i32
    return %arg0, %arg2 : i32, i32
  }
  func.func @transform_1(%arg0: i32, %arg1: i32, %arg2: i32) -> (i32, i32) {
    %c0_i32 = arith.constant 0 : i32
    return %arg2, %arg1 : i32, i32
  }
  func.func @transform_2(%arg0: i32, %arg1: i32, %arg2: i32) -> (i32, i32) {
    %c0_i32 = arith.constant 0 : i32
    %c0_i32_0 = arith.constant 0 : i32
    return %c0_i32, %arg1 : i32, i32
  }
  func.func @transform_3(%arg0: i32, %arg1: i32, %arg2: i32) -> (i32, i32) {
    %c0_i32 = arith.constant 0 : i32
    %c0_i32_0 = arith.constant 0 : i32
    return %c0_i32, %arg1 : i32, i32
  }
  func.func @transform_4(%arg0: i32, %arg1: i32, %arg2: i32) -> (i32, i32) {
    %c0_i32 = arith.constant 0 : i32
    return %arg0, %arg1 : i32, i32
  }
}

module attributes {stable_mosaic.version = 11 : i64} {
  func.func @_matmul_affine_kernel(%arg0: i32, %arg1: i32, %arg2: i32, %arg3: memref<24x512xbf16, #tpu.memory_space<vmem>>, %arg4: memref<512x256xbf16, #tpu.memory_space<vmem>>, %arg5: memref<1x256xf32, #tpu.memory_space<vmem>>, %arg6: memref<1x256xf32, #tpu.memory_space<vmem>>, %arg7: memref<24x256xf32, #tpu.memory_space<vmem>>, %arg8: memref<24x256xf32, #tpu.memory_space<vmem>>) attributes {dimension_semantics = [#tpu.dimension_semantics<parallel>, #tpu.dimension_semantics<parallel>, #tpu.dimension_semantics<arbitrary>], iteration_bounds = array<i64: 1, 1, 5>, scalar_prefetch = 0 : i64, scratch_operands = 1 : i64, tpu.core_type = #tpu.core_type<tc>, window_params = [{transform_indices = @transform_0, window_bounds = array<i64: 24, 512>}, {transform_indices = @transform_1, window_bounds = array<i64: 512, 256>}, {transform_indices = @transform_2, window_bounds = array<i64: 1, 256>}, {transform_indices = @transform_3, window_bounds = array<i64: 1, 256>}, {transform_indices = @transform_4, window_bounds = array<i64: 24, 256>}]} {
    %c0_i32 = arith.constant 0 : i32
    %0 = arith.cmpi eq, %arg2, %c0_i32 : i32
    %1 = arith.extui %0 : i1 to i32
    %c0_i32_0 = arith.constant 0 : i32
    %2 = arith.cmpi ne, %1, %c0_i32_0 : i32
    scf.if %2 {
      %cst_9 = arith.constant 0.000000e+00 : f32
      %12 = vector.broadcast %cst_9 : f32 to vector<24x256xf32>
      %c0_10 = arith.constant 0 : index
      %c0_11 = arith.constant 0 : index
      %13 = vector.load %arg8[%c0_10, %c0_11] : memref<24x256xf32, #tpu.memory_space<vmem>>, vector<24x256xf32>
      tpu.vector_store %arg8[%c0_10, %c0_11], %12 {strides = array<i32>} : memref<24x256xf32, #tpu.memory_space<vmem>>, vector<24x256xf32>,
    } else {
    }
    %c0 = arith.constant 0 : index
    %c0_1 = arith.constant 0 : index
    %3 = vector.load %arg8[%c0, %c0_1] : memref<24x256xf32, #tpu.memory_space<vmem>>, vector<24x256xf32>
    %c0_2 = arith.constant 0 : index
    %c0_3 = arith.constant 0 : index
    %4 = vector.load %arg3[%c0_2, %c0_3] : memref<24x512xbf16, #tpu.memory_space<vmem>>, vector<24x512xbf16>
    %c0_4 = arith.constant 0 : index
    %c0_5 = arith.constant 0 : index
    %5 = vector.load %arg4[%c0_4, %c0_5] : memref<512x256xbf16, #tpu.memory_space<vmem>>, vector<512x256xbf16>
    %cst = arith.constant dense<0.000000e+00> : vector<24x256xf32>
    %6 = tpu.matmul %4, %5, %cst {dimension_numbers = #tpu.dot_dimension_numbers<[1], [0], [0], [1], [0, 0, 1, 1], [], []>} : vector<24x512xbf16>, vector<512x256xbf16>, vector<24x256xf32> -> vector<24x256xf32>
    %7 = arith.addf %3, %6 : vector<24x256xf32>
    %c0_6 = arith.constant 0 : index
    %c0_7 = arith.constant 0 : index
    %8 = vector.load %arg8[%c0_6, %c0_7] : memref<24x256xf32, #tpu.memory_space<vmem>>, vector<24x256xf32>
    tpu.vector_store %arg8[%c0_6, %c0_7], %7 {strides = array<i32>} : memref<24x256xf32, #tpu.memory_space<vmem>>, vector<24x256xf32>,
    %c4_i32 = arith.constant 4 : i32
    %9 = arith.cmpi eq, %arg2, %c4_i32 : i32
    %10 = arith.extui %9 : i1 to i32
    %c0_i32_8 = arith.constant 0 : i32
    %11 = arith.cmpi ne, %10, %c0_i32_8 : i32
    scf.if %11 {
      %c0_9 = arith.constant 0 : index
      %c0_10 = arith.constant 0 : index
      %12 = vector.load %arg8[%c0_9, %c0_10] : memref<24x256xf32, #tpu.memory_space<vmem>>, vector<24x256xf32>
      %c0_11 = arith.constant 0 : index
      %c0_12 = arith.constant 0 : index
      %13 = vector.load %arg5[%c0_11, %c0_12] : memref<1x256xf32, #tpu.memory_space<vmem>>, vector<1x256xf32>
      %14 = vector.broadcast %13 : vector<1x256xf32> to vector<24x256xf32>
      %15 = arith.mulf %12, %14 : vector<24x256xf32>
      %c0_13 = arith.constant 0 : index
      %c0_14 = arith.constant 0 : index
      %16 = vector.load %arg6[%c0_13, %c0_14] : memref<1x256xf32, #tpu.memory_space<vmem>>, vector<1x256xf32>
      %17 = vector.broadcast %16 : vector<1x256xf32> to vector<24x256xf32>
      %18 = arith.addf %15, %17 : vector<24x256xf32>
      %cst_15 = arith.constant 0.000000e+00 : f32
      %19 = vector.broadcast %cst_15 : f32 to vector<24x256xf32>
      %20 = arith.maximumf %18, %19 : vector<24x256xf32>
      %c0_16 = arith.constant 0 : index
      %c0_17 = arith.constant 0 : index
      %21 = vector.load %arg7[%c0_16, %c0_17] : memref<24x256xf32, #tpu.memory_space<vmem>>, vector<24x256xf32>
      tpu.vector_store %arg7[%c0_16, %c0_17], %20 {strides = array<i32>} : memref<24x256xf32, #tpu.memory_space<vmem>>, vector<24x256xf32>,
    } else {
    }
    return
  }
  func.func @transform_0(%arg0: i32, %arg1: i32, %arg2: i32) -> (i32, i32) {
    %c0_i32 = arith.constant 0 : i32
    return %arg0, %arg2 : i32, i32
  }
  func.func @transform_1(%arg0: i32, %arg1: i32, %arg2: i32) -> (i32, i32) {
    %c0_i32 = arith.constant 0 : i32
    return %arg2, %arg1 : i32, i32
  }
  func.func @transform_2(%arg0: i32, %arg1: i32, %arg2: i32) -> (i32, i32) {
    %c0_i32 = arith.constant 0 : i32
    %c0_i32_0 = arith.constant 0 : i32
    return %c0_i32, %arg1 : i32, i32
  }
  func.func @transform_3(%arg0: i32, %arg1: i32, %arg2: i32) -> (i32, i32) {
    %c0_i32 = arith.constant 0 : i32
    %c0_i32_0 = arith.constant 0 : i32
    return %c0_i32, %arg1 : i32, i32
  }
  func.func @transform_4(%arg0: i32, %arg1: i32, %arg2: i32) -> (i32, i32) {
    %c0_i32 = arith.constant 0 : i32
    return %arg0, %arg1 : i32, i32
  }
}

module attributes {stable_mosaic.version = 11 : i64} {
  func.func @_matmul_affine_kernel(%arg0: i32, %arg1: i32, %arg2: i32, %arg3: memref<24x512xbf16, #tpu.memory_space<vmem>>, %arg4: memref<512x256xbf16, #tpu.memory_space<vmem>>, %arg5: memref<1x256xf32, #tpu.memory_space<vmem>>, %arg6: memref<1x256xf32, #tpu.memory_space<vmem>>, %arg7: memref<24x256xf32, #tpu.memory_space<vmem>>, %arg8: memref<24x256xf32, #tpu.memory_space<vmem>>) attributes {dimension_semantics = [#tpu.dimension_semantics<parallel>, #tpu.dimension_semantics<parallel>, #tpu.dimension_semantics<arbitrary>], iteration_bounds = array<i64: 1, 4, 1>, scalar_prefetch = 0 : i64, scratch_operands = 1 : i64, tpu.core_type = #tpu.core_type<tc>, window_params = [{transform_indices = @transform_0, window_bounds = array<i64: 24, 512>}, {transform_indices = @transform_1, window_bounds = array<i64: 512, 256>}, {transform_indices = @transform_2, window_bounds = array<i64: 1, 256>}, {transform_indices = @transform_3, window_bounds = array<i64: 1, 256>}, {transform_indices = @transform_4, window_bounds = array<i64: 24, 256>}]} {
    %c0_i32 = arith.constant 0 : i32
    %0 = arith.cmpi eq, %arg2, %c0_i32 : i32
    %1 = arith.extui %0 : i1 to i32
    %c0_i32_0 = arith.constant 0 : i32
    %2 = arith.cmpi ne, %1, %c0_i32_0 : i32
    scf.if %2 {
      %cst_10 = arith.constant 0.000000e+00 : f32
      %12 = vector.broadcast %cst_10 : f32 to vector<24x256xf32>
      %c0_11 = arith.constant 0 : index
      %c0_12 = arith.constant 0 : index
      %13 = vector.load %arg8[%c0_11, %c0_12] : memref<24x256xf32, #tpu.memory_space<vmem>>, vector<24x256xf32>
      tpu.vector_store %arg8[%c0_11, %c0_12], %12 {strides = array<i32>} : memref<24x256xf32, #tpu.memory_space<vmem>>, vector<24x256xf32>,
    } else {
    }
    %c0 = arith.constant 0 : index
    %c0_1 = arith.constant 0 : index
    %3 = vector.load %arg8[%c0, %c0_1] : memref<24x256xf32, #tpu.memory_space<vmem>>, vector<24x256xf32>
    %c0_2 = arith.constant 0 : index
    %c0_3 = arith.constant 0 : index
    %4 = vector.load %arg3[%c0_2, %c0_3] : memref<24x512xbf16, #tpu.memory_space<vmem>>, vector<24x512xbf16>
    %c0_4 = arith.constant 0 : index
    %c0_5 = arith.constant 0 : index
    %5 = vector.load %arg4[%c0_4, %c0_5] : memref<512x256xbf16, #tpu.memory_space<vmem>>, vector<512x256xbf16>
    %cst = arith.constant dense<0.000000e+00> : vector<24x256xf32>
    %6 = tpu.matmul %4, %5, %cst {dimension_numbers = #tpu.dot_dimension_numbers<[1], [0], [0], [1], [0, 0, 1, 1], [], []>} : vector<24x512xbf16>, vector<512x256xbf16>, vector<24x256xf32> -> vector<24x256xf32>
    %7 = arith.addf %3, %6 : vector<24x256xf32>
    %c0_6 = arith.constant 0 : index
    %c0_7 = arith.constant 0 : index
    %8 = vector.load %arg8[%c0_6, %c0_7] : memref<24x256xf32, #tpu.memory_space<vmem>>, vector<24x256xf32>
    tpu.vector_store %arg8[%c0_6, %c0_7], %7 {strides = array<i32>} : memref<24x256xf32, #tpu.memory_space<vmem>>, vector<24x256xf32>,
    %c0_i32_8 = arith.constant 0 : i32
    %9 = arith.cmpi eq, %arg2, %c0_i32_8 : i32
    %10 = arith.extui %9 : i1 to i32
    %c0_i32_9 = arith.constant 0 : i32
    %11 = arith.cmpi ne, %10, %c0_i32_9 : i32
    scf.if %11 {
      %c0_10 = arith.constant 0 : index
      %c0_11 = arith.constant 0 : index
      %12 = vector.load %arg8[%c0_10, %c0_11] : memref<24x256xf32, #tpu.memory_space<vmem>>, vector<24x256xf32>
      %c0_12 = arith.constant 0 : index
      %c0_13 = arith.constant 0 : index
      %13 = vector.load %arg5[%c0_12, %c0_13] : memref<1x256xf32, #tpu.memory_space<vmem>>, vector<1x256xf32>
      %14 = vector.broadcast %13 : vector<1x256xf32> to vector<24x256xf32>
      %15 = arith.mulf %12, %14 : vector<24x256xf32>
      %c0_14 = arith.constant 0 : index
      %c0_15 = arith.constant 0 : index
      %16 = vector.load %arg6[%c0_14, %c0_15] : memref<1x256xf32, #tpu.memory_space<vmem>>, vector<1x256xf32>
      %17 = vector.broadcast %16 : vector<1x256xf32> to vector<24x256xf32>
      %18 = arith.addf %15, %17 : vector<24x256xf32>
      %c0_16 = arith.constant 0 : index
      %c0_17 = arith.constant 0 : index
      %19 = vector.load %arg7[%c0_16, %c0_17] : memref<24x256xf32, #tpu.memory_space<vmem>>, vector<24x256xf32>
      tpu.vector_store %arg7[%c0_16, %c0_17], %18 {strides = array<i32>} : memref<24x256xf32, #tpu.memory_space<vmem>>, vector<24x256xf32>,
    } else {
    }
    return
  }
  func.func @transform_0(%arg0: i32, %arg1: i32, %arg2: i32) -> (i32, i32) {
    %c0_i32 = arith.constant 0 : i32
    return %arg0, %arg2 : i32, i32
  }
  func.func @transform_1(%arg0: i32, %arg1: i32, %arg2: i32) -> (i32, i32) {
    %c0_i32 = arith.constant 0 : i32
    return %arg2, %arg1 : i32, i32
  }
  func.func @transform_2(%arg0: i32, %arg1: i32, %arg2: i32) -> (i32, i32) {
    %c0_i32 = arith.constant 0 : i32
    %c0_i32_0 = arith.constant 0 : i32
    return %c0_i32, %arg1 : i32, i32
  }
  func.func @transform_3(%arg0: i32, %arg1: i32, %arg2: i32) -> (i32, i32) {
    %c0_i32 = arith.constant 0 : i32
    %c0_i32_0 = arith.constant 0 : i32
    return %c0_i32, %arg1 : i32, i32
  }
  func.func @transform_4(%arg0: i32, %arg1: i32, %arg2: i32) -> (i32, i32) {
    %c0_i32 = arith.constant 0 : i32
    return %arg0, %arg1 : i32, i32
  }
}

module attributes {stable_mosaic.version = 11 : i64} {
  func.func @_matmul_affine_kernel(%arg0: i32, %arg1: i32, %arg2: i32, %arg3: memref<24x256xbf16, #tpu.memory_space<vmem>>, %arg4: memref<256x256xbf16, #tpu.memory_space<vmem>>, %arg5: memref<1x256xf32, #tpu.memory_space<vmem>>, %arg6: memref<1x256xf32, #tpu.memory_space<vmem>>, %arg7: memref<24x256xf32, #tpu.memory_space<vmem>>, %arg8: memref<24x256xf32, #tpu.memory_space<vmem>>, %arg9: memref<24x256xf32, #tpu.memory_space<vmem>>) attributes {dimension_semantics = [#tpu.dimension_semantics<parallel>, #tpu.dimension_semantics<parallel>, #tpu.dimension_semantics<arbitrary>], iteration_bounds = array<i64: 1, 4, 1>, scalar_prefetch = 0 : i64, scratch_operands = 1 : i64, tpu.core_type = #tpu.core_type<tc>, window_params = [{transform_indices = @transform_0, window_bounds = array<i64: 24, 256>}, {transform_indices = @transform_1, window_bounds = array<i64: 256, 256>}, {transform_indices = @transform_2, window_bounds = array<i64: 1, 256>}, {transform_indices = @transform_3, window_bounds = array<i64: 1, 256>}, {transform_indices = @transform_4, window_bounds = array<i64: 24, 256>}, {transform_indices = @transform_5, window_bounds = array<i64: 24, 256>}]} {
    %c0_i32 = arith.constant 0 : i32
    %0 = arith.cmpi eq, %arg2, %c0_i32 : i32
    %1 = arith.extui %0 : i1 to i32
    %c0_i32_0 = arith.constant 0 : i32
    %2 = arith.cmpi ne, %1, %c0_i32_0 : i32
    scf.if %2 {
      %cst_10 = arith.constant 0.000000e+00 : f32
      %12 = vector.broadcast %cst_10 : f32 to vector<24x256xf32>
      %c0_11 = arith.constant 0 : index
      %c0_12 = arith.constant 0 : index
      %13 = vector.load %arg9[%c0_11, %c0_12] : memref<24x256xf32, #tpu.memory_space<vmem>>, vector<24x256xf32>
      tpu.vector_store %arg9[%c0_11, %c0_12], %12 {strides = array<i32>} : memref<24x256xf32, #tpu.memory_space<vmem>>, vector<24x256xf32>,
    } else {
    }
    %c0 = arith.constant 0 : index
    %c0_1 = arith.constant 0 : index
    %3 = vector.load %arg9[%c0, %c0_1] : memref<24x256xf32, #tpu.memory_space<vmem>>, vector<24x256xf32>
    %c0_2 = arith.constant 0 : index
    %c0_3 = arith.constant 0 : index
    %4 = vector.load %arg3[%c0_2, %c0_3] : memref<24x256xbf16, #tpu.memory_space<vmem>>, vector<24x256xbf16>
    %c0_4 = arith.constant 0 : index
    %c0_5 = arith.constant 0 : index
    %5 = vector.load %arg4[%c0_4, %c0_5] : memref<256x256xbf16, #tpu.memory_space<vmem>>, vector<256x256xbf16>
    %cst = arith.constant dense<0.000000e+00> : vector<24x256xf32>
    %6 = tpu.matmul %4, %5, %cst {dimension_numbers = #tpu.dot_dimension_numbers<[1], [0], [0], [1], [0, 0, 1, 1], [], []>} : vector<24x256xbf16>, vector<256x256xbf16>, vector<24x256xf32> -> vector<24x256xf32>
    %7 = arith.addf %3, %6 : vector<24x256xf32>
    %c0_6 = arith.constant 0 : index
    %c0_7 = arith.constant 0 : index
    %8 = vector.load %arg9[%c0_6, %c0_7] : memref<24x256xf32, #tpu.memory_space<vmem>>, vector<24x256xf32>
    tpu.vector_store %arg9[%c0_6, %c0_7], %7 {strides = array<i32>} : memref<24x256xf32, #tpu.memory_space<vmem>>, vector<24x256xf32>,
    %c0_i32_8 = arith.constant 0 : i32
    %9 = arith.cmpi eq, %arg2, %c0_i32_8 : i32
    %10 = arith.extui %9 : i1 to i32
    %c0_i32_9 = arith.constant 0 : i32
    %11 = arith.cmpi ne, %10, %c0_i32_9 : i32
    scf.if %11 {
      %c0_10 = arith.constant 0 : index
      %c0_11 = arith.constant 0 : index
      %12 = vector.load %arg9[%c0_10, %c0_11] : memref<24x256xf32, #tpu.memory_space<vmem>>, vector<24x256xf32>
      %c0_12 = arith.constant 0 : index
      %c0_13 = arith.constant 0 : index
      %13 = vector.load %arg5[%c0_12, %c0_13] : memref<1x256xf32, #tpu.memory_space<vmem>>, vector<1x256xf32>
      %14 = vector.broadcast %13 : vector<1x256xf32> to vector<24x256xf32>
      %15 = arith.mulf %12, %14 : vector<24x256xf32>
      %c0_14 = arith.constant 0 : index
      %c0_15 = arith.constant 0 : index
      %16 = vector.load %arg6[%c0_14, %c0_15] : memref<1x256xf32, #tpu.memory_space<vmem>>, vector<1x256xf32>
      %17 = vector.broadcast %16 : vector<1x256xf32> to vector<24x256xf32>
      %18 = arith.addf %15, %17 : vector<24x256xf32>
      %c0_16 = arith.constant 0 : index
      %c0_17 = arith.constant 0 : index
      %19 = vector.load %arg7[%c0_16, %c0_17] : memref<24x256xf32, #tpu.memory_space<vmem>>, vector<24x256xf32>
      %20 = arith.addf %18, %19 : vector<24x256xf32>
      %cst_18 = arith.constant 0.000000e+00 : f32
      %21 = vector.broadcast %cst_18 : f32 to vector<24x256xf32>
      %22 = arith.maximumf %20, %21 : vector<24x256xf32>
      %c0_19 = arith.constant 0 : index
      %c0_20 = arith.constant 0 : index
      %23 = vector.load %arg8[%c0_19, %c0_20] : memref<24x256xf32, #tpu.memory_space<vmem>>, vector<24x256xf32>
      tpu.vector_store %arg8[%c0_19, %c0_20], %22 {strides = array<i32>} : memref<24x256xf32, #tpu.memory_space<vmem>>, vector<24x256xf32>,
    } else {
    }
    return
  }
  func.func @transform_0(%arg0: i32, %arg1: i32, %arg2: i32) -> (i32, i32) {
    %c0_i32 = arith.constant 0 : i32
    return %arg0, %arg2 : i32, i32
  }
  func.func @transform_1(%arg0: i32, %arg1: i32, %arg2: i32) -> (i32, i32) {
    %c0_i32 = arith.constant 0 : i32
    return %arg2, %arg1 : i32, i32
  }
  func.func @transform_2(%arg0: i32, %arg1: i32, %arg2: i32) -> (i32, i32) {
    %c0_i32 = arith.constant 0 : i32
    %c0_i32_0 = arith.constant 0 : i32
    return %c0_i32, %arg1 : i32, i32
  }
  func.func @transform_3(%arg0: i32, %arg1: i32, %arg2: i32) -> (i32, i32) {
    %c0_i32 = arith.constant 0 : i32
    %c0_i32_0 = arith.constant 0 : i32
    return %c0_i32, %arg1 : i32, i32
  }
  func.func @transform_4(%arg0: i32, %arg1: i32, %arg2: i32) -> (i32, i32) {
    %c0_i32 = arith.constant 0 : i32
    return %arg0, %arg1 : i32, i32
  }
  func.func @transform_5(%arg0: i32, %arg1: i32, %arg2: i32) -> (i32, i32) {
    %c0_i32 = arith.constant 0 : i32
    return %arg0, %arg1 : i32, i32
  }
}

module attributes {stable_mosaic.version = 11 : i64} {
  func.func @_matmul_affine_kernel(%arg0: i32, %arg1: i32, %arg2: i32, %arg3: memref<24x512xbf16, #tpu.memory_space<vmem>>, %arg4: memref<512x256xbf16, #tpu.memory_space<vmem>>, %arg5: memref<1x256xf32, #tpu.memory_space<vmem>>, %arg6: memref<1x256xf32, #tpu.memory_space<vmem>>, %arg7: memref<24x256xf32, #tpu.memory_space<vmem>>, %arg8: memref<24x256xf32, #tpu.memory_space<vmem>>) attributes {dimension_semantics = [#tpu.dimension_semantics<parallel>, #tpu.dimension_semantics<parallel>, #tpu.dimension_semantics<arbitrary>], iteration_bounds = array<i64: 1, 2, 2>, scalar_prefetch = 0 : i64, scratch_operands = 1 : i64, tpu.core_type = #tpu.core_type<tc>, window_params = [{transform_indices = @transform_0, window_bounds = array<i64: 24, 512>}, {transform_indices = @transform_1, window_bounds = array<i64: 512, 256>}, {transform_indices = @transform_2, window_bounds = array<i64: 1, 256>}, {transform_indices = @transform_3, window_bounds = array<i64: 1, 256>}, {transform_indices = @transform_4, window_bounds = array<i64: 24, 256>}]} {
    %c0_i32 = arith.constant 0 : i32
    %0 = arith.cmpi eq, %arg2, %c0_i32 : i32
    %1 = arith.extui %0 : i1 to i32
    %c0_i32_0 = arith.constant 0 : i32
    %2 = arith.cmpi ne, %1, %c0_i32_0 : i32
    scf.if %2 {
      %cst_9 = arith.constant 0.000000e+00 : f32
      %12 = vector.broadcast %cst_9 : f32 to vector<24x256xf32>
      %c0_10 = arith.constant 0 : index
      %c0_11 = arith.constant 0 : index
      %13 = vector.load %arg8[%c0_10, %c0_11] : memref<24x256xf32, #tpu.memory_space<vmem>>, vector<24x256xf32>
      tpu.vector_store %arg8[%c0_10, %c0_11], %12 {strides = array<i32>} : memref<24x256xf32, #tpu.memory_space<vmem>>, vector<24x256xf32>,
    } else {
    }
    %c0 = arith.constant 0 : index
    %c0_1 = arith.constant 0 : index
    %3 = vector.load %arg8[%c0, %c0_1] : memref<24x256xf32, #tpu.memory_space<vmem>>, vector<24x256xf32>
    %c0_2 = arith.constant 0 : index
    %c0_3 = arith.constant 0 : index
    %4 = vector.load %arg3[%c0_2, %c0_3] : memref<24x512xbf16, #tpu.memory_space<vmem>>, vector<24x512xbf16>
    %c0_4 = arith.constant 0 : index
    %c0_5 = arith.constant 0 : index
    %5 = vector.load %arg4[%c0_4, %c0_5] : memref<512x256xbf16, #tpu.memory_space<vmem>>, vector<512x256xbf16>
    %cst = arith.constant dense<0.000000e+00> : vector<24x256xf32>
    %6 = tpu.matmul %4, %5, %cst {dimension_numbers = #tpu.dot_dimension_numbers<[1], [0], [0], [1], [0, 0, 1, 1], [], []>} : vector<24x512xbf16>, vector<512x256xbf16>, vector<24x256xf32> -> vector<24x256xf32>
    %7 = arith.addf %3, %6 : vector<24x256xf32>
    %c0_6 = arith.constant 0 : index
    %c0_7 = arith.constant 0 : index
    %8 = vector.load %arg8[%c0_6, %c0_7] : memref<24x256xf32, #tpu.memory_space<vmem>>, vector<24x256xf32>
    tpu.vector_store %arg8[%c0_6, %c0_7], %7 {strides = array<i32>} : memref<24x256xf32, #tpu.memory_space<vmem>>, vector<24x256xf32>,
    %c1_i32 = arith.constant 1 : i32
    %9 = arith.cmpi eq, %arg2, %c1_i32 : i32
    %10 = arith.extui %9 : i1 to i32
    %c0_i32_8 = arith.constant 0 : i32
    %11 = arith.cmpi ne, %10, %c0_i32_8 : i32
    scf.if %11 {
      %c0_9 = arith.constant 0 : index
      %c0_10 = arith.constant 0 : index
      %12 = vector.load %arg8[%c0_9, %c0_10] : memref<24x256xf32, #tpu.memory_space<vmem>>, vector<24x256xf32>
      %c0_11 = arith.constant 0 : index
      %c0_12 = arith.constant 0 : index
      %13 = vector.load %arg5[%c0_11, %c0_12] : memref<1x256xf32, #tpu.memory_space<vmem>>, vector<1x256xf32>
      %14 = vector.broadcast %13 : vector<1x256xf32> to vector<24x256xf32>
      %15 = arith.mulf %12, %14 : vector<24x256xf32>
      %c0_13 = arith.constant 0 : index
      %c0_14 = arith.constant 0 : index
      %16 = vector.load %arg6[%c0_13, %c0_14] : memref<1x256xf32, #tpu.memory_space<vmem>>, vector<1x256xf32>
      %17 = vector.broadcast %16 : vector<1x256xf32> to vector<24x256xf32>
      %18 = arith.addf %15, %17 : vector<24x256xf32>
      %cst_15 = arith.constant 0.000000e+00 : f32
      %19 = vector.broadcast %cst_15 : f32 to vector<24x256xf32>
      %20 = arith.maximumf %18, %19 : vector<24x256xf32>
      %c0_16 = arith.constant 0 : index
      %c0_17 = arith.constant 0 : index
      %21 = vector.load %arg7[%c0_16, %c0_17] : memref<24x256xf32, #tpu.memory_space<vmem>>, vector<24x256xf32>
      tpu.vector_store %arg7[%c0_16, %c0_17], %20 {strides = array<i32>} : memref<24x256xf32, #tpu.memory_space<vmem>>, vector<24x256xf32>,
    } else {
    }
    return
  }
  func.func @transform_0(%arg0: i32, %arg1: i32, %arg2: i32) -> (i32, i32) {
    %c0_i32 = arith.constant 0 : i32
    return %arg0, %arg2 : i32, i32
  }
  func.func @transform_1(%arg0: i32, %arg1: i32, %arg2: i32) -> (i32, i32) {
    %c0_i32 = arith.constant 0 : i32
    return %arg2, %arg1 : i32, i32
  }
  func.func @transform_2(%arg0: i32, %arg1: i32, %arg2: i32) -> (i32, i32) {
    %c0_i32 = arith.constant 0 : i32
    %c0_i32_0 = arith.constant 0 : i32
    return %c0_i32, %arg1 : i32, i32
  }
  func.func @transform_3(%arg0: i32, %arg1: i32, %arg2: i32) -> (i32, i32) {
    %c0_i32 = arith.constant 0 : i32
    %c0_i32_0 = arith.constant 0 : i32
    return %c0_i32, %arg1 : i32, i32
  }
  func.func @transform_4(%arg0: i32, %arg1: i32, %arg2: i32) -> (i32, i32) {
    %c0_i32 = arith.constant 0 : i32
    return %arg0, %arg1 : i32, i32
  }
}

module attributes {stable_mosaic.version = 11 : i64} {
  func.func @_matmul_affine_kernel(%arg0: i32, %arg1: i32, %arg2: i32, %arg3: memref<24x512xbf16, #tpu.memory_space<vmem>>, %arg4: memref<512x256xbf16, #tpu.memory_space<vmem>>, %arg5: memref<1x256xf32, #tpu.memory_space<vmem>>, %arg6: memref<1x256xf32, #tpu.memory_space<vmem>>, %arg7: memref<24x256xf32, #tpu.memory_space<vmem>>, %arg8: memref<24x256xf32, #tpu.memory_space<vmem>>) attributes {dimension_semantics = [#tpu.dimension_semantics<parallel>, #tpu.dimension_semantics<parallel>, #tpu.dimension_semantics<arbitrary>], iteration_bounds = array<i64: 1, 6, 1>, scalar_prefetch = 0 : i64, scratch_operands = 1 : i64, tpu.core_type = #tpu.core_type<tc>, window_params = [{transform_indices = @transform_0, window_bounds = array<i64: 24, 512>}, {transform_indices = @transform_1, window_bounds = array<i64: 512, 256>}, {transform_indices = @transform_2, window_bounds = array<i64: 1, 256>}, {transform_indices = @transform_3, window_bounds = array<i64: 1, 256>}, {transform_indices = @transform_4, window_bounds = array<i64: 24, 256>}]} {
    %c0_i32 = arith.constant 0 : i32
    %0 = arith.cmpi eq, %arg2, %c0_i32 : i32
    %1 = arith.extui %0 : i1 to i32
    %c0_i32_0 = arith.constant 0 : i32
    %2 = arith.cmpi ne, %1, %c0_i32_0 : i32
    scf.if %2 {
      %cst_10 = arith.constant 0.000000e+00 : f32
      %12 = vector.broadcast %cst_10 : f32 to vector<24x256xf32>
      %c0_11 = arith.constant 0 : index
      %c0_12 = arith.constant 0 : index
      %13 = vector.load %arg8[%c0_11, %c0_12] : memref<24x256xf32, #tpu.memory_space<vmem>>, vector<24x256xf32>
      tpu.vector_store %arg8[%c0_11, %c0_12], %12 {strides = array<i32>} : memref<24x256xf32, #tpu.memory_space<vmem>>, vector<24x256xf32>,
    } else {
    }
    %c0 = arith.constant 0 : index
    %c0_1 = arith.constant 0 : index
    %3 = vector.load %arg8[%c0, %c0_1] : memref<24x256xf32, #tpu.memory_space<vmem>>, vector<24x256xf32>
    %c0_2 = arith.constant 0 : index
    %c0_3 = arith.constant 0 : index
    %4 = vector.load %arg3[%c0_2, %c0_3] : memref<24x512xbf16, #tpu.memory_space<vmem>>, vector<24x512xbf16>
    %c0_4 = arith.constant 0 : index
    %c0_5 = arith.constant 0 : index
    %5 = vector.load %arg4[%c0_4, %c0_5] : memref<512x256xbf16, #tpu.memory_space<vmem>>, vector<512x256xbf16>
    %cst = arith.constant dense<0.000000e+00> : vector<24x256xf32>
    %6 = tpu.matmul %4, %5, %cst {dimension_numbers = #tpu.dot_dimension_numbers<[1], [0], [0], [1], [0, 0, 1, 1], [], []>} : vector<24x512xbf16>, vector<512x256xbf16>, vector<24x256xf32> -> vector<24x256xf32>
    %7 = arith.addf %3, %6 : vector<24x256xf32>
    %c0_6 = arith.constant 0 : index
    %c0_7 = arith.constant 0 : index
    %8 = vector.load %arg8[%c0_6, %c0_7] : memref<24x256xf32, #tpu.memory_space<vmem>>, vector<24x256xf32>
    tpu.vector_store %arg8[%c0_6, %c0_7], %7 {strides = array<i32>} : memref<24x256xf32, #tpu.memory_space<vmem>>, vector<24x256xf32>,
    %c0_i32_8 = arith.constant 0 : i32
    %9 = arith.cmpi eq, %arg2, %c0_i32_8 : i32
    %10 = arith.extui %9 : i1 to i32
    %c0_i32_9 = arith.constant 0 : i32
    %11 = arith.cmpi ne, %10, %c0_i32_9 : i32
    scf.if %11 {
      %c0_10 = arith.constant 0 : index
      %c0_11 = arith.constant 0 : index
      %12 = vector.load %arg8[%c0_10, %c0_11] : memref<24x256xf32, #tpu.memory_space<vmem>>, vector<24x256xf32>
      %c0_12 = arith.constant 0 : index
      %c0_13 = arith.constant 0 : index
      %13 = vector.load %arg5[%c0_12, %c0_13] : memref<1x256xf32, #tpu.memory_space<vmem>>, vector<1x256xf32>
      %14 = vector.broadcast %13 : vector<1x256xf32> to vector<24x256xf32>
      %15 = arith.mulf %12, %14 : vector<24x256xf32>
      %c0_14 = arith.constant 0 : index
      %c0_15 = arith.constant 0 : index
      %16 = vector.load %arg6[%c0_14, %c0_15] : memref<1x256xf32, #tpu.memory_space<vmem>>, vector<1x256xf32>
      %17 = vector.broadcast %16 : vector<1x256xf32> to vector<24x256xf32>
      %18 = arith.addf %15, %17 : vector<24x256xf32>
      %c0_16 = arith.constant 0 : index
      %c0_17 = arith.constant 0 : index
      %19 = vector.load %arg7[%c0_16, %c0_17] : memref<24x256xf32, #tpu.memory_space<vmem>>, vector<24x256xf32>
      tpu.vector_store %arg7[%c0_16, %c0_17], %18 {strides = array<i32>} : memref<24x256xf32, #tpu.memory_space<vmem>>, vector<24x256xf32>,
    } else {
    }
    return
  }
  func.func @transform_0(%arg0: i32, %arg1: i32, %arg2: i32) -> (i32, i32) {
    %c0_i32 = arith.constant 0 : i32
    return %arg0, %arg2 : i32, i32
  }
  func.func @transform_1(%arg0: i32, %arg1: i32, %arg2: i32) -> (i32, i32) {
    %c0_i32 = arith.constant 0 : i32
    return %arg2, %arg1 : i32, i32
  }
  func.func @transform_2(%arg0: i32, %arg1: i32, %arg2: i32) -> (i32, i32) {
    %c0_i32 = arith.constant 0 : i32
    %c0_i32_0 = arith.constant 0 : i32
    return %c0_i32, %arg1 : i32, i32
  }
  func.func @transform_3(%arg0: i32, %arg1: i32, %arg2: i32) -> (i32, i32) {
    %c0_i32 = arith.constant 0 : i32
    %c0_i32_0 = arith.constant 0 : i32
    return %c0_i32, %arg1 : i32, i32
  }
  func.func @transform_4(%arg0: i32, %arg1: i32, %arg2: i32) -> (i32, i32) {
    %c0_i32 = arith.constant 0 : i32
    return %arg0, %arg1 : i32, i32
  }
}

module attributes {stable_mosaic.version = 11 : i64} {
  func.func @_mhsa_kernel(%arg0: i32, %arg1: i32, %arg2: memref<1x9x128xbf16, #tpu.memory_space<vmem>>, %arg3: memref<1x9x128xbf16, #tpu.memory_space<vmem>>, %arg4: memref<1x9x128xbf16, #tpu.memory_space<vmem>>, %arg5: memref<1x9x128xbf16, #tpu.memory_space<vmem>>, %arg6: memref<1x9x128xf32, #tpu.memory_space<vmem>>) attributes {dimension_semantics = [#tpu.dimension_semantics<parallel>, #tpu.dimension_semantics<parallel>], iteration_bounds = array<i64: 2, 4>, scalar_prefetch = 0 : i64, scratch_operands = 0 : i64, tpu.core_type = #tpu.core_type<tc>, window_params = [{transform_indices = @transform_0, window_bounds = array<i64: 1, 9, 128>}, {transform_indices = @transform_1, window_bounds = array<i64: 1, 9, 128>}, {transform_indices = @transform_2, window_bounds = array<i64: 1, 9, 128>}, {transform_indices = @transform_3, window_bounds = array<i64: 1, 9, 128>}, {transform_indices = @transform_4, window_bounds = array<i64: 1, 9, 128>}]} {
    %c0 = arith.constant 0 : index
    %c0_0 = arith.constant 0 : index
    %c0_1 = arith.constant 0 : index
    %0 = vector.load %arg2[%c0, %c0_0, %c0_1] : memref<1x9x128xbf16, #tpu.memory_space<vmem>>, vector<1x9x128xbf16>
    %1 = vector.shape_cast %0 : vector<1x9x128xbf16> to vector<9x128xbf16>
    %c0_2 = arith.constant 0 : index
    %c0_3 = arith.constant 0 : index
    %c0_4 = arith.constant 0 : index
    %2 = vector.load %arg3[%c0_2, %c0_3, %c0_4] : memref<1x9x128xbf16, #tpu.memory_space<vmem>>, vector<1x9x128xbf16>
    %3 = vector.shape_cast %2 : vector<1x9x128xbf16> to vector<9x128xbf16>
    %c0_5 = arith.constant 0 : index
    %c0_6 = arith.constant 0 : index
    %c0_7 = arith.constant 0 : index
    %4 = vector.load %arg4[%c0_5, %c0_6, %c0_7] : memref<1x9x128xbf16, #tpu.memory_space<vmem>>, vector<1x9x128xbf16>
    %5 = vector.shape_cast %4 : vector<1x9x128xbf16> to vector<9x128xbf16>
    %c0_8 = arith.constant 0 : index
    %c0_9 = arith.constant 0 : index
    %c0_10 = arith.constant 0 : index
    %6 = vector.load %arg5[%c0_8, %c0_9, %c0_10] : memref<1x9x128xbf16, #tpu.memory_space<vmem>>, vector<1x9x128xbf16>
    %7 = vector.shape_cast %6 : vector<1x9x128xbf16> to vector<9x128xbf16>
    %8 = tpu.transpose %3, [1, 0] : vector<9x128xbf16> -> vector<128x9xbf16>
    %cst = arith.constant dense<0.000000e+00> : vector<9x9xf32>
    %9 = tpu.matmul %1, %8, %cst {dimension_numbers = #tpu.dot_dimension_numbers<[1], [0], [0], [1], [0, 0, 1, 1], [], []>} : vector<9x128xbf16>, vector<128x9xbf16>, vector<9x9xf32> -> vector<9x9xf32>
    %10 = tpu.transpose %1, [1, 0] : vector<9x128xbf16> -> vector<128x9xbf16>
    %cst_11 = arith.constant dense<0.000000e+00> : vector<9x9xf32>
    %11 = tpu.matmul %7, %10, %cst_11 {dimension_numbers = #tpu.dot_dimension_numbers<[1], [0], [0], [1], [0, 0, 1, 1], [], []>} : vector<9x128xbf16>, vector<128x9xbf16>, vector<9x9xf32> -> vector<9x9xf32>
    %12 = arith.addf %9, %11 : vector<9x9xf32>
    %cst_12 = arith.constant dense<0xFF800000> : vector<9xf32>
    %13 = vector.multi_reduction <maximumf>, %12, %cst_12 [1] : vector<9x9xf32> to vector<9xf32>
    %14 = vector.shape_cast %13 : vector<9xf32> to vector<9x1xf32>
    %15 = vector.broadcast %14 : vector<9x1xf32> to vector<9x9xf32>
    %16 = arith.subf %12, %15 : vector<9x9xf32>
    %17 = math.exp %16 : vector<9x9xf32>
    %cst_13 = arith.constant dense<0.000000e+00> : vector<9xf32>
    %18 = vector.multi_reduction <add>, %17, %cst_13 [1] : vector<9x9xf32> to vector<9xf32>
    %19 = vector.shape_cast %18 : vector<9xf32> to vector<9x1xf32>
    %20 = tpu.reciprocal %19 {approx = true} : vector<9x1xf32> -> vector<9x1xf32>
    %21 = vector.broadcast %20 : vector<9x1xf32> to vector<9x9xf32>
    %22 = arith.mulf %17, %21 : vector<9x9xf32>
    %23 = arith.truncf %22 : vector<9x9xf32> to vector<9x9xbf16>
    %cst_14 = arith.constant dense<0.000000e+00> : vector<9x128xf32>
    %24 = tpu.matmul %23, %5, %cst_14 {dimension_numbers = #tpu.dot_dimension_numbers<[1], [0], [0], [1], [0, 0, 1, 1], [], []>} : vector<9x9xbf16>, vector<9x128xbf16>, vector<9x128xf32> -> vector<9x128xf32>
    %cst_15 = arith.constant 0.999994993 : f32
    %25 = vector.broadcast %cst_15 : f32 to vector<9x128xf32>
    %26 = arith.mulf %24, %25 : vector<9x128xf32>
    %cst_16 = arith.constant 0.000000e+00 : f32
    %27 = vector.broadcast %cst_16 : f32 to vector<9x128xf32>
    %28 = arith.maximumf %26, %27 : vector<9x128xf32>
    %c0_17 = arith.constant 0 : index
    %c0_18 = arith.constant 0 : index
    %c0_19 = arith.constant 0 : index
    %29 = vector.load %arg6[%c0_17, %c0_18, %c0_19] : memref<1x9x128xf32, #tpu.memory_space<vmem>>, vector<1x9x128xf32>
    %30 = vector.shape_cast %29 : vector<1x9x128xf32> to vector<9x128xf32>
    %31 = vector.shape_cast %28 : vector<9x128xf32> to vector<1x9x128xf32>
    tpu.vector_store %arg6[%c0_17, %c0_18, %c0_19], %31 {strides = array<i32>} : memref<1x9x128xf32, #tpu.memory_space<vmem>>, vector<1x9x128xf32>,
    return
  }
  func.func @transform_0(%arg0: i32, %arg1: i32) -> (i32, i32, i32) {
    %c0_i32 = arith.constant 0 : i32
    %c0_i32_0 = arith.constant 0 : i32
    return %arg0, %c0_i32, %arg1 : i32, i32, i32
  }
  func.func @transform_1(%arg0: i32, %arg1: i32) -> (i32, i32, i32) {
    %c4_i32 = arith.constant 4 : i32
    %0 = arith.addi %c4_i32, %arg1 : i32
    %c0_i32 = arith.constant 0 : i32
    %c0_i32_0 = arith.constant 0 : i32
    return %arg0, %c0_i32, %0 : i32, i32, i32
  }
  func.func @transform_2(%arg0: i32, %arg1: i32) -> (i32, i32, i32) {
    %c8_i32 = arith.constant 8 : i32
    %0 = arith.addi %c8_i32, %arg1 : i32
    %c0_i32 = arith.constant 0 : i32
    %c0_i32_0 = arith.constant 0 : i32
    return %arg0, %c0_i32, %0 : i32, i32, i32
  }
  func.func @transform_3(%arg0: i32, %arg1: i32) -> (i32, i32, i32) {
    %c0_i32 = arith.constant 0 : i32
    %c0_i32_0 = arith.constant 0 : i32
    %c0_i32_1 = arith.constant 0 : i32
    return %arg1, %c0_i32, %c0_i32_0 : i32, i32, i32
  }
  func.func @transform_4(%arg0: i32, %arg1: i32) -> (i32, i32, i32) {
    %c0_i32 = arith.constant 0 : i32
    %c0_i32_0 = arith.constant 0 : i32
    return %arg0, %c0_i32, %arg1 : i32, i32, i32
  }
}

module attributes {stable_mosaic.version = 11 : i64} {
  func.func @_matmul_affine_kernel(%arg0: i32, %arg1: i32, %arg2: i32, %arg3: memref<24x512xbf16, #tpu.memory_space<vmem>>, %arg4: memref<512x256xbf16, #tpu.memory_space<vmem>>, %arg5: memref<1x256xf32, #tpu.memory_space<vmem>>, %arg6: memref<1x256xf32, #tpu.memory_space<vmem>>, %arg7: memref<24x256xf32, #tpu.memory_space<vmem>>, %arg8: memref<24x256xf32, #tpu.memory_space<vmem>>) attributes {dimension_semantics = [#tpu.dimension_semantics<parallel>, #tpu.dimension_semantics<parallel>, #tpu.dimension_semantics<arbitrary>], iteration_bounds = array<i64: 1, 8, 2>, scalar_prefetch = 0 : i64, scratch_operands = 1 : i64, tpu.core_type = #tpu.core_type<tc>, window_params = [{transform_indices = @transform_0, window_bounds = array<i64: 24, 512>}, {transform_indices = @transform_1, window_bounds = array<i64: 512, 256>}, {transform_indices = @transform_2, window_bounds = array<i64: 1, 256>}, {transform_indices = @transform_3, window_bounds = array<i64: 1, 256>}, {transform_indices = @transform_4, window_bounds = array<i64: 24, 256>}]} {
    %c0_i32 = arith.constant 0 : i32
    %0 = arith.cmpi eq, %arg2, %c0_i32 : i32
    %1 = arith.extui %0 : i1 to i32
    %c0_i32_0 = arith.constant 0 : i32
    %2 = arith.cmpi ne, %1, %c0_i32_0 : i32
    scf.if %2 {
      %cst_9 = arith.constant 0.000000e+00 : f32
      %12 = vector.broadcast %cst_9 : f32 to vector<24x256xf32>
      %c0_10 = arith.constant 0 : index
      %c0_11 = arith.constant 0 : index
      %13 = vector.load %arg8[%c0_10, %c0_11] : memref<24x256xf32, #tpu.memory_space<vmem>>, vector<24x256xf32>
      tpu.vector_store %arg8[%c0_10, %c0_11], %12 {strides = array<i32>} : memref<24x256xf32, #tpu.memory_space<vmem>>, vector<24x256xf32>,
    } else {
    }
    %c0 = arith.constant 0 : index
    %c0_1 = arith.constant 0 : index
    %3 = vector.load %arg8[%c0, %c0_1] : memref<24x256xf32, #tpu.memory_space<vmem>>, vector<24x256xf32>
    %c0_2 = arith.constant 0 : index
    %c0_3 = arith.constant 0 : index
    %4 = vector.load %arg3[%c0_2, %c0_3] : memref<24x512xbf16, #tpu.memory_space<vmem>>, vector<24x512xbf16>
    %c0_4 = arith.constant 0 : index
    %c0_5 = arith.constant 0 : index
    %5 = vector.load %arg4[%c0_4, %c0_5] : memref<512x256xbf16, #tpu.memory_space<vmem>>, vector<512x256xbf16>
    %cst = arith.constant dense<0.000000e+00> : vector<24x256xf32>
    %6 = tpu.matmul %4, %5, %cst {dimension_numbers = #tpu.dot_dimension_numbers<[1], [0], [0], [1], [0, 0, 1, 1], [], []>} : vector<24x512xbf16>, vector<512x256xbf16>, vector<24x256xf32> -> vector<24x256xf32>
    %7 = arith.addf %3, %6 : vector<24x256xf32>
    %c0_6 = arith.constant 0 : index
    %c0_7 = arith.constant 0 : index
    %8 = vector.load %arg8[%c0_6, %c0_7] : memref<24x256xf32, #tpu.memory_space<vmem>>, vector<24x256xf32>
    tpu.vector_store %arg8[%c0_6, %c0_7], %7 {strides = array<i32>} : memref<24x256xf32, #tpu.memory_space<vmem>>, vector<24x256xf32>,
    %c1_i32 = arith.constant 1 : i32
    %9 = arith.cmpi eq, %arg2, %c1_i32 : i32
    %10 = arith.extui %9 : i1 to i32
    %c0_i32_8 = arith.constant 0 : i32
    %11 = arith.cmpi ne, %10, %c0_i32_8 : i32
    scf.if %11 {
      %c0_9 = arith.constant 0 : index
      %c0_10 = arith.constant 0 : index
      %12 = vector.load %arg8[%c0_9, %c0_10] : memref<24x256xf32, #tpu.memory_space<vmem>>, vector<24x256xf32>
      %c0_11 = arith.constant 0 : index
      %c0_12 = arith.constant 0 : index
      %13 = vector.load %arg5[%c0_11, %c0_12] : memref<1x256xf32, #tpu.memory_space<vmem>>, vector<1x256xf32>
      %14 = vector.broadcast %13 : vector<1x256xf32> to vector<24x256xf32>
      %15 = arith.mulf %12, %14 : vector<24x256xf32>
      %c0_13 = arith.constant 0 : index
      %c0_14 = arith.constant 0 : index
      %16 = vector.load %arg6[%c0_13, %c0_14] : memref<1x256xf32, #tpu.memory_space<vmem>>, vector<1x256xf32>
      %17 = vector.broadcast %16 : vector<1x256xf32> to vector<24x256xf32>
      %18 = arith.addf %15, %17 : vector<24x256xf32>
      %c0_15 = arith.constant 0 : index
      %c0_16 = arith.constant 0 : index
      %19 = vector.load %arg7[%c0_15, %c0_16] : memref<24x256xf32, #tpu.memory_space<vmem>>, vector<24x256xf32>
      tpu.vector_store %arg7[%c0_15, %c0_16], %18 {strides = array<i32>} : memref<24x256xf32, #tpu.memory_space<vmem>>, vector<24x256xf32>,
    } else {
    }
    return
  }
  func.func @transform_0(%arg0: i32, %arg1: i32, %arg2: i32) -> (i32, i32) {
    %c0_i32 = arith.constant 0 : i32
    return %arg0, %arg2 : i32, i32
  }
  func.func @transform_1(%arg0: i32, %arg1: i32, %arg2: i32) -> (i32, i32) {
    %c0_i32 = arith.constant 0 : i32
    return %arg2, %arg1 : i32, i32
  }
  func.func @transform_2(%arg0: i32, %arg1: i32, %arg2: i32) -> (i32, i32) {
    %c0_i32 = arith.constant 0 : i32
    %c0_i32_0 = arith.constant 0 : i32
    return %c0_i32, %arg1 : i32, i32
  }
  func.func @transform_3(%arg0: i32, %arg1: i32, %arg2: i32) -> (i32, i32) {
    %c0_i32 = arith.constant 0 : i32
    %c0_i32_0 = arith.constant 0 : i32
    return %c0_i32, %arg1 : i32, i32
  }
  func.func @transform_4(%arg0: i32, %arg1: i32, %arg2: i32) -> (i32, i32) {
    %c0_i32 = arith.constant 0 : i32
    return %arg0, %arg1 : i32, i32
  }
}

module attributes {stable_mosaic.version = 11 : i64} {
  func.func @_matmul_affine_kernel(%arg0: i32, %arg1: i32, %arg2: i32, %arg3: memref<24x512xbf16, #tpu.memory_space<vmem>>, %arg4: memref<512x256xbf16, #tpu.memory_space<vmem>>, %arg5: memref<1x256xf32, #tpu.memory_space<vmem>>, %arg6: memref<1x256xf32, #tpu.memory_space<vmem>>, %arg7: memref<24x256xf32, #tpu.memory_space<vmem>>, %arg8: memref<24x256xf32, #tpu.memory_space<vmem>>, %arg9: memref<24x256xf32, #tpu.memory_space<vmem>>) attributes {dimension_semantics = [#tpu.dimension_semantics<parallel>, #tpu.dimension_semantics<parallel>, #tpu.dimension_semantics<arbitrary>], iteration_bounds = array<i64: 1, 8, 1>, scalar_prefetch = 0 : i64, scratch_operands = 1 : i64, tpu.core_type = #tpu.core_type<tc>, window_params = [{transform_indices = @transform_0, window_bounds = array<i64: 24, 512>}, {transform_indices = @transform_1, window_bounds = array<i64: 512, 256>}, {transform_indices = @transform_2, window_bounds = array<i64: 1, 256>}, {transform_indices = @transform_3, window_bounds = array<i64: 1, 256>}, {transform_indices = @transform_4, window_bounds = array<i64: 24, 256>}, {transform_indices = @transform_5, window_bounds = array<i64: 24, 256>}]} {
    %c0_i32 = arith.constant 0 : i32
    %0 = arith.cmpi eq, %arg2, %c0_i32 : i32
    %1 = arith.extui %0 : i1 to i32
    %c0_i32_0 = arith.constant 0 : i32
    %2 = arith.cmpi ne, %1, %c0_i32_0 : i32
    scf.if %2 {
      %cst_10 = arith.constant 0.000000e+00 : f32
      %12 = vector.broadcast %cst_10 : f32 to vector<24x256xf32>
      %c0_11 = arith.constant 0 : index
      %c0_12 = arith.constant 0 : index
      %13 = vector.load %arg9[%c0_11, %c0_12] : memref<24x256xf32, #tpu.memory_space<vmem>>, vector<24x256xf32>
      tpu.vector_store %arg9[%c0_11, %c0_12], %12 {strides = array<i32>} : memref<24x256xf32, #tpu.memory_space<vmem>>, vector<24x256xf32>,
    } else {
    }
    %c0 = arith.constant 0 : index
    %c0_1 = arith.constant 0 : index
    %3 = vector.load %arg9[%c0, %c0_1] : memref<24x256xf32, #tpu.memory_space<vmem>>, vector<24x256xf32>
    %c0_2 = arith.constant 0 : index
    %c0_3 = arith.constant 0 : index
    %4 = vector.load %arg3[%c0_2, %c0_3] : memref<24x512xbf16, #tpu.memory_space<vmem>>, vector<24x512xbf16>
    %c0_4 = arith.constant 0 : index
    %c0_5 = arith.constant 0 : index
    %5 = vector.load %arg4[%c0_4, %c0_5] : memref<512x256xbf16, #tpu.memory_space<vmem>>, vector<512x256xbf16>
    %cst = arith.constant dense<0.000000e+00> : vector<24x256xf32>
    %6 = tpu.matmul %4, %5, %cst {dimension_numbers = #tpu.dot_dimension_numbers<[1], [0], [0], [1], [0, 0, 1, 1], [], []>} : vector<24x512xbf16>, vector<512x256xbf16>, vector<24x256xf32> -> vector<24x256xf32>
    %7 = arith.addf %3, %6 : vector<24x256xf32>
    %c0_6 = arith.constant 0 : index
    %c0_7 = arith.constant 0 : index
    %8 = vector.load %arg9[%c0_6, %c0_7] : memref<24x256xf32, #tpu.memory_space<vmem>>, vector<24x256xf32>
    tpu.vector_store %arg9[%c0_6, %c0_7], %7 {strides = array<i32>} : memref<24x256xf32, #tpu.memory_space<vmem>>, vector<24x256xf32>,
    %c0_i32_8 = arith.constant 0 : i32
    %9 = arith.cmpi eq, %arg2, %c0_i32_8 : i32
    %10 = arith.extui %9 : i1 to i32
    %c0_i32_9 = arith.constant 0 : i32
    %11 = arith.cmpi ne, %10, %c0_i32_9 : i32
    scf.if %11 {
      %c0_10 = arith.constant 0 : index
      %c0_11 = arith.constant 0 : index
      %12 = vector.load %arg9[%c0_10, %c0_11] : memref<24x256xf32, #tpu.memory_space<vmem>>, vector<24x256xf32>
      %c0_12 = arith.constant 0 : index
      %c0_13 = arith.constant 0 : index
      %13 = vector.load %arg5[%c0_12, %c0_13] : memref<1x256xf32, #tpu.memory_space<vmem>>, vector<1x256xf32>
      %14 = vector.broadcast %13 : vector<1x256xf32> to vector<24x256xf32>
      %15 = arith.mulf %12, %14 : vector<24x256xf32>
      %c0_14 = arith.constant 0 : index
      %c0_15 = arith.constant 0 : index
      %16 = vector.load %arg6[%c0_14, %c0_15] : memref<1x256xf32, #tpu.memory_space<vmem>>, vector<1x256xf32>
      %17 = vector.broadcast %16 : vector<1x256xf32> to vector<24x256xf32>
      %18 = arith.addf %15, %17 : vector<24x256xf32>
      %c0_16 = arith.constant 0 : index
      %c0_17 = arith.constant 0 : index
      %19 = vector.load %arg7[%c0_16, %c0_17] : memref<24x256xf32, #tpu.memory_space<vmem>>, vector<24x256xf32>
      %20 = arith.addf %18, %19 : vector<24x256xf32>
      %cst_18 = arith.constant 0.000000e+00 : f32
      %21 = vector.broadcast %cst_18 : f32 to vector<24x256xf32>
      %22 = arith.maximumf %20, %21 : vector<24x256xf32>
      %c0_19 = arith.constant 0 : index
      %c0_20 = arith.constant 0 : index
      %23 = vector.load %arg8[%c0_19, %c0_20] : memref<24x256xf32, #tpu.memory_space<vmem>>, vector<24x256xf32>
      tpu.vector_store %arg8[%c0_19, %c0_20], %22 {strides = array<i32>} : memref<24x256xf32, #tpu.memory_space<vmem>>, vector<24x256xf32>,
    } else {
    }
    return
  }
  func.func @transform_0(%arg0: i32, %arg1: i32, %arg2: i32) -> (i32, i32) {
    %c0_i32 = arith.constant 0 : i32
    return %arg0, %arg2 : i32, i32
  }
  func.func @transform_1(%arg0: i32, %arg1: i32, %arg2: i32) -> (i32, i32) {
    %c0_i32 = arith.constant 0 : i32
    return %arg2, %arg1 : i32, i32
  }
  func.func @transform_2(%arg0: i32, %arg1: i32, %arg2: i32) -> (i32, i32) {
    %c0_i32 = arith.constant 0 : i32
    %c0_i32_0 = arith.constant 0 : i32
    return %c0_i32, %arg1 : i32, i32
  }
  func.func @transform_3(%arg0: i32, %arg1: i32, %arg2: i32) -> (i32, i32) {
    %c0_i32 = arith.constant 0 : i32
    %c0_i32_0 = arith.constant 0 : i32
    return %c0_i32, %arg1 : i32, i32
  }
  func.func @transform_4(%arg0: i32, %arg1: i32, %arg2: i32) -> (i32, i32) {
    %c0_i32 = arith.constant 0 : i32
    return %arg0, %arg1 : i32, i32
  }
  func.func @transform_5(%arg0: i32, %arg1: i32, %arg2: i32) -> (i32, i32) {
    %c0_i32 = arith.constant 0 : i32
    return %arg0, %arg1 : i32, i32
  }
}

module attributes {stable_mosaic.version = 11 : i64} {
  func.func @_matmul_affine_kernel(%arg0: i32, %arg1: i32, %arg2: i32, %arg3: memref<24x512xbf16, #tpu.memory_space<vmem>>, %arg4: memref<512x128xbf16, #tpu.memory_space<vmem>>, %arg5: memref<1x128xf32, #tpu.memory_space<vmem>>, %arg6: memref<1x128xf32, #tpu.memory_space<vmem>>, %arg7: memref<24x128xf32, #tpu.memory_space<vmem>>, %arg8: memref<24x128xf32, #tpu.memory_space<vmem>>) attributes {dimension_semantics = [#tpu.dimension_semantics<parallel>, #tpu.dimension_semantics<parallel>, #tpu.dimension_semantics<arbitrary>], iteration_bounds = array<i64: 1, 1, 4>, scalar_prefetch = 0 : i64, scratch_operands = 1 : i64, tpu.core_type = #tpu.core_type<tc>, window_params = [{transform_indices = @transform_0, window_bounds = array<i64: 24, 512>}, {transform_indices = @transform_1, window_bounds = array<i64: 512, 128>}, {transform_indices = @transform_2, window_bounds = array<i64: 1, 128>}, {transform_indices = @transform_3, window_bounds = array<i64: 1, 128>}, {transform_indices = @transform_4, window_bounds = array<i64: 24, 128>}]} {
    %c0_i32 = arith.constant 0 : i32
    %0 = arith.cmpi eq, %arg2, %c0_i32 : i32
    %1 = arith.extui %0 : i1 to i32
    %c0_i32_0 = arith.constant 0 : i32
    %2 = arith.cmpi ne, %1, %c0_i32_0 : i32
    scf.if %2 {
      %cst_9 = arith.constant 0.000000e+00 : f32
      %12 = vector.broadcast %cst_9 : f32 to vector<24x128xf32>
      %c0_10 = arith.constant 0 : index
      %c0_11 = arith.constant 0 : index
      %13 = vector.load %arg8[%c0_10, %c0_11] : memref<24x128xf32, #tpu.memory_space<vmem>>, vector<24x128xf32>
      tpu.vector_store %arg8[%c0_10, %c0_11], %12 {strides = array<i32>} : memref<24x128xf32, #tpu.memory_space<vmem>>, vector<24x128xf32>,
    } else {
    }
    %c0 = arith.constant 0 : index
    %c0_1 = arith.constant 0 : index
    %3 = vector.load %arg8[%c0, %c0_1] : memref<24x128xf32, #tpu.memory_space<vmem>>, vector<24x128xf32>
    %c0_2 = arith.constant 0 : index
    %c0_3 = arith.constant 0 : index
    %4 = vector.load %arg3[%c0_2, %c0_3] : memref<24x512xbf16, #tpu.memory_space<vmem>>, vector<24x512xbf16>
    %c0_4 = arith.constant 0 : index
    %c0_5 = arith.constant 0 : index
    %5 = vector.load %arg4[%c0_4, %c0_5] : memref<512x128xbf16, #tpu.memory_space<vmem>>, vector<512x128xbf16>
    %cst = arith.constant dense<0.000000e+00> : vector<24x128xf32>
    %6 = tpu.matmul %4, %5, %cst {dimension_numbers = #tpu.dot_dimension_numbers<[1], [0], [0], [1], [0, 0, 1, 1], [], []>} : vector<24x512xbf16>, vector<512x128xbf16>, vector<24x128xf32> -> vector<24x128xf32>
    %7 = arith.addf %3, %6 : vector<24x128xf32>
    %c0_6 = arith.constant 0 : index
    %c0_7 = arith.constant 0 : index
    %8 = vector.load %arg8[%c0_6, %c0_7] : memref<24x128xf32, #tpu.memory_space<vmem>>, vector<24x128xf32>
    tpu.vector_store %arg8[%c0_6, %c0_7], %7 {strides = array<i32>} : memref<24x128xf32, #tpu.memory_space<vmem>>, vector<24x128xf32>,
    %c3_i32 = arith.constant 3 : i32
    %9 = arith.cmpi eq, %arg2, %c3_i32 : i32
    %10 = arith.extui %9 : i1 to i32
    %c0_i32_8 = arith.constant 0 : i32
    %11 = arith.cmpi ne, %10, %c0_i32_8 : i32
    scf.if %11 {
      %c0_9 = arith.constant 0 : index
      %c0_10 = arith.constant 0 : index
      %12 = vector.load %arg8[%c0_9, %c0_10] : memref<24x128xf32, #tpu.memory_space<vmem>>, vector<24x128xf32>
      %c0_11 = arith.constant 0 : index
      %c0_12 = arith.constant 0 : index
      %13 = vector.load %arg5[%c0_11, %c0_12] : memref<1x128xf32, #tpu.memory_space<vmem>>, vector<1x128xf32>
      %14 = vector.broadcast %13 : vector<1x128xf32> to vector<24x128xf32>
      %15 = arith.mulf %12, %14 : vector<24x128xf32>
      %c0_13 = arith.constant 0 : index
      %c0_14 = arith.constant 0 : index
      %16 = vector.load %arg6[%c0_13, %c0_14] : memref<1x128xf32, #tpu.memory_space<vmem>>, vector<1x128xf32>
      %17 = vector.broadcast %16 : vector<1x128xf32> to vector<24x128xf32>
      %18 = arith.addf %15, %17 : vector<24x128xf32>
      %c0_15 = arith.constant 0 : index
      %c0_16 = arith.constant 0 : index
      %19 = vector.load %arg7[%c0_15, %c0_16] : memref<24x128xf32, #tpu.memory_space<vmem>>, vector<24x128xf32>
      tpu.vector_store %arg7[%c0_15, %c0_16], %18 {strides = array<i32>} : memref<24x128xf32, #tpu.memory_space<vmem>>, vector<24x128xf32>,
    } else {
    }
    return
  }
  func.func @transform_0(%arg0: i32, %arg1: i32, %arg2: i32) -> (i32, i32) {
    %c0_i32 = arith.constant 0 : i32
    return %arg0, %arg2 : i32, i32
  }
  func.func @transform_1(%arg0: i32, %arg1: i32, %arg2: i32) -> (i32, i32) {
    %c0_i32 = arith.constant 0 : i32
    return %arg2, %arg1 : i32, i32
  }
  func.func @transform_2(%arg0: i32, %arg1: i32, %arg2: i32) -> (i32, i32) {
    %c0_i32 = arith.constant 0 : i32
    %c0_i32_0 = arith.constant 0 : i32
    return %c0_i32, %arg1 : i32, i32
  }
  func.func @transform_3(%arg0: i32, %arg1: i32, %arg2: i32) -> (i32, i32) {
    %c0_i32 = arith.constant 0 : i32
    %c0_i32_0 = arith.constant 0 : i32
    return %c0_i32, %arg1 : i32, i32
  }
  func.func @transform_4(%arg0: i32, %arg1: i32, %arg2: i32) -> (i32, i32) {
    %c0_i32 = arith.constant 0 : i32
    return %arg0, %arg1 : i32, i32
  }
}

</mosaic_0001>

<bundles_post_ra>
// kernel: forward.23
= control target key start
LH: loop header
LB: loop body
LE: loop exit
PB: predicated region body
PF: predicated region fallthrough
CT: control target
= control target key end

     0   :  { %s429_s1 = inlined_call_operand.vmem [shape: bf16[128,128], index: 1, kind: input, shape index: {}]   ;;  %s430_s0 = inlined_call_operand.vmem [shape: bf16[56,128], index: 0, kind: input, shape index: {}]   ;;  %s431_s2 = inlined_call_operand.vmem [shape: f32[1,128], index: 2, kind: input, shape index: {}]   ;;  %s432_s3 = inlined_call_operand.vmem [shape: f32[1,128], index: 3, kind: input, shape index: {}]   ;;  %s433_s4 = inlined_call_operand.vmem [shape: f32[56,128], index: 4, kind: output, shape index: {}]  }
   0x1   :  { %v329_v0 = vld [vmem:[%s429_s1 + $0x38] sm:$0xff]   ;;  %v330_v1 = vld [vmem:[%s429_s1 + $0x30] sm:$0xff]   ;;  %v331_v2 = vld [vmem:[%s429_s1 + $0x28] sm:$0xff]  }
   0x2   :  { %289 = vmatprep.subr.bf16.mxu0 %v329_v0  ;;  %313 = vmatprep.subr.bf16.mxu1 %v329_v0  ;;  %v332_v3 = vld [vmem:[%s429_s1 + $0x20] sm:$0xff]   ;;  %v338_v5 = vld [vmem:[%s430_s0 + $0x10] sm:$0xff]   ;;  %v333_v6 = vld [vmem:[%s429_s1 + $0x18] sm:$0xff]  }
   0x3   :  { %290 = vmatpush3.bf16.msra.mxu0 %v329_v0  ;;  %321 = vmatpush3.bf16.msra.mxu1 %v329_v0  ;;  %v337_v4 = vld [vmem:[%s430_s0] sm:$0xff]   ;;  %v334_v7 = vld [vmem:[%s429_s1 + $0x10] sm:$0xff]   ;;  %v335_v8 = vld [vmem:[%s429_s1 + $0x8] sm:$0xff]  }
   0x4   :  { %291 = vmatprep.subr.bf16.mxu0 %v330_v1  ;;  %314 = vmatprep.subr.bf16.mxu1 %v330_v1  ;;  %v336_v9 = vld [vmem:[%s429_s1] sm:$0xff]   ;;  %v339_v10 = vld [vmem:[%s430_s0 + $0x8] sm:$0xff]   ;;  %v340_v11 = vld [vmem:[%s430_s0 + $0x18] ss:$0 sps:$4 sm:$0xff]  }
   0x5   :  { %305 = vmatprep.mubr.bf16.mxu0 %v337_v4  ;;  %309 = vmatprep.mubr.bf16.mxu1 %v338_v5  ;;  %v275_v12 = vld [vmem:[%s431_s2] ss:$0 sm:$0xff] }
   0x6   :  { %v276_v14 = vld [vmem:[%s432_s3] ss:$0 sm:$0xff] }
   0x7   :  { %292 = vmatpush3.bf16.msra.mxu0 %v330_v1  ;;  %322 = vmatpush3.bf16.msra.mxu1 %v330_v1 }
   0x8   :  { %293 = vmatprep.subr.bf16.mxu0 %v331_v2  ;;  %315 = vmatprep.subr.bf16.mxu1 %v331_v2 }
   0xb   :  { %294 = vmatpush3.bf16.msra.mxu0 %v331_v2  ;;  %323 = vmatpush3.bf16.msra.mxu1 %v331_v2 }
   0xc   :  { %295 = vmatprep.subr.bf16.mxu0 %v332_v3  ;;  %316 = vmatprep.subr.bf16.mxu1 %v332_v3 }
   0xf   :  { %296 = vmatpush3.bf16.msra.mxu0 %v332_v3  ;;  %324 = vmatpush3.bf16.msra.mxu1 %v332_v3 }
  0x10   :  { %297 = vmatprep.subr.bf16.mxu0 %v333_v6  ;;  %317 = vmatprep.subr.bf16.mxu1 %v333_v6 }
  0x13   :  { %298 = vmatpush3.bf16.msra.mxu0 %v333_v6  ;;  %325 = vmatpush3.bf16.msra.mxu1 %v333_v6 }
  0x14   :  { %299 = vmatprep.subr.bf16.mxu0 %v334_v7  ;;  %318 = vmatprep.subr.bf16.mxu1 %v334_v7 }
  0x17   :  { %300 = vmatpush3.bf16.msra.mxu0 %v334_v7  ;;  %326 = vmatpush3.bf16.msra.mxu1 %v334_v7 }
  0x18   :  { %301 = vmatprep.subr.bf16.mxu0 %v335_v8  ;;  %319 = vmatprep.subr.bf16.mxu1 %v335_v8 }
  0x1b   :  { %302 = vmatpush3.bf16.msra.mxu0 %v335_v8  ;;  %327 = vmatpush3.bf16.msra.mxu1 %v335_v8 }
  0x1c   :  { %303 = vmatprep.subr.bf16.mxu0 %v336_v9  ;;  %320 = vmatprep.subr.bf16.mxu1 %v336_v9 }
  0x1f   :  { %304 = vmatpush3.bf16.msra.mxu0 %v336_v9  ;;  %328 = vmatpush3.bf16.msra.mxu1 %v336_v9 }
  0x22   :  { %306 = vmatmul.mubr.bf16.vlgmr.msra.gmra.mxu0 %v339_v10  ;;  %310 = vmatmul.mubr.bf16.vlgmr.msra.gmra.mxu1 %v340_v11 }
  0xe2   :  { %v307_v13 = vpop.f32.mrf.mxu0  ;;  %v311_v15 = vpop.f32.mrf.mxu1 }
  0xe3   :  { %v226_v16 = vmul.f32 %v307_v13, %v275_v12  ;;  %v230_v17 = vmul.f32 %v311_v15, %v275_v12 }
  0xe4   :  { %v163_v18 = vpop.f32.mrf.mxu0  ;;  %v179_v19 = vpop.f32.mrf.mxu1 }
  0xe5   :  { %v240_v20 = vadd.f32 %v276_v14, %v226_v16  ;;  %v244_v21 = vadd.f32 %v276_v14, %v230_v17  ;;  %v224_v22 = vmul.f32 %v275_v12, %v163_v18  ;;  %v228_v23 = vmul.f32 %v275_v12, %v179_v19 }
  0xe6   :  { %v308_v24 = vpop.f32.mrf.mxu0  ;;  %v312_v25 = vpop.f32.mrf.mxu1 }
  0xe7   :  { %v247_v26 = vmax.f32 %v240_v20, 0.0  ;;  %v251_v27 = vmax.f32 %v244_v21, 0.0  ;;  %v238_v28 = vadd.f32 %v276_v14, %v224_v22  ;;  %v242_v29 = vadd.f32 %v276_v14, %v228_v23 }
  0xe8   :  { %v227_v30 = vmul.f32 %v308_v24, %v275_v12  ;;  %v166_v31 = vpop.f32.mrf.mxu0  ;;  %v182_v32 = vpop.f32.mrf.mxu1 }
  0xe9   :  { %254 = vst [vmem:[%s433_s4 + $0x10] sm:$0xff] %v247_v26  ;;  %258 = vst [vmem:[%s433_s4 + $0x30] sm:$0xff] %v251_v27  ;;  %v245_v33 = vmax.f32 %v238_v28, 0.0  ;;  %v249_v34 = vmax.f32 %v242_v29, 0.0  ;;  %v225_v35 = vmul.f32 %v275_v12, %v166_v31  ;;  %v229_v36 = vmul.f32 %v275_v12, %v182_v32 }
  0xea   :  { %v241_v37 = vadd.f32 %v276_v14, %v227_v30 }
  0xeb   :  { %252 = vst [vmem:[%s433_s4] sm:$0xff] %v245_v33  ;;  %256 = vst [vmem:[%s433_s4 + $0x20] sm:$0xff] %v249_v34  ;;  %v239_v38 = vadd.f32 %v276_v14, %v225_v35  ;;  %v243_v39 = vadd.f32 %v276_v14, %v229_v36 }
  0xec   :  { %v248_v40 = vmax.f32 %v241_v37, 0.0 }
  0xed   :  { %v246_v41 = vmax.f32 %v239_v38, 0.0  ;;  %v250_v42 = vmax.f32 %v243_v39, 0.0 }
  0xee   :  { %255 = vst [vmem:[%s433_s4 + $0x18] sm:$0xff] %v248_v40 }
  0xef   :  { %253 = vst [vmem:[%s433_s4 + $0x8] sm:$0xff] %v246_v41  ;;  %257 = vst [vmem:[%s433_s4 + $0x28] sm:$0xff] %v250_v42 }

// kernel: forward.21
= control target key start
LH: loop header
LB: loop body
LE: loop exit
PB: predicated region body
PF: predicated region fallthrough
CT: control target
= control target key end

     0   :  { %vm151_vm0 = vcmask 523264   ;;  %s430_s0 = inlined_call_operand.vmem [shape: f32[56,64], index: 0, kind: input, shape index: {}]   ;;  %s431_s1 = inlined_call_operand.vmem [shape: f32[56,64], index: 1, kind: input, shape index: {}]   ;;  %s432_s2 = inlined_call_operand.vmem [shape: f32[56,64], index: 2, kind: input, shape index: {}]   ;;  %s433_s3 = inlined_call_operand.vmem [shape: f32[56,64], index: 3, kind: input, shape index: {}]   ;;  %s434_s4 = inlined_call_operand.vmem [shape: f32[56,64], index: 4, kind: input, shape index: {}]   ;;  %s435_s5 = inlined_call_operand.vmem [shape: f32[56,64], index: 5, kind: input, shape index: {}]   ;;  %s436_s6 = inlined_call_operand.vmem [shape: f32[56,64], index: 6, kind: input, shape index: {}]   ;;  %s437_s7 = inlined_call_operand.vmem [shape: f32[56,64], index: 7, kind: input, shape index: {}]   ;;  %s438_s8 = inlined_call_operand.vmem [shape: f32[56,64], index: 8, kind: input, shape index: {}]   ;;  %s439_s9 = inlined_call_operand.vmem [shape: f32[56,64], index: 9, kind: output, shape index: {}]  }
   0x1   :  { %v32_v0 = vld [vmem:[%s430_s0] sm:$0xff]  ;;  %v33_v6 = vld [vmem:[%s430_s0 + $0x8] sm:$0xff]  ;;  %v34_v15 = vld [vmem:[%s430_s0 + $0x10] sm:$0xff] }
   0x2   :  { %v39_v1 = vld [vmem:[%s431_s1] sm:$0xff]  ;;  %v40_v7 = vld [vmem:[%s431_s1 + $0x8] sm:$0xff]  ;;  %v41_v16 = vld [vmem:[%s431_s1 + $0x10] sm:$0xff] }
   0x3   :  { %v53_v2 = vld [vmem:[%s432_s2] sm:$0xff]  ;;  %v46_v3 = vmax.f32 %v32_v0, %v39_v1  ;;  %v54_v8 = vld [vmem:[%s432_s2 + $0x8] sm:$0xff]  ;;  %v47_v10 = vmax.f32 %v33_v6, %v40_v7  ;;  %v55_v17 = vld [vmem:[%s432_s2 + $0x10] sm:$0xff]  ;;  %v48_v20 = vmax.f32 %v34_v15, %v41_v16 }
   0x4   :  { %v67_v4 = vld [vmem:[%s433_s3] sm:$0xff]  ;;  %v68_v13 = vld [vmem:[%s433_s3 + $0x8] sm:$0xff]  ;;  %v69_v24 = vld [vmem:[%s433_s3 + $0x10] sm:$0xff] }
   0x5   :  { %v60_v5 = vmax.f32 %v46_v3, %v53_v2  ;;  %v81_v9 = vld [vmem:[%s434_s4] sm:$0xff]  ;;  %v61_v14 = vmax.f32 %v47_v10, %v54_v8  ;;  %v82_v19 = vld [vmem:[%s434_s4 + $0x8] sm:$0xff]  ;;  %v62_v26 = vmax.f32 %v48_v20, %v55_v17  ;;  %v35_v27 = vld [vmem:[%s430_s0 + $0x18] sm:$0xff] }
   0x6   :  { %v95_v12 = vld [vmem:[%s435_s5] sm:$0xff]  ;;  %v96_v23 = vld [vmem:[%s435_s5 + $0x8] sm:$0xff]  ;;  %v42_v28 = vld [vmem:[%s431_s1 + $0x18] sm:$0xff] }
   0x7   :  { %v74_v11 = vmax.f32 %v60_v5, %v67_v4  ;;  %v109_v21 = vld [vmem:[%s436_s6] sm:$0xff]  ;;  %v75_v22 = vmax.f32 %v61_v14, %v68_v13  ;;  %v56_v29 = vld [vmem:[%s432_s2 + $0x18] sm:$0xff]  ;;  %v83_v33 = vld [vmem:[%s434_s4 + $0x10] sm:$0xff]  ;;  %v49_v34 = vmax.f32 %v35_v27, %v42_v28  ;;  %v76_v37 = vmax.f32 %v62_v26, %v69_v24 }
   0x8   :  { %v123_v30 = vld [vmem:[%s437_s7] sm:$0xff]  ;;  %v110_v36 = vld [vmem:[%s436_s6 + $0x8] sm:$0xff]  ;;  %v97_v38 = vld [vmem:[%s435_s5 + $0x10] sm:$0xff] }
   0x9   :  { %v88_v18 = vmax.f32 %v74_v11, %v81_v9  ;;  %v137_v31 = vld [vmem:[%s438_s8] sm:$0xff]  ;;  %v89_v32 = vmax.f32 %v75_v22, %v82_v19  ;;  %v70_v39 = vld [vmem:[%s433_s3 + $0x18] sm:$0xff]  ;;  %v63_v41 = vmax.f32 %v49_v34, %v56_v29  ;;  %v124_v46 = vld [vmem:[%s437_s7 + $0x8] sm:$0xff]  ;;  %v90_v48 = vmax.f32 %v76_v37, %v83_v33 }
   0xa   :  { %v36_v42 = vld [vmem:[%s430_s0 + $0x20] sm:$0xff]  ;;  %v138_v47 = vld [vmem:[%s438_s8 + $0x8] sm:$0xff]  ;;  %v84_v49 = vld [vmem:[%s434_s4 + $0x18] sm:$0xff] }
   0xb   :  { %v102_v25 = vmax.f32 %v88_v18, %v95_v12  ;;  %v103_v40 = vmax.f32 %v89_v32, %v96_v23  ;;  %v43_v43 = vld [vmem:[%s431_s1 + $0x20] sm:$0xff]  ;;  %v111_v52 = vld [vmem:[%s436_s6 + $0x10] sm:$0xff]  ;;  %v77_v53 = vmax.f32 %v63_v41, %v70_v39  ;;  %v98_v54 = vld [vmem:[%s435_s5 + $0x18] sm:$0xff]  ;;  %v104_v57 = vmax.f32 %v90_v48, %v97_v38 }
   0xc   :  { %v57_v44 = vld [vmem:[%s432_s2 + $0x20] sm:$0xff]  ;;  %v50_v50 = vmax.f32 %v36_v42, %v43_v43  ;;  %v37_v59 = vld [vmem:[%s430_s0 + $0x28] sm:$0xff]  ;;  %v125_v63 = vld [vmem:[%s437_s7 + $0x10] sm:$0xff] }
   0xd   :  { %v116_v35 = vmax.f32 %v102_v25, %v109_v21  ;;  %v117_v51 = vmax.f32 %v103_v40, %v110_v36  ;;  %v71_v55 = vld [vmem:[%s433_s3 + $0x20] sm:$0xff]  ;;  %v44_v60 = vld [vmem:[%s431_s1 + $0x28] sm:$0xff]  ;;  %v139_v0 = vld [vmem:[%s438_s8 + $0x10] sm:$0xff]  ;;  %v91_v1 = vmax.f32 %v77_v53, %v84_v49  ;;  %v118_v4 = vmax.f32 %v104_v57, %v111_v52 }
   0xe   :  { %v64_v58 = vmax.f32 %v50_v50, %v57_v44  ;;  %v58_v61 = vld [vmem:[%s432_s2 + $0x28] sm:$0xff]  ;;  %v85_v2 = vld [vmem:[%s434_s4 + $0x20] sm:$0xff]  ;;  %v51_v3 = vmax.f32 %v37_v59, %v44_v60  ;;  %v112_v5 = vld [vmem:[%s436_s6 + $0x18] sm:$0xff] }
   0xf   :  { %v130_v45 = vmax.f32 %v116_v35, %v123_v30  ;;  %v131_v62 = vmax.f32 %v117_v51, %v124_v46  ;;  %v99_v7 = vld [vmem:[%s435_s5 + $0x20] sm:$0xff]  ;;  %v72_v8 = vld [vmem:[%s433_s3 + $0x28] sm:$0xff]  ;;  %v105_v10 = vmax.f32 %v91_v1, %v98_v54  ;;  %v38_v12 = vld [vmem:[%s430_s0 + $0x30] sm:$0xff]  ;;  %v132_v15 = vmax.f32 %v118_v4, %v125_v63 }
  0x10   :  { %v78_v6 = vmax.f32 %v64_v58, %v71_v55  ;;  %v65_v11 = vmax.f32 %v51_v3, %v58_v61  ;;  %v45_v13 = vld [vmem:[%s431_s1 + $0x30] sm:$0xff]  ;;  %v126_v16 = vld [vmem:[%s437_s7 + $0x18] sm:$0xff]  ;;  %v86_v18 = vld [vmem:[%s434_s4 + $0x28] sm:$0xff] }
  0x11   :  { %v144_v56 = vmax.f32 %v130_v45, %v137_v31  ;;  %v145_v9 = vmax.f32 %v131_v62, %v138_v47  ;;  %v59_v14 = vld [vmem:[%s432_s2 + $0x30] sm:$0xff]  ;;  %v52_v19 = vmax.f32 %v38_v12, %v45_v13  ;;  %v119_v20 = vmax.f32 %v105_v10, %v112_v5  ;;  %v113_v21 = vld [vmem:[%s436_s6 + $0x20] sm:$0xff]  ;;  %v140_v25 = vld [vmem:[%s438_s8 + $0x18] sm:$0xff] }
  0x12   :  { %v92_v17 = vmax.f32 %v78_v6, %v85_v2  ;;  %v79_v22 = vmax.f32 %v65_v11, %v72_v8  ;;  %v73_v23 = vld [vmem:[%s433_s3 + $0x30] sm:$0xff]  ;;  %v146_v24 = vmax.f32 %v132_v15, %v139_v0  ;;  %v100_v27 = vld [vmem:[%s435_s5 + $0x28] sm:$0xff]  ;;  %v127_v30 = vld [vmem:[%s437_s7 + $0x20] sm:$0xff] }
  0x13   :  { %152 = vst.msk [vmem:[%s439_s9] sm:$0xff] %vm151_vm0, %v144_v56  ;;  %153 = vst.msk [vmem:[%s439_s9 + $0x8] sm:$0xff] %vm151_vm0, %v145_v9  ;;  %v66_v28 = vmax.f32 %v52_v19, %v59_v14  ;;  %v133_v29 = vmax.f32 %v119_v20, %v126_v16  ;;  %v87_v32 = vld [vmem:[%s434_s4 + $0x30] sm:$0xff]  ;;  %v114_v34 = vld [vmem:[%s436_s6 + $0x28] sm:$0xff] }
  0x14   :  { %v106_v26 = vmax.f32 %v92_v17, %v99_v7  ;;  %v93_v31 = vmax.f32 %v79_v22, %v86_v18  ;;  %154 = vst.msk [vmem:[%s439_s9 + $0x10] sm:$0xff] %vm151_vm0, %v146_v24  ;;  %v141_v37 = vld [vmem:[%s438_s8 + $0x20] sm:$0xff]  ;;  %v101_v39 = vld [vmem:[%s435_s5 + $0x30] sm:$0xff]  ;;  %v128_v41 = vld [vmem:[%s437_s7 + $0x28] sm:$0xff] }
  0x15   :  { %v80_v35 = vmax.f32 %v66_v28, %v73_v23  ;;  %v147_v36 = vmax.f32 %v133_v29, %v140_v25  ;;  %v115_v44 = vld [vmem:[%s436_s6 + $0x30] sm:$0xff]  ;;  %v142_v46 = vld [vmem:[%s438_s8 + $0x28] sm:$0xff] }
  0x16   :  { %v120_v33 = vmax.f32 %v106_v26, %v113_v21  ;;  %v107_v38 = vmax.f32 %v93_v31, %v100_v27  ;;  %v129_v49 = vld [vmem:[%s437_s7 + $0x30] sm:$0xff] }
  0x17   :  { %v94_v42 = vmax.f32 %v80_v35, %v87_v32  ;;  %155 = vst.msk [vmem:[%s439_s9 + $0x18] sm:$0xff] %vm151_vm0, %v147_v36  ;;  %v143_v52 = vld [vmem:[%s438_s8 + $0x30] sm:$0xff] }
  0x18   :  { %v134_v40 = vmax.f32 %v120_v33, %v127_v30  ;;  %v121_v43 = vmax.f32 %v107_v38, %v114_v34 }
  0x19   :  { %v108_v47 = vmax.f32 %v94_v42, %v101_v39 }
  0x1a   :  { %v148_v45 = vmax.f32 %v134_v40, %v141_v37  ;;  %v135_v48 = vmax.f32 %v121_v43, %v128_v41 }
  0x1b   :  { %v122_v50 = vmax.f32 %v108_v47, %v115_v44 }
  0x1c   :  { %156 = vst.msk [vmem:[%s439_s9 + $0x20] sm:$0xff] %vm151_vm0, %v148_v45  ;;  %v149_v51 = vmax.f32 %v135_v48, %v142_v46 }
  0x1d   :  { %v136_v53 = vmax.f32 %v122_v50, %v129_v49 }
  0x1e   :  { %157 = vst.msk [vmem:[%s439_s9 + $0x28] sm:$0xff] %vm151_vm0, %v149_v51 }
  0x1f   :  { %v150_v54 = vmax.f32 %v136_v53, %v143_v52 }
  0x21   :  { %158 = vst.msk [vmem:[%s439_s9 + $0x30] sm:$0xff] %vm151_vm0, %v150_v54 }

// kernel: forward.20
= control target key start
LH: loop header
LB: loop body
LE: loop exit
PB: predicated region body
PF: predicated region fallthrough
CT: control target
= control target key end

     0   :  { %s873_s1 = inlined_call_operand.vmem [shape: bf16[256,128], index: 1, kind: input, shape index: {}]   ;;  %s874_s0 = inlined_call_operand.vmem [shape: bf16[128,256], index: 0, kind: input, shape index: {}]   ;;  %s875_s2 = inlined_call_operand.vmem [shape: f32[1,128], index: 2, kind: input, shape index: {}]   ;;  %s876_s3 = inlined_call_operand.vmem [shape: f32[1,128], index: 3, kind: input, shape index: {}]   ;;  %s877_s4 = inlined_call_operand.vmem [shape: f32[128,128], index: 4, kind: output, shape index: {}]  }
   0x1   :  { %v622_v0 = vld [vmem:[%s873_s1 + $0x78] sm:$0xff]   ;;  %v624_v2 = vld [vmem:[%s873_s1 + $0x70] sm:$0xff]   ;;  %v626_v4 = vld [vmem:[%s873_s1 + $0x68] sm:$0xff]  }
   0x2   :  { %v623_v1 = vld [vmem:[%s873_s1 + $0x38] sm:$0xff]   ;;  %542 = vmatprep.subr.bf16.mxu0 %v622_v0  ;;  %606 = vmatprep.subr.bf16.mxu1 %v622_v0  ;;  %v625_v3 = vld [vmem:[%s873_s1 + $0x30] sm:$0xff]   ;;  %v627_v5 = vld [vmem:[%s873_s1 + $0x28] sm:$0xff]  }
   0x3   :  { %543 = vmatpush3.bf16.msra.mxu0 %v623_v1  ;;  %614 = vmatpush3.bf16.msra.mxu1 %v623_v1  ;;  %v628_v6 = vld [vmem:[%s873_s1 + $0x60] sm:$0xff]   ;;  %v630_v8 = vld [vmem:[%s873_s1 + $0x58] sm:$0xff]   ;;  %v632_v10 = vld [vmem:[%s873_s1 + $0x50] sm:$0xff]  }
   0x4   :  { %544 = vmatprep.subr.bf16.mxu0 %v624_v2  ;;  %607 = vmatprep.subr.bf16.mxu1 %v624_v2  ;;  %v629_v7 = vld [vmem:[%s873_s1 + $0x20] sm:$0xff]   ;;  %v631_v9 = vld [vmem:[%s873_s1 + $0x18] sm:$0xff]   ;;  %v633_v13 = vld [vmem:[%s873_s1 + $0x10] sm:$0xff]  }
   0x5   :  { %v640_v11 = vld [vmem:[%s874_s0 + $0x4] ss:$8 sps:$4 sm:$0xff]   ;;  %v638_v18 = vld [vmem:[%s874_s0] ss:$8 sps:$4 sm:$0xff]   ;;  %v644_v20 = vld [vmem:[%s874_s0 + $0x14] ss:$8 sps:$4 sm:$0xff]  }
   0x6   :  { %v643_v12 = vld [vmem:[%s874_s0 + $0x44] ss:$8 sps:$4 sm:$0xff]   ;;  %310 = vmatprep.mubr.bf16.mxu0 %v640_v11  ;;  %v641_v19 = vld [vmem:[%s874_s0 + $0x40] ss:$8 sps:$4 sm:$0xff]   ;;  %v646_v21 = vld [vmem:[%s874_s0 + $0x54] ss:$8 sps:$4 sm:$0xff]  }
   0x7   :  { %545 = vmatpush3.bf16.msra.mxu0 %v625_v3  ;;  %615 = vmatpush3.bf16.msra.mxu1 %v625_v3  ;;  %v634_v14 = vld [vmem:[%s873_s1 + $0x48] sm:$0xff]   ;;  %v636_v16 = vld [vmem:[%s873_s1 + $0x40] sm:$0xff]   ;;  %v648_v22 = vld [vmem:[%s874_s0 + $0x10] ss:$8 sps:$4 sm:$0xff]  }
   0x8   :  { %546 = vmatprep.subr.bf16.mxu0 %v626_v4  ;;  %608 = vmatprep.subr.bf16.mxu1 %v626_v4  ;;  %v635_v15 = vld [vmem:[%s873_s1 + $0x8] sm:$0xff]   ;;  %v637_v17 = vld [vmem:[%s873_s1] sm:$0xff]   ;;  %v649_v23 = vld [vmem:[%s874_s0 + $0x50] ss:$8 sps:$4 sm:$0xff]  }
   0x9   :  { %342 = vmatprep.mubr.bf16.mxu1 %v643_v12  ;;  %v650_v24 = vld [vmem:[%s874_s0 + $0x24] ss:$8 sps:$4 sm:$0xff]   ;;  %v654_v26 = vld [vmem:[%s874_s0 + $0x20] ss:$8 sps:$4 sm:$0xff]   ;;  %v656_v28 = vld [vmem:[%s874_s0 + $0x34] ss:$8 sps:$4 sm:$0xff]  }
   0xa   :  { %v652_v25 = vld [vmem:[%s874_s0 + $0x64] ss:$8 sps:$4 sm:$0xff]   ;;  %v655_v27 = vld [vmem:[%s874_s0 + $0x60] ss:$8 sps:$4 sm:$0xff]   ;;  %v658_v29 = vld [vmem:[%s874_s0 + $0x74] ss:$8 sps:$4 sm:$0xff]  }
   0xb   :  { %547 = vmatpush3.bf16.msra.mxu0 %v627_v5  ;;  %616 = vmatpush3.bf16.msra.mxu1 %v627_v5  ;;  %v660_v30 = vld [vmem:[%s874_s0 + $0x30] ss:$8 sps:$4 sm:$0xff]   ;;  %v786_v35 = vld [vmem:[%s875_s2] ss:$0 sm:$0xff] }
   0xc   :  { %548 = vmatprep.subr.bf16.mxu0 %v628_v6  ;;  %609 = vmatprep.subr.bf16.mxu1 %v628_v6  ;;  %v661_v31 = vld [vmem:[%s874_s0 + $0x70] ss:$8 sps:$4 sm:$0xff]   ;;  %v791_v39 = vld [vmem:[%s876_s3] ss:$0 sm:$0xff] }
   0xf   :  { %549 = vmatpush3.bf16.msra.mxu0 %v629_v7  ;;  %617 = vmatpush3.bf16.msra.mxu1 %v629_v7 }
  0x10   :  { %550 = vmatprep.subr.bf16.mxu0 %v630_v8  ;;  %610 = vmatprep.subr.bf16.mxu1 %v630_v8 }
  0x13   :  { %551 = vmatpush3.bf16.msra.mxu0 %v631_v9  ;;  %618 = vmatpush3.bf16.msra.mxu1 %v631_v9 }
  0x14   :  { %552 = vmatprep.subr.bf16.mxu0 %v632_v10  ;;  %611 = vmatprep.subr.bf16.mxu1 %v632_v10 }
  0x17   :  { %553 = vmatpush3.bf16.msra.mxu0 %v633_v13  ;;  %619 = vmatpush3.bf16.msra.mxu1 %v633_v13 }
  0x18   :  { %554 = vmatprep.subr.bf16.mxu0 %v634_v14  ;;  %612 = vmatprep.subr.bf16.mxu1 %v634_v14 }
  0x1b   :  { %555 = vmatpush3.bf16.msra.mxu0 %v635_v15  ;;  %620 = vmatpush3.bf16.msra.mxu1 %v635_v15 }
  0x1c   :  { %556 = vmatprep.subr.bf16.mxu0 %v636_v16  ;;  %613 = vmatprep.subr.bf16.mxu1 %v636_v16 }
  0x1f   :  { %557 = vmatpush3.bf16.msra.mxu0 %v637_v17  ;;  %621 = vmatpush3.bf16.msra.mxu1 %v637_v17 }
  0x22   :  { %311 = vmatmul.mubr.bf16.vlgmr.msra.gmra.mxu0 %v638_v18  ;;  %343 = vmatmul.mubr.bf16.vlgmr.msra.gmra.mxu1 %v641_v19 }
  0x23   :  { %318 = vmatprep.mubr.bf16.mxu0 %v644_v20  ;;  %350 = vmatprep.mubr.bf16.mxu1 %v646_v21 }
  0x2a   :  { %319 = vmatmul.mubr.bf16.gmra.mxu0 %v648_v22  ;;  %351 = vmatmul.mubr.bf16.gmra.mxu1 %v649_v23 }
  0x2b   :  { %326 = vmatprep.mubr.bf16.mxu0 %v650_v24  ;;  %358 = vmatprep.mubr.bf16.mxu1 %v652_v25 }
  0x32   :  { %327 = vmatmul.mubr.bf16.gmra.mxu0 %v654_v26  ;;  %359 = vmatmul.mubr.bf16.gmra.mxu1 %v655_v27 }
  0x33   :  { %334 = vmatprep.mubr.bf16.mxu0 %v656_v28  ;;  %366 = vmatprep.mubr.bf16.mxu1 %v658_v29 }
  0x3a   :  { %335 = vmatmul.mubr.bf16.gmra.mxu0 %v660_v30  ;;  %367 = vmatmul.mubr.bf16.gmra.mxu1 %v661_v31 }
  0xe2   :  { %v558_v32 = vpop.f32.mrf.mxu0  ;;  %v582_v33 = vpop.f32.mrf.mxu1 }
  0xe4   :  { %v559_v34 = vpop.f32.mrf.mxu0  ;;  %v583_v36 = vpop.f32.mrf.mxu1 }
  0xe5   :  { %v560_v37 = vadd.f32 %v559_v34, %v558_v32  ;;  %v584_v38 = vadd.f32 %v583_v36, %v582_v33 }
  0xe6   :  { %v561_v40 = vpop.f32.mrf.mxu0  ;;  %v585_v41 = vpop.f32.mrf.mxu1 }
  0xe7   :  { %v433_v42 = vmul.f32 %v560_v37, %v786_v35  ;;  %v441_v43 = vmul.f32 %v584_v38, %v786_v35 }
  0xe8   :  { %v562_v44 = vpop.f32.mrf.mxu0  ;;  %v586_v45 = vpop.f32.mrf.mxu1 }
  0xe9   :  { %v456_v46 = vadd.f32 %v791_v39, %v433_v42  ;;  %v464_v47 = vadd.f32 %v791_v39, %v441_v43  ;;  %v563_v48 = vadd.f32 %v562_v44, %v561_v40  ;;  %v587_v49 = vadd.f32 %v586_v45, %v585_v41 }
  0xea   :  { %v564_v50 = vpop.f32.mrf.mxu0  ;;  %v588_v51 = vpop.f32.mrf.mxu1 }
  0xeb   :  { %v472_v52 = vmax.f32 %v456_v46, 0.0  ;;  %v480_v53 = vmax.f32 %v464_v47, 0.0  ;;  %v434_v54 = vmul.f32 %v563_v48, %v786_v35  ;;  %v442_v55 = vmul.f32 %v587_v49, %v786_v35 }
  0xec   :  { %v565_v56 = vpop.f32.mrf.mxu0  ;;  %v589_v57 = vpop.f32.mrf.mxu1 }
  0xed   :  { %488 = vst [vmem:[%s877_s4] sm:$0xff] %v472_v52  ;;  %496 = vst [vmem:[%s877_s4 + $0x40] sm:$0xff] %v480_v53  ;;  %v457_v58 = vadd.f32 %v791_v39, %v434_v54  ;;  %v465_v59 = vadd.f32 %v791_v39, %v442_v55  ;;  %v566_v60 = vadd.f32 %v565_v56, %v564_v50 }
  0xee   :  { %v590_v61 = vadd.f32 %v589_v57, %v588_v51  ;;  %v567_v62 = vpop.f32.mrf.mxu0  ;;  %v591_v63 = vpop.f32.mrf.mxu1 }
  0xef   :  { %v473_v0 = vmax.f32 %v457_v58, 0.0  ;;  %v481_v1 = vmax.f32 %v465_v59, 0.0  ;;  %v435_v2 = vmul.f32 %v566_v60, %v786_v35 }
  0xf0   :  { %v443_v3 = vmul.f32 %v590_v61, %v786_v35  ;;  %v568_v4 = vpop.f32.mrf.mxu0  ;;  %v592_v5 = vpop.f32.mrf.mxu1 }
  0xf1   :  { %489 = vst [vmem:[%s877_s4 + $0x8] sm:$0xff] %v473_v0  ;;  %497 = vst [vmem:[%s877_s4 + $0x48] sm:$0xff] %v481_v1  ;;  %v458_v6 = vadd.f32 %v791_v39, %v435_v2  ;;  %v569_v8 = vadd.f32 %v568_v4, %v567_v62  ;;  %v593_v9 = vadd.f32 %v592_v5, %v591_v63 }
  0xf2   :  { %v466_v7 = vadd.f32 %v791_v39, %v443_v3  ;;  %v570_v10 = vpop.f32.mrf.mxu0  ;;  %v594_v11 = vpop.f32.mrf.mxu1 }
  0xf3   :  { %v474_v12 = vmax.f32 %v458_v6, 0.0  ;;  %v436_v14 = vmul.f32 %v569_v8, %v786_v35  ;;  %v444_v15 = vmul.f32 %v593_v9, %v786_v35 }
  0xf4   :  { %v482_v13 = vmax.f32 %v466_v7, 0.0  ;;  %v571_v16 = vpop.f32.mrf.mxu0  ;;  %v595_v17 = vpop.f32.mrf.mxu1 }
  0xf5   :  { %490 = vst [vmem:[%s877_s4 + $0x10] sm:$0xff] %v474_v12  ;;  %v459_v18 = vadd.f32 %v791_v39, %v436_v14  ;;  %v467_v19 = vadd.f32 %v791_v39, %v444_v15  ;;  %v572_v20 = vadd.f32 %v571_v16, %v570_v10  ;;  %v596_v21 = vadd.f32 %v595_v17, %v594_v11 }
  0xf6   :  { %498 = vst [vmem:[%s877_s4 + $0x50] sm:$0xff] %v482_v13  ;;  %v573_v22 = vpop.f32.mrf.mxu0  ;;  %v597_v23 = vpop.f32.mrf.mxu1 }
  0xf7   :  { %v475_v24 = vmax.f32 %v459_v18, 0.0  ;;  %v483_v25 = vmax.f32 %v467_v19, 0.0  ;;  %v437_v26 = vmul.f32 %v572_v20, %v786_v35  ;;  %v445_v27 = vmul.f32 %v596_v21, %v786_v35 }
  0xf8   :  { %v574_v28 = vpop.f32.mrf.mxu0  ;;  %v598_v29 = vpop.f32.mrf.mxu1 }
  0xf9   :  { %491 = vst [vmem:[%s877_s4 + $0x18] sm:$0xff] %v475_v24  ;;  %499 = vst [vmem:[%s877_s4 + $0x58] sm:$0xff] %v483_v25  ;;  %v460_v30 = vadd.f32 %v791_v39, %v437_v26  ;;  %v468_v31 = vadd.f32 %v791_v39, %v445_v27  ;;  %v575_v32 = vadd.f32 %v574_v28, %v573_v22 }
  0xfa   :  { %v599_v33 = vadd.f32 %v598_v29, %v597_v23  ;;  %v576_v34 = vpop.f32.mrf.mxu0  ;;  %v600_v36 = vpop.f32.mrf.mxu1 }
  0xfb   :  { %v476_v37 = vmax.f32 %v460_v30, 0.0  ;;  %v484_v38 = vmax.f32 %v468_v31, 0.0  ;;  %v438_v40 = vmul.f32 %v575_v32, %v786_v35 }
  0xfc   :  { %v446_v41 = vmul.f32 %v599_v33, %v786_v35  ;;  %v577_v42 = vpop.f32.mrf.mxu0  ;;  %v601_v43 = vpop.f32.mrf.mxu1 }
  0xfd   :  { %492 = vst [vmem:[%s877_s4 + $0x20] sm:$0xff] %v476_v37  ;;  %500 = vst [vmem:[%s877_s4 + $0x60] sm:$0xff] %v484_v38  ;;  %v461_v44 = vadd.f32 %v791_v39, %v438_v40  ;;  %v578_v46 = vadd.f32 %v577_v42, %v576_v34  ;;  %v602_v47 = vadd.f32 %v601_v43, %v600_v36 }
  0xfe   :  { %v469_v45 = vadd.f32 %v791_v39, %v446_v41  ;;  %v579_v48 = vpop.f32.mrf.mxu0  ;;  %v603_v49 = vpop.f32.mrf.mxu1 }
  0xff   :  { %v477_v50 = vmax.f32 %v461_v44, 0.0  ;;  %v439_v52 = vmul.f32 %v578_v46, %v786_v35  ;;  %v447_v53 = vmul.f32 %v602_v47, %v786_v35 }
 0x100   :  { %v485_v51 = vmax.f32 %v469_v45, 0.0  ;;  %v580_v54 = vpop.f32.mrf.mxu0  ;;  %v604_v55 = vpop.f32.mrf.mxu1 }
 0x101   :  { %493 = vst [vmem:[%s877_s4 + $0x28] sm:$0xff] %v477_v50  ;;  %v462_v56 = vadd.f32 %v791_v39, %v439_v52  ;;  %v470_v57 = vadd.f32 %v791_v39, %v447_v53  ;;  %v581_v58 = vadd.f32 %v580_v54, %v579_v48  ;;  %v605_v59 = vadd.f32 %v604_v55, %v603_v49 }
 0x102   :  { %501 = vst [vmem:[%s877_s4 + $0x68] sm:$0xff] %v485_v51 }
 0x103   :  { %v478_v60 = vmax.f32 %v462_v56, 0.0  ;;  %v486_v61 = vmax.f32 %v470_v57, 0.0  ;;  %v440_v62 = vmul.f32 %v581_v58, %v786_v35  ;;  %v448_v63 = vmul.f32 %v605_v59, %v786_v35 }
 0x105   :  { %494 = vst [vmem:[%s877_s4 + $0x30] sm:$0xff] %v478_v60  ;;  %502 = vst [vmem:[%s877_s4 + $0x70] sm:$0xff] %v486_v61  ;;  %v463_v0 = vadd.f32 %v791_v39, %v440_v62  ;;  %v471_v1 = vadd.f32 %v791_v39, %v448_v63 }
 0x107   :  { %v479_v2 = vmax.f32 %v463_v0, 0.0  ;;  %v487_v3 = vmax.f32 %v471_v1, 0.0 }
 0x109   :  { %495 = vst [vmem:[%s877_s4 + $0x38] sm:$0xff] %v479_v2  ;;  %503 = vst [vmem:[%s877_s4 + $0x78] sm:$0xff] %v487_v3 }

// kernel: forward.24
= control target key start
LH: loop header
LB: loop body
LE: loop exit
PB: predicated region body
PF: predicated region fallthrough
CT: control target
= control target key end

     0   :  { %s1247_s15 = smov 0   ;;  %s1249_s16 = smov 0   ;;  %s1380_s0 = inlined_call_operand.vmem [shape: bf16[56,768], index: 0, kind: input, shape index: {}]   ;;  %s1381_s1 = inlined_call_operand.vmem [shape: bf16[768,128], index: 1, kind: input, shape index: {}]   ;;  %s1382_s2 = inlined_call_operand.vmem [shape: f32[1,128], index: 2, kind: input, shape index: {}]   ;;  %s1383_s3 = inlined_call_operand.vmem [shape: f32[1,128], index: 3, kind: input, shape index: {}]   ;;  %s1384_s4 = inlined_call_operand.vmem [shape: f32[56,128], index: 4, kind: output, shape index: {}]  }
   0x1   :  { %s1251_s17 = smov 0   ;;  %s1253_s18 = smov 0  }
   0x2   :  { %s1255_s19 = smov 0  }
   0x3 LB: > { %s26_s20 = sadd.s32 1, %s1215_s18  ;;  %p49_p1 = scmp.ne.s32.totalorder %s1207_s16, %s1203_s15  ;;  %s1219_s19 = sphi %s1255_s19, %s14_s19   ;;  %s1215_s18 = sphi %s1253_s18, %s1388_s18   ;;  %s1211_s17 = sphi %s1251_s17, %s1387_s17   ;;  %s1207_s16 = sphi %s1249_s16, %s1386_s16   ;;  %s1203_s15 = sphi %s1247_s15, %s1385_s15  }
   0x4   : > { %p27_p0 = scmp.ge.s32.totalorder %s26_s20, 2  ;;  %p50_p2 = scmp.eq.s32.totalorder %s1219_s19, 0 }
   0x5   : > { %s42_s22 = sadd.s32 1, %s1207_s16  ;;  %p960_p5 = scmp.ge.s32.totalorder %s1219_s19, 2 }
   0x6   : > { %s1390_s20 = smov (%p27_p0, %s26_s20), 0  ;;  %p51_p3 = por %p50_p2, %p49_p1 }
   0x7   : > { %s38_s21 = ssub.s32 %s1215_s18, %s1390_s20  ;;  %195 = sbr.rel (%p960_p5) target bundleno = 25 (0x19), region = 24 }
   0x8   : > { %p40_p4 = scmp.eq.s32.totalorder %s38_s21, 0 }
   0xa   : > { %s1282_s23 = scalar_select %p40_p4, %s1207_s16, %s42_s22  }
   0xc   : > { %198 = sbr.rel (!%p51_p3) target bundleno = 25 (0x19), region = 28  ;;  %s200_s24 = sand.u32 (%p51_p3), 1, %s1207_s16  }
   0xd   : > { %s1022_s25 = smul.u32 (%p51_p3), 12, %s1215_s18 }
   0xe   : > { %s1099_s26 = smul.u32 (%p51_p3), 84, %s200_s24 }
   0xf   : > { %s208_s29 = scalar_lea.vmem (%p51_p3), %s1380_s0, %s1022_s25 }
  0x10   : > { %v223_v0 = vld [vmem:[%s208_s29] sm:$0xff] (%p51_p3)  ;;  %v225_v1 = vld [vmem:[%s208_s29 + $0x18] sm:$0xff] (%p51_p3)  ;;  %v227_v2 = vld [vmem:[%s208_s29 + $0x30] sm:$0xff] (%p51_p3)  ;;  %s202_s30 = scalar_lea.vmem (%p51_p3), [#allocation3], %s1099_s26 }
  0x11   : > { %224 = vst [vmem:[%s202_s30] sm:$0xff] %v223_v0  ;;  %226 = vst [vmem:[%s202_s30 + $0xc] sm:$0xff] %v225_v1  ;;  %v229_v3 = vld [vmem:[%s208_s29 + $0x48] sm:$0xff]  ;;  %v231_v4 = vld [vmem:[%s208_s29 + $0x60] sm:$0xff] }
  0x12   : > { %228 = vst [vmem:[%s202_s30 + $0x18] sm:$0xff] %v227_v2  ;;  %v233_v5 = vld [vmem:[%s208_s29 + $0x78] sm:$0xff]  ;;  %230 = vst [vmem:[%s202_s30 + $0x24] sm:$0xff] %v229_v3  ;;  %v235_v6 = vld [vmem:[%s208_s29 + $0x90] sm:$0xff] }
  0x13   : > { %232 = vst [vmem:[%s202_s30 + $0x30] sm:$0xff] %v231_v4  ;;  %234 = vst [vmem:[%s202_s30 + $0x3c] sm:$0xff] %v233_v5  ;;  %v962_v7 = vld [vmem:[%s208_s29 + $0x8] sm:$0xf]  ;;  %v964_v8 = vld [vmem:[%s208_s29 + $0x20] sm:$0xf] }
  0x14   : > { %236 = vst [vmem:[%s202_s30 + $0x48] sm:$0xff] %v235_v6  ;;  %963 = vst [vmem:[%s202_s30 + $0x8] sm:$0xf] %v962_v7  ;;  %v966_v9 = vld [vmem:[%s208_s29 + $0x38] sm:$0xf] }
  0x15   : > { %965 = vst [vmem:[%s202_s30 + $0x14] sm:$0xf] %v964_v8  ;;  %v968_v10 = vld [vmem:[%s208_s29 + $0x50] sm:$0xf]  ;;  %v970_v11 = vld [vmem:[%s208_s29 + $0x68] sm:$0xf] }
  0x16   : > { %967 = vst [vmem:[%s202_s30 + $0x20] sm:$0xf] %v966_v9  ;;  %969 = vst [vmem:[%s202_s30 + $0x2c] sm:$0xf] %v968_v10  ;;  %v972_v12 = vld [vmem:[%s208_s29 + $0x80] sm:$0xf] }
  0x17   : > { %971 = vst [vmem:[%s202_s30 + $0x38] sm:$0xf] %v970_v11  ;;  %v974_v13 = vld [vmem:[%s208_s29 + $0x98] sm:$0xf]  ;;  %973 = vst [vmem:[%s202_s30 + $0x44] sm:$0xf] %v972_v12 }
  0x18   : > { %975 = vst [vmem:[%s202_s30 + $0x50] sm:$0xf] %v974_v13 }
  0x19 PF: > { %p976_p6 = scmp.ge.s32.totalorder %s1219_s19, 1  ;;  %p275_p7 = scmp.lt.s32.totalorder %s1219_s19, 3 }
  0x1b   : > { %p276_p8 = pnand %p976_p6, %p275_p7 }
  0x1c   : > { %s282_s5 = sand.u32 (!%p276_p8), 1, %s1203_s15   ;;  %s326_s6 = smul.u32 (!%p276_p8), 48, %s1211_s17 }
  0x1d   : > { %279 = sbr.rel (%p276_p8) target bundleno = 317 (0x13d), region = 58  ;;  %p978_p10 = scmp.ne.s32.totalorder (!%p276_p8), %s1211_s17, 0 }
  0x1e   : > { %s1100_s7 = smul.u32 (!%p276_p8), 84, %s282_s5  ;;  %p327_p9 = scmp.lt.s32.totalorder (!%p276_p8), %s326_s6, 95 }
  0x20   : > { %s1299_s12 = scalar_lea.vmem (!%p276_p8), [#allocation3], %s1100_s7 }
  0x22   : > { %s1392_s6 = smov (!%p327_p9, %s326_s6), 95  ;;  %354 = sbr.rel (%p978_p10) target bundleno = 44 (0x2c), region = 66 }
  0x23   : > { %s977_s8 = sshll.u32 %s1392_s6, 2 }
  0x24   : > { %s1297_s11 = scalar_lea.vmem %s1381_s1, %s977_s8 }
  0x27   : > { %v1221_v14 = vmov 0.0  }
  0x28   : > { %355 = vst [vmem:[#allocation2 + $0x30] sm:$0xff] %v1221_v14  ;;  %356 = vst [vmem:[#allocation2] sm:$0xff] %v1221_v14 }
  0x29   : > { %357 = vst [vmem:[#allocation2 + $0x18] sm:$0xff] %v1221_v14  ;;  %358 = vst [vmem:[#allocation2 + $0x10] sm:$0xff] %v1221_v14 }
  0x2a   : > { %359 = vst [vmem:[#allocation2 + $0x8] sm:$0xff] %v1221_v14  ;;  %360 = vst [vmem:[#allocation2 + $0x20] sm:$0xff] %v1221_v14 }
  0x2b   : > { %361 = vst [vmem:[#allocation2 + $0x28] sm:$0xff] %v1221_v14 }
  0x2c PF: > { %v1142_v15 = vld [vmem:[%s1297_s11 + $0x78] sm:$0xff]   ;;  %v1145_v18 = vld [vmem:[%s1297_s11 + $0x70] sm:$0xff]   ;;  %v1148_v21 = vld [vmem:[%s1297_s11 + $0x68] sm:$0xff]   ;;  %p1015_p11 = scmp.ne.s32.totalorder %s1211_s17, 1 }
  0x2d   : > { %v1143_v16 = vld [vmem:[%s1297_s11 + $0x38] sm:$0xff]   ;;  %1023 = vmatprep.subr.bf16.mxu0 %v1142_v15  ;;  %v1146_v19 = vld [vmem:[%s1297_s11 + $0x30] sm:$0xff]   ;;  %v1149_v22 = vld [vmem:[%s1297_s11 + $0x28] sm:$0xff]  }
  0x2e   : > { %v1144_v17 = vld [vmem:[%s1297_s11 + $0xb8] sm:$0xff]   ;;  %1024 = vmatpush3.bf16.msra.mxu0 %v1143_v16  ;;  %v1147_v20 = vld [vmem:[%s1297_s11 + $0xb0] sm:$0xff]   ;;  %v1150_v23 = vld [vmem:[%s1297_s11 + $0xa8] sm:$0xff]  }
  0x2f   : > { %1075 = vmatprep.subr.bf16.mxu1 %v1144_v17  ;;  %1025 = vmatprep.subr.bf16.mxu0 %v1145_v18  ;;  %v1151_v24 = vld [vmem:[%s1297_s11 + $0x60] sm:$0xff]   ;;  %v1154_v27 = vld [vmem:[%s1297_s11 + $0x58] sm:$0xff]   ;;  %v1157_v30 = vld [vmem:[%s1297_s11 + $0x50] sm:$0xff]  }
  0x30   : > { %1076 = vmatpush3.bf16.msra.mxu1 %v1144_v17  ;;  %v1152_v25 = vld [vmem:[%s1297_s11 + $0x20] sm:$0xff]   ;;  %v1156_v28 = vld [vmem:[%s1297_s11 + $0x98] sm:$0xff]   ;;  %v1159_v31 = vld [vmem:[%s1297_s11 + $0x90] sm:$0xff]  }
  0x31   : > { %1077 = vmatprep.subr.bf16.mxu1 %v1147_v20  ;;  %v1153_v26 = vld [vmem:[%s1297_s11 + $0xa0] sm:$0xff]   ;;  %v1155_v29 = vld [vmem:[%s1297_s11 + $0x18] sm:$0xff]   ;;  %v1158_v32 = vld [vmem:[%s1297_s11 + $0x10] sm:$0xff]  }
  0x32   : > { %1026 = vmatpush3.bf16.msra.mxu0 %v1146_v19  ;;  %v1160_v33 = vld [vmem:[%s1297_s11 + $0x48] sm:$0xff]   ;;  %v1163_v36 = vld [vmem:[%s1297_s11 + $0x40] sm:$0xff]   ;;  %v362_v57 = vld [vmem:[#allocation2 + $0x30] sm:$0xff] }
  0x33   : > { %1027 = vmatprep.subr.bf16.mxu0 %v1148_v21  ;;  %v1161_v34 = vld [vmem:[%s1297_s11 + $0x8] sm:$0xff]   ;;  %v1165_v37 = vld [vmem:[%s1297_s11 + $0x80] sm:$0xff]   ;;  %v364_v8 = vld [vmem:[#allocation2 + $0x18] sm:$0xff] }
  0x34   : > { %1078 = vmatpush3.bf16.msra.mxu1 %v1147_v20  ;;  %v1162_v35 = vld [vmem:[%s1297_s11 + $0x88] sm:$0xff]   ;;  %v1164_v40 = vld [vmem:[%s1297_s11] sm:$0xff]   ;;  %v365_v16 = vld [vmem:[#allocation2 + $0x10] sm:$0xff] }
  0x35   : > { %1079 = vmatprep.subr.bf16.mxu1 %v1150_v23  ;;  %v1168_v38 = vld [vmem:[%s1299_s12 + $0x4] ss:$12 sps:$4 sm:$0xff]   ;;  %v1169_v39 = vld [vmem:[%s1299_s12 + $0x8] ss:$12 sps:$4 sm:$0xff]   ;;  %v1166_v41 = vld [vmem:[%s1299_s12] ss:$12 sps:$4 sm:$0xff]  }
  0x36   : > { %1028 = vmatpush3.bf16.msra.mxu0 %v1149_v22  ;;  %666 = vmatprep.mubr.bf16.mxu0 %v1168_v38  ;;  %v1171_v42 = vld [vmem:[%s1299_s12 + $0x1c] ss:$12 sps:$4 sm:$0xff]   ;;  %v1170_v43 = vld [vmem:[%s1299_s12 + $0x20] ss:$12 sps:$4 sm:$0xff]   ;;  %v1176_v44 = vld [vmem:[%s1299_s12 + $0x38] ss:$12 sps:$4 sm:$0xff]  }
  0x37   : > { %1029 = vmatprep.subr.bf16.mxu0 %v1151_v24  ;;  %1091 = vmatprep.mubr.bf16.mxu1 %v1169_v39  ;;  %v1173_v45 = vld [vmem:[%s1299_s12 + $0x18] ss:$12 sps:$4 sm:$0xff]   ;;  %v1174_v46 = vld [vmem:[%s1299_s12 + $0x34] ss:$12 sps:$4 sm:$0xff]   ;;  %v1178_v47 = vld [vmem:[%s1299_s12 + $0x50] ss:$0 sps:$4 sm:$0xff]  }
  0x38   : > { %1080 = vmatpush3.bf16.msra.mxu1 %v1150_v23  ;;  %v381_v48 = vld [vmem:[%s1299_s12 + $0x48] sm:$0xff]  ;;  %v1177_v49 = vld [vmem:[%s1299_s12 + $0x30] ss:$12 sps:$4 sm:$0xff]  }
  0x39   : > { %1081 = vmatprep.subr.bf16.mxu1 %v1153_v26  ;;  %v989_v50 = vcombine.high %v381_v48, %v381_v48  ;;  %v988_v51 = vcombine.low %v381_v48, %v381_v48  ;;  %v363_v1 = vld [vmem:[#allocation2] sm:$0xff]  ;;  %v366_v22 = vld [vmem:[#allocation2 + $0x8] sm:$0xff] }
  0x3a   : > { %1030 = vmatpush3.bf16.msra.mxu0 %v1152_v25 }
  0x3b   : > { %1031 = vmatprep.subr.bf16.mxu0 %v1154_v27 }
  0x3c   : > { %1082 = vmatpush3.bf16.msra.mxu1 %v1153_v26 }
  0x3d   : > { %1083 = vmatprep.subr.bf16.mxu1 %v1156_v28 }
  0x3e   : > { %1032 = vmatpush3.bf16.msra.mxu0 %v1155_v29 }
  0x3f   : > { %1033 = vmatprep.subr.bf16.mxu0 %v1157_v30 }
  0x40   : > { %1084 = vmatpush3.bf16.msra.mxu1 %v1156_v28  ;;  %v367_v28 = vld [vmem:[#allocation2 + $0x20] sm:$0xff] }
  0x41   : > { %1085 = vmatprep.subr.bf16.mxu1 %v1159_v31 }
  0x42   : > { %1034 = vmatpush3.bf16.msra.mxu0 %v1158_v32 }
  0x43   : > { %1035 = vmatprep.subr.bf16.mxu0 %v1160_v33 }
  0x44   : > { %1086 = vmatpush3.bf16.msra.mxu1 %v1159_v31 }
  0x45   : > { %1087 = vmatprep.subr.bf16.mxu1 %v1162_v35 }
  0x46   : > { %1036 = vmatpush3.bf16.msra.mxu0 %v1161_v34 }
  0x47   : > { %1037 = vmatprep.subr.bf16.mxu0 %v1163_v36 }
  0x48   : > { %1088 = vmatpush3.bf16.msra.mxu1 %v1162_v35  ;;  %v368_v35 = vld [vmem:[#allocation2 + $0x28] sm:$0xff] }
  0x49   : > { %1089 = vmatprep.subr.bf16.mxu1 %v1165_v37 }
  0x4a   : > { %1038 = vmatpush3.bf16.msra.mxu0 %v1164_v40 }
  0x4c   : > { %1090 = vmatpush3.bf16.msra.mxu1 %v1165_v37 }
  0x4d   : > { %667 = vmatmul.mubr.bf16.vlgmr.msra.gmra.mxu0 %v1166_v41 }
  0x4e   : > { %674 = vmatprep.mubr.bf16.mxu0 %v1171_v42 }
  0x4f   : > { %1092 = vmatmul.mubr.bf16.vlgmr.msra.gmra.mxu1 %v1170_v43 }
  0x50   : > { %1095 = vmatprep.mubr.bf16.mxu1 %v1176_v44 }
  0x55   : > { %675 = vmatmul.mubr.bf16.gmra.mxu0 %v1173_v45 }
  0x56   : > { %682 = vmatprep.mubr.bf16.mxu0 %v1174_v46 }
  0x57   : > { %1096 = vmatmul.mubr.bf16.gmra.mxu1 %v1178_v47 }
  0x5d   : > { %683 = vmatmul.mubr.bf16.gmra.mxu0 %v1177_v49 }
  0x5e   : > { %690 = vmatprep.mubr.bf16.mxu0 %v989_v50 }
  0x65   : > { %691 = vmatmul.mubr.bf16.gmra.mxu0 %v988_v51 }
 0x10d   : > { %v1039_v52 = vpop.f32.mrf.mxu0 }
 0x10f   : > { %v1040_v53 = vpop.f32.mrf.mxu0  ;;  %v1093_v54 = vpop.f32.mrf.mxu1 }
 0x110   : > { %v1041_v55 = vadd.f32 %v1040_v53, %v1039_v52 }
 0x111   : > { %v1042_v56 = vpop.f32.mrf.mxu0  ;;  %v732_v58 = vpop.f32.mrf.mxu1 }
 0x112   : > { %v733_v59 = vadd.f32 %v1041_v55, %v732_v58 }
 0x113   : > { %v1043_v60 = vpop.f32.mrf.mxu0  ;;  %v1094_v61 = vpop.f32.mrf.mxu1 }
 0x114   : > { %v762_v62 = vadd.f32 %v733_v59, %v362_v57  ;;  %v1044_v63 = vadd.f32 %v1043_v60, %v1042_v56 }
 0x115   : > { %v1045_v0 = vpop.f32.mrf.mxu0  ;;  %v735_v2 = vpop.f32.mrf.mxu1 }
 0x116   : > { %769 = vst [vmem:[#allocation2 + $0x30] sm:$0xff] %v762_v62  ;;  %v736_v3 = vadd.f32 %v1044_v63, %v735_v2 }
 0x117   : > { %v1046_v4 = vpop.f32.mrf.mxu0  ;;  %v1097_v5 = vpop.f32.mrf.mxu1 }
 0x118   : > { %v763_v6 = vadd.f32 %v736_v3, %v363_v1  ;;  %v1047_v7 = vadd.f32 %v1046_v4, %v1045_v0 }
 0x119   : > { %v1048_v9 = vpop.f32.mrf.mxu0  ;;  %v748_v10 = vpop.f32.mrf.mxu1 }
 0x11a   : > { %770 = vst [vmem:[#allocation2] sm:$0xff] %v763_v6  ;;  %v741_v11 = vadd.f32 %v1093_v54, %v1047_v7 }
 0x11b   : > { %v1049_v12 = vpop.f32.mrf.mxu0  ;;  %v1098_v13 = vpop.f32.mrf.mxu1 }
 0x11c   : > { %v764_v14 = vadd.f32 %v741_v11, %v364_v8  ;;  %v1050_v15 = vadd.f32 %v1049_v12, %v1048_v9 }
 0x11d   : > { %v1051_v17 = vpop.f32.mrf.mxu0  ;;  %v751_v29 = vpop.f32.mrf.mxu1 }
 0x11e   : > { %771 = vst [vmem:[#allocation2 + $0x18] sm:$0xff] %v764_v14  ;;  %v744_v18 = vadd.f32 %v1094_v61, %v1050_v15 }
 0x11f   : > { %v1052_v19 = vpop.f32.mrf.mxu0 }
 0x120   : > { %v765_v20 = vadd.f32 %v744_v18, %v365_v16  ;;  %v1053_v21 = vadd.f32 %v1052_v19, %v1051_v17 }
 0x121   : > { %v1054_v23 = vpop.f32.mrf.mxu0 }
 0x122   : > { %772 = vst [vmem:[#allocation2 + $0x10] sm:$0xff] %v765_v20  ;;  %v749_v24 = vadd.f32 %v1053_v21, %v748_v10 }
 0x123   : > { %v1055_v25 = vpop.f32.mrf.mxu0 }
 0x124   : > { %v766_v26 = vadd.f32 %v749_v24, %v366_v22  ;;  %v1056_v27 = vadd.f32 %v1055_v25, %v1054_v23 }
 0x125   : > { %v1057_v30 = vpop.f32.mrf.mxu0 }
 0x126   : > { %773 = vst [vmem:[#allocation2 + $0x8] sm:$0xff] %v766_v26  ;;  %v752_v31 = vadd.f32 %v1056_v27, %v751_v29 }
 0x127   : > { %v1058_v32 = vpop.f32.mrf.mxu0 }
 0x128   : > { %v767_v33 = vadd.f32 %v752_v31, %v367_v28  ;;  %v1059_v34 = vadd.f32 %v1058_v32, %v1057_v30 }
 0x129   : > { %v1060_v36 = vpop.f32.mrf.mxu0 }
 0x12a   : > { %774 = vst [vmem:[#allocation2 + $0x20] sm:$0xff] %v767_v33  ;;  %v757_v37 = vadd.f32 %v1097_v5, %v1059_v34  ;;  %779 = sbr.rel (%p1015_p11) target bundleno = 317 (0x13d), region = 70 }
 0x12b   : > { %v1061_v38 = vpop.f32.mrf.mxu0 }
 0x12c   : > { %v768_v39 = vadd.f32 %v757_v37, %v368_v35 }
 0x12e   : > { %775 = vst [vmem:[#allocation2 + $0x28] sm:$0xff] %v768_v39 }
 0x12f   : > { %v780_v40 = vld [vmem:[#allocation2 + $0x30] sm:$0xff]  ;;  %v1016_v41 = vld [vmem:[%s1382_s2] ss:$0 sm:$0xff]  ;;  %v782_v45 = vld [vmem:[#allocation2 + $0x18] sm:$0xff] }
 0x130   : > { %v1017_v42 = vld [vmem:[%s1383_s3] ss:$0 sm:$0xff]  ;;  %v794_v43 = vmul.f32 %v1016_v41, %v780_v40  ;;  %v783_v46 = vld [vmem:[#allocation2 + $0x10] sm:$0xff]  ;;  %v796_v48 = vmul.f32 %v1016_v41, %v782_v45  ;;  %v784_v50 = vld [vmem:[#allocation2 + $0x8] sm:$0xff] }
 0x131   : > { %v781_v44 = vld [vmem:[#allocation2] sm:$0xff]  ;;  %v797_v49 = vmul.f32 %v1016_v41, %v783_v46  ;;  %v798_v54 = vmul.f32 %v1016_v41, %v784_v50 }
 0x132   : > { %v795_v47 = vmul.f32 %v1016_v41, %v781_v44  ;;  %v785_v51 = vld [vmem:[#allocation2 + $0x20] sm:$0xff]  ;;  %v808_v53 = vadd.f32 %v1017_v42, %v794_v43  ;;  %v810_v58 = vadd.f32 %v1017_v42, %v796_v48 }
 0x133   : > { %v799_v55 = vmul.f32 %v1016_v41, %v785_v51  ;;  %v811_v59 = vadd.f32 %v1017_v42, %v797_v49  ;;  %v812_v61 = vadd.f32 %v1017_v42, %v798_v54 }
 0x134   : > { %v809_v57 = vadd.f32 %v1017_v42, %v795_v47  ;;  %v815_v60 = vmax.f32 %v808_v53, 0.0  ;;  %v817_v1 = vmax.f32 %v810_v58, 0.0 }
 0x135   : > { %v786_v52 = vld [vmem:[#allocation2 + $0x28] sm:$0xff]  ;;  %v813_v62 = vadd.f32 %v1017_v42, %v799_v55  ;;  %v818_v2 = vmax.f32 %v811_v59, 0.0  ;;  %v819_v3 = vmax.f32 %v812_v61, 0.0 }
 0x136   : > { %v800_v56 = vmul.f32 %v1016_v41, %v786_v52  ;;  %v816_v0 = vmax.f32 %v809_v57, 0.0  ;;  %822 = vst [vmem:[%s1384_s4] sm:$0xff] %v815_v60  ;;  %824 = vst [vmem:[%s1384_s4 + $0x10] sm:$0xff] %v817_v1 }
 0x137   : > { %v820_v4 = vmax.f32 %v813_v62, 0.0  ;;  %825 = vst [vmem:[%s1384_s4 + $0x18] sm:$0xff] %v818_v2  ;;  %826 = vst [vmem:[%s1384_s4 + $0x20] sm:$0xff] %v819_v3 }
 0x138   : > { %v814_v63 = vadd.f32 %v1017_v42, %v800_v56  ;;  %823 = vst [vmem:[%s1384_s4 + $0x8] sm:$0xff] %v816_v0 }
 0x139   : > { %827 = vst [vmem:[%s1384_s4 + $0x28] sm:$0xff] %v820_v4 }
 0x13a   : > { %v821_v5 = vmax.f32 %v814_v63, 0.0 }
 0x13c   : > { %828 = vst [vmem:[%s1384_s4 + $0x30] sm:$0xff] %v821_v5 }
 0x13d PF: > { %s14_s19 = sadd.s32 1, %s1219_s19   ;;  %s1385_s15 = smov %s1207_s16 }
 0x13e   : > { %p11_p12 = scmp.ge.s32.totalorder %s14_s19, 4   ;;  %s1386_s16 = smov %s1282_s23 }
 0x13f   : > { %s1387_s17 = smov %s1215_s18  ;;  %s1388_s18 = smov %s1390_s20 }
 0x140   :  { %13 = sbr.rel (!%p11_p12) target bundleno = 3 (0x3), region = 120 }

// kernel: forward.25
= control target key start
LH: loop header
LB: loop body
LE: loop exit
PB: predicated region body
PF: predicated region fallthrough
CT: control target
= control target key end

     0   :  { %v471_v1 = vmov 0   ;;  %v296_v21 = vlaneseq  ;;  %s688_s1 = inlined_call_operand.vmem [shape: bf16[128,256], index: 1, kind: input, shape index: {}]   ;;  %s689_s0 = inlined_call_operand.vmem [shape: bf16[56,128], index: 0, kind: input, shape index: {}]   ;;  %s690_s2 = inlined_call_operand.vmem [shape: f32[1,256], index: 2, kind: input, shape index: {}]   ;;  %s691_s3 = inlined_call_operand.vmem [shape: f32[1,256], index: 3, kind: input, shape index: {}]   ;;  %s692_s4 = inlined_call_operand.vmem [shape: f32[56,256], index: 4, kind: input, shape index: {}]   ;;  %s693_s5 = inlined_call_operand.vmem [shape: f32[56,256], index: 5, kind: output, shape index: {}]  }
   0x1   :  { %v443_v0 = vld [vmem:[%s688_s1 + $0x74] ss:$8 sps:$4 sm:$0xff]   ;;  %210 = vmatprep.mubr.bf16.mxu0 %v471_v1  ;;  %230 = vmatprep.mubr.bf16.mxu1 %v471_v1  ;;  %v445_v2 = vld [vmem:[%s688_s1 + $0x70] ss:$8 sps:$4 sm:$0xff]   ;;  %v446_v3 = vld [vmem:[%s688_s1 + $0x64] ss:$8 sps:$4 sm:$0xff]  }
   0x2   :  { %178 = vmatprep.subr.bf16.mxu0 %v443_v0  ;;  %426 = vmatprep.subr.bf16.mxu1 %v443_v0  ;;  %v448_v4 = vld [vmem:[%s688_s1 + $0x60] ss:$8 sps:$4 sm:$0xff]   ;;  %v449_v5 = vld [vmem:[%s688_s1 + $0x54] ss:$8 sps:$4 sm:$0xff]   ;;  %v451_v6 = vld [vmem:[%s688_s1 + $0x50] ss:$8 sps:$4 sm:$0xff]  }
   0x3   :  { %179 = vmatpush1.bf16.msra.mxu0 %v445_v2  ;;  %434 = vmatpush1.bf16.msra.mxu1 %v445_v2  ;;  %v452_v7 = vld [vmem:[%s688_s1 + $0x44] ss:$8 sps:$4 sm:$0xff]   ;;  %v454_v8 = vld [vmem:[%s688_s1 + $0x40] ss:$8 sps:$4 sm:$0xff]   ;;  %v455_v9 = vld [vmem:[%s688_s1 + $0x34] ss:$8 sps:$4 sm:$0xff]  }
   0x4   :  { %180 = vmatprep.subr.bf16.mxu0 %v446_v3  ;;  %427 = vmatprep.subr.bf16.mxu1 %v446_v3  ;;  %v457_v10 = vld [vmem:[%s688_s1 + $0x30] ss:$8 sps:$4 sm:$0xff]   ;;  %v458_v11 = vld [vmem:[%s688_s1 + $0x24] ss:$8 sps:$4 sm:$0xff]   ;;  %v460_v12 = vld [vmem:[%s688_s1 + $0x20] ss:$8 sps:$4 sm:$0xff]  }
   0x5   :  { %v461_v13 = vld [vmem:[%s688_s1 + $0x14] ss:$8 sps:$4 sm:$0xff]   ;;  %v463_v14 = vld [vmem:[%s688_s1 + $0x10] ss:$8 sps:$4 sm:$0xff]   ;;  %v464_v15 = vld [vmem:[%s688_s1 + $0x4] ss:$8 sps:$4 sm:$0xff]  }
   0x6   :  { %v466_v16 = vld [vmem:[%s688_s1] ss:$8 sps:$4 sm:$0xff]   ;;  %v468_v18 = vld [vmem:[%s689_s0 + $0x10] sm:$0xff]   ;;  %v470_v20 = vld [vmem:[%s689_s0 + $0x18] ss:$0 sps:$4 sm:$0xff]   ;;  %v297_v22 = vshrl.u32 %v296_v21, 7 }
   0x7   :  { %181 = vmatpush1.bf16.msra.mxu0 %v448_v4  ;;  %435 = vmatpush1.bf16.msra.mxu1 %v448_v4  ;;  %v467_v17 = vld [vmem:[%s689_s0] sm:$0xff]   ;;  %v469_v19 = vld [vmem:[%s689_s0 + $0x8] sm:$0xff]   ;;  %v348_v59 = vld [vmem:[%s692_s4 + $0x10] sm:$0xff] }
   0x8   :  { %182 = vmatprep.subr.bf16.mxu0 %v449_v5  ;;  %428 = vmatprep.subr.bf16.mxu1 %v449_v5  ;;  %v298_v23 = vsub.s32 0, %v297_v22  ;;  %v294_v24 = vld [vmem:[%s690_s2] sm:$0x3]  ;;  %v302_v25 = vsub.s32 1, %v297_v22  ;;  %v347_v43 = vld [vmem:[%s692_s4 + $0x8] sm:$0xff]  ;;  %v356_v60 = vld [vmem:[%s692_s4 + $0x50] sm:$0xff] }
   0x9   :  { %v320_v26 = vld [vmem:[%s691_s3] sm:$0x3]  ;;  %v355_v44 = vld [vmem:[%s692_s4 + $0x48] sm:$0xff]  ;;  %v349_v5 = vld [vmem:[%s692_s4 + $0x18] sm:$0xff] }
   0xa   :  { %v568_v27 = vrot.slane %v294_v24, %v298_v23  ;;  %v570_v28 = vrot.slane %v320_v26, %v298_v23  ;;  %v572_v29 = vrot.slane %v294_v24, %v302_v25  ;;  %v576_v34 = vrot.slane %v320_v26, %v302_v25  ;;  %v346_v35 = vld [vmem:[%s692_s4] sm:$0xff]  ;;  %v351_v25 = vld [vmem:[%s692_s4 + $0x28] sm:$0xff] }
   0xb   :  { %183 = vmatpush1.bf16.msra.mxu0 %v451_v6  ;;  %436 = vmatpush1.bf16.msra.mxu1 %v451_v6  ;;  %v354_v36 = vld [vmem:[%s692_s4 + $0x40] sm:$0xff]  ;;  %v357_v6 = vld [vmem:[%s692_s4 + $0x58] sm:$0xff]  ;;  %v359_v26 = vld [vmem:[%s692_s4 + $0x68] sm:$0xff] }
   0xc   :  { %184 = vmatprep.subr.bf16.mxu0 %v452_v7  ;;  %429 = vmatprep.subr.bf16.mxu1 %v452_v7 }
   0xf   :  { %185 = vmatpush1.bf16.msra.mxu0 %v454_v8  ;;  %437 = vmatpush1.bf16.msra.mxu1 %v454_v8 }
  0x10   :  { %186 = vmatprep.subr.bf16.mxu0 %v455_v9  ;;  %430 = vmatprep.subr.bf16.mxu1 %v455_v9 }
  0x13   :  { %187 = vmatpush1.bf16.msra.mxu0 %v457_v10  ;;  %438 = vmatpush1.bf16.msra.mxu1 %v457_v10 }
  0x14   :  { %188 = vmatprep.subr.bf16.mxu0 %v458_v11  ;;  %431 = vmatprep.subr.bf16.mxu1 %v458_v11 }
  0x17   :  { %189 = vmatpush1.bf16.msra.mxu0 %v460_v12  ;;  %439 = vmatpush1.bf16.msra.mxu1 %v460_v12 }
  0x18   :  { %190 = vmatprep.subr.bf16.mxu0 %v461_v13  ;;  %432 = vmatprep.subr.bf16.mxu1 %v461_v13  ;;  %v350_v13 = vld [vmem:[%s692_s4 + $0x20] sm:$0xff] }
  0x1b   :  { %191 = vmatpush1.bf16.msra.mxu0 %v463_v14  ;;  %440 = vmatpush1.bf16.msra.mxu1 %v463_v14  ;;  %v358_v14 = vld [vmem:[%s692_s4 + $0x60] sm:$0xff] }
  0x1c   :  { %192 = vmatprep.subr.bf16.mxu0 %v464_v15  ;;  %433 = vmatprep.subr.bf16.mxu1 %v464_v15 }
  0x1f   :  { %193 = vmatpush1.bf16.msra.mxu0 %v466_v16  ;;  %441 = vmatpush1.bf16.msra.mxu1 %v466_v16 }
  0x22   :  { %211 = vmatmul.mubr.bf16.vlgmr.msra.gmra.mxu0 %v467_v17  ;;  %231 = vmatmul.mubr.bf16.vlgmr.msra.gmra.mxu1 %v468_v18 }
  0x23   :  { %220 = vmatprep.mubr.bf16.mxu0 %v471_v1  ;;  %240 = vmatprep.mubr.bf16.mxu1 %v471_v1 }
  0x2a   :  { %221 = vmatmul.mubr.bf16.gmra.mxu0 %v469_v19  ;;  %241 = vmatmul.mubr.bf16.gmra.mxu1 %v470_v20 }
  0xe2   :  { %v212_v30 = vpop.f32.mrf.mxu0  ;;  %v232_v31 = vpop.f32.mrf.mxu1 }
  0xe3   :  { %v306_v32 = vmul.f32 %v568_v27, %v212_v30  ;;  %v314_v33 = vmul.f32 %v568_v27, %v232_v31 }
  0xe4   :  { %v214_v37 = vpop.f32.mrf.mxu0  ;;  %v234_v38 = vpop.f32.mrf.mxu1 }
  0xe5   :  { %v332_v39 = vadd.f32 %v570_v28, %v306_v32  ;;  %v340_v40 = vadd.f32 %v570_v28, %v314_v33  ;;  %v307_v41 = vmul.f32 %v572_v29, %v214_v37  ;;  %v315_v42 = vmul.f32 %v572_v29, %v234_v38 }
  0xe6   :  { %v216_v45 = vpop.f32.mrf.mxu0  ;;  %v236_v46 = vpop.f32.mrf.mxu1 }
  0xe7   :  { %v360_v47 = vadd.f32 %v346_v35, %v332_v39  ;;  %v368_v48 = vadd.f32 %v354_v36, %v340_v40  ;;  %v333_v49 = vadd.f32 %v576_v34, %v307_v41  ;;  %v341_v50 = vadd.f32 %v576_v34, %v315_v42 }
  0xe8   :  { %v308_v51 = vmul.f32 %v568_v27, %v216_v45  ;;  %v316_v52 = vmul.f32 %v568_v27, %v236_v46  ;;  %v218_v53 = vpop.f32.mrf.mxu0  ;;  %v238_v54 = vpop.f32.mrf.mxu1  ;;  %v352_v46 = vld [vmem:[%s692_s4 + $0x30] sm:$0xff] }
  0xe9   :  { %v374_v55 = vmax.f32 %v360_v47, 0.0  ;;  %v382_v56 = vmax.f32 %v368_v48, 0.0  ;;  %v361_v57 = vadd.f32 %v347_v43, %v333_v49  ;;  %v369_v58 = vadd.f32 %v355_v44, %v341_v50  ;;  %v353_v50 = vld [vmem:[%s692_s4 + $0x38] sm:$0xff] }
  0xea   :  { %v334_v61 = vadd.f32 %v570_v28, %v308_v51  ;;  %v342_v62 = vadd.f32 %v570_v28, %v316_v52  ;;  %v309_v63 = vmul.f32 %v572_v29, %v218_v53  ;;  %v317_v0 = vmul.f32 %v572_v29, %v238_v54  ;;  %v222_v1 = vpop.f32.mrf.mxu0  ;;  %v242_v2 = vpop.f32.mrf.mxu1 }
  0xeb   :  { %388 = vst [vmem:[%s693_s5] sm:$0xff] %v374_v55  ;;  %396 = vst [vmem:[%s693_s5 + $0x40] sm:$0xff] %v382_v56  ;;  %v375_v3 = vmax.f32 %v361_v57, 0.0  ;;  %v383_v4 = vmax.f32 %v369_v58, 0.0  ;;  %v310_v7 = vmul.f32 %v568_v27, %v222_v1  ;;  %v318_v8 = vmul.f32 %v568_v27, %v242_v2 }
  0xec   :  { %v362_v9 = vadd.f32 %v348_v59, %v334_v61  ;;  %v370_v10 = vadd.f32 %v356_v60, %v342_v62  ;;  %v335_v11 = vadd.f32 %v576_v34, %v309_v63  ;;  %v343_v12 = vadd.f32 %v576_v34, %v317_v0  ;;  %v224_v15 = vpop.f32.mrf.mxu0  ;;  %v244_v16 = vpop.f32.mrf.mxu1 }
  0xed   :  { %389 = vst [vmem:[%s693_s5 + $0x8] sm:$0xff] %v375_v3  ;;  %397 = vst [vmem:[%s693_s5 + $0x48] sm:$0xff] %v383_v4  ;;  %v336_v17 = vadd.f32 %v570_v28, %v310_v7  ;;  %v344_v18 = vadd.f32 %v570_v28, %v318_v8  ;;  %v311_v19 = vmul.f32 %v572_v29, %v224_v15 }
  0xee   :  { %v319_v20 = vmul.f32 %v572_v29, %v244_v16  ;;  %v376_v21 = vmax.f32 %v362_v9, 0.0  ;;  %v384_v22 = vmax.f32 %v370_v10, 0.0  ;;  %v363_v23 = vadd.f32 %v349_v5, %v335_v11  ;;  %v226_v30 = vpop.f32.mrf.mxu0  ;;  %v246_v31 = vpop.f32.mrf.mxu1 }
  0xef   :  { %v371_v24 = vadd.f32 %v357_v6, %v343_v12  ;;  %v364_v32 = vadd.f32 %v350_v13, %v336_v17  ;;  %v372_v33 = vadd.f32 %v358_v14, %v344_v18  ;;  %v337_v35 = vadd.f32 %v576_v34, %v311_v19 }
  0xf0   :  { %v345_v36 = vadd.f32 %v576_v34, %v319_v20  ;;  %390 = vst [vmem:[%s693_s5 + $0x10] sm:$0xff] %v376_v21  ;;  %398 = vst [vmem:[%s693_s5 + $0x50] sm:$0xff] %v384_v22  ;;  %v377_v37 = vmax.f32 %v363_v23, 0.0  ;;  %v312_v39 = vmul.f32 %v568_v27, %v226_v30  ;;  %v228_v40 = vpop.f32.mrf.mxu0  ;;  %v247_v41 = vpop.f32.mrf.mxu1 }
  0xf1   :  { %v385_v38 = vmax.f32 %v371_v24, 0.0  ;;  %v378_v42 = vmax.f32 %v364_v32, 0.0  ;;  %v386_v43 = vmax.f32 %v372_v33, 0.0  ;;  %v365_v44 = vadd.f32 %v351_v25, %v337_v35 }
  0xf2   :  { %v373_v45 = vadd.f32 %v359_v26, %v345_v36  ;;  %391 = vst [vmem:[%s693_s5 + $0x18] sm:$0xff] %v377_v37  ;;  %v338_v27 = vadd.f32 %v570_v28, %v312_v39  ;;  %v313_v47 = vmul.f32 %v572_v29, %v228_v40 }
  0xf3   :  { %399 = vst [vmem:[%s693_s5 + $0x58] sm:$0xff] %v385_v38  ;;  %392 = vst [vmem:[%s693_s5 + $0x20] sm:$0xff] %v378_v42  ;;  %v379_v48 = vmax.f32 %v365_v44, 0.0 }
  0xf4   :  { %400 = vst [vmem:[%s693_s5 + $0x60] sm:$0xff] %v386_v43  ;;  %v387_v49 = vmax.f32 %v373_v45, 0.0  ;;  %v366_v51 = vadd.f32 %v352_v46, %v338_v27  ;;  %v339_v52 = vadd.f32 %v576_v34, %v313_v47 }
  0xf5   :  { %393 = vst [vmem:[%s693_s5 + $0x28] sm:$0xff] %v379_v48 }
  0xf6   :  { %401 = vst [vmem:[%s693_s5 + $0x68] sm:$0xff] %v387_v49  ;;  %v380_v28 = vmax.f32 %v366_v51, 0.0  ;;  %v367_v29 = vadd.f32 %v353_v50, %v339_v52 }
  0xf8   :  { %394 = vst [vmem:[%s693_s5 + $0x30] sm:$0xff] %v380_v28  ;;  %v381_v53 = vmax.f32 %v367_v29, 0.0 }
  0xfa   :  { %395 = vst [vmem:[%s693_s5 + $0x38] sm:$0xff] %v381_v53 }

// kernel: forward.27
= control target key start
LH: loop header
LB: loop body
LE: loop exit
PB: predicated region body
PF: predicated region fallthrough
CT: control target
= control target key end

     0   :  { %s572_s1 = inlined_call_operand.vmem [shape: bf16[256,128], index: 1, kind: input, shape index: {}]   ;;  %s573_s0 = inlined_call_operand.vmem [shape: bf16[56,256], index: 0, kind: input, shape index: {}]   ;;  %s574_s2 = inlined_call_operand.vmem [shape: f32[1,128], index: 2, kind: input, shape index: {}]   ;;  %s575_s3 = inlined_call_operand.vmem [shape: f32[1,128], index: 3, kind: input, shape index: {}]   ;;  %s576_s4 = inlined_call_operand.vmem [shape: f32[56,128], index: 4, kind: output, shape index: {}]  }
   0x1   :  { %v424_v0 = vld [vmem:[%s572_s1 + $0x78] sm:$0xff]   ;;  %v426_v2 = vld [vmem:[%s572_s1 + $0x70] sm:$0xff]   ;;  %v428_v4 = vld [vmem:[%s572_s1 + $0x68] sm:$0xff]  }
   0x2   :  { %v425_v1 = vld [vmem:[%s572_s1 + $0x38] sm:$0xff]   ;;  %368 = vmatprep.subr.bf16.mxu0 %v424_v0  ;;  %408 = vmatprep.subr.bf16.mxu1 %v424_v0  ;;  %v427_v3 = vld [vmem:[%s572_s1 + $0x30] sm:$0xff]   ;;  %v429_v5 = vld [vmem:[%s572_s1 + $0x28] sm:$0xff]  }
   0x3   :  { %369 = vmatpush3.bf16.msra.mxu0 %v425_v1  ;;  %416 = vmatpush3.bf16.msra.mxu1 %v425_v1  ;;  %v430_v6 = vld [vmem:[%s572_s1 + $0x60] sm:$0xff]   ;;  %v432_v8 = vld [vmem:[%s572_s1 + $0x58] sm:$0xff]   ;;  %v434_v10 = vld [vmem:[%s572_s1 + $0x50] sm:$0xff]  }
   0x4   :  { %370 = vmatprep.subr.bf16.mxu0 %v426_v2  ;;  %409 = vmatprep.subr.bf16.mxu1 %v426_v2  ;;  %v431_v7 = vld [vmem:[%s572_s1 + $0x20] sm:$0xff]   ;;  %v433_v9 = vld [vmem:[%s572_s1 + $0x18] sm:$0xff]   ;;  %v435_v13 = vld [vmem:[%s572_s1 + $0x10] sm:$0xff]  }
   0x5   :  { %v442_v11 = vld [vmem:[%s573_s0 + $0x4] ss:$8 sps:$4 sm:$0xff]   ;;  %v42_v18 = vld [vmem:[%s573_s0 + $0x30] sm:$0xff]  ;;  %v440_v19 = vld [vmem:[%s573_s0] ss:$8 sps:$4 sm:$0xff]  }
   0x6   :  { %v445_v12 = vld [vmem:[%s573_s0 + $0x24] ss:$8 sps:$4 sm:$0xff]   ;;  %240 = vmatprep.mubr.bf16.mxu0 %v442_v11  ;;  %v443_v20 = vld [vmem:[%s573_s0 + $0x20] ss:$8 sps:$4 sm:$0xff]   ;;  %v446_v21 = vld [vmem:[%s573_s0 + $0x14] ss:$8 sps:$4 sm:$0xff]   ;;  %v349_v22 = vcombine.high %v42_v18, %v42_v18  ;;  %v348_v24 = vcombine.low %v42_v18, %v42_v18 }
   0x7   :  { %371 = vmatpush3.bf16.msra.mxu0 %v427_v3  ;;  %417 = vmatpush3.bf16.msra.mxu1 %v427_v3  ;;  %v436_v14 = vld [vmem:[%s572_s1 + $0x48] sm:$0xff]   ;;  %v438_v16 = vld [vmem:[%s572_s1 + $0x40] sm:$0xff]   ;;  %v449_v23 = vld [vmem:[%s573_s0 + $0x10] ss:$8 sps:$4 sm:$0xff]  }
   0x8   :  { %372 = vmatprep.subr.bf16.mxu0 %v428_v4  ;;  %410 = vmatprep.subr.bf16.mxu1 %v428_v4  ;;  %v437_v15 = vld [vmem:[%s572_s1 + $0x8] sm:$0xff]   ;;  %v439_v17 = vld [vmem:[%s572_s1] sm:$0xff]  }
   0x9   :  { %256 = vmatprep.mubr.bf16.mxu1 %v445_v12  ;;  %v366_v28 = vld [vmem:[%s574_s2] ss:$0 sm:$0xff] }
   0xa   :  { %v367_v32 = vld [vmem:[%s575_s3] ss:$0 sm:$0xff] }
   0xb   :  { %373 = vmatpush3.bf16.msra.mxu0 %v429_v5  ;;  %418 = vmatpush3.bf16.msra.mxu1 %v429_v5 }
   0xc   :  { %374 = vmatprep.subr.bf16.mxu0 %v430_v6  ;;  %411 = vmatprep.subr.bf16.mxu1 %v430_v6 }
   0xf   :  { %375 = vmatpush3.bf16.msra.mxu0 %v431_v7  ;;  %419 = vmatpush3.bf16.msra.mxu1 %v431_v7 }
  0x10   :  { %376 = vmatprep.subr.bf16.mxu0 %v432_v8  ;;  %412 = vmatprep.subr.bf16.mxu1 %v432_v8 }
  0x13   :  { %377 = vmatpush3.bf16.msra.mxu0 %v433_v9  ;;  %420 = vmatpush3.bf16.msra.mxu1 %v433_v9 }
  0x14   :  { %378 = vmatprep.subr.bf16.mxu0 %v434_v10  ;;  %413 = vmatprep.subr.bf16.mxu1 %v434_v10 }
  0x17   :  { %379 = vmatpush3.bf16.msra.mxu0 %v435_v13  ;;  %421 = vmatpush3.bf16.msra.mxu1 %v435_v13 }
  0x18   :  { %380 = vmatprep.subr.bf16.mxu0 %v436_v14  ;;  %414 = vmatprep.subr.bf16.mxu1 %v436_v14 }
  0x1b   :  { %381 = vmatpush3.bf16.msra.mxu0 %v437_v15  ;;  %422 = vmatpush3.bf16.msra.mxu1 %v437_v15 }
  0x1c   :  { %382 = vmatprep.subr.bf16.mxu0 %v438_v16  ;;  %415 = vmatprep.subr.bf16.mxu1 %v438_v16 }
  0x1f   :  { %383 = vmatpush3.bf16.msra.mxu0 %v439_v17  ;;  %423 = vmatpush3.bf16.msra.mxu1 %v439_v17 }
  0x22   :  { %241 = vmatmul.mubr.bf16.vlgmr.msra.gmra.mxu0 %v440_v19  ;;  %257 = vmatmul.mubr.bf16.vlgmr.msra.gmra.mxu1 %v443_v20 }
  0x23   :  { %248 = vmatprep.mubr.bf16.mxu0 %v446_v21  ;;  %264 = vmatprep.mubr.bf16.mxu1 %v349_v22 }
  0x2a   :  { %249 = vmatmul.mubr.bf16.gmra.mxu0 %v449_v23  ;;  %265 = vmatmul.mubr.bf16.gmra.mxu1 %v348_v24 }
  0xe2   :  { %v384_v25 = vpop.f32.mrf.mxu0  ;;  %v396_v26 = vpop.f32.mrf.mxu1 }
  0xe4   :  { %v385_v27 = vpop.f32.mrf.mxu0  ;;  %v397_v29 = vpop.f32.mrf.mxu1 }
  0xe5   :  { %v386_v30 = vadd.f32 %v385_v27, %v384_v25  ;;  %v398_v31 = vadd.f32 %v397_v29, %v396_v26 }
  0xe6   :  { %v387_v33 = vpop.f32.mrf.mxu0  ;;  %v399_v34 = vpop.f32.mrf.mxu1 }
  0xe7   :  { %v303_v35 = vmul.f32 %v386_v30, %v366_v28  ;;  %v307_v36 = vmul.f32 %v398_v31, %v366_v28 }
  0xe8   :  { %v388_v37 = vpop.f32.mrf.mxu0  ;;  %v400_v38 = vpop.f32.mrf.mxu1 }
  0xe9   :  { %v317_v39 = vadd.f32 %v367_v32, %v303_v35  ;;  %v321_v40 = vadd.f32 %v367_v32, %v307_v36  ;;  %v389_v41 = vadd.f32 %v388_v37, %v387_v33  ;;  %v401_v42 = vadd.f32 %v400_v38, %v399_v34 }
  0xea   :  { %v390_v43 = vpop.f32.mrf.mxu0  ;;  %v402_v44 = vpop.f32.mrf.mxu1 }
  0xeb   :  { %v324_v45 = vmax.f32 %v317_v39, 0.0  ;;  %v328_v46 = vmax.f32 %v321_v40, 0.0  ;;  %v304_v47 = vmul.f32 %v389_v41, %v366_v28  ;;  %v308_v48 = vmul.f32 %v401_v42, %v366_v28 }
  0xec   :  { %v391_v49 = vpop.f32.mrf.mxu0  ;;  %v403_v50 = vpop.f32.mrf.mxu1 }
  0xed   :  { %331 = vst [vmem:[%s576_s4] sm:$0xff] %v324_v45  ;;  %335 = vst [vmem:[%s576_s4 + $0x20] sm:$0xff] %v328_v46  ;;  %v318_v51 = vadd.f32 %v367_v32, %v304_v47  ;;  %v322_v52 = vadd.f32 %v367_v32, %v308_v48  ;;  %v392_v53 = vadd.f32 %v391_v49, %v390_v43 }
  0xee   :  { %v404_v54 = vadd.f32 %v403_v50, %v402_v44  ;;  %v393_v55 = vpop.f32.mrf.mxu0  ;;  %v405_v56 = vpop.f32.mrf.mxu1 }
  0xef   :  { %v325_v57 = vmax.f32 %v318_v51, 0.0  ;;  %v329_v58 = vmax.f32 %v322_v52, 0.0  ;;  %v305_v59 = vmul.f32 %v392_v53, %v366_v28 }
  0xf0   :  { %v309_v60 = vmul.f32 %v404_v54, %v366_v28  ;;  %v394_v61 = vpop.f32.mrf.mxu0  ;;  %v406_v62 = vpop.f32.mrf.mxu1 }
  0xf1   :  { %332 = vst [vmem:[%s576_s4 + $0x8] sm:$0xff] %v325_v57  ;;  %336 = vst [vmem:[%s576_s4 + $0x28] sm:$0xff] %v329_v58  ;;  %v319_v63 = vadd.f32 %v367_v32, %v305_v59  ;;  %v395_v1 = vadd.f32 %v394_v61, %v393_v55 }
  0xf2   :  { %v323_v0 = vadd.f32 %v367_v32, %v309_v60 }
  0xf3   :  { %v326_v2 = vmax.f32 %v319_v63, 0.0  ;;  %v306_v4 = vmul.f32 %v395_v1, %v366_v28 }
  0xf4   :  { %v330_v3 = vmax.f32 %v323_v0, 0.0 }
  0xf5   :  { %333 = vst [vmem:[%s576_s4 + $0x10] sm:$0xff] %v326_v2  ;;  %v320_v5 = vadd.f32 %v367_v32, %v306_v4 }
  0xf6   :  { %337 = vst [vmem:[%s576_s4 + $0x30] sm:$0xff] %v330_v3 }
  0xf7   :  { %v327_v6 = vmax.f32 %v320_v5, 0.0 }
  0xf9   :  { %334 = vst [vmem:[%s576_s4 + $0x18] sm:$0xff] %v327_v6 }

// kernel: forward.22
= control target key start
LH: loop header
LB: loop body
LE: loop exit
PB: predicated region body
PF: predicated region fallthrough
CT: control target
= control target key end

     0   :  { %v426_v1 = vmov 0   ;;  %v293_v21 = vlaneseq  ;;  %s560_s1 = inlined_call_operand.vmem [shape: bf16[128,256], index: 1, kind: input, shape index: {}]   ;;  %s561_s0 = inlined_call_operand.vmem [shape: bf16[56,128], index: 0, kind: input, shape index: {}]   ;;  %s562_s2 = inlined_call_operand.vmem [shape: f32[1,256], index: 2, kind: input, shape index: {}]   ;;  %s563_s3 = inlined_call_operand.vmem [shape: f32[1,256], index: 3, kind: input, shape index: {}]   ;;  %s564_s4 = inlined_call_operand.vmem [shape: f32[56,256], index: 4, kind: output, shape index: {}]  }
   0x1   :  { %v398_v0 = vld [vmem:[%s560_s1 + $0x74] ss:$8 sps:$4 sm:$0xff]   ;;  %207 = vmatprep.mubr.bf16.mxu0 %v426_v1  ;;  %227 = vmatprep.mubr.bf16.mxu1 %v426_v1  ;;  %v400_v2 = vld [vmem:[%s560_s1 + $0x70] ss:$8 sps:$4 sm:$0xff]   ;;  %v401_v3 = vld [vmem:[%s560_s1 + $0x64] ss:$8 sps:$4 sm:$0xff]  }
   0x2   :  { %175 = vmatprep.subr.bf16.mxu0 %v398_v0  ;;  %381 = vmatprep.subr.bf16.mxu1 %v398_v0  ;;  %v403_v4 = vld [vmem:[%s560_s1 + $0x60] ss:$8 sps:$4 sm:$0xff]   ;;  %v404_v5 = vld [vmem:[%s560_s1 + $0x54] ss:$8 sps:$4 sm:$0xff]   ;;  %v406_v6 = vld [vmem:[%s560_s1 + $0x50] ss:$8 sps:$4 sm:$0xff]  }
   0x3   :  { %176 = vmatpush1.bf16.msra.mxu0 %v400_v2  ;;  %389 = vmatpush1.bf16.msra.mxu1 %v400_v2  ;;  %v407_v7 = vld [vmem:[%s560_s1 + $0x44] ss:$8 sps:$4 sm:$0xff]   ;;  %v409_v8 = vld [vmem:[%s560_s1 + $0x40] ss:$8 sps:$4 sm:$0xff]   ;;  %v410_v9 = vld [vmem:[%s560_s1 + $0x34] ss:$8 sps:$4 sm:$0xff]  }
   0x4   :  { %177 = vmatprep.subr.bf16.mxu0 %v401_v3  ;;  %382 = vmatprep.subr.bf16.mxu1 %v401_v3  ;;  %v412_v10 = vld [vmem:[%s560_s1 + $0x30] ss:$8 sps:$4 sm:$0xff]   ;;  %v413_v11 = vld [vmem:[%s560_s1 + $0x24] ss:$8 sps:$4 sm:$0xff]   ;;  %v415_v12 = vld [vmem:[%s560_s1 + $0x20] ss:$8 sps:$4 sm:$0xff]  }
   0x5   :  { %v416_v13 = vld [vmem:[%s560_s1 + $0x14] ss:$8 sps:$4 sm:$0xff]   ;;  %v418_v14 = vld [vmem:[%s560_s1 + $0x10] ss:$8 sps:$4 sm:$0xff]   ;;  %v419_v15 = vld [vmem:[%s560_s1 + $0x4] ss:$8 sps:$4 sm:$0xff]  }
   0x6   :  { %v421_v16 = vld [vmem:[%s560_s1] ss:$8 sps:$4 sm:$0xff]   ;;  %v423_v18 = vld [vmem:[%s561_s0 + $0x10] sm:$0xff]   ;;  %v425_v20 = vld [vmem:[%s561_s0 + $0x18] ss:$0 sps:$4 sm:$0xff]   ;;  %v294_v22 = vshrl.u32 %v293_v21, 7 }
   0x7   :  { %178 = vmatpush1.bf16.msra.mxu0 %v403_v4  ;;  %390 = vmatpush1.bf16.msra.mxu1 %v403_v4  ;;  %v422_v17 = vld [vmem:[%s561_s0] sm:$0xff]   ;;  %v424_v19 = vld [vmem:[%s561_s0 + $0x8] sm:$0xff]  }
   0x8   :  { %179 = vmatprep.subr.bf16.mxu0 %v404_v5  ;;  %383 = vmatprep.subr.bf16.mxu1 %v404_v5  ;;  %v295_v23 = vsub.s32 0, %v294_v22  ;;  %v291_v24 = vld [vmem:[%s562_s2] sm:$0x3]  ;;  %v299_v25 = vsub.s32 1, %v294_v22 }
   0x9   :  { %v317_v26 = vld [vmem:[%s563_s3] sm:$0x3] }
   0xa   :  { %v296_v27 = vrot.slane %v291_v24, %v295_v23  ;;  %v322_v28 = vrot.slane %v317_v26, %v295_v23  ;;  %v300_v29 = vrot.slane %v291_v24, %v299_v25  ;;  %v326_v34 = vrot.slane %v317_v26, %v299_v25 }
   0xb   :  { %180 = vmatpush1.bf16.msra.mxu0 %v406_v6  ;;  %391 = vmatpush1.bf16.msra.mxu1 %v406_v6 }
   0xc   :  { %181 = vmatprep.subr.bf16.mxu0 %v407_v7  ;;  %384 = vmatprep.subr.bf16.mxu1 %v407_v7 }
   0xf   :  { %182 = vmatpush1.bf16.msra.mxu0 %v409_v8  ;;  %392 = vmatpush1.bf16.msra.mxu1 %v409_v8 }
  0x10   :  { %183 = vmatprep.subr.bf16.mxu0 %v410_v9  ;;  %385 = vmatprep.subr.bf16.mxu1 %v410_v9 }
  0x13   :  { %184 = vmatpush1.bf16.msra.mxu0 %v412_v10  ;;  %393 = vmatpush1.bf16.msra.mxu1 %v412_v10 }
  0x14   :  { %185 = vmatprep.subr.bf16.mxu0 %v413_v11  ;;  %386 = vmatprep.subr.bf16.mxu1 %v413_v11 }
  0x17   :  { %186 = vmatpush1.bf16.msra.mxu0 %v415_v12  ;;  %394 = vmatpush1.bf16.msra.mxu1 %v415_v12 }
  0x18   :  { %187 = vmatprep.subr.bf16.mxu0 %v416_v13  ;;  %387 = vmatprep.subr.bf16.mxu1 %v416_v13 }
  0x1b   :  { %188 = vmatpush1.bf16.msra.mxu0 %v418_v14  ;;  %395 = vmatpush1.bf16.msra.mxu1 %v418_v14 }
  0x1c   :  { %189 = vmatprep.subr.bf16.mxu0 %v419_v15  ;;  %388 = vmatprep.subr.bf16.mxu1 %v419_v15 }
  0x1f   :  { %190 = vmatpush1.bf16.msra.mxu0 %v421_v16  ;;  %396 = vmatpush1.bf16.msra.mxu1 %v421_v16 }
  0x22   :  { %208 = vmatmul.mubr.bf16.vlgmr.msra.gmra.mxu0 %v422_v17  ;;  %228 = vmatmul.mubr.bf16.vlgmr.msra.gmra.mxu1 %v423_v18 }
  0x23   :  { %217 = vmatprep.mubr.bf16.mxu0 %v426_v1  ;;  %237 = vmatprep.mubr.bf16.mxu1 %v426_v1 }
  0x2a   :  { %218 = vmatmul.mubr.bf16.gmra.mxu0 %v424_v19  ;;  %238 = vmatmul.mubr.bf16.gmra.mxu1 %v425_v20 }
  0xe2   :  { %v209_v30 = vpop.f32.mrf.mxu0  ;;  %v229_v31 = vpop.f32.mrf.mxu1 }
  0xe3   :  { %v303_v32 = vmul.f32 %v296_v27, %v209_v30  ;;  %v311_v33 = vmul.f32 %v296_v27, %v229_v31 }
  0xe4   :  { %v211_v35 = vpop.f32.mrf.mxu0  ;;  %v231_v36 = vpop.f32.mrf.mxu1 }
  0xe5   :  { %v329_v37 = vadd.f32 %v322_v28, %v303_v32  ;;  %v337_v38 = vadd.f32 %v322_v28, %v311_v33  ;;  %v304_v39 = vmul.f32 %v300_v29, %v211_v35  ;;  %v312_v40 = vmul.f32 %v300_v29, %v231_v36 }
  0xe6   :  { %v213_v41 = vpop.f32.mrf.mxu0  ;;  %v233_v42 = vpop.f32.mrf.mxu1 }
  0xe7   :  { %343 = vst [vmem:[%s564_s4] sm:$0xff] %v329_v37  ;;  %351 = vst [vmem:[%s564_s4 + $0x40] sm:$0xff] %v337_v38  ;;  %v330_v43 = vadd.f32 %v326_v34, %v304_v39  ;;  %v338_v44 = vadd.f32 %v326_v34, %v312_v40  ;;  %v305_v45 = vmul.f32 %v296_v27, %v213_v41 }
  0xe8   :  { %v313_v46 = vmul.f32 %v296_v27, %v233_v42  ;;  %v215_v47 = vpop.f32.mrf.mxu0  ;;  %v235_v48 = vpop.f32.mrf.mxu1 }
  0xe9   :  { %344 = vst [vmem:[%s564_s4 + $0x8] sm:$0xff] %v330_v43  ;;  %352 = vst [vmem:[%s564_s4 + $0x48] sm:$0xff] %v338_v44  ;;  %v331_v49 = vadd.f32 %v322_v28, %v305_v45  ;;  %v306_v51 = vmul.f32 %v300_v29, %v215_v47  ;;  %v314_v52 = vmul.f32 %v300_v29, %v235_v48 }
  0xea   :  { %v339_v50 = vadd.f32 %v322_v28, %v313_v46  ;;  %v219_v53 = vpop.f32.mrf.mxu0  ;;  %v239_v54 = vpop.f32.mrf.mxu1 }
  0xeb   :  { %345 = vst [vmem:[%s564_s4 + $0x10] sm:$0xff] %v331_v49  ;;  %v332_v55 = vadd.f32 %v326_v34, %v306_v51  ;;  %v340_v56 = vadd.f32 %v326_v34, %v314_v52  ;;  %v307_v57 = vmul.f32 %v296_v27, %v219_v53  ;;  %v315_v58 = vmul.f32 %v296_v27, %v239_v54 }
  0xec   :  { %353 = vst [vmem:[%s564_s4 + $0x50] sm:$0xff] %v339_v50  ;;  %v221_v59 = vpop.f32.mrf.mxu0  ;;  %v241_v60 = vpop.f32.mrf.mxu1 }
  0xed   :  { %346 = vst [vmem:[%s564_s4 + $0x18] sm:$0xff] %v332_v55  ;;  %354 = vst [vmem:[%s564_s4 + $0x58] sm:$0xff] %v340_v56  ;;  %v333_v61 = vadd.f32 %v322_v28, %v307_v57  ;;  %v341_v62 = vadd.f32 %v322_v28, %v315_v58  ;;  %v308_v63 = vmul.f32 %v300_v29, %v221_v59 }
  0xee   :  { %v316_v0 = vmul.f32 %v300_v29, %v241_v60  ;;  %v223_v1 = vpop.f32.mrf.mxu0  ;;  %v243_v2 = vpop.f32.mrf.mxu1 }
  0xef   :  { %347 = vst [vmem:[%s564_s4 + $0x20] sm:$0xff] %v333_v61  ;;  %355 = vst [vmem:[%s564_s4 + $0x60] sm:$0xff] %v341_v62  ;;  %v334_v3 = vadd.f32 %v326_v34, %v308_v63  ;;  %v309_v5 = vmul.f32 %v296_v27, %v223_v1 }
  0xf0   :  { %v342_v4 = vadd.f32 %v326_v34, %v316_v0  ;;  %v225_v6 = vpop.f32.mrf.mxu0  ;;  %v244_v7 = vpop.f32.mrf.mxu1 }
  0xf1   :  { %348 = vst [vmem:[%s564_s4 + $0x28] sm:$0xff] %v334_v3  ;;  %v335_v8 = vadd.f32 %v322_v28, %v309_v5  ;;  %v310_v9 = vmul.f32 %v300_v29, %v225_v6 }
  0xf2   :  { %356 = vst [vmem:[%s564_s4 + $0x68] sm:$0xff] %v342_v4 }
  0xf3   :  { %349 = vst [vmem:[%s564_s4 + $0x30] sm:$0xff] %v335_v8  ;;  %v336_v10 = vadd.f32 %v326_v34, %v310_v9 }
  0xf5   :  { %350 = vst [vmem:[%s564_s4 + $0x38] sm:$0xff] %v336_v10 }

// kernel: forward.28
= control target key start
LH: loop header
LB: loop body
LE: loop exit
PB: predicated region body
PF: predicated region fallthrough
CT: control target
= control target key end

     0   :  { %s1083_s15 = smov 0   ;;  %s1085_s16 = smov 0   ;;  %s1198_s0 = inlined_call_operand.vmem [shape: bf16[24,1152], index: 0, kind: input, shape index: {}]   ;;  %s1199_s1 = inlined_call_operand.vmem [shape: bf16[1152,128], index: 1, kind: input, shape index: {}]   ;;  %s1200_s2 = inlined_call_operand.vmem [shape: f32[1,128], index: 2, kind: input, shape index: {}]   ;;  %s1201_s3 = inlined_call_operand.vmem [shape: f32[1,128], index: 3, kind: input, shape index: {}]   ;;  %s1202_s4 = inlined_call_operand.vmem [shape: f32[24,128], index: 4, kind: output, shape index: {}]  }
   0x1   :  { %s1087_s17 = smov 0   ;;  %s1089_s18 = smov 0  }
   0x2   :  { %s1091_s19 = smov 0  }
   0x3 LB: > { %s26_s20 = sadd.s32 1, %s1051_s18  ;;  %p49_p1 = scmp.ne.s32.totalorder %s1043_s16, %s1039_s15  ;;  %s1055_s19 = sphi %s1091_s19, %s14_s19   ;;  %s1051_s18 = sphi %s1089_s18, %s1206_s18   ;;  %s1047_s17 = sphi %s1087_s17, %s1205_s17   ;;  %s1043_s16 = sphi %s1085_s16, %s1204_s16   ;;  %s1039_s15 = sphi %s1083_s15, %s1203_s15  }
   0x4   : > { %p27_p0 = scmp.ge.s32.totalorder %s26_s20, 3  ;;  %p50_p2 = scmp.eq.s32.totalorder %s1055_s19, 0 }
   0x5   : > { %s42_s22 = sadd.s32 1, %s1043_s16  ;;  %p836_p5 = scmp.ge.s32.totalorder %s1055_s19, 3 }
   0x6   : > { %s1208_s20 = smov (%p27_p0, %s26_s20), 0  ;;  %p51_p3 = por %p50_p2, %p49_p1 }
   0x7   : > { %s38_s21 = ssub.s32 %s1051_s18, %s1208_s20  ;;  %195 = sbr.rel (%p836_p5) target bundleno = 20 (0x14), region = 24 }
   0x8   : > { %p40_p4 = scmp.eq.s32.totalorder %s38_s21, 0 }
   0xa   : > { %s1118_s23 = scalar_select %p40_p4, %s1043_s16, %s42_s22  }
   0xc   : > { %198 = sbr.rel (!%p51_p3) target bundleno = 20 (0x14), region = 28  ;;  %s200_s24 = sand.u32 (%p51_p3), 1, %s1043_s16  }
   0xd   : > { %s884_s25 = smul.u32 (%p51_p3), 12, %s1051_s18 }
   0xe   : > { %s943_s26 = smul.u32 (%p51_p3), 36, %s200_s24 }
   0xf   : > { %s208_s29 = scalar_lea.vmem (%p51_p3), %s1198_s0, %s884_s25 }
  0x10   : > { %v223_v0 = vld [vmem:[%s208_s29] sm:$0xff] (%p51_p3)  ;;  %v227_v2 = vld [vmem:[%s208_s29 + $0x48] sm:$0xff] (%p51_p3)  ;;  %s202_s30 = scalar_lea.vmem (%p51_p3), [#allocation3], %s943_s26  ;;  %v842_v5 = vld [vmem:[%s208_s29 + $0x50] sm:$0xf] (%p51_p3) }
  0x11   : > { %v225_v1 = vld [vmem:[%s208_s29 + $0x24] sm:$0xff]  ;;  %224 = vst [vmem:[%s202_s30] sm:$0xff] %v223_v0  ;;  %228 = vst [vmem:[%s202_s30 + $0x18] sm:$0xff] %v227_v2  ;;  %v840_v4 = vld [vmem:[%s208_s29 + $0x2c] sm:$0xf] }
  0x12   : > { %226 = vst [vmem:[%s202_s30 + $0xc] sm:$0xff] %v225_v1  ;;  %v838_v3 = vld [vmem:[%s208_s29 + $0x8] sm:$0xf]  ;;  %841 = vst [vmem:[%s202_s30 + $0x14] sm:$0xf] %v840_v4 }
  0x13   : > { %839 = vst [vmem:[%s202_s30 + $0x8] sm:$0xf] %v838_v3  ;;  %843 = vst [vmem:[%s202_s30 + $0x20] sm:$0xf] %v842_v5 }
  0x14 PF: > { %p844_p6 = scmp.ge.s32.totalorder %s1055_s19, 1  ;;  %p259_p7 = scmp.lt.s32.totalorder %s1055_s19, 4 }
  0x16   : > { %p260_p8 = pnand %p844_p6, %p259_p7 }
  0x17   : > { %s266_s5 = sand.u32 (!%p260_p8), 1, %s1039_s15   ;;  %s310_s6 = smul.u32 (!%p260_p8), 48, %s1047_s17 }
  0x18   : > { %263 = sbr.rel (%p260_p8) target bundleno = 295 (0x127), region = 58  ;;  %p846_p10 = scmp.ne.s32.totalorder (!%p260_p8), %s1047_s17, 0 }
  0x19   : > { %s944_s7 = smul.u32 (!%p260_p8), 36, %s266_s5  ;;  %p311_p9 = scmp.lt.s32.totalorder (!%p260_p8), %s310_s6, 143 }
  0x1b   : > { %s1135_s12 = scalar_lea.vmem (!%p260_p8), [#allocation3], %s944_s7 }
  0x1d   : > { %s1210_s6 = smov (!%p311_p9, %s310_s6), 143  ;;  %338 = sbr.rel (%p846_p10) target bundleno = 37 (0x25), region = 66 }
  0x1e   : > { %s845_s8 = sshll.u32 %s1210_s6, 2 }
  0x1f   : > { %s1133_s11 = scalar_lea.vmem %s1199_s1, %s845_s8 }
  0x22   : > { %v1057_v6 = vmov 0.0  }
  0x23   : > { %339 = vst [vmem:[#allocation2 + $0x10] sm:$0xff] %v1057_v6  ;;  %340 = vst [vmem:[#allocation2] sm:$0xff] %v1057_v6 }
  0x24   : > { %341 = vst [vmem:[#allocation2 + $0x8] sm:$0xff] %v1057_v6 }
  0x25 PF: > { %v986_v7 = vld [vmem:[%s1133_s11 + $0x78] sm:$0xff]   ;;  %v989_v10 = vld [vmem:[%s1133_s11 + $0x70] sm:$0xff]   ;;  %v992_v13 = vld [vmem:[%s1133_s11 + $0x68] sm:$0xff]   ;;  %p877_p11 = scmp.ne.s32.totalorder %s1047_s17, 2 }
  0x26   : > { %v987_v8 = vld [vmem:[%s1133_s11 + $0xb8] sm:$0xff]   ;;  %885 = vmatprep.subr.bf16.mxu0 %v986_v7  ;;  %v990_v11 = vld [vmem:[%s1133_s11 + $0xb0] sm:$0xff]   ;;  %v993_v14 = vld [vmem:[%s1133_s11 + $0xa8] sm:$0xff]  }
  0x27   : > { %v988_v9 = vld [vmem:[%s1133_s11 + $0x38] sm:$0xff]   ;;  %923 = vmatprep.subr.bf16.mxu1 %v987_v8  ;;  %v991_v12 = vld [vmem:[%s1133_s11 + $0x30] sm:$0xff]   ;;  %v994_v15 = vld [vmem:[%s1133_s11 + $0x28] sm:$0xff]  }
  0x28   : > { %886 = vmatpush3.bf16.msra.mxu0 %v988_v9  ;;  %924 = vmatpush3.bf16.msra.mxu1 %v987_v8  ;;  %v995_v16 = vld [vmem:[%s1133_s11 + $0x60] sm:$0xff]   ;;  %v998_v19 = vld [vmem:[%s1133_s11 + $0x58] sm:$0xff]   ;;  %v1001_v22 = vld [vmem:[%s1133_s11 + $0x50] sm:$0xff]  }
  0x29   : > { %887 = vmatprep.subr.bf16.mxu0 %v989_v10  ;;  %925 = vmatprep.subr.bf16.mxu1 %v990_v11  ;;  %v996_v17 = vld [vmem:[%s1133_s11 + $0xa0] sm:$0xff]   ;;  %v999_v20 = vld [vmem:[%s1133_s11 + $0x98] sm:$0xff]   ;;  %v1002_v23 = vld [vmem:[%s1133_s11 + $0x90] sm:$0xff]  }
  0x2a   : > { %v997_v18 = vld [vmem:[%s1133_s11 + $0x20] sm:$0xff]   ;;  %v1000_v21 = vld [vmem:[%s1133_s11 + $0x18] sm:$0xff]   ;;  %v1003_v24 = vld [vmem:[%s1133_s11 + $0x10] sm:$0xff]  }
  0x2b   : > { %v1004_v25 = vld [vmem:[%s1133_s11 + $0x48] sm:$0xff]   ;;  %v1007_v28 = vld [vmem:[%s1133_s11 + $0x40] sm:$0xff]   ;;  %v349_v33 = vld [vmem:[%s1135_s12 + $0x18] sm:$0xff] }
  0x2c   : > { %888 = vmatpush3.bf16.msra.mxu0 %v991_v12  ;;  %926 = vmatpush3.bf16.msra.mxu1 %v990_v11  ;;  %v1005_v26 = vld [vmem:[%s1133_s11 + $0x88] sm:$0xff]   ;;  %v1008_v29 = vld [vmem:[%s1133_s11 + $0x80] sm:$0xff]   ;;  %v1014_v35 = vld [vmem:[%s1135_s12 + $0x20] ss:$0 sps:$4 sm:$0xff]   ;;  %v851_v36 = vcombine.high %v349_v33, %v349_v33  ;;  %v850_v37 = vcombine.low %v349_v33, %v349_v33 }
  0x2d   : > { %889 = vmatprep.subr.bf16.mxu0 %v992_v13  ;;  %927 = vmatprep.subr.bf16.mxu1 %v993_v14  ;;  %v1006_v27 = vld [vmem:[%s1133_s11 + $0x8] sm:$0xff]   ;;  %v1009_v32 = vld [vmem:[%s1133_s11] sm:$0xff]   ;;  %v342_v43 = vld [vmem:[#allocation2 + $0x10] sm:$0xff] }
  0x2e   : > { %v1012_v30 = vld [vmem:[%s1135_s12 + $0x4] ss:$12 sps:$4 sm:$0xff]   ;;  %v1013_v31 = vld [vmem:[%s1135_s12 + $0x8] ss:$12 sps:$4 sm:$0xff]   ;;  %v1010_v34 = vld [vmem:[%s1135_s12] ss:$12 sps:$4 sm:$0xff]  }
  0x2f   : > { %602 = vmatprep.mubr.bf16.mxu0 %v1012_v30  ;;  %939 = vmatprep.mubr.bf16.mxu1 %v1013_v31  ;;  %v343_v50 = vld [vmem:[#allocation2] sm:$0xff]  ;;  %v344_v57 = vld [vmem:[#allocation2 + $0x8] sm:$0xff] }
  0x30   : > { %890 = vmatpush3.bf16.msra.mxu0 %v994_v15  ;;  %928 = vmatpush3.bf16.msra.mxu1 %v993_v14 }
  0x31   : > { %891 = vmatprep.subr.bf16.mxu0 %v995_v16  ;;  %929 = vmatprep.subr.bf16.mxu1 %v996_v17 }
  0x34   : > { %892 = vmatpush3.bf16.msra.mxu0 %v997_v18  ;;  %930 = vmatpush3.bf16.msra.mxu1 %v996_v17 }
  0x35   : > { %893 = vmatprep.subr.bf16.mxu0 %v998_v19  ;;  %931 = vmatprep.subr.bf16.mxu1 %v999_v20 }
  0x38   : > { %894 = vmatpush3.bf16.msra.mxu0 %v1000_v21  ;;  %932 = vmatpush3.bf16.msra.mxu1 %v999_v20 }
  0x39   : > { %895 = vmatprep.subr.bf16.mxu0 %v1001_v22  ;;  %933 = vmatprep.subr.bf16.mxu1 %v1002_v23 }
  0x3c   : > { %896 = vmatpush3.bf16.msra.mxu0 %v1003_v24  ;;  %934 = vmatpush3.bf16.msra.mxu1 %v1002_v23 }
  0x3d   : > { %897 = vmatprep.subr.bf16.mxu0 %v1004_v25  ;;  %935 = vmatprep.subr.bf16.mxu1 %v1005_v26 }
  0x40   : > { %898 = vmatpush3.bf16.msra.mxu0 %v1006_v27  ;;  %936 = vmatpush3.bf16.msra.mxu1 %v1005_v26 }
  0x41   : > { %899 = vmatprep.subr.bf16.mxu0 %v1007_v28  ;;  %937 = vmatprep.subr.bf16.mxu1 %v1008_v29 }
  0x44   : > { %900 = vmatpush3.bf16.msra.mxu0 %v1009_v32  ;;  %938 = vmatpush3.bf16.msra.mxu1 %v1008_v29 }
  0x47   : > { %603 = vmatmul.mubr.bf16.vlgmr.msra.gmra.mxu0 %v1010_v34  ;;  %940 = vmatmul.mubr.bf16.vlgmr.msra.gmra.mxu1 %v1014_v35 }
  0x48   : > { %610 = vmatprep.mubr.bf16.mxu0 %v851_v36 }
  0x4f   : > { %611 = vmatmul.mubr.bf16.gmra.mxu0 %v850_v37 }
 0x107   : > { %v901_v38 = vpop.f32.mrf.mxu0  ;;  %v941_v39 = vpop.f32.mrf.mxu1 }
 0x109   : > { %v902_v40 = vpop.f32.mrf.mxu0  ;;  %v652_v41 = vpop.f32.mrf.mxu1 }
 0x10a   : > { %v903_v42 = vadd.f32 %v902_v40, %v901_v38 }
 0x10b   : > { %v904_v44 = vpop.f32.mrf.mxu0  ;;  %v942_v45 = vpop.f32.mrf.mxu1 }
 0x10c   : > { %v653_v46 = vadd.f32 %v903_v42, %v652_v41 }
 0x10d   : > { %v905_v47 = vpop.f32.mrf.mxu0  ;;  %v655_v51 = vpop.f32.mrf.mxu1 }
 0x10e   : > { %v666_v48 = vadd.f32 %v653_v46, %v342_v43  ;;  %v906_v49 = vadd.f32 %v905_v47, %v904_v44 }
 0x10f   : > { %v907_v52 = vpop.f32.mrf.mxu0 }
 0x110   : > { %669 = vst [vmem:[#allocation2 + $0x10] sm:$0xff] %v666_v48  ;;  %v656_v53 = vadd.f32 %v906_v49, %v655_v51 }
 0x111   : > { %v908_v54 = vpop.f32.mrf.mxu0 }
 0x112   : > { %v667_v55 = vadd.f32 %v656_v53, %v343_v50  ;;  %v909_v56 = vadd.f32 %v908_v54, %v907_v52 }
 0x113   : > { %v910_v58 = vpop.f32.mrf.mxu0 }
 0x114   : > { %670 = vst [vmem:[#allocation2] sm:$0xff] %v667_v55  ;;  %v661_v59 = vadd.f32 %v941_v39, %v909_v56  ;;  %675 = sbr.rel (%p877_p11) target bundleno = 295 (0x127), region = 70 }
 0x115   : > { %v911_v60 = vpop.f32.mrf.mxu0 }
 0x116   : > { %v668_v61 = vadd.f32 %v661_v59, %v344_v57 }
 0x118   : > { %671 = vst [vmem:[#allocation2 + $0x8] sm:$0xff] %v668_v61 }
 0x119   : > { %v676_v62 = vld [vmem:[#allocation2 + $0x10] sm:$0xff]  ;;  %v878_v63 = vld [vmem:[%s1200_s2] ss:$0 sm:$0xff] }
 0x11a   : > { %v879_v0 = vld [vmem:[%s1201_s3] ss:$0 sm:$0xff]  ;;  %v686_v1 = vmul.f32 %v878_v63, %v676_v62 }
 0x11b   : > { %v677_v2 = vld [vmem:[#allocation2] sm:$0xff] }
 0x11c   : > { %v687_v4 = vmul.f32 %v878_v63, %v677_v2  ;;  %v696_v6 = vadd.f32 %v879_v0, %v686_v1 }
 0x11e   : > { %v697_v7 = vadd.f32 %v879_v0, %v687_v4  ;;  %v699_v9 = vmax.f32 %v696_v6, 0.0 }
 0x11f   : > { %v678_v3 = vld [vmem:[#allocation2 + $0x8] sm:$0xff] }
 0x120   : > { %v688_v5 = vmul.f32 %v878_v63, %v678_v3  ;;  %v700_v10 = vmax.f32 %v697_v7, 0.0  ;;  %702 = vst [vmem:[%s1202_s4] sm:$0xff] %v699_v9 }
 0x122   : > { %v698_v8 = vadd.f32 %v879_v0, %v688_v5  ;;  %703 = vst [vmem:[%s1202_s4 + $0x8] sm:$0xff] %v700_v10 }
 0x124   : > { %v701_v11 = vmax.f32 %v698_v8, 0.0 }
 0x126   : > { %704 = vst [vmem:[%s1202_s4 + $0x10] sm:$0xff] %v701_v11 }
 0x127 PF: > { %s14_s19 = sadd.s32 1, %s1055_s19   ;;  %s1203_s15 = smov %s1043_s16 }
 0x128   : > { %p11_p12 = scmp.ge.s32.totalorder %s14_s19, 5   ;;  %s1204_s16 = smov %s1118_s23 }
 0x129   : > { %s1205_s17 = smov %s1051_s18  ;;  %s1206_s18 = smov %s1208_s20 }
 0x12a   :  { %13 = sbr.rel (!%p11_p12) target bundleno = 3 (0x3), region = 120 }

// kernel: forward.26
= control target key start
LH: loop header
LB: loop body
LE: loop exit
PB: predicated region body
PF: predicated region fallthrough
CT: control target
= control target key end

     0   :  { %s1201_s15 = smov 0   ;;  %s1203_s16 = smov 0   ;;  %s1401_s0 = inlined_call_operand.vmem [shape: bf16[24,256], index: 0, kind: input, shape index: {}]   ;;  %s1402_s1 = inlined_call_operand.vmem [shape: bf16[256,512], index: 1, kind: input, shape index: {}]   ;;  %s1403_s2 = inlined_call_operand.vmem [shape: f32[1,512], index: 2, kind: input, shape index: {}]   ;;  %s1404_s3 = inlined_call_operand.vmem [shape: f32[1,512], index: 3, kind: input, shape index: {}]   ;;  %s1405_s4 = inlined_call_operand.vmem [shape: f32[24,512], index: 4, kind: output, shape index: {}]  }
   0x1   :  { %s1205_s17 = smov 0   ;;  %s1207_s18 = smov 0  }
   0x2   :  { %s1209_s19 = smov 0  }
   0x3 LB: > { %s29_s20 = sadd.s32 1, %s1170_s18  ;;  %s956_s21 = sadd.s32 4294967295, %s1174_s19   ;;  %s1174_s19 = sphi %s1209_s19, %s14_s19   ;;  %s1170_s18 = sphi %s1207_s18, %s1410_s18   ;;  %s1166_s17 = sphi %s1205_s17, %s1409_s17   ;;  %s1162_s16 = sphi %s1203_s16, %s1408_s16   ;;  %s1158_s15 = sphi %s1201_s15, %s1407_s15  }
   0x4   : > { %p31_p0 = scmp.ge.s32.totalorder %s29_s20, 2  ;;  %p77_p1 = scmp.ne.s32.totalorder %s1162_s16, %s1158_s15 }
   0x5   : > { %p78_p2 = scmp.eq.s32.totalorder %s1174_s19, 0  ;;  %p161_p4 = scmp.eq.s32.totalorder %s956_s21, 1 }
   0x6   : > { %s1412_s20 = smov (%p31_p0, %s29_s20), 0  ;;  %s70_s23 = sadd.s32 1, %s1162_s16 }
   0x7   : > { %p79_p3 = por %p78_p2, %p77_p1  ;;  %s66_s22 = ssub.s32 %s1170_s18, %s1412_s20 }
   0x8   : > { %p68_p5 = scmp.eq.s32.totalorder %s66_s22, 0  ;;  %p1236_p6 = por %p161_p4, %p77_p1 }
   0x9   : > { %p960_p7 = scmp.ge.s32.totalorder %s1174_s19, 2 }
   0xa   : > { %s1241_s25 = scalar_select %p68_p5, %s1162_s16, %s70_s23  }
   0xb   : > { %198 = sbr.rel (%p960_p7) target bundleno = 36 (0x24), region = 20 }
  0x10   : > { %201 = sbr.rel (!%p79_p3) target bundleno = 36 (0x24), region = 24  ;;  %s203_s26 = sand.u32 (%p79_p3), 1, %s1162_s16  }
  0x11   : > { %s1008_s27 = sshll.u32 (%p79_p3), %s1170_s18, 3  ;;  %s961_s28 = sshll.u32 (%p79_p3), %s203_s26, 8 }
  0x12   : > { %s1249_s5 = scalar_lea.vmem (%p79_p3), %s1402_s1, %s1008_s27  ;;  %s1254_s6 = scalar_lea.vmem (%p79_p3), [#allocation3], %s961_s28 }
  0x13   : > { %v302_v0 = vld [vmem:[%s1249_s5] sm:$0xff] (%p79_p3)  ;;  %v304_v1 = vld [vmem:[%s1249_s5 + $0x10] sm:$0xff] (%p79_p3) }
  0x14   : > { %v306_v2 = vld [vmem:[%s1249_s5 + $0x20] sm:$0xff] (%p79_p3)  ;;  %303 = vst [vmem:[%s1254_s6] sm:$0xff] (%p79_p3), %v302_v0  ;;  %305 = vst [vmem:[%s1254_s6 + $0x8] sm:$0xff] (%p79_p3), %v304_v1  ;;  %v308_v3 = vld [vmem:[%s1249_s5 + $0x30] sm:$0xff] (%p79_p3) }
  0x15   : > { %307 = vst [vmem:[%s1254_s6 + $0x10] sm:$0xff] %v306_v2  ;;  %v310_v4 = vld [vmem:[%s1249_s5 + $0x40] sm:$0xff]  ;;  %v312_v5 = vld [vmem:[%s1249_s5 + $0x50] sm:$0xff]  ;;  %309 = vst [vmem:[%s1254_s6 + $0x18] sm:$0xff] %v308_v3 }
  0x16   : > { %311 = vst [vmem:[%s1254_s6 + $0x20] sm:$0xff] %v310_v4  ;;  %313 = vst [vmem:[%s1254_s6 + $0x28] sm:$0xff] %v312_v5  ;;  %v314_v6 = vld [vmem:[%s1249_s5 + $0x60] sm:$0xff]  ;;  %v316_v7 = vld [vmem:[%s1249_s5 + $0x70] sm:$0xff] }
  0x17   : > { %v318_v8 = vld [vmem:[%s1249_s5 + $0x80] sm:$0xff]  ;;  %315 = vst [vmem:[%s1254_s6 + $0x30] sm:$0xff] %v314_v6  ;;  %317 = vst [vmem:[%s1254_s6 + $0x38] sm:$0xff] %v316_v7  ;;  %v320_v9 = vld [vmem:[%s1249_s5 + $0x90] sm:$0xff] }
  0x18   : > { %319 = vst [vmem:[%s1254_s6 + $0x40] sm:$0xff] %v318_v8  ;;  %v322_v10 = vld [vmem:[%s1249_s5 + $0xa0] sm:$0xff]  ;;  %v324_v11 = vld [vmem:[%s1249_s5 + $0xb0] sm:$0xff]  ;;  %321 = vst [vmem:[%s1254_s6 + $0x48] sm:$0xff] %v320_v9 }
  0x19   : > { %323 = vst [vmem:[%s1254_s6 + $0x50] sm:$0xff] %v322_v10  ;;  %325 = vst [vmem:[%s1254_s6 + $0x58] sm:$0xff] %v324_v11  ;;  %v326_v12 = vld [vmem:[%s1249_s5 + $0xc0] sm:$0xff]  ;;  %v328_v13 = vld [vmem:[%s1249_s5 + $0xd0] sm:$0xff] }
  0x1a   : > { %v330_v14 = vld [vmem:[%s1249_s5 + $0xe0] sm:$0xff]  ;;  %327 = vst [vmem:[%s1254_s6 + $0x60] sm:$0xff] %v326_v12  ;;  %329 = vst [vmem:[%s1254_s6 + $0x68] sm:$0xff] %v328_v13  ;;  %v332_v15 = vld [vmem:[%s1249_s5 + $0xf0] sm:$0xff] }
  0x1b   : > { %331 = vst [vmem:[%s1254_s6 + $0x70] sm:$0xff] %v330_v14  ;;  %v334_v16 = vld [vmem:[%s1249_s5 + $0x100] sm:$0xff]  ;;  %v336_v17 = vld [vmem:[%s1249_s5 + $0x110] sm:$0xff]  ;;  %333 = vst [vmem:[%s1254_s6 + $0x78] sm:$0xff] %v332_v15 }
  0x1c   : > { %335 = vst [vmem:[%s1254_s6 + $0x80] sm:$0xff] %v334_v16  ;;  %337 = vst [vmem:[%s1254_s6 + $0x88] sm:$0xff] %v336_v17  ;;  %v338_v18 = vld [vmem:[%s1249_s5 + $0x120] sm:$0xff]  ;;  %v340_v19 = vld [vmem:[%s1249_s5 + $0x130] sm:$0xff] }
  0x1d   : > { %v342_v20 = vld [vmem:[%s1249_s5 + $0x140] sm:$0xff]  ;;  %339 = vst [vmem:[%s1254_s6 + $0x90] sm:$0xff] %v338_v18  ;;  %341 = vst [vmem:[%s1254_s6 + $0x98] sm:$0xff] %v340_v19  ;;  %v344_v21 = vld [vmem:[%s1249_s5 + $0x150] sm:$0xff] }
  0x1e   : > { %343 = vst [vmem:[%s1254_s6 + $0xa0] sm:$0xff] %v342_v20  ;;  %v346_v22 = vld [vmem:[%s1249_s5 + $0x160] sm:$0xff]  ;;  %v348_v23 = vld [vmem:[%s1249_s5 + $0x170] sm:$0xff]  ;;  %345 = vst [vmem:[%s1254_s6 + $0xa8] sm:$0xff] %v344_v21 }
  0x1f   : > { %347 = vst [vmem:[%s1254_s6 + $0xb0] sm:$0xff] %v346_v22  ;;  %349 = vst [vmem:[%s1254_s6 + $0xb8] sm:$0xff] %v348_v23  ;;  %v350_v24 = vld [vmem:[%s1249_s5 + $0x180] sm:$0xff]  ;;  %v352_v25 = vld [vmem:[%s1249_s5 + $0x190] sm:$0xff] }
  0x20   : > { %v354_v26 = vld [vmem:[%s1249_s5 + $0x1a0] sm:$0xff]  ;;  %351 = vst [vmem:[%s1254_s6 + $0xc0] sm:$0xff] %v350_v24  ;;  %353 = vst [vmem:[%s1254_s6 + $0xc8] sm:$0xff] %v352_v25  ;;  %v356_v27 = vld [vmem:[%s1249_s5 + $0x1b0] sm:$0xff] }
  0x21   : > { %355 = vst [vmem:[%s1254_s6 + $0xd0] sm:$0xff] %v354_v26  ;;  %v358_v28 = vld [vmem:[%s1249_s5 + $0x1c0] sm:$0xff]  ;;  %v360_v29 = vld [vmem:[%s1249_s5 + $0x1d0] sm:$0xff]  ;;  %357 = vst [vmem:[%s1254_s6 + $0xd8] sm:$0xff] %v356_v27 }
  0x22   : > { %359 = vst [vmem:[%s1254_s6 + $0xe0] sm:$0xff] %v358_v28  ;;  %361 = vst [vmem:[%s1254_s6 + $0xe8] sm:$0xff] %v360_v29  ;;  %v362_v30 = vld [vmem:[%s1249_s5 + $0x1e0] sm:$0xff]  ;;  %v364_v31 = vld [vmem:[%s1249_s5 + $0x1f0] sm:$0xff] }
  0x23   : > { %363 = vst [vmem:[%s1254_s6 + $0xf0] sm:$0xff] %v362_v30  ;;  %365 = vst [vmem:[%s1254_s6 + $0xf8] sm:$0xff] %v364_v31 }
  0x24 PF: > { %p964_p8 = scmp.ge.s32.totalorder %s1174_s19, 1  ;;  %p386_p9 = scmp.lt.s32.totalorder %s1174_s19, 3 }
  0x26   : > { %p387_p10 = pnand %p964_p8, %p386_p9 }
  0x27   : > { %s393_s7 = sand.u32 (!%p387_p10), 1, %s1158_s15   ;;  %s966_s22 = sshll.u32 (!%p387_p10), %s1166_s17, 1 }
  0x28   : > { %390 = sbr.rel (%p387_p10) target bundleno = 323 (0x143), region = 70  ;;  %s965_s8 = sshll.u32 (!%p387_p10), %s393_s7, 8 }
  0x29   : > { %s1332_s13 = scalar_lea.vmem (!%p387_p10), [#allocation3], %s965_s8  ;;  %p450_p11 = scmp.lt.s32.totalorder (!%p387_p10), %s966_s22, 3 }
  0x2a   : > { %s1042_s5 = smul.u32 (!%p387_p10), 48, %s393_s7 }
  0x2c   : > { %s434_s6 = scalar_lea.vmem (!%p387_p10), [#allocation4], %s1042_s5 }
  0x2d   : > { %v1133_v32 = vld [vmem:[%s1401_s0 + $0x4] ss:$8 sps:$4 sm:$0xff]   ;;  %v1328_v33 = vld [vmem:[%s1401_s0 + $0x10] sm:$0xff]  ;;  %v1088_v38 = vld [vmem:[%s1332_s13 + $0x60] ss:$8 sps:$4 sm:$0xff]   ;;  %v763_v5 = vlaneseq  ;;  %s1414_s22 = smov (!%p450_p11, %s966_s22), 3 }
  0x2e   : > { %v971_v34 = vcombine.high %v1328_v33, %v1328_v33  ;;  %v1083_v35 = vld [vmem:[%s1332_s13 + $0x74] ss:$8 sps:$4 sm:$0xff]   ;;  %721 = vmatprep.mubr.bf16.mxu0 %v1133_v32  ;;  %v1085_v36 = vld [vmem:[%s1332_s13 + $0x70] ss:$8 sps:$4 sm:$0xff]   ;;  %v1086_v37 = vld [vmem:[%s1332_s13 + $0x64] ss:$8 sps:$4 sm:$0xff]   ;;  %v970_v4 = vcombine.low %v1328_v33, %v1328_v33  ;;  %s452_s27 = scalar_lea.vmem %s1403_s2, %s1414_s22  ;;  %s457_s30 = scalar_lea.vmem %s1404_s3, %s1414_s22 }
  0x2f   : > { %689 = vmatprep.subr.bf16.mxu0 %v1083_v35  ;;  %1010 = vmatprep.subr.bf16.mxu1 %v1083_v35  ;;  %v1089_v39 = vld [vmem:[%s1332_s13 + $0x54] ss:$8 sps:$4 sm:$0xff]   ;;  %v1091_v40 = vld [vmem:[%s1332_s13 + $0x50] ss:$8 sps:$4 sm:$0xff]   ;;  %v1092_v41 = vld [vmem:[%s1332_s13 + $0x44] ss:$8 sps:$4 sm:$0xff]  }
  0x30   : > { %731 = vmatprep.mubr.bf16.mxu1 %v971_v34  ;;  %690 = vmatpush1.bf16.msra.mxu0 %v1085_v36  ;;  %v1094_v42 = vld [vmem:[%s1332_s13 + $0x40] ss:$8 sps:$4 sm:$0xff]   ;;  %v1095_v43 = vld [vmem:[%s1332_s13 + $0x34] ss:$8 sps:$4 sm:$0xff]   ;;  %v1097_v44 = vld [vmem:[%s1332_s13 + $0x30] ss:$8 sps:$4 sm:$0xff]  }
  0x31   : > { %1026 = vmatpush1.bf16.msra.mxu1 %v1085_v36  ;;  %691 = vmatprep.subr.bf16.mxu0 %v1086_v37  ;;  %v1098_v45 = vld [vmem:[%s1332_s13 + $0x24] ss:$8 sps:$4 sm:$0xff]   ;;  %v1100_v46 = vld [vmem:[%s1332_s13 + $0x20] ss:$8 sps:$4 sm:$0xff]   ;;  %v1101_v47 = vld [vmem:[%s1332_s13 + $0x14] ss:$8 sps:$4 sm:$0xff]  }
  0x32   : > { %1011 = vmatprep.subr.bf16.mxu1 %v1086_v37  ;;  %v1103_v48 = vld [vmem:[%s1332_s13 + $0x10] ss:$8 sps:$4 sm:$0xff]   ;;  %v1104_v49 = vld [vmem:[%s1332_s13 + $0x4] ss:$8 sps:$4 sm:$0xff]   ;;  %v1106_v50 = vld [vmem:[%s1332_s13] ss:$8 sps:$4 sm:$0xff]  }
  0x33   : > { %v1107_v51 = vld [vmem:[%s1332_s13 + $0xf4] ss:$8 sps:$4 sm:$0xff]   ;;  %v1109_v52 = vld [vmem:[%s1332_s13 + $0xf0] ss:$8 sps:$4 sm:$0xff]   ;;  %v1110_v53 = vld [vmem:[%s1332_s13 + $0xe4] ss:$8 sps:$4 sm:$0xff]  }
  0x34   : > { %692 = vmatpush1.bf16.msra.mxu0 %v1088_v38  ;;  %v1112_v54 = vld [vmem:[%s1332_s13 + $0xe0] ss:$8 sps:$4 sm:$0xff]   ;;  %v1113_v55 = vld [vmem:[%s1332_s13 + $0xd4] ss:$8 sps:$4 sm:$0xff]   ;;  %v1115_v56 = vld [vmem:[%s1332_s13 + $0xd0] ss:$8 sps:$4 sm:$0xff]  }
  0x35   : > { %1027 = vmatpush1.bf16.msra.mxu1 %v1088_v38  ;;  %693 = vmatprep.subr.bf16.mxu0 %v1089_v39  ;;  %v1116_v57 = vld [vmem:[%s1332_s13 + $0xc4] ss:$8 sps:$4 sm:$0xff]   ;;  %v1118_v58 = vld [vmem:[%s1332_s13 + $0xc0] ss:$8 sps:$4 sm:$0xff]   ;;  %v1119_v59 = vld [vmem:[%s1332_s13 + $0xb4] ss:$8 sps:$4 sm:$0xff]  }
  0x36   : > { %1012 = vmatprep.subr.bf16.mxu1 %v1089_v39  ;;  %v1121_v60 = vld [vmem:[%s1332_s13 + $0xb0] ss:$8 sps:$4 sm:$0xff]   ;;  %v1122_v61 = vld [vmem:[%s1332_s13 + $0xa4] ss:$8 sps:$4 sm:$0xff]   ;;  %v1124_v62 = vld [vmem:[%s1332_s13 + $0xa0] ss:$8 sps:$4 sm:$0xff]  }
  0x37   : > { %v1125_v63 = vld [vmem:[%s1332_s13 + $0x94] ss:$8 sps:$4 sm:$0xff]   ;;  %v1127_v0 = vld [vmem:[%s1332_s13 + $0x90] ss:$8 sps:$4 sm:$0xff]   ;;  %v1128_v1 = vld [vmem:[%s1332_s13 + $0x84] ss:$8 sps:$4 sm:$0xff]  }
  0x38   : > { %694 = vmatpush1.bf16.msra.mxu0 %v1091_v40  ;;  %v1130_v2 = vld [vmem:[%s1332_s13 + $0x80] ss:$8 sps:$4 sm:$0xff]   ;;  %v764_v6 = vshrl.u32 %v763_v5, 7  ;;  %s1009_s15 = sshll.u32 (%p1236_p6), %s1166_s17, 4 }
  0x39   : > { %1028 = vmatpush1.bf16.msra.mxu1 %v1091_v40  ;;  %695 = vmatprep.subr.bf16.mxu0 %v1092_v41  ;;  %v1131_v3 = vld [vmem:[%s1401_s0] ss:$8 sps:$4 sm:$0xff]   ;;  %s815_s9 = scalar_lea.vmem (%p1236_p6), %s1405_s4, %s1009_s15 }
  0x3a   : > { %1013 = vmatprep.subr.bf16.mxu1 %v1092_v41  ;;  %v765_v7 = vsub.s32 0, %v764_v6  ;;  %v761_v8 = vld [vmem:[%s452_s27] sm:$0x3]  ;;  %v769_v9 = vsub.s32 1, %v764_v6 }
  0x3b   : > { %v779_v10 = vld [vmem:[%s457_s30] sm:$0x3] }
  0x3c   : > { %696 = vmatpush1.bf16.msra.mxu0 %v1094_v42  ;;  %v766_v11 = vrot.slane %v761_v8, %v765_v7  ;;  %v784_v12 = vrot.slane %v779_v10, %v765_v7  ;;  %v770_v13 = vrot.slane %v761_v8, %v769_v9  ;;  %v788_v18 = vrot.slane %v779_v10, %v769_v9 }
  0x3d   : > { %1029 = vmatpush1.bf16.msra.mxu1 %v1094_v42  ;;  %697 = vmatprep.subr.bf16.mxu0 %v1095_v43 }
  0x3e   : > { %1014 = vmatprep.subr.bf16.mxu1 %v1095_v43 }
  0x40   : > { %698 = vmatpush1.bf16.msra.mxu0 %v1097_v44 }
  0x41   : > { %1030 = vmatpush1.bf16.msra.mxu1 %v1097_v44  ;;  %699 = vmatprep.subr.bf16.mxu0 %v1098_v45 }
  0x42   : > { %1015 = vmatprep.subr.bf16.mxu1 %v1098_v45 }
  0x44   : > { %700 = vmatpush1.bf16.msra.mxu0 %v1100_v46 }
  0x45   : > { %1031 = vmatpush1.bf16.msra.mxu1 %v1100_v46  ;;  %701 = vmatprep.subr.bf16.mxu0 %v1101_v47 }
  0x46   : > { %1016 = vmatprep.subr.bf16.mxu1 %v1101_v47 }
  0x48   : > { %702 = vmatpush1.bf16.msra.mxu0 %v1103_v48 }
  0x49   : > { %1032 = vmatpush1.bf16.msra.mxu1 %v1103_v48  ;;  %703 = vmatprep.subr.bf16.mxu0 %v1104_v49 }
  0x4a   : > { %1017 = vmatprep.subr.bf16.mxu1 %v1104_v49 }
  0x4c   : > { %704 = vmatpush1.bf16.msra.mxu0 %v1106_v50 }
  0x4d   : > { %1033 = vmatpush1.bf16.msra.mxu1 %v1106_v50  ;;  %705 = vmatprep.subr.bf16.mxu0 %v1107_v51 }
  0x4e   : > { %1018 = vmatprep.subr.bf16.mxu1 %v1107_v51 }
  0x50   : > { %706 = vmatpush2.bf16.msra.mxu0 %v1109_v52 }
  0x51   : > { %1034 = vmatpush2.bf16.msra.mxu1 %v1109_v52  ;;  %707 = vmatprep.subr.bf16.mxu0 %v1110_v53 }
  0x52   : > { %1019 = vmatprep.subr.bf16.mxu1 %v1110_v53 }
  0x54   : > { %708 = vmatpush2.bf16.msra.mxu0 %v1112_v54 }
  0x55   : > { %1035 = vmatpush2.bf16.msra.mxu1 %v1112_v54  ;;  %709 = vmatprep.subr.bf16.mxu0 %v1113_v55 }
  0x56   : > { %1020 = vmatprep.subr.bf16.mxu1 %v1113_v55 }
  0x58   : > { %710 = vmatpush2.bf16.msra.mxu0 %v1115_v56 }
  0x59   : > { %1036 = vmatpush2.bf16.msra.mxu1 %v1115_v56  ;;  %711 = vmatprep.subr.bf16.mxu0 %v1116_v57 }
  0x5a   : > { %1021 = vmatprep.subr.bf16.mxu1 %v1116_v57 }
  0x5c   : > { %712 = vmatpush2.bf16.msra.mxu0 %v1118_v58 }
  0x5d   : > { %1037 = vmatpush2.bf16.msra.mxu1 %v1118_v58  ;;  %713 = vmatprep.subr.bf16.mxu0 %v1119_v59 }
  0x5e   : > { %1022 = vmatprep.subr.bf16.mxu1 %v1119_v59 }
  0x60   : > { %714 = vmatpush2.bf16.msra.mxu0 %v1121_v60 }
  0x61   : > { %1038 = vmatpush2.bf16.msra.mxu1 %v1121_v60  ;;  %715 = vmatprep.subr.bf16.mxu0 %v1122_v61 }
  0x62   : > { %1023 = vmatprep.subr.bf16.mxu1 %v1122_v61 }
  0x64   : > { %716 = vmatpush2.bf16.msra.mxu0 %v1124_v62 }
  0x65   : > { %1039 = vmatpush2.bf16.msra.mxu1 %v1124_v62  ;;  %717 = vmatprep.subr.bf16.mxu0 %v1125_v63 }
  0x66   : > { %1024 = vmatprep.subr.bf16.mxu1 %v1125_v63 }
  0x68   : > { %718 = vmatpush2.bf16.msra.mxu0 %v1127_v0 }
  0x69   : > { %1040 = vmatpush2.bf16.msra.mxu1 %v1127_v0  ;;  %719 = vmatprep.subr.bf16.mxu0 %v1128_v1 }
  0x6a   : > { %1025 = vmatprep.subr.bf16.mxu1 %v1128_v1 }
  0x6c   : > { %720 = vmatpush2.bf16.msra.mxu0 %v1130_v2 }
  0x6d   : > { %1041 = vmatpush2.bf16.msra.mxu1 %v1130_v2 }
  0x6f   : > { %722 = vmatmul.mubr.bf16.vlgmr.msra.gmra.mxu0 %v1131_v3 }
  0x70   : > { %732 = vmatmul.mubr.bf16.vlgmr.msra.gmra.mxu1 %v970_v4 }
 0x12f   : > { %v723_v14 = vpop.f32.mrf.mxu0 }
 0x130   : > { %v733_v15 = vpop.f32.mrf.mxu1  ;;  %v773_v16 = vmul.f32 %v766_v11, %v723_v14 }
 0x131   : > { %v777_v17 = vmul.f32 %v766_v11, %v733_v15  ;;  %v725_v19 = vpop.f32.mrf.mxu0 }
 0x132   : > { %v735_v20 = vpop.f32.mrf.mxu1  ;;  %v791_v21 = vadd.f32 %v784_v12, %v773_v16  ;;  %v774_v23 = vmul.f32 %v770_v13, %v725_v19 }
 0x133   : > { %v795_v22 = vadd.f32 %v784_v12, %v777_v17  ;;  %v778_v24 = vmul.f32 %v770_v13, %v735_v20  ;;  %v727_v25 = vpop.f32.mrf.mxu0 }
 0x134   : > { %v737_v26 = vpop.f32.mrf.mxu1  ;;  %797 = vst [vmem:[%s434_s6] sm:$0xff] %v791_v21  ;;  %v792_v27 = vadd.f32 %v788_v18, %v774_v23  ;;  %v775_v29 = vmul.f32 %v766_v11, %v727_v25 }
 0x135   : > { %801 = vst [vmem:[%s434_s6 + $0x20] sm:$0xff] %v795_v22  ;;  %v796_v28 = vadd.f32 %v788_v18, %v778_v24  ;;  %v729_v30 = vpop.f32.mrf.mxu0 }
 0x136   : > { %v738_v31 = vpop.f32.mrf.mxu1  ;;  %798 = vst [vmem:[%s434_s6 + $0x8] sm:$0xff] %v792_v27  ;;  %v793_v32 = vadd.f32 %v784_v12, %v775_v29  ;;  %v776_v33 = vmul.f32 %v770_v13, %v729_v30  ;;  %809 = sbr.rel (!%p1236_p6) target bundleno = 323 (0x143), region = 86 }
 0x137   : > { %802 = vst [vmem:[%s434_s6 + $0x28] sm:$0xff] %v796_v28 }
 0x138   : > { %799 = vst [vmem:[%s434_s6 + $0x10] sm:$0xff] %v793_v32  ;;  %v794_v34 = vadd.f32 %v788_v18, %v776_v33 }
 0x13a   : > { %800 = vst [vmem:[%s434_s6 + $0x18] sm:$0xff] %v794_v34 }
 0x13b   : > { %v828_v35 = vld [vmem:[%s434_s6] sm:$0xff] }
 0x13c   : > { %v836_v39 = vld [vmem:[%s434_s6 + $0x20] sm:$0xff]  ;;  %829 = vst [vmem:[%s815_s9] sm:$0xff] %v828_v35 }
 0x13d   : > { %v830_v36 = vld [vmem:[%s434_s6 + $0x8] sm:$0xff]  ;;  %837 = vst [vmem:[%s815_s9 + $0x40] sm:$0xff] %v836_v39 }
 0x13e   : > { %v838_v40 = vld [vmem:[%s434_s6 + $0x28] sm:$0xff]  ;;  %831 = vst [vmem:[%s815_s9 + $0x8] sm:$0xff] %v830_v36 }
 0x13f   : > { %v832_v37 = vld [vmem:[%s434_s6 + $0x10] sm:$0xff]  ;;  %839 = vst [vmem:[%s815_s9 + $0x48] sm:$0xff] %v838_v40 }
 0x140   : > { %833 = vst [vmem:[%s815_s9 + $0x20] sm:$0xff] %v832_v37 }
 0x141   : > { %v834_v38 = vld [vmem:[%s434_s6 + $0x18] sm:$0xff] }
 0x142   : > { %835 = vst [vmem:[%s815_s9 + $0x28] sm:$0xff] %v834_v38 }
 0x143 PF: > { %s14_s19 = sadd.s32 1, %s1174_s19   ;;  %s1407_s15 = smov %s1162_s16 }
 0x144   : > { %p11_p12 = scmp.ge.s32.totalorder %s14_s19, 4   ;;  %s1408_s16 = smov %s1241_s25 }
 0x145   : > { %s1409_s17 = smov %s1170_s18  ;;  %s1410_s18 = smov %s1412_s20 }
 0x146   :  { %13 = sbr.rel (!%p11_p12) target bundleno = 3 (0x3), region = 149 }

// kernel: forward.29
= control target key start
LH: loop header
LB: loop body
LE: loop exit
PB: predicated region body
PF: predicated region fallthrough
CT: control target
= control target key end

     0   :  { %s1097_s18 = smov 0   ;;  %s1099_s19 = smov 0   ;;  %s1247_s0 = inlined_call_operand.vmem [shape: bf16[24,128], index: 0, kind: input, shape index: {}]   ;;  %s1248_s1 = inlined_call_operand.vmem [shape: bf16[128,512], index: 1, kind: input, shape index: {}]   ;;  %s1249_s2 = inlined_call_operand.vmem [shape: f32[1,512], index: 2, kind: input, shape index: {}]   ;;  %s1250_s3 = inlined_call_operand.vmem [shape: f32[1,512], index: 3, kind: input, shape index: {}]   ;;  %s1251_s4 = inlined_call_operand.vmem [shape: f32[24,512], index: 4, kind: input, shape index: {}]   ;;  %s1252_s5 = inlined_call_operand.vmem [shape: f32[24,512], index: 5, kind: output, shape index: {}]  }
   0x1   :  { %s1101_s20 = smov 0   ;;  %s1103_s21 = smov 0  }
   0x2   :  { %s1105_s22 = smov 0  }
   0x3 LB: > { %s30_s23 = sadd.s32 1, %s1060_s21  ;;  %s902_s24 = sadd.s32 4294967295, %s1064_s22   ;;  %s1064_s22 = sphi %s1105_s22, %s15_s22   ;;  %s1060_s21 = sphi %s1103_s21, %s1258_s21   ;;  %s1056_s20 = sphi %s1101_s20, %s1257_s20   ;;  %s1052_s19 = sphi %s1099_s19, %s1256_s19   ;;  %s1048_s18 = sphi %s1097_s18, %s1255_s18  }
   0x4   : > { %p32_p0 = scmp.ge.s32.totalorder %s30_s23, 2  ;;  %p78_p1 = scmp.ne.s32.totalorder %s1052_s19, %s1048_s18 }
   0x5   : > { %p79_p2 = scmp.eq.s32.totalorder %s1064_s22, 0  ;;  %p190_p4 = scmp.eq.s32.totalorder %s902_s24, 1 }
   0x6   : > { %s1260_s23 = smov (%p32_p0, %s30_s23), 0  ;;  %s71_s27 = sadd.s32 1, %s1052_s19 }
   0x7   : > { %p1129_p3 = por %p79_p2, %p78_p1  ;;  %s67_s26 = ssub.s32 %s1060_s21, %s1260_s23 }
   0x8   : > { %p69_p5 = scmp.eq.s32.totalorder %s67_s26, 0  ;;  %p1136_p6 = por %p190_p4, %p78_p1 }
   0x9   : > { %p906_p7 = scmp.ge.s32.totalorder %s1064_s22, 2 }
   0xa   : > { %s1141_s29 = scalar_select %p69_p5, %s1052_s19, %s71_s27  }
   0xb   : > { %224 = sbr.rel (%p906_p7) target bundleno = 35 (0x23), region = 20 }
  0x10   : > { %227 = sbr.rel (!%p1129_p3) target bundleno = 28 (0x1c), region = 24  ;;  %s229_s30 = sand.u32 (%p1129_p3), 1, %s1052_s19  }
  0x11   : > { %s938_s6 = sshll.u32 (%p1129_p3), %s1060_s21, 3  ;;  %s907_s7 = sshll.u32 (%p1129_p3), %s229_s30, 7 }
  0x12   : > { %s1151_s10 = scalar_lea.vmem (%p1129_p3), %s1248_s1, %s938_s6  ;;  %s231_s11 = scalar_lea.vmem (%p1129_p3), [#allocation3], %s907_s7 }
  0x13   : > { %v296_v0 = vld [vmem:[%s1151_s10] sm:$0xff] (%p1129_p3)  ;;  %v298_v1 = vld [vmem:[%s1151_s10 + $0x10] sm:$0xff] (%p1129_p3) }
  0x14   : > { %v300_v2 = vld [vmem:[%s1151_s10 + $0x20] sm:$0xff] (%p1129_p3)  ;;  %297 = vst [vmem:[%s231_s11] sm:$0xff] (%p1129_p3), %v296_v0  ;;  %299 = vst [vmem:[%s231_s11 + $0x8] sm:$0xff] (%p1129_p3), %v298_v1  ;;  %v302_v3 = vld [vmem:[%s1151_s10 + $0x30] sm:$0xff] (%p1129_p3) }
  0x15   : > { %301 = vst [vmem:[%s231_s11 + $0x10] sm:$0xff] %v300_v2  ;;  %v304_v4 = vld [vmem:[%s1151_s10 + $0x40] sm:$0xff]  ;;  %v306_v5 = vld [vmem:[%s1151_s10 + $0x50] sm:$0xff]  ;;  %303 = vst [vmem:[%s231_s11 + $0x18] sm:$0xff] %v302_v3 }
  0x16   : > { %305 = vst [vmem:[%s231_s11 + $0x20] sm:$0xff] %v304_v4  ;;  %307 = vst [vmem:[%s231_s11 + $0x28] sm:$0xff] %v306_v5  ;;  %v308_v6 = vld [vmem:[%s1151_s10 + $0x60] sm:$0xff]  ;;  %v310_v7 = vld [vmem:[%s1151_s10 + $0x70] sm:$0xff] }
  0x17   : > { %v312_v8 = vld [vmem:[%s1151_s10 + $0x80] sm:$0xff]  ;;  %309 = vst [vmem:[%s231_s11 + $0x30] sm:$0xff] %v308_v6  ;;  %311 = vst [vmem:[%s231_s11 + $0x38] sm:$0xff] %v310_v7  ;;  %v314_v9 = vld [vmem:[%s1151_s10 + $0x90] sm:$0xff] }
  0x18   : > { %313 = vst [vmem:[%s231_s11 + $0x40] sm:$0xff] %v312_v8  ;;  %v316_v10 = vld [vmem:[%s1151_s10 + $0xa0] sm:$0xff]  ;;  %v318_v11 = vld [vmem:[%s1151_s10 + $0xb0] sm:$0xff]  ;;  %315 = vst [vmem:[%s231_s11 + $0x48] sm:$0xff] %v314_v9 }
  0x19   : > { %317 = vst [vmem:[%s231_s11 + $0x50] sm:$0xff] %v316_v10  ;;  %319 = vst [vmem:[%s231_s11 + $0x58] sm:$0xff] %v318_v11  ;;  %v320_v12 = vld [vmem:[%s1151_s10 + $0xc0] sm:$0xff]  ;;  %v322_v13 = vld [vmem:[%s1151_s10 + $0xd0] sm:$0xff] }
  0x1a   : > { %v324_v14 = vld [vmem:[%s1151_s10 + $0xe0] sm:$0xff]  ;;  %321 = vst [vmem:[%s231_s11 + $0x60] sm:$0xff] %v320_v12  ;;  %323 = vst [vmem:[%s231_s11 + $0x68] sm:$0xff] %v322_v13  ;;  %v326_v15 = vld [vmem:[%s1151_s10 + $0xf0] sm:$0xff] }
  0x1b   : > { %325 = vst [vmem:[%s231_s11 + $0x70] sm:$0xff] %v324_v14  ;;  %327 = vst [vmem:[%s231_s11 + $0x78] sm:$0xff] %v326_v15 }
  0x1c PF: > { %349 = sbr.rel (!%p1129_p3) target bundleno = 35 (0x23), region = 70  ;;  %s351_s12 = sand.u32 (%p1129_p3), 1, %s1052_s19  }
  0x1d   : > { %s939_s13 = sshll.u32 (%p1129_p3), %s1060_s21, 4  ;;  %s957_s14 = smul.u32 (%p1129_p3), 48, %s351_s12 }
  0x1e   : > { %s359_s17 = scalar_lea.vmem (%p1129_p3), %s1251_s4, %s939_s13 }
  0x1f   : > { %v372_v16 = vld [vmem:[%s359_s17] sm:$0xff] (%p1129_p3)  ;;  %v374_v17 = vld [vmem:[%s359_s17 + $0x8] sm:$0xff] (%p1129_p3)  ;;  %s353_s24 = scalar_lea.vmem (%p1129_p3), [#allocation4], %s957_s14 }
  0x20   : > { %v376_v18 = vld [vmem:[%s359_s17 + $0x20] sm:$0xff] (%p1129_p3)  ;;  %v378_v19 = vld [vmem:[%s359_s17 + $0x28] sm:$0xff] (%p1129_p3)  ;;  %373 = vst [vmem:[%s353_s24] sm:$0xff] (%p1129_p3), %v372_v16  ;;  %375 = vst [vmem:[%s353_s24 + $0x8] sm:$0xff] (%p1129_p3), %v374_v17 }
  0x21   : > { %v380_v20 = vld [vmem:[%s359_s17 + $0x40] sm:$0xff]  ;;  %v382_v21 = vld [vmem:[%s359_s17 + $0x48] sm:$0xff]  ;;  %377 = vst [vmem:[%s353_s24 + $0x10] sm:$0xff] %v376_v18  ;;  %379 = vst [vmem:[%s353_s24 + $0x18] sm:$0xff] %v378_v19 }
  0x22   : > { %381 = vst [vmem:[%s353_s24 + $0x20] sm:$0xff] %v380_v20  ;;  %383 = vst [vmem:[%s353_s24 + $0x28] sm:$0xff] %v382_v21 }
  0x23 PF: > { %p912_p8 = scmp.ge.s32.totalorder %s1064_s22, 1  ;;  %p388_p9 = scmp.lt.s32.totalorder %s1064_s22, 3 }
  0x25   : > { %p389_p10 = pnand %p912_p8, %p388_p9 }
  0x26   : > { %s395_s25 = sand.u32 (!%p389_p10), 1, %s1048_s18   ;;  %s914_s9 = sshll.u32 (!%p389_p10), %s1056_s20, 1 }
  0x27   : > { %392 = sbr.rel (%p389_p10) target bundleno = 295 (0x127), region = 93  ;;  %s913_s26 = sshll.u32 (!%p389_p10), %s395_s25, 7 }
  0x28   : > { %s1181_s27 = scalar_lea.vmem (!%p389_p10), [#allocation3], %s913_s26  ;;  %p460_p11 = scmp.lt.s32.totalorder (!%p389_p10), %s914_s9, 3 }
  0x29   : > { %s1214_s16 = smul.u32 (!%p389_p10), 48, %s395_s25 }
  0x2b   : > { %s1217_s17 = scalar_lea.vmem (!%p389_p10), [#allocation4], %s1214_s16  ;;  %s447_s18 = scalar_lea.vmem (!%p389_p10), [#allocation5], %s1214_s16 }
  0x2c   : > { %v1066_v22 = vmov 0   ;;  %v1000_v23 = vld [vmem:[%s1181_s27 + $0x74] ss:$8 sps:$4 sm:$0xff]   ;;  %v1002_v24 = vld [vmem:[%s1181_s27 + $0x70] ss:$8 sps:$4 sm:$0xff]   ;;  %v1024_v39 = vld [vmem:[%s1247_s0] sm:$0xff]   ;;  %v673_v41 = vlaneseq }
  0x2d   : > { %631 = vmatprep.mubr.bf16.mxu0 %v1066_v22  ;;  %641 = vmatprep.mubr.bf16.mxu1 %v1066_v22  ;;  %v1003_v25 = vld [vmem:[%s1181_s27 + $0x64] ss:$8 sps:$4 sm:$0xff]   ;;  %v1005_v26 = vld [vmem:[%s1181_s27 + $0x60] ss:$8 sps:$4 sm:$0xff]   ;;  %v1006_v27 = vld [vmem:[%s1181_s27 + $0x54] ss:$8 sps:$4 sm:$0xff]  }
  0x2e   : > { %599 = vmatprep.subr.bf16.mxu0 %v1000_v23  ;;  %941 = vmatprep.subr.bf16.mxu1 %v1000_v23  ;;  %v1008_v28 = vld [vmem:[%s1181_s27 + $0x50] ss:$8 sps:$4 sm:$0xff]   ;;  %v1009_v29 = vld [vmem:[%s1181_s27 + $0x44] ss:$8 sps:$4 sm:$0xff]   ;;  %v1011_v30 = vld [vmem:[%s1181_s27 + $0x40] ss:$8 sps:$4 sm:$0xff]  }
  0x2f   : > { %600 = vmatpush1.bf16.msra.mxu0 %v1002_v24  ;;  %949 = vmatpush1.bf16.msra.mxu1 %v1002_v24  ;;  %v1012_v31 = vld [vmem:[%s1181_s27 + $0x34] ss:$8 sps:$4 sm:$0xff]   ;;  %v1014_v32 = vld [vmem:[%s1181_s27 + $0x30] ss:$8 sps:$4 sm:$0xff]   ;;  %v1015_v33 = vld [vmem:[%s1181_s27 + $0x24] ss:$8 sps:$4 sm:$0xff]  }
  0x30   : > { %601 = vmatprep.subr.bf16.mxu0 %v1003_v25  ;;  %942 = vmatprep.subr.bf16.mxu1 %v1003_v25  ;;  %v1017_v34 = vld [vmem:[%s1181_s27 + $0x20] ss:$8 sps:$4 sm:$0xff]   ;;  %v1018_v35 = vld [vmem:[%s1181_s27 + $0x14] ss:$8 sps:$4 sm:$0xff]   ;;  %v1020_v36 = vld [vmem:[%s1181_s27 + $0x10] ss:$8 sps:$4 sm:$0xff]  }
  0x31   : > { %v1021_v37 = vld [vmem:[%s1181_s27 + $0x4] ss:$8 sps:$4 sm:$0xff]   ;;  %v1023_v38 = vld [vmem:[%s1181_s27] ss:$8 sps:$4 sm:$0xff]   ;;  %s1262_s9 = smov (!%p460_p11, %s914_s9), 3  ;;  %v674_v42 = vshrl.u32 %v673_v41, 7 }
  0x32   : > { %v1025_v40 = vld [vmem:[%s1247_s0 + $0x8] ss:$0 sps:$4 sm:$0xff]   ;;  %s462_s12 = scalar_lea.vmem %s1249_s2, %s1262_s9  ;;  %s467_s15 = scalar_lea.vmem %s1250_s3, %s1262_s9  ;;  %v707_v55 = vld [vmem:[%s1217_s17] sm:$0xff]  ;;  %v709_v14 = vld [vmem:[%s1217_s17 + $0x10] sm:$0xff] }
  0x33   : > { %602 = vmatpush1.bf16.msra.mxu0 %v1005_v26  ;;  %950 = vmatpush1.bf16.msra.mxu1 %v1005_v26  ;;  %v675_v43 = vsub.s32 0, %v674_v42  ;;  %v671_v44 = vld [vmem:[%s462_s12] sm:$0x3]  ;;  %v679_v45 = vsub.s32 1, %v674_v42  ;;  %v708_v63 = vld [vmem:[%s1217_s17 + $0x8] sm:$0xff]  ;;  %v710_v19 = vld [vmem:[%s1217_s17 + $0x18] sm:$0xff] }
  0x34   : > { %603 = vmatprep.subr.bf16.mxu0 %v1006_v27  ;;  %943 = vmatprep.subr.bf16.mxu1 %v1006_v27  ;;  %v689_v46 = vld [vmem:[%s467_s15] sm:$0x3]  ;;  %v712_v0 = vld [vmem:[%s1217_s17 + $0x28] sm:$0xff]  ;;  %s940_s24 = sshll.u32 (%p1136_p6), %s1056_s20, 4 }
  0x35   : > { %v676_v47 = vrot.slane %v671_v44, %v675_v43  ;;  %v694_v48 = vrot.slane %v689_v46, %v675_v43  ;;  %v680_v49 = vrot.slane %v671_v44, %v679_v45  ;;  %v698_v54 = vrot.slane %v689_v46, %v679_v45  ;;  %v711_v56 = vld [vmem:[%s1217_s17 + $0x20] sm:$0xff]  ;;  %s743_s27 = scalar_lea.vmem (%p1136_p6), %s1252_s5, %s940_s24 }
  0x37   : > { %604 = vmatpush1.bf16.msra.mxu0 %v1008_v28  ;;  %951 = vmatpush1.bf16.msra.mxu1 %v1008_v28 }
  0x38   : > { %605 = vmatprep.subr.bf16.mxu0 %v1009_v29  ;;  %944 = vmatprep.subr.bf16.mxu1 %v1009_v29 }
  0x3b   : > { %606 = vmatpush1.bf16.msra.mxu0 %v1011_v30  ;;  %952 = vmatpush1.bf16.msra.mxu1 %v1011_v30 }
  0x3c   : > { %607 = vmatprep.subr.bf16.mxu0 %v1012_v31  ;;  %945 = vmatprep.subr.bf16.mxu1 %v1012_v31 }
  0x3f   : > { %608 = vmatpush1.bf16.msra.mxu0 %v1014_v32  ;;  %953 = vmatpush1.bf16.msra.mxu1 %v1014_v32 }
  0x40   : > { %609 = vmatprep.subr.bf16.mxu0 %v1015_v33  ;;  %946 = vmatprep.subr.bf16.mxu1 %v1015_v33 }
  0x43   : > { %610 = vmatpush1.bf16.msra.mxu0 %v1017_v34  ;;  %954 = vmatpush1.bf16.msra.mxu1 %v1017_v34 }
  0x44   : > { %611 = vmatprep.subr.bf16.mxu0 %v1018_v35  ;;  %947 = vmatprep.subr.bf16.mxu1 %v1018_v35 }
  0x47   : > { %612 = vmatpush1.bf16.msra.mxu0 %v1020_v36  ;;  %955 = vmatpush1.bf16.msra.mxu1 %v1020_v36 }
  0x48   : > { %613 = vmatprep.subr.bf16.mxu0 %v1021_v37  ;;  %948 = vmatprep.subr.bf16.mxu1 %v1021_v37 }
  0x4b   : > { %614 = vmatpush1.bf16.msra.mxu0 %v1023_v38  ;;  %956 = vmatpush1.bf16.msra.mxu1 %v1023_v38 }
  0x4e   : > { %632 = vmatmul.mubr.bf16.vlgmr.msra.gmra.mxu0 %v1024_v39  ;;  %642 = vmatmul.mubr.bf16.vlgmr.msra.gmra.mxu1 %v1025_v40 }
 0x10e   : > { %v633_v50 = vpop.f32.mrf.mxu0  ;;  %v643_v51 = vpop.f32.mrf.mxu1 }
 0x10f   : > { %v683_v52 = vmul.f32 %v676_v47, %v633_v50  ;;  %v687_v53 = vmul.f32 %v676_v47, %v643_v51 }
 0x110   : > { %v635_v57 = vpop.f32.mrf.mxu0  ;;  %v645_v58 = vpop.f32.mrf.mxu1 }
 0x111   : > { %v701_v59 = vadd.f32 %v694_v48, %v683_v52  ;;  %v705_v60 = vadd.f32 %v694_v48, %v687_v53  ;;  %v684_v61 = vmul.f32 %v680_v49, %v635_v57  ;;  %v688_v62 = vmul.f32 %v680_v49, %v645_v58 }
 0x112   : > { %v637_v1 = vpop.f32.mrf.mxu0  ;;  %v647_v2 = vpop.f32.mrf.mxu1 }
 0x113   : > { %v713_v3 = vadd.f32 %v707_v55, %v701_v59  ;;  %v717_v4 = vadd.f32 %v711_v56, %v705_v60  ;;  %v702_v5 = vadd.f32 %v698_v54, %v684_v61  ;;  %v706_v6 = vadd.f32 %v698_v54, %v688_v62 }
 0x114   : > { %v685_v7 = vmul.f32 %v676_v47, %v637_v1  ;;  %v639_v8 = vpop.f32.mrf.mxu0  ;;  %v648_v9 = vpop.f32.mrf.mxu1 }
 0x115   : > { %v719_v10 = vmax.f32 %v713_v3, 0.0  ;;  %v723_v11 = vmax.f32 %v717_v4, 0.0  ;;  %v714_v12 = vadd.f32 %v708_v63, %v702_v5  ;;  %v718_v13 = vadd.f32 %v712_v0, %v706_v6 }
 0x116   : > { %v703_v15 = vadd.f32 %v694_v48, %v685_v7  ;;  %v686_v16 = vmul.f32 %v680_v49, %v639_v8 }
 0x117   : > { %725 = vst [vmem:[%s447_s18] sm:$0xff] %v719_v10  ;;  %729 = vst [vmem:[%s447_s18 + $0x20] sm:$0xff] %v723_v11  ;;  %v720_v17 = vmax.f32 %v714_v12, 0.0  ;;  %v724_v18 = vmax.f32 %v718_v13, 0.0 }
 0x118   : > { %v715_v20 = vadd.f32 %v709_v14, %v703_v15  ;;  %v704_v21 = vadd.f32 %v698_v54, %v686_v16 }
 0x119   : > { %726 = vst [vmem:[%s447_s18 + $0x8] sm:$0xff] %v720_v17  ;;  %730 = vst [vmem:[%s447_s18 + $0x28] sm:$0xff] %v724_v18 }
 0x11a   : > { %v721_v22 = vmax.f32 %v715_v20, 0.0  ;;  %v716_v23 = vadd.f32 %v710_v19, %v704_v21  ;;  %737 = sbr.rel (!%p1136_p6) target bundleno = 295 (0x127), region = 113 }
 0x11c   : > { %727 = vst [vmem:[%s447_s18 + $0x10] sm:$0xff] %v721_v22  ;;  %v722_v24 = vmax.f32 %v716_v23, 0.0 }
 0x11e   : > { %728 = vst [vmem:[%s447_s18 + $0x18] sm:$0xff] %v722_v24  ;;  %v756_v25 = vld [vmem:[%s447_s18] sm:$0xff] (%p1136_p6) }
 0x11f   : > { %v764_v29 = vld [vmem:[%s447_s18 + $0x20] sm:$0xff]  ;;  %757 = vst [vmem:[%s743_s27] sm:$0xff] %v756_v25 }
 0x120   : > { %v758_v26 = vld [vmem:[%s447_s18 + $0x8] sm:$0xff]  ;;  %765 = vst [vmem:[%s743_s27 + $0x40] sm:$0xff] %v764_v29 }
 0x121   : > { %v766_v30 = vld [vmem:[%s447_s18 + $0x28] sm:$0xff]  ;;  %759 = vst [vmem:[%s743_s27 + $0x8] sm:$0xff] %v758_v26 }
 0x122   : > { %767 = vst [vmem:[%s743_s27 + $0x48] sm:$0xff] %v766_v30 }
 0x123   : > { %v760_v27 = vld [vmem:[%s447_s18 + $0x10] sm:$0xff] }
 0x124   : > { %761 = vst [vmem:[%s743_s27 + $0x20] sm:$0xff] %v760_v27 }
 0x125   : > { %v762_v28 = vld [vmem:[%s447_s18 + $0x18] sm:$0xff] }
 0x126   : > { %763 = vst [vmem:[%s743_s27 + $0x28] sm:$0xff] %v762_v28 }
 0x127 PF: > { %s15_s22 = sadd.s32 1, %s1064_s22   ;;  %s1255_s18 = smov %s1052_s19 }
 0x128   : > { %p12_p12 = scmp.ge.s32.totalorder %s15_s22, 4   ;;  %s1256_s19 = smov %s1141_s29 }
 0x129   : > { %s1257_s20 = smov %s1060_s21  ;;  %s1258_s21 = smov %s1260_s23 }
 0x12a   :  { %14 = sbr.rel (!%p12_p12) target bundleno = 3 (0x3), region = 184 }

// kernel: forward.31
= control target key start
LH: loop header
LB: loop body
LE: loop exit
PB: predicated region body
PF: predicated region fallthrough
CT: control target
= control target key end

     0   :  { %s1069_s1 = inlined_call_operand.vmem [shape: bf16[512,256], index: 1, kind: input, shape index: {}]   ;;  %s1070_s0 = inlined_call_operand.vmem [shape: bf16[24,512], index: 0, kind: input, shape index: {}]   ;;  %s1071_s2 = inlined_call_operand.vmem [shape: f32[1,256], index: 2, kind: input, shape index: {}]   ;;  %s1072_s3 = inlined_call_operand.vmem [shape: f32[1,256], index: 3, kind: input, shape index: {}]   ;;  %s1073_s4 = inlined_call_operand.vmem [shape: f32[24,256], index: 4, kind: output, shape index: {}]  }
   0x1   :  { %v704_v0 = vld [vmem:[%s1069_s1 + $0x74] ss:$8 sps:$4 sm:$0xff]   ;;  %v708_v2 = vld [vmem:[%s1069_s1 + $0x70] ss:$8 sps:$4 sm:$0xff]   ;;  %v710_v4 = vld [vmem:[%s1069_s1 + $0x64] ss:$8 sps:$4 sm:$0xff]  }
   0x2   :  { %v706_v1 = vld [vmem:[%s1069_s1 + $0x174] ss:$8 sps:$4 sm:$0xff]   ;;  %457 = vmatprep.subr.bf16.mxu0 %v704_v0  ;;  %v709_v3 = vld [vmem:[%s1069_s1 + $0x170] ss:$8 sps:$4 sm:$0xff]   ;;  %v712_v5 = vld [vmem:[%s1069_s1 + $0x164] ss:$8 sps:$4 sm:$0xff]  }
   0x3   :  { %508 = vmatprep.subr.bf16.mxu1 %v706_v1  ;;  %458 = vmatpush1.bf16.msra.mxu0 %v708_v2  ;;  %v714_v6 = vld [vmem:[%s1069_s1 + $0x60] ss:$8 sps:$4 sm:$0xff]   ;;  %v716_v8 = vld [vmem:[%s1069_s1 + $0x54] ss:$8 sps:$4 sm:$0xff]   ;;  %v720_v10 = vld [vmem:[%s1069_s1 + $0x50] ss:$8 sps:$4 sm:$0xff]  }
   0x4   :  { %509 = vmatpush1.bf16.msra.mxu1 %v709_v3  ;;  %459 = vmatprep.subr.bf16.mxu0 %v710_v4  ;;  %v715_v7 = vld [vmem:[%s1069_s1 + $0x160] ss:$8 sps:$4 sm:$0xff]   ;;  %v718_v9 = vld [vmem:[%s1069_s1 + $0x154] ss:$8 sps:$4 sm:$0xff]   ;;  %v721_v11 = vld [vmem:[%s1069_s1 + $0x150] ss:$8 sps:$4 sm:$0xff]  }
   0x5   :  { %510 = vmatprep.subr.bf16.mxu1 %v712_v5  ;;  %v722_v12 = vld [vmem:[%s1069_s1 + $0x44] ss:$8 sps:$4 sm:$0xff]   ;;  %v726_v14 = vld [vmem:[%s1069_s1 + $0x40] ss:$8 sps:$4 sm:$0xff]   ;;  %v728_v16 = vld [vmem:[%s1069_s1 + $0x34] ss:$8 sps:$4 sm:$0xff]  }
   0x6   :  { %v724_v13 = vld [vmem:[%s1069_s1 + $0x144] ss:$8 sps:$4 sm:$0xff]   ;;  %v727_v15 = vld [vmem:[%s1069_s1 + $0x140] ss:$8 sps:$4 sm:$0xff]   ;;  %v730_v17 = vld [vmem:[%s1069_s1 + $0x134] ss:$8 sps:$4 sm:$0xff]  }
   0x7   :  { %460 = vmatpush1.bf16.msra.mxu0 %v714_v6  ;;  %v732_v18 = vld [vmem:[%s1069_s1 + $0x30] ss:$8 sps:$4 sm:$0xff]   ;;  %v734_v20 = vld [vmem:[%s1069_s1 + $0x24] ss:$8 sps:$4 sm:$0xff]   ;;  %v738_v22 = vld [vmem:[%s1069_s1 + $0x20] ss:$8 sps:$4 sm:$0xff]  }
   0x8   :  { %511 = vmatpush1.bf16.msra.mxu1 %v715_v7  ;;  %461 = vmatprep.subr.bf16.mxu0 %v716_v8  ;;  %v733_v19 = vld [vmem:[%s1069_s1 + $0x130] ss:$8 sps:$4 sm:$0xff]   ;;  %v736_v21 = vld [vmem:[%s1069_s1 + $0x124] ss:$8 sps:$4 sm:$0xff]   ;;  %v739_v23 = vld [vmem:[%s1069_s1 + $0x120] ss:$8 sps:$4 sm:$0xff]  }
   0x9   :  { %512 = vmatprep.subr.bf16.mxu1 %v718_v9  ;;  %v740_v24 = vld [vmem:[%s1069_s1 + $0x14] ss:$8 sps:$4 sm:$0xff]   ;;  %v744_v26 = vld [vmem:[%s1069_s1 + $0x10] ss:$8 sps:$4 sm:$0xff]   ;;  %v746_v28 = vld [vmem:[%s1069_s1 + $0x4] ss:$8 sps:$4 sm:$0xff]  }
   0xa   :  { %v742_v25 = vld [vmem:[%s1069_s1 + $0x114] ss:$8 sps:$4 sm:$0xff]   ;;  %v745_v27 = vld [vmem:[%s1069_s1 + $0x110] ss:$8 sps:$4 sm:$0xff]   ;;  %v748_v29 = vld [vmem:[%s1069_s1 + $0x104] ss:$8 sps:$4 sm:$0xff]  }
   0xb   :  { %462 = vmatpush1.bf16.msra.mxu0 %v720_v10  ;;  %v750_v30 = vld [vmem:[%s1069_s1] ss:$8 sps:$4 sm:$0xff]   ;;  %v752_v32 = vld [vmem:[%s1069_s1 + $0xf4] ss:$8 sps:$4 sm:$0xff]   ;;  %v756_v34 = vld [vmem:[%s1069_s1 + $0xf0] ss:$8 sps:$4 sm:$0xff]   ;;  %v582_v10 = vlaneseq }
   0xc   :  { %513 = vmatpush1.bf16.msra.mxu1 %v721_v11  ;;  %463 = vmatprep.subr.bf16.mxu0 %v722_v12  ;;  %v751_v31 = vld [vmem:[%s1069_s1 + $0x100] ss:$8 sps:$4 sm:$0xff]   ;;  %v754_v33 = vld [vmem:[%s1069_s1 + $0x1f4] ss:$8 sps:$4 sm:$0xff]   ;;  %v757_v35 = vld [vmem:[%s1069_s1 + $0x1f0] ss:$8 sps:$4 sm:$0xff]  }
   0xd   :  { %514 = vmatprep.subr.bf16.mxu1 %v724_v13  ;;  %v758_v36 = vld [vmem:[%s1069_s1 + $0xe4] ss:$8 sps:$4 sm:$0xff]   ;;  %v762_v38 = vld [vmem:[%s1069_s1 + $0xe0] ss:$8 sps:$4 sm:$0xff]   ;;  %v764_v40 = vld [vmem:[%s1069_s1 + $0xd4] ss:$8 sps:$4 sm:$0xff]  }
   0xe   :  { %v760_v37 = vld [vmem:[%s1069_s1 + $0x1e4] ss:$8 sps:$4 sm:$0xff]   ;;  %v763_v39 = vld [vmem:[%s1069_s1 + $0x1e0] ss:$8 sps:$4 sm:$0xff]   ;;  %v766_v41 = vld [vmem:[%s1069_s1 + $0x1d4] ss:$8 sps:$4 sm:$0xff]  }
   0xf   :  { %464 = vmatpush1.bf16.msra.mxu0 %v726_v14  ;;  %v768_v42 = vld [vmem:[%s1069_s1 + $0xd0] ss:$8 sps:$4 sm:$0xff]   ;;  %v770_v44 = vld [vmem:[%s1069_s1 + $0xc4] ss:$8 sps:$4 sm:$0xff]   ;;  %v774_v46 = vld [vmem:[%s1069_s1 + $0xc0] ss:$8 sps:$4 sm:$0xff]  }
  0x10   :  { %515 = vmatpush1.bf16.msra.mxu1 %v727_v15  ;;  %465 = vmatprep.subr.bf16.mxu0 %v728_v16  ;;  %v769_v43 = vld [vmem:[%s1069_s1 + $0x1d0] ss:$8 sps:$4 sm:$0xff]   ;;  %v772_v45 = vld [vmem:[%s1069_s1 + $0x1c4] ss:$8 sps:$4 sm:$0xff]   ;;  %v775_v48 = vld [vmem:[%s1069_s1 + $0x1c0] ss:$8 sps:$4 sm:$0xff]  }
  0x11   :  { %516 = vmatprep.subr.bf16.mxu1 %v730_v17  ;;  %v802_v47 = vld [vmem:[%s1070_s0 + $0x4] ss:$16 sps:$4 sm:$0xff]   ;;  %v805_v51 = vld [vmem:[%s1070_s0 + $0xc] ss:$16 sps:$4 sm:$0xff]   ;;  %v780_v52 = vld [vmem:[%s1069_s1 + $0xb0] ss:$8 sps:$4 sm:$0xff]  }
  0x12   :  { %v776_v49 = vld [vmem:[%s1069_s1 + $0xb4] ss:$8 sps:$4 sm:$0xff]   ;;  %489 = vmatprep.mubr.bf16.mxu0 %v802_v47  ;;  %540 = vmatprep.mubr.bf16.mxu1 %v805_v51  ;;  %v781_v53 = vld [vmem:[%s1069_s1 + $0x1b0] ss:$8 sps:$4 sm:$0xff]   ;;  %v782_v54 = vld [vmem:[%s1069_s1 + $0xa4] ss:$8 sps:$4 sm:$0xff]  }
  0x13   :  { %466 = vmatpush1.bf16.msra.mxu0 %v732_v18  ;;  %v778_v50 = vld [vmem:[%s1069_s1 + $0x1b4] ss:$8 sps:$4 sm:$0xff]   ;;  %v784_v55 = vld [vmem:[%s1069_s1 + $0x1a4] ss:$8 sps:$4 sm:$0xff]   ;;  %v786_v56 = vld [vmem:[%s1069_s1 + $0xa0] ss:$8 sps:$4 sm:$0xff]  }
  0x14   :  { %517 = vmatpush1.bf16.msra.mxu1 %v733_v19  ;;  %467 = vmatprep.subr.bf16.mxu0 %v734_v20  ;;  %v787_v57 = vld [vmem:[%s1069_s1 + $0x1a0] ss:$8 sps:$4 sm:$0xff]   ;;  %v788_v58 = vld [vmem:[%s1069_s1 + $0x94] ss:$8 sps:$4 sm:$0xff]   ;;  %v792_v60 = vld [vmem:[%s1069_s1 + $0x90] ss:$8 sps:$4 sm:$0xff]  }
  0x15   :  { %518 = vmatprep.subr.bf16.mxu1 %v736_v21  ;;  %v790_v59 = vld [vmem:[%s1069_s1 + $0x194] ss:$8 sps:$4 sm:$0xff]   ;;  %v793_v61 = vld [vmem:[%s1069_s1 + $0x190] ss:$8 sps:$4 sm:$0xff]   ;;  %v794_v62 = vld [vmem:[%s1069_s1 + $0x84] ss:$8 sps:$4 sm:$0xff]  }
  0x16   :  { %v796_v63 = vld [vmem:[%s1069_s1 + $0x184] ss:$8 sps:$4 sm:$0xff]   ;;  %v798_v0 = vld [vmem:[%s1069_s1 + $0x80] ss:$8 sps:$4 sm:$0xff]   ;;  %v583_v11 = vshrl.u32 %v582_v10, 7 }
  0x17   :  { %468 = vmatpush1.bf16.msra.mxu0 %v738_v22  ;;  %v799_v1 = vld [vmem:[%s1069_s1 + $0x180] ss:$8 sps:$4 sm:$0xff]  }
  0x18   :  { %519 = vmatpush1.bf16.msra.mxu1 %v739_v23  ;;  %469 = vmatprep.subr.bf16.mxu0 %v740_v24  ;;  %v37_v2 = vld [vmem:[%s1070_s0 + $0x20] sm:$0xff]  ;;  %v38_v3 = vld [vmem:[%s1070_s0 + $0x28] sm:$0xff]  ;;  %v584_v12 = vsub.s32 0, %v583_v11  ;;  %v588_v14 = vsub.s32 1, %v583_v11 }
  0x19   :  { %520 = vmatprep.subr.bf16.mxu1 %v742_v25  ;;  %v800_v4 = vld [vmem:[%s1070_s0] ss:$16 sps:$4 sm:$0xff]   ;;  %v803_v5 = vld [vmem:[%s1070_s0 + $0x8] ss:$16 sps:$4 sm:$0xff]   ;;  %v637_v6 = vcombine.high %v37_v2, %v37_v2  ;;  %v639_v7 = vcombine.high %v38_v3, %v38_v3  ;;  %v636_v8 = vcombine.low %v37_v2, %v37_v2  ;;  %v638_v9 = vcombine.low %v38_v3, %v38_v3 }
  0x1a   :  { %v580_v13 = vld [vmem:[%s1071_s2] sm:$0x3] }
  0x1b   :  { %470 = vmatpush1.bf16.msra.mxu0 %v744_v26  ;;  %v598_v15 = vld [vmem:[%s1072_s3] sm:$0x3]  ;;  %v585_v16 = vrot.slane %v580_v13, %v584_v12  ;;  %v589_v21 = vrot.slane %v580_v13, %v588_v14 }
  0x1c   :  { %521 = vmatpush1.bf16.msra.mxu1 %v745_v27  ;;  %471 = vmatprep.subr.bf16.mxu0 %v746_v28  ;;  %v603_v20 = vrot.slane %v598_v15, %v584_v12  ;;  %v607_v26 = vrot.slane %v598_v15, %v588_v14 }
  0x1d   :  { %522 = vmatprep.subr.bf16.mxu1 %v748_v29 }
  0x1f   :  { %472 = vmatpush1.bf16.msra.mxu0 %v750_v30 }
  0x20   :  { %523 = vmatpush1.bf16.msra.mxu1 %v751_v31  ;;  %473 = vmatprep.subr.bf16.mxu0 %v752_v32 }
  0x21   :  { %524 = vmatprep.subr.bf16.mxu1 %v754_v33 }
  0x23   :  { %474 = vmatpush2.bf16.msra.mxu0 %v756_v34 }
  0x24   :  { %525 = vmatpush2.bf16.msra.mxu1 %v757_v35  ;;  %475 = vmatprep.subr.bf16.mxu0 %v758_v36 }
  0x25   :  { %526 = vmatprep.subr.bf16.mxu1 %v760_v37 }
  0x27   :  { %476 = vmatpush2.bf16.msra.mxu0 %v762_v38 }
  0x28   :  { %527 = vmatpush2.bf16.msra.mxu1 %v763_v39  ;;  %477 = vmatprep.subr.bf16.mxu0 %v764_v40 }
  0x29   :  { %528 = vmatprep.subr.bf16.mxu1 %v766_v41 }
  0x2b   :  { %478 = vmatpush2.bf16.msra.mxu0 %v768_v42 }
  0x2c   :  { %529 = vmatpush2.bf16.msra.mxu1 %v769_v43  ;;  %479 = vmatprep.subr.bf16.mxu0 %v770_v44 }
  0x2d   :  { %530 = vmatprep.subr.bf16.mxu1 %v772_v45 }
  0x2f   :  { %480 = vmatpush2.bf16.msra.mxu0 %v774_v46 }
  0x30   :  { %531 = vmatpush2.bf16.msra.mxu1 %v775_v48  ;;  %481 = vmatprep.subr.bf16.mxu0 %v776_v49 }
  0x31   :  { %532 = vmatprep.subr.bf16.mxu1 %v778_v50 }
  0x33   :  { %482 = vmatpush2.bf16.msra.mxu0 %v780_v52 }
  0x34   :  { %533 = vmatpush2.bf16.msra.mxu1 %v781_v53  ;;  %483 = vmatprep.subr.bf16.mxu0 %v782_v54 }
  0x35   :  { %534 = vmatprep.subr.bf16.mxu1 %v784_v55 }
  0x37   :  { %484 = vmatpush2.bf16.msra.mxu0 %v786_v56 }
  0x38   :  { %535 = vmatpush2.bf16.msra.mxu1 %v787_v57  ;;  %485 = vmatprep.subr.bf16.mxu0 %v788_v58 }
  0x39   :  { %536 = vmatprep.subr.bf16.mxu1 %v790_v59 }
  0x3b   :  { %486 = vmatpush2.bf16.msra.mxu0 %v792_v60 }
  0x3c   :  { %537 = vmatpush2.bf16.msra.mxu1 %v793_v61  ;;  %487 = vmatprep.subr.bf16.mxu0 %v794_v62 }
  0x3d   :  { %538 = vmatprep.subr.bf16.mxu1 %v796_v63 }
  0x3f   :  { %488 = vmatpush2.bf16.msra.mxu0 %v798_v0 }
  0x40   :  { %539 = vmatpush2.bf16.msra.mxu1 %v799_v1 }
  0x42   :  { %490 = vmatmul.mubr.bf16.vlgmr.msra.gmra.mxu0 %v800_v4 }
  0x43   :  { %541 = vmatmul.mubr.bf16.vlgmr.msra.gmra.mxu1 %v803_v5  ;;  %499 = vmatprep.mubr.bf16.mxu0 %v637_v6 }
  0x44   :  { %550 = vmatprep.mubr.bf16.mxu1 %v639_v7 }
  0x4a   :  { %500 = vmatmul.mubr.bf16.gmra.mxu0 %v636_v8 }
  0x4b   :  { %551 = vmatmul.mubr.bf16.gmra.mxu1 %v638_v9 }
 0x102   :  { %v491_v17 = vpop.f32.mrf.mxu0 }
 0x103   :  { %v542_v18 = vpop.f32.mrf.mxu1 }
 0x104   :  { %v543_v19 = vadd.f32 %v542_v18, %v491_v17  ;;  %v493_v22 = vpop.f32.mrf.mxu0 }
 0x105   :  { %v544_v23 = vpop.f32.mrf.mxu1 }
 0x106   :  { %v592_v24 = vmul.f32 %v585_v16, %v543_v19  ;;  %v545_v25 = vadd.f32 %v544_v23, %v493_v22  ;;  %v495_v27 = vpop.f32.mrf.mxu0 }
 0x107   :  { %v546_v28 = vpop.f32.mrf.mxu1 }
 0x108   :  { %v610_v29 = vadd.f32 %v603_v20, %v592_v24  ;;  %v593_v30 = vmul.f32 %v589_v21, %v545_v25  ;;  %v547_v31 = vadd.f32 %v546_v28, %v495_v27  ;;  %v497_v32 = vpop.f32.mrf.mxu0 }
 0x109   :  { %v548_v33 = vpop.f32.mrf.mxu1 }
 0x10a   :  { %v616_v34 = vmax.f32 %v610_v29, 0.0  ;;  %v611_v35 = vadd.f32 %v607_v26, %v593_v30  ;;  %v594_v36 = vmul.f32 %v585_v16, %v547_v31  ;;  %v549_v37 = vadd.f32 %v548_v33, %v497_v32  ;;  %v501_v38 = vpop.f32.mrf.mxu0 }
 0x10b   :  { %v552_v39 = vpop.f32.mrf.mxu1 }
 0x10c   :  { %622 = vst [vmem:[%s1073_s4] sm:$0xff] %v616_v34  ;;  %v617_v40 = vmax.f32 %v611_v35, 0.0  ;;  %v612_v41 = vadd.f32 %v603_v20, %v594_v36  ;;  %v595_v42 = vmul.f32 %v589_v21, %v549_v37  ;;  %v553_v43 = vadd.f32 %v552_v39, %v501_v38  ;;  %v503_v44 = vpop.f32.mrf.mxu0 }
 0x10d   :  { %v554_v45 = vpop.f32.mrf.mxu1 }
 0x10e   :  { %623 = vst [vmem:[%s1073_s4 + $0x8] sm:$0xff] %v617_v40  ;;  %v618_v46 = vmax.f32 %v612_v41, 0.0  ;;  %v613_v47 = vadd.f32 %v607_v26, %v595_v42  ;;  %v596_v48 = vmul.f32 %v585_v16, %v553_v43  ;;  %v555_v49 = vadd.f32 %v554_v45, %v503_v44  ;;  %v505_v50 = vpop.f32.mrf.mxu0 }
 0x10f   :  { %v556_v51 = vpop.f32.mrf.mxu1 }
 0x110   :  { %624 = vst [vmem:[%s1073_s4 + $0x10] sm:$0xff] %v618_v46  ;;  %v619_v52 = vmax.f32 %v613_v47, 0.0  ;;  %v614_v53 = vadd.f32 %v603_v20, %v596_v48  ;;  %v597_v54 = vmul.f32 %v589_v21, %v555_v49  ;;  %v506_v55 = vpop.f32.mrf.mxu0 }
 0x111   :  { %v557_v56 = vpop.f32.mrf.mxu1 }
 0x112   :  { %625 = vst [vmem:[%s1073_s4 + $0x18] sm:$0xff] %v619_v52  ;;  %v620_v57 = vmax.f32 %v614_v53, 0.0  ;;  %v615_v58 = vadd.f32 %v607_v26, %v597_v54 }
 0x114   :  { %626 = vst [vmem:[%s1073_s4 + $0x20] sm:$0xff] %v620_v57  ;;  %v621_v59 = vmax.f32 %v615_v58, 0.0 }
 0x116   :  { %627 = vst [vmem:[%s1073_s4 + $0x28] sm:$0xff] %v621_v59 }

// kernel: forward.32
= control target key start
LH: loop header
LB: loop body
LE: loop exit
PB: predicated region body
PF: predicated region fallthrough
CT: control target
= control target key end

     0   :  { %s1400_s15 = smov 0   ;;  %s1402_s16 = smov 0   ;;  %s1565_s0 = inlined_call_operand.vmem [shape: bf16[24,2560], index: 0, kind: input, shape index: {}]   ;;  %s1566_s1 = inlined_call_operand.vmem [shape: bf16[2560,256], index: 1, kind: input, shape index: {}]   ;;  %s1567_s2 = inlined_call_operand.vmem [shape: f32[1,256], index: 2, kind: input, shape index: {}]   ;;  %s1568_s3 = inlined_call_operand.vmem [shape: f32[1,256], index: 3, kind: input, shape index: {}]   ;;  %s1569_s4 = inlined_call_operand.vmem [shape: f32[24,256], index: 4, kind: output, shape index: {}]  }
   0x1   :  { %s1404_s17 = smov 0   ;;  %s1406_s18 = smov 0  }
   0x2   :  { %s1408_s19 = smov 0  }
   0x3 LB: > { %s26_s20 = sadd.s32 1, %s1368_s18  ;;  %p49_p1 = scmp.ne.s32.totalorder %s1360_s16, %s1356_s15  ;;  %s1372_s19 = sphi %s1408_s19, %s14_s19   ;;  %s1368_s18 = sphi %s1406_s18, %s1573_s18   ;;  %s1364_s17 = sphi %s1404_s17, %s1572_s17   ;;  %s1360_s16 = sphi %s1402_s16, %s1571_s16   ;;  %s1356_s15 = sphi %s1400_s15, %s1570_s15  }
   0x4   : > { %p27_p0 = scmp.ge.s32.totalorder %s26_s20, 5  ;;  %p50_p2 = scmp.eq.s32.totalorder %s1372_s19, 0 }
   0x5   : > { %s42_s22 = sadd.s32 1, %s1360_s16  ;;  %p1098_p5 = scmp.ge.s32.totalorder %s1372_s19, 5 }
   0x6   : > { %s1575_s20 = smov (%p27_p0, %s26_s20), 0  ;;  %p51_p3 = por %p50_p2, %p49_p1 }
   0x7   : > { %s38_s21 = ssub.s32 %s1368_s18, %s1575_s20  ;;  %199 = sbr.rel (%p1098_p5) target bundleno = 20 (0x14), region = 24 }
   0x8   : > { %p40_p4 = scmp.eq.s32.totalorder %s38_s21, 0 }
   0xa   : > { %s1435_s23 = scalar_select %p40_p4, %s1360_s16, %s42_s22  }
   0xc   : > { %202 = sbr.rel (!%p51_p3) target bundleno = 20 (0x14), region = 28  ;;  %s204_s24 = sand.u32 (%p51_p3), 1, %s1360_s16  }
   0xd   : > { %s1183_s25 = sshll.u32 (%p51_p3), %s1368_s18, 4  ;;  %s1185_s26 = smul.u32 (%p51_p3), 48, %s204_s24 }
   0xe   : > { %s212_s29 = scalar_lea.vmem (%p51_p3), %s1565_s0, %s1183_s25 }
   0xf   : > { %v225_v0 = vld [vmem:[%s212_s29] sm:$0xff] (%p51_p3)  ;;  %v227_v1 = vld [vmem:[%s212_s29 + $0x8] sm:$0xff] (%p51_p3)  ;;  %v229_v2 = vld [vmem:[%s212_s29 + $0x50] sm:$0xff] (%p51_p3)  ;;  %s206_s30 = scalar_lea.vmem (%p51_p3), [#allocation3], %s1185_s26 }
  0x10   : > { %v231_v3 = vld [vmem:[%s212_s29 + $0x58] sm:$0xff] (%p51_p3)  ;;  %v233_v4 = vld [vmem:[%s212_s29 + $0xa0] sm:$0xff] (%p51_p3)  ;;  %v235_v5 = vld [vmem:[%s212_s29 + $0xa8] sm:$0xff] (%p51_p3)  ;;  %226 = vst [vmem:[%s206_s30] sm:$0xff] (%p51_p3), %v225_v0 }
  0x11   : > { %228 = vst [vmem:[%s206_s30 + $0x8] sm:$0xff] %v227_v1  ;;  %230 = vst [vmem:[%s206_s30 + $0x10] sm:$0xff] %v229_v2 }
  0x12   : > { %232 = vst [vmem:[%s206_s30 + $0x18] sm:$0xff] %v231_v3  ;;  %234 = vst [vmem:[%s206_s30 + $0x20] sm:$0xff] %v233_v4 }
  0x13   : > { %236 = vst [vmem:[%s206_s30 + $0x28] sm:$0xff] %v235_v5 }
  0x14 PF: > { %p1101_p6 = scmp.ge.s32.totalorder %s1372_s19, 1  ;;  %p256_p7 = scmp.lt.s32.totalorder %s1372_s19, 6 }
  0x16   : > { %p257_p8 = pnand %p1101_p6, %p256_p7 }
  0x17   : > { %s263_s5 = sand.u32 (!%p257_p8), 1, %s1356_s15   ;;  %s1102_s6 = sshll.u32 (!%p257_p8), %s1364_s17, 6 }
  0x18   : > { %260 = sbr.rel (%p257_p8) target bundleno = 329 (0x149), region = 55  ;;  %p315_p9 = scmp.lt.s32.totalorder (!%p257_p8), %s1102_s6, 319 }
  0x19   : > { %s1186_s7 = smul.u32 (!%p257_p8), 48, %s263_s5  ;;  %p1105_p10 = scmp.ne.s32.totalorder (!%p257_p8), %s1364_s17, 0 }
  0x1b   : > { %s1452_s12 = scalar_lea.vmem (!%p257_p8), [#allocation3], %s1186_s7 }
  0x1d   : > { %s1577_s6 = smov (!%p315_p9, %s1102_s6), 319  ;;  %350 = sbr.rel (%p1105_p10) target bundleno = 38 (0x26), region = 63 }
  0x1e   : > { %s1184_s8 = sshll.u32 %s1577_s6, 3 }
  0x1f   : > { %s1450_s11 = scalar_lea.vmem %s1566_s1, %s1184_s8 }
  0x22   : > { %v1374_v6 = vmov 0.0  }
  0x23   : > { %351 = vst [vmem:[#allocation2 + $0x28] sm:$0xff] %v1374_v6  ;;  %352 = vst [vmem:[#allocation2 + $0x10] sm:$0xff] %v1374_v6 }
  0x24   : > { %353 = vst [vmem:[#allocation2 + $0x8] sm:$0xff] %v1374_v6  ;;  %354 = vst [vmem:[#allocation2] sm:$0xff] %v1374_v6 }
  0x25   : > { %355 = vst [vmem:[#allocation2 + $0x18] sm:$0xff] %v1374_v6  ;;  %356 = vst [vmem:[#allocation2 + $0x20] sm:$0xff] %v1374_v6 }
  0x26 PF: > { %v1228_v7 = vld [vmem:[%s1450_s11 + $0x74] ss:$8 sps:$4 sm:$0xff]   ;;  %v1232_v9 = vld [vmem:[%s1450_s11 + $0x70] ss:$8 sps:$4 sm:$0xff]   ;;  %v1234_v11 = vld [vmem:[%s1450_s11 + $0x64] ss:$8 sps:$4 sm:$0xff]  }
  0x27   : > { %v1230_v8 = vld [vmem:[%s1450_s11 + $0x174] ss:$8 sps:$4 sm:$0xff]   ;;  %787 = vmatprep.subr.bf16.mxu0 %v1228_v7  ;;  %v1233_v10 = vld [vmem:[%s1450_s11 + $0x170] ss:$8 sps:$4 sm:$0xff]   ;;  %v1236_v12 = vld [vmem:[%s1450_s11 + $0x164] ss:$8 sps:$4 sm:$0xff]  }
  0x28   : > { %838 = vmatprep.subr.bf16.mxu1 %v1230_v8  ;;  %788 = vmatpush1.bf16.msra.mxu0 %v1232_v9  ;;  %v1238_v13 = vld [vmem:[%s1450_s11 + $0x60] ss:$8 sps:$4 sm:$0xff]   ;;  %v1240_v15 = vld [vmem:[%s1450_s11 + $0x54] ss:$8 sps:$4 sm:$0xff]   ;;  %v1244_v17 = vld [vmem:[%s1450_s11 + $0x50] ss:$8 sps:$4 sm:$0xff]  }
  0x29   : > { %839 = vmatpush1.bf16.msra.mxu1 %v1233_v10  ;;  %789 = vmatprep.subr.bf16.mxu0 %v1234_v11  ;;  %v1239_v14 = vld [vmem:[%s1450_s11 + $0x160] ss:$8 sps:$4 sm:$0xff]   ;;  %v1242_v16 = vld [vmem:[%s1450_s11 + $0x154] ss:$8 sps:$4 sm:$0xff]   ;;  %v1245_v18 = vld [vmem:[%s1450_s11 + $0x150] ss:$8 sps:$4 sm:$0xff]  }
  0x2a   : > { %840 = vmatprep.subr.bf16.mxu1 %v1236_v12  ;;  %v1246_v19 = vld [vmem:[%s1450_s11 + $0x44] ss:$8 sps:$4 sm:$0xff]   ;;  %v1250_v21 = vld [vmem:[%s1450_s11 + $0x40] ss:$8 sps:$4 sm:$0xff]   ;;  %v1252_v23 = vld [vmem:[%s1450_s11 + $0x34] ss:$8 sps:$4 sm:$0xff]  }
  0x2b   : > { %v1248_v20 = vld [vmem:[%s1450_s11 + $0x144] ss:$8 sps:$4 sm:$0xff]   ;;  %v1251_v22 = vld [vmem:[%s1450_s11 + $0x140] ss:$8 sps:$4 sm:$0xff]   ;;  %v1254_v24 = vld [vmem:[%s1450_s11 + $0x134] ss:$8 sps:$4 sm:$0xff]  }
  0x2c   : > { %790 = vmatpush1.bf16.msra.mxu0 %v1238_v13  ;;  %v1256_v25 = vld [vmem:[%s1450_s11 + $0x30] ss:$8 sps:$4 sm:$0xff]   ;;  %v1258_v27 = vld [vmem:[%s1450_s11 + $0x24] ss:$8 sps:$4 sm:$0xff]   ;;  %v1262_v29 = vld [vmem:[%s1450_s11 + $0x20] ss:$8 sps:$4 sm:$0xff]  }
  0x2d   : > { %841 = vmatpush1.bf16.msra.mxu1 %v1239_v14  ;;  %791 = vmatprep.subr.bf16.mxu0 %v1240_v15  ;;  %v1257_v26 = vld [vmem:[%s1450_s11 + $0x130] ss:$8 sps:$4 sm:$0xff]   ;;  %v1260_v28 = vld [vmem:[%s1450_s11 + $0x124] ss:$8 sps:$4 sm:$0xff]   ;;  %v1263_v30 = vld [vmem:[%s1450_s11 + $0x120] ss:$8 sps:$4 sm:$0xff]  }
  0x2e   : > { %842 = vmatprep.subr.bf16.mxu1 %v1242_v16  ;;  %v1264_v31 = vld [vmem:[%s1450_s11 + $0x14] ss:$8 sps:$4 sm:$0xff]   ;;  %v1268_v33 = vld [vmem:[%s1450_s11 + $0x10] ss:$8 sps:$4 sm:$0xff]   ;;  %v1270_v35 = vld [vmem:[%s1450_s11 + $0x4] ss:$8 sps:$4 sm:$0xff]  }
  0x2f   : > { %v1266_v32 = vld [vmem:[%s1450_s11 + $0x114] ss:$8 sps:$4 sm:$0xff]   ;;  %v1269_v34 = vld [vmem:[%s1450_s11 + $0x110] ss:$8 sps:$4 sm:$0xff]   ;;  %v1272_v36 = vld [vmem:[%s1450_s11 + $0x104] ss:$8 sps:$4 sm:$0xff]  }
  0x30   : > { %792 = vmatpush1.bf16.msra.mxu0 %v1244_v17  ;;  %v1274_v37 = vld [vmem:[%s1450_s11] ss:$8 sps:$4 sm:$0xff]   ;;  %v1276_v39 = vld [vmem:[%s1450_s11 + $0xf4] ss:$8 sps:$4 sm:$0xff]   ;;  %v1280_v41 = vld [vmem:[%s1450_s11 + $0xf0] ss:$8 sps:$4 sm:$0xff]  }
  0x31   : > { %843 = vmatpush1.bf16.msra.mxu1 %v1245_v18  ;;  %793 = vmatprep.subr.bf16.mxu0 %v1246_v19  ;;  %v1275_v38 = vld [vmem:[%s1450_s11 + $0x100] ss:$8 sps:$4 sm:$0xff]   ;;  %v1278_v40 = vld [vmem:[%s1450_s11 + $0x1f4] ss:$8 sps:$4 sm:$0xff]   ;;  %v1281_v42 = vld [vmem:[%s1450_s11 + $0x1f0] ss:$8 sps:$4 sm:$0xff]  }
  0x32   : > { %844 = vmatprep.subr.bf16.mxu1 %v1248_v20  ;;  %v1282_v43 = vld [vmem:[%s1450_s11 + $0xe4] ss:$8 sps:$4 sm:$0xff]   ;;  %v1286_v45 = vld [vmem:[%s1450_s11 + $0xe0] ss:$8 sps:$4 sm:$0xff]   ;;  %v1288_v47 = vld [vmem:[%s1450_s11 + $0xd4] ss:$8 sps:$4 sm:$0xff]  }
  0x33   : > { %v1284_v44 = vld [vmem:[%s1450_s11 + $0x1e4] ss:$8 sps:$4 sm:$0xff]   ;;  %v1287_v46 = vld [vmem:[%s1450_s11 + $0x1e0] ss:$8 sps:$4 sm:$0xff]   ;;  %v1290_v48 = vld [vmem:[%s1450_s11 + $0x1d4] ss:$8 sps:$4 sm:$0xff]  }
  0x34   : > { %794 = vmatpush1.bf16.msra.mxu0 %v1250_v21  ;;  %v1292_v49 = vld [vmem:[%s1450_s11 + $0xd0] ss:$8 sps:$4 sm:$0xff]   ;;  %v1294_v51 = vld [vmem:[%s1450_s11 + $0xc4] ss:$8 sps:$4 sm:$0xff]   ;;  %v1298_v53 = vld [vmem:[%s1450_s11 + $0xc0] ss:$8 sps:$4 sm:$0xff]  }
  0x35   : > { %845 = vmatpush1.bf16.msra.mxu1 %v1251_v22  ;;  %795 = vmatprep.subr.bf16.mxu0 %v1252_v23  ;;  %v1293_v50 = vld [vmem:[%s1450_s11 + $0x1d0] ss:$8 sps:$4 sm:$0xff]   ;;  %v1296_v52 = vld [vmem:[%s1450_s11 + $0x1c4] ss:$8 sps:$4 sm:$0xff]   ;;  %v1299_v55 = vld [vmem:[%s1450_s11 + $0x1c0] ss:$8 sps:$4 sm:$0xff]  }
  0x36   : > { %846 = vmatprep.subr.bf16.mxu1 %v1254_v24  ;;  %v1326_v54 = vld [vmem:[%s1452_s12 + $0x4] ss:$16 sps:$4 sm:$0xff]   ;;  %v1329_v58 = vld [vmem:[%s1452_s12 + $0xc] ss:$16 sps:$4 sm:$0xff]   ;;  %v1304_v59 = vld [vmem:[%s1450_s11 + $0xb0] ss:$8 sps:$4 sm:$0xff]  }
  0x37   : > { %v1300_v56 = vld [vmem:[%s1450_s11 + $0xb4] ss:$8 sps:$4 sm:$0xff]   ;;  %819 = vmatprep.mubr.bf16.mxu0 %v1326_v54  ;;  %870 = vmatprep.mubr.bf16.mxu1 %v1329_v58  ;;  %v1305_v60 = vld [vmem:[%s1450_s11 + $0x1b0] ss:$8 sps:$4 sm:$0xff]   ;;  %v1306_v61 = vld [vmem:[%s1450_s11 + $0xa4] ss:$8 sps:$4 sm:$0xff]  }
  0x38   : > { %796 = vmatpush1.bf16.msra.mxu0 %v1256_v25  ;;  %v1302_v57 = vld [vmem:[%s1450_s11 + $0x1b4] ss:$8 sps:$4 sm:$0xff]   ;;  %v1308_v62 = vld [vmem:[%s1450_s11 + $0x1a4] ss:$8 sps:$4 sm:$0xff]   ;;  %v1310_v63 = vld [vmem:[%s1450_s11 + $0xa0] ss:$8 sps:$4 sm:$0xff]  }
  0x39   : > { %847 = vmatpush1.bf16.msra.mxu1 %v1257_v26  ;;  %797 = vmatprep.subr.bf16.mxu0 %v1258_v27  ;;  %v1311_v0 = vld [vmem:[%s1450_s11 + $0x1a0] ss:$8 sps:$4 sm:$0xff]   ;;  %v1312_v1 = vld [vmem:[%s1450_s11 + $0x94] ss:$8 sps:$4 sm:$0xff]   ;;  %v1316_v3 = vld [vmem:[%s1450_s11 + $0x90] ss:$8 sps:$4 sm:$0xff]  }
  0x3a   : > { %848 = vmatprep.subr.bf16.mxu1 %v1260_v28  ;;  %v1314_v2 = vld [vmem:[%s1450_s11 + $0x194] ss:$8 sps:$4 sm:$0xff]   ;;  %v1317_v4 = vld [vmem:[%s1450_s11 + $0x190] ss:$8 sps:$4 sm:$0xff]   ;;  %v1318_v5 = vld [vmem:[%s1450_s11 + $0x84] ss:$8 sps:$4 sm:$0xff]  }
  0x3b   : > { %v1320_v6 = vld [vmem:[%s1450_s11 + $0x184] ss:$8 sps:$4 sm:$0xff]   ;;  %v1322_v7 = vld [vmem:[%s1450_s11 + $0x80] ss:$8 sps:$4 sm:$0xff]   ;;  %v358_v22 = vld [vmem:[#allocation2 + $0x10] sm:$0xff]  ;;  %p1178_p11 = scmp.ne.s32.totalorder %s1364_s17, 4 }
  0x3c   : > { %798 = vmatpush1.bf16.msra.mxu0 %v1262_v29  ;;  %v1323_v8 = vld [vmem:[%s1450_s11 + $0x180] ss:$8 sps:$4 sm:$0xff]  }
  0x3d   : > { %849 = vmatpush1.bf16.msra.mxu1 %v1263_v30  ;;  %799 = vmatprep.subr.bf16.mxu0 %v1264_v31  ;;  %v367_v9 = vld [vmem:[%s1452_s12 + $0x20] sm:$0xff]  ;;  %v368_v10 = vld [vmem:[%s1452_s12 + $0x28] sm:$0xff] }
  0x3e   : > { %850 = vmatprep.subr.bf16.mxu1 %v1266_v32  ;;  %v1324_v11 = vld [vmem:[%s1452_s12] ss:$16 sps:$4 sm:$0xff]   ;;  %v1327_v12 = vld [vmem:[%s1452_s12 + $0x8] ss:$16 sps:$4 sm:$0xff]   ;;  %v1111_v13 = vcombine.high %v367_v9, %v367_v9  ;;  %v1113_v14 = vcombine.high %v368_v10, %v368_v10  ;;  %v1110_v15 = vcombine.low %v367_v9, %v367_v9  ;;  %v1112_v16 = vcombine.low %v368_v10, %v368_v10 }
  0x3f   : > { %v357_v18 = vld [vmem:[#allocation2 + $0x28] sm:$0xff]  ;;  %v360_v32 = vld [vmem:[#allocation2] sm:$0xff] }
  0x40   : > { %800 = vmatpush1.bf16.msra.mxu0 %v1268_v33  ;;  %v359_v27 = vld [vmem:[#allocation2 + $0x8] sm:$0xff] }
  0x41   : > { %851 = vmatpush1.bf16.msra.mxu1 %v1269_v34  ;;  %801 = vmatprep.subr.bf16.mxu0 %v1270_v35 }
  0x42   : > { %852 = vmatprep.subr.bf16.mxu1 %v1272_v36 }
  0x44   : > { %802 = vmatpush1.bf16.msra.mxu0 %v1274_v37  ;;  %v361_v37 = vld [vmem:[#allocation2 + $0x18] sm:$0xff] }
  0x45   : > { %853 = vmatpush1.bf16.msra.mxu1 %v1275_v38  ;;  %803 = vmatprep.subr.bf16.mxu0 %v1276_v39 }
  0x46   : > { %854 = vmatprep.subr.bf16.mxu1 %v1278_v40 }
  0x48   : > { %804 = vmatpush2.bf16.msra.mxu0 %v1280_v41 }
  0x49   : > { %855 = vmatpush2.bf16.msra.mxu1 %v1281_v42  ;;  %805 = vmatprep.subr.bf16.mxu0 %v1282_v43  ;;  %v362_v42 = vld [vmem:[#allocation2 + $0x20] sm:$0xff] }
  0x4a   : > { %856 = vmatprep.subr.bf16.mxu1 %v1284_v44 }
  0x4c   : > { %806 = vmatpush2.bf16.msra.mxu0 %v1286_v45 }
  0x4d   : > { %857 = vmatpush2.bf16.msra.mxu1 %v1287_v46  ;;  %807 = vmatprep.subr.bf16.mxu0 %v1288_v47 }
  0x4e   : > { %858 = vmatprep.subr.bf16.mxu1 %v1290_v48 }
  0x50   : > { %808 = vmatpush2.bf16.msra.mxu0 %v1292_v49 }
  0x51   : > { %859 = vmatpush2.bf16.msra.mxu1 %v1293_v50  ;;  %809 = vmatprep.subr.bf16.mxu0 %v1294_v51 }
  0x52   : > { %860 = vmatprep.subr.bf16.mxu1 %v1296_v52 }
  0x54   : > { %810 = vmatpush2.bf16.msra.mxu0 %v1298_v53 }
  0x55   : > { %861 = vmatpush2.bf16.msra.mxu1 %v1299_v55  ;;  %811 = vmatprep.subr.bf16.mxu0 %v1300_v56 }
  0x56   : > { %862 = vmatprep.subr.bf16.mxu1 %v1302_v57 }
  0x58   : > { %812 = vmatpush2.bf16.msra.mxu0 %v1304_v59 }
  0x59   : > { %863 = vmatpush2.bf16.msra.mxu1 %v1305_v60  ;;  %813 = vmatprep.subr.bf16.mxu0 %v1306_v61 }
  0x5a   : > { %864 = vmatprep.subr.bf16.mxu1 %v1308_v62 }
  0x5c   : > { %814 = vmatpush2.bf16.msra.mxu0 %v1310_v63 }
  0x5d   : > { %865 = vmatpush2.bf16.msra.mxu1 %v1311_v0  ;;  %815 = vmatprep.subr.bf16.mxu0 %v1312_v1 }
  0x5e   : > { %866 = vmatprep.subr.bf16.mxu1 %v1314_v2 }
  0x60   : > { %816 = vmatpush2.bf16.msra.mxu0 %v1316_v3 }
  0x61   : > { %867 = vmatpush2.bf16.msra.mxu1 %v1317_v4  ;;  %817 = vmatprep.subr.bf16.mxu0 %v1318_v5 }
  0x62   : > { %868 = vmatprep.subr.bf16.mxu1 %v1320_v6 }
  0x64   : > { %818 = vmatpush2.bf16.msra.mxu0 %v1322_v7 }
  0x65   : > { %869 = vmatpush2.bf16.msra.mxu1 %v1323_v8 }
  0x67   : > { %820 = vmatmul.mubr.bf16.vlgmr.msra.gmra.mxu0 %v1324_v11 }
  0x68   : > { %871 = vmatmul.mubr.bf16.vlgmr.msra.gmra.mxu1 %v1327_v12  ;;  %829 = vmatprep.mubr.bf16.mxu0 %v1111_v13 }
  0x69   : > { %880 = vmatprep.mubr.bf16.mxu1 %v1113_v14 }
  0x6f   : > { %830 = vmatmul.mubr.bf16.gmra.mxu0 %v1110_v15 }
  0x70   : > { %881 = vmatmul.mubr.bf16.gmra.mxu1 %v1112_v16 }
 0x127   : > { %v821_v17 = vpop.f32.mrf.mxu0 }
 0x128   : > { %v872_v19 = vpop.f32.mrf.mxu1 }
 0x129   : > { %v873_v20 = vadd.f32 %v872_v19, %v821_v17  ;;  %v823_v21 = vpop.f32.mrf.mxu0 }
 0x12a   : > { %v874_v23 = vpop.f32.mrf.mxu1 }
 0x12b   : > { %v889_v24 = vadd.f32 %v873_v20, %v357_v18  ;;  %v875_v25 = vadd.f32 %v874_v23, %v823_v21  ;;  %v825_v26 = vpop.f32.mrf.mxu0 }
 0x12c   : > { %v876_v28 = vpop.f32.mrf.mxu1 }
 0x12d   : > { %895 = vst [vmem:[#allocation2 + $0x28] sm:$0xff] %v889_v24  ;;  %v890_v29 = vadd.f32 %v875_v25, %v358_v22  ;;  %v877_v30 = vadd.f32 %v876_v28, %v825_v26  ;;  %v827_v31 = vpop.f32.mrf.mxu0 }
 0x12e   : > { %v878_v33 = vpop.f32.mrf.mxu1 }
 0x12f   : > { %896 = vst [vmem:[#allocation2 + $0x10] sm:$0xff] %v890_v29  ;;  %v891_v34 = vadd.f32 %v877_v30, %v359_v27  ;;  %v879_v35 = vadd.f32 %v878_v33, %v827_v31  ;;  %v831_v36 = vpop.f32.mrf.mxu0 }
 0x130   : > { %v882_v38 = vpop.f32.mrf.mxu1 }
 0x131   : > { %897 = vst [vmem:[#allocation2 + $0x8] sm:$0xff] %v891_v34  ;;  %v892_v39 = vadd.f32 %v879_v35, %v360_v32  ;;  %v883_v40 = vadd.f32 %v882_v38, %v831_v36  ;;  %v833_v41 = vpop.f32.mrf.mxu0 }
 0x132   : > { %v884_v43 = vpop.f32.mrf.mxu1 }
 0x133   : > { %898 = vst [vmem:[#allocation2] sm:$0xff] %v892_v39  ;;  %v893_v44 = vadd.f32 %v883_v40, %v361_v37  ;;  %v885_v45 = vadd.f32 %v884_v43, %v833_v41  ;;  %v835_v46 = vpop.f32.mrf.mxu0  ;;  %904 = sbr.rel (%p1178_p11) target bundleno = 329 (0x149), region = 67 }
 0x134   : > { %v886_v47 = vpop.f32.mrf.mxu1 }
 0x135   : > { %899 = vst [vmem:[#allocation2 + $0x18] sm:$0xff] %v893_v44  ;;  %v894_v48 = vadd.f32 %v885_v45, %v362_v42  ;;  %v836_v49 = vpop.f32.mrf.mxu0 }
 0x136   : > { %v887_v50 = vpop.f32.mrf.mxu1 }
 0x137   : > { %900 = vst [vmem:[#allocation2 + $0x20] sm:$0xff] %v894_v48 }
 0x138   : > { %v913_v51 = vlaneseq  ;;  %v911_v53 = vld [vmem:[%s1567_s2] sm:$0x3]  ;;  %v905_v55 = vld [vmem:[#allocation2 + $0x28] sm:$0xff]  ;;  %v906_v58 = vld [vmem:[#allocation2 + $0x10] sm:$0xff] }
 0x139   : > { %v929_v54 = vld [vmem:[%s1568_s3] sm:$0x3]  ;;  %v907_v59 = vld [vmem:[#allocation2 + $0x8] sm:$0xff] }
 0x13a   : > { %v914_v52 = vshrl.u32 %v913_v51, 7  ;;  %v908_v60 = vld [vmem:[#allocation2] sm:$0xff] }
 0x13c   : > { %v915_v56 = vsub.s32 0, %v914_v52  ;;  %v919_v57 = vsub.s32 1, %v914_v52  ;;  %v909_v1 = vld [vmem:[#allocation2 + $0x18] sm:$0xff] }
 0x13e   : > { %v916_v61 = vrot.slane %v911_v53, %v915_v56  ;;  %v934_v62 = vrot.slane %v929_v54, %v915_v56  ;;  %v920_v63 = vrot.slane %v911_v53, %v919_v57  ;;  %v938_v0 = vrot.slane %v929_v54, %v919_v57  ;;  %v910_v2 = vld [vmem:[#allocation2 + $0x20] sm:$0xff] }
 0x140   : > { %v923_v3 = vmul.f32 %v916_v61, %v905_v55  ;;  %v924_v4 = vmul.f32 %v920_v63, %v906_v58  ;;  %v925_v5 = vmul.f32 %v916_v61, %v907_v59  ;;  %v926_v6 = vmul.f32 %v920_v63, %v908_v60 }
 0x141   : > { %v927_v7 = vmul.f32 %v916_v61, %v909_v1  ;;  %v928_v8 = vmul.f32 %v920_v63, %v910_v2 }
 0x142   : > { %v941_v9 = vadd.f32 %v934_v62, %v923_v3  ;;  %v942_v10 = vadd.f32 %v938_v0, %v924_v4  ;;  %v943_v11 = vadd.f32 %v934_v62, %v925_v5  ;;  %v944_v12 = vadd.f32 %v938_v0, %v926_v6 }
 0x143   : > { %v945_v13 = vadd.f32 %v934_v62, %v927_v7  ;;  %v946_v14 = vadd.f32 %v938_v0, %v928_v8 }
 0x144   : > { %v947_v15 = vmax.f32 %v941_v9, 0.0  ;;  %v948_v16 = vmax.f32 %v942_v10, 0.0  ;;  %v949_v17 = vmax.f32 %v943_v11, 0.0  ;;  %v950_v18 = vmax.f32 %v944_v12, 0.0 }
 0x145   : > { %v951_v19 = vmax.f32 %v945_v13, 0.0  ;;  %v952_v20 = vmax.f32 %v946_v14, 0.0 }
 0x146   : > { %953 = vst [vmem:[%s1569_s4] sm:$0xff] %v947_v15  ;;  %954 = vst [vmem:[%s1569_s4 + $0x8] sm:$0xff] %v948_v16 }
 0x147   : > { %955 = vst [vmem:[%s1569_s4 + $0x10] sm:$0xff] %v949_v17  ;;  %956 = vst [vmem:[%s1569_s4 + $0x18] sm:$0xff] %v950_v18 }
 0x148   : > { %957 = vst [vmem:[%s1569_s4 + $0x20] sm:$0xff] %v951_v19  ;;  %958 = vst [vmem:[%s1569_s4 + $0x28] sm:$0xff] %v952_v20 }
 0x149 PF: > { %s14_s19 = sadd.s32 1, %s1372_s19   ;;  %s1570_s15 = smov %s1360_s16 }
 0x14a   : > { %p11_p12 = scmp.ge.s32.totalorder %s14_s19, 7   ;;  %s1571_s16 = smov %s1435_s23 }
 0x14b   : > { %s1572_s17 = smov %s1368_s18  ;;  %s1573_s18 = smov %s1575_s20 }
 0x14c   :  { %13 = sbr.rel (!%p11_p12) target bundleno = 3 (0x3), region = 111 }

// kernel: forward.30
= control target key start
LH: loop header
LB: loop body
LE: loop exit
PB: predicated region body
PF: predicated region fallthrough
CT: control target
= control target key end

     0   :  { %s1649_s15 = smov 0   ;;  %s1651_s16 = smov 0   ;;  %s1962_s0 = inlined_call_operand.vmem [shape: bf16[24,512], index: 0, kind: input, shape index: {}]   ;;  %s1963_s1 = inlined_call_operand.vmem [shape: bf16[512,1024], index: 1, kind: input, shape index: {}]   ;;  %s1964_s2 = inlined_call_operand.vmem [shape: f32[1,1024], index: 2, kind: input, shape index: {}]   ;;  %s1965_s3 = inlined_call_operand.vmem [shape: f32[1,1024], index: 3, kind: input, shape index: {}]   ;;  %s1966_s4 = inlined_call_operand.vmem [shape: f32[24,1024], index: 4, kind: output, shape index: {}]  }
   0x1   :  { %s1653_s17 = smov 0   ;;  %s1655_s18 = smov 0  }
   0x2   :  { %s1657_s19 = smov 0  }
   0x3 LB: > { %s29_s20 = sadd.s32 1, %s1618_s18  ;;  %s1347_s21 = sadd.s32 4294967295, %s1622_s19   ;;  %s1622_s19 = sphi %s1657_s19, %s14_s19   ;;  %s1618_s18 = sphi %s1655_s18, %s1971_s18   ;;  %s1614_s17 = sphi %s1653_s17, %s1970_s17   ;;  %s1610_s16 = sphi %s1651_s16, %s1969_s16   ;;  %s1606_s15 = sphi %s1649_s15, %s1968_s15  }
   0x4   : > { %p31_p0 = scmp.ge.s32.totalorder %s29_s20, 4  ;;  %p77_p1 = scmp.ne.s32.totalorder %s1610_s16, %s1606_s15 }
   0x5   : > { %p78_p2 = scmp.eq.s32.totalorder %s1622_s19, 0  ;;  %p161_p4 = scmp.eq.s32.totalorder %s1347_s21, 3 }
   0x6   : > { %s1973_s20 = smov (%p31_p0, %s29_s20), 0  ;;  %s70_s23 = sadd.s32 1, %s1610_s16 }
   0x7   : > { %p79_p3 = por %p78_p2, %p77_p1  ;;  %s66_s22 = ssub.s32 %s1618_s18, %s1973_s20 }
   0x8   : > { %p68_p5 = scmp.eq.s32.totalorder %s66_s22, 0  ;;  %p1684_p6 = por %p161_p4, %p77_p1 }
   0x9   : > { %p1351_p7 = scmp.ge.s32.totalorder %s1622_s19, 4 }
   0xa   : > { %s1689_s25 = scalar_select %p68_p5, %s1610_s16, %s70_s23  }
   0xb   : > { %198 = sbr.rel (%p1351_p7) target bundleno = 84 (0x54), region = 20 }
  0x10   : > { %201 = sbr.rel (!%p79_p3) target bundleno = 84 (0x54), region = 24  ;;  %s203_s26 = sand.u32 (%p79_p3), 1, %s1610_s16  }
  0x11   : > { %s1435_s27 = sshll.u32 (%p79_p3), %s1618_s18, 3  ;;  %s1352_s28 = sshll.u32 (%p79_p3), %s203_s26, 9 }
  0x12   : > { %s1697_s5 = scalar_lea.vmem (%p79_p3), %s1963_s1, %s1435_s27  ;;  %s1702_s6 = scalar_lea.vmem (%p79_p3), [#allocation3], %s1352_s28 }
  0x13   : > { %v366_v0 = vld [vmem:[%s1697_s5] sm:$0xff] (%p79_p3) }
  0x14   : > { %v368_v1 = vld [vmem:[%s1697_s5 + $0x20] sm:$0xff] (%p79_p3)  ;;  %367 = vst [vmem:[%s1702_s6] sm:$0xff] (%p79_p3), %v366_v0 }
  0x15   : > { %v370_v2 = vld [vmem:[%s1697_s5 + $0x40] sm:$0xff]  ;;  %369 = vst [vmem:[%s1702_s6 + $0x8] sm:$0xff] %v368_v1 }
  0x16   : > { %371 = vst [vmem:[%s1702_s6 + $0x10] sm:$0xff] %v370_v2  ;;  %v372_v3 = vld [vmem:[%s1697_s5 + $0x60] sm:$0xff] }
  0x17   : > { %v374_v4 = vld [vmem:[%s1697_s5 + $0x80] sm:$0xff]  ;;  %373 = vst [vmem:[%s1702_s6 + $0x18] sm:$0xff] %v372_v3 }
  0x18   : > { %v376_v5 = vld [vmem:[%s1697_s5 + $0xa0] sm:$0xff]  ;;  %375 = vst [vmem:[%s1702_s6 + $0x20] sm:$0xff] %v374_v4 }
  0x19   : > { %377 = vst [vmem:[%s1702_s6 + $0x28] sm:$0xff] %v376_v5  ;;  %v378_v6 = vld [vmem:[%s1697_s5 + $0xc0] sm:$0xff] }
  0x1a   : > { %v380_v7 = vld [vmem:[%s1697_s5 + $0xe0] sm:$0xff]  ;;  %379 = vst [vmem:[%s1702_s6 + $0x30] sm:$0xff] %v378_v6 }
  0x1b   : > { %v382_v8 = vld [vmem:[%s1697_s5 + $0x100] sm:$0xff]  ;;  %381 = vst [vmem:[%s1702_s6 + $0x38] sm:$0xff] %v380_v7 }
  0x1c   : > { %383 = vst [vmem:[%s1702_s6 + $0x40] sm:$0xff] %v382_v8  ;;  %v384_v9 = vld [vmem:[%s1697_s5 + $0x120] sm:$0xff] }
  0x1d   : > { %v386_v10 = vld [vmem:[%s1697_s5 + $0x140] sm:$0xff]  ;;  %385 = vst [vmem:[%s1702_s6 + $0x48] sm:$0xff] %v384_v9 }
  0x1e   : > { %v388_v11 = vld [vmem:[%s1697_s5 + $0x160] sm:$0xff]  ;;  %387 = vst [vmem:[%s1702_s6 + $0x50] sm:$0xff] %v386_v10 }
  0x1f   : > { %389 = vst [vmem:[%s1702_s6 + $0x58] sm:$0xff] %v388_v11  ;;  %v390_v12 = vld [vmem:[%s1697_s5 + $0x180] sm:$0xff] }
  0x20   : > { %v392_v13 = vld [vmem:[%s1697_s5 + $0x1a0] sm:$0xff]  ;;  %391 = vst [vmem:[%s1702_s6 + $0x60] sm:$0xff] %v390_v12 }
  0x21   : > { %v394_v14 = vld [vmem:[%s1697_s5 + $0x1c0] sm:$0xff]  ;;  %393 = vst [vmem:[%s1702_s6 + $0x68] sm:$0xff] %v392_v13 }
  0x22   : > { %395 = vst [vmem:[%s1702_s6 + $0x70] sm:$0xff] %v394_v14  ;;  %v396_v15 = vld [vmem:[%s1697_s5 + $0x1e0] sm:$0xff] }
  0x23   : > { %v398_v16 = vld [vmem:[%s1697_s5 + $0x200] sm:$0xff]  ;;  %397 = vst [vmem:[%s1702_s6 + $0x78] sm:$0xff] %v396_v15 }
  0x24   : > { %v400_v17 = vld [vmem:[%s1697_s5 + $0x220] sm:$0xff]  ;;  %399 = vst [vmem:[%s1702_s6 + $0x80] sm:$0xff] %v398_v16 }
  0x25   : > { %401 = vst [vmem:[%s1702_s6 + $0x88] sm:$0xff] %v400_v17  ;;  %v402_v18 = vld [vmem:[%s1697_s5 + $0x240] sm:$0xff] }
  0x26   : > { %v404_v19 = vld [vmem:[%s1697_s5 + $0x260] sm:$0xff]  ;;  %403 = vst [vmem:[%s1702_s6 + $0x90] sm:$0xff] %v402_v18 }
  0x27   : > { %v406_v20 = vld [vmem:[%s1697_s5 + $0x280] sm:$0xff]  ;;  %405 = vst [vmem:[%s1702_s6 + $0x98] sm:$0xff] %v404_v19 }
  0x28   : > { %407 = vst [vmem:[%s1702_s6 + $0xa0] sm:$0xff] %v406_v20  ;;  %v408_v21 = vld [vmem:[%s1697_s5 + $0x2a0] sm:$0xff] }
  0x29   : > { %v410_v22 = vld [vmem:[%s1697_s5 + $0x2c0] sm:$0xff]  ;;  %409 = vst [vmem:[%s1702_s6 + $0xa8] sm:$0xff] %v408_v21 }
  0x2a   : > { %v412_v23 = vld [vmem:[%s1697_s5 + $0x2e0] sm:$0xff]  ;;  %411 = vst [vmem:[%s1702_s6 + $0xb0] sm:$0xff] %v410_v22 }
  0x2b   : > { %413 = vst [vmem:[%s1702_s6 + $0xb8] sm:$0xff] %v412_v23  ;;  %v414_v24 = vld [vmem:[%s1697_s5 + $0x300] sm:$0xff] }
  0x2c   : > { %v416_v25 = vld [vmem:[%s1697_s5 + $0x320] sm:$0xff]  ;;  %415 = vst [vmem:[%s1702_s6 + $0xc0] sm:$0xff] %v414_v24 }
  0x2d   : > { %v418_v26 = vld [vmem:[%s1697_s5 + $0x340] sm:$0xff]  ;;  %417 = vst [vmem:[%s1702_s6 + $0xc8] sm:$0xff] %v416_v25 }
  0x2e   : > { %419 = vst [vmem:[%s1702_s6 + $0xd0] sm:$0xff] %v418_v26  ;;  %v420_v27 = vld [vmem:[%s1697_s5 + $0x360] sm:$0xff] }
  0x2f   : > { %v422_v28 = vld [vmem:[%s1697_s5 + $0x380] sm:$0xff]  ;;  %421 = vst [vmem:[%s1702_s6 + $0xd8] sm:$0xff] %v420_v27 }
  0x30   : > { %v424_v29 = vld [vmem:[%s1697_s5 + $0x3a0] sm:$0xff]  ;;  %423 = vst [vmem:[%s1702_s6 + $0xe0] sm:$0xff] %v422_v28 }
  0x31   : > { %425 = vst [vmem:[%s1702_s6 + $0xe8] sm:$0xff] %v424_v29  ;;  %v426_v30 = vld [vmem:[%s1697_s5 + $0x3c0] sm:$0xff] }
  0x32   : > { %v428_v31 = vld [vmem:[%s1697_s5 + $0x3e0] sm:$0xff]  ;;  %427 = vst [vmem:[%s1702_s6 + $0xf0] sm:$0xff] %v426_v30 }
  0x33   : > { %v430_v32 = vld [vmem:[%s1697_s5 + $0x400] sm:$0xff]  ;;  %429 = vst [vmem:[%s1702_s6 + $0xf8] sm:$0xff] %v428_v31 }
  0x34   : > { %431 = vst [vmem:[%s1702_s6 + $0x100] sm:$0xff] %v430_v32  ;;  %v432_v33 = vld [vmem:[%s1697_s5 + $0x420] sm:$0xff] }
  0x35   : > { %v434_v34 = vld [vmem:[%s1697_s5 + $0x440] sm:$0xff]  ;;  %433 = vst [vmem:[%s1702_s6 + $0x108] sm:$0xff] %v432_v33 }
  0x36   : > { %v436_v35 = vld [vmem:[%s1697_s5 + $0x460] sm:$0xff]  ;;  %435 = vst [vmem:[%s1702_s6 + $0x110] sm:$0xff] %v434_v34 }
  0x37   : > { %437 = vst [vmem:[%s1702_s6 + $0x118] sm:$0xff] %v436_v35  ;;  %v438_v36 = vld [vmem:[%s1697_s5 + $0x480] sm:$0xff] }
  0x38   : > { %v440_v37 = vld [vmem:[%s1697_s5 + $0x4a0] sm:$0xff]  ;;  %439 = vst [vmem:[%s1702_s6 + $0x120] sm:$0xff] %v438_v36 }
  0x39   : > { %v442_v38 = vld [vmem:[%s1697_s5 + $0x4c0] sm:$0xff]  ;;  %441 = vst [vmem:[%s1702_s6 + $0x128] sm:$0xff] %v440_v37 }
  0x3a   : > { %443 = vst [vmem:[%s1702_s6 + $0x130] sm:$0xff] %v442_v38  ;;  %v444_v39 = vld [vmem:[%s1697_s5 + $0x4e0] sm:$0xff] }
  0x3b   : > { %v446_v40 = vld [vmem:[%s1697_s5 + $0x500] sm:$0xff]  ;;  %445 = vst [vmem:[%s1702_s6 + $0x138] sm:$0xff] %v444_v39 }
  0x3c   : > { %v448_v41 = vld [vmem:[%s1697_s5 + $0x520] sm:$0xff]  ;;  %447 = vst [vmem:[%s1702_s6 + $0x140] sm:$0xff] %v446_v40 }
  0x3d   : > { %449 = vst [vmem:[%s1702_s6 + $0x148] sm:$0xff] %v448_v41  ;;  %v450_v42 = vld [vmem:[%s1697_s5 + $0x540] sm:$0xff] }
  0x3e   : > { %v452_v43 = vld [vmem:[%s1697_s5 + $0x560] sm:$0xff]  ;;  %451 = vst [vmem:[%s1702_s6 + $0x150] sm:$0xff] %v450_v42 }
  0x3f   : > { %v454_v44 = vld [vmem:[%s1697_s5 + $0x580] sm:$0xff]  ;;  %453 = vst [vmem:[%s1702_s6 + $0x158] sm:$0xff] %v452_v43 }
  0x40   : > { %455 = vst [vmem:[%s1702_s6 + $0x160] sm:$0xff] %v454_v44  ;;  %v456_v45 = vld [vmem:[%s1697_s5 + $0x5a0] sm:$0xff] }
  0x41   : > { %v458_v46 = vld [vmem:[%s1697_s5 + $0x5c0] sm:$0xff]  ;;  %457 = vst [vmem:[%s1702_s6 + $0x168] sm:$0xff] %v456_v45 }
  0x42   : > { %v460_v47 = vld [vmem:[%s1697_s5 + $0x5e0] sm:$0xff]  ;;  %459 = vst [vmem:[%s1702_s6 + $0x170] sm:$0xff] %v458_v46 }
  0x43   : > { %461 = vst [vmem:[%s1702_s6 + $0x178] sm:$0xff] %v460_v47  ;;  %v462_v48 = vld [vmem:[%s1697_s5 + $0x600] sm:$0xff] }
  0x44   : > { %v464_v49 = vld [vmem:[%s1697_s5 + $0x620] sm:$0xff]  ;;  %463 = vst [vmem:[%s1702_s6 + $0x180] sm:$0xff] %v462_v48 }
  0x45   : > { %v466_v50 = vld [vmem:[%s1697_s5 + $0x640] sm:$0xff]  ;;  %465 = vst [vmem:[%s1702_s6 + $0x188] sm:$0xff] %v464_v49 }
  0x46   : > { %467 = vst [vmem:[%s1702_s6 + $0x190] sm:$0xff] %v466_v50  ;;  %v468_v51 = vld [vmem:[%s1697_s5 + $0x660] sm:$0xff] }
  0x47   : > { %v470_v52 = vld [vmem:[%s1697_s5 + $0x680] sm:$0xff]  ;;  %469 = vst [vmem:[%s1702_s6 + $0x198] sm:$0xff] %v468_v51 }
  0x48   : > { %v472_v53 = vld [vmem:[%s1697_s5 + $0x6a0] sm:$0xff]  ;;  %471 = vst [vmem:[%s1702_s6 + $0x1a0] sm:$0xff] %v470_v52 }
  0x49   : > { %473 = vst [vmem:[%s1702_s6 + $0x1a8] sm:$0xff] %v472_v53  ;;  %v474_v54 = vld [vmem:[%s1697_s5 + $0x6c0] sm:$0xff] }
  0x4a   : > { %v476_v55 = vld [vmem:[%s1697_s5 + $0x6e0] sm:$0xff]  ;;  %475 = vst [vmem:[%s1702_s6 + $0x1b0] sm:$0xff] %v474_v54 }
  0x4b   : > { %v478_v56 = vld [vmem:[%s1697_s5 + $0x700] sm:$0xff]  ;;  %477 = vst [vmem:[%s1702_s6 + $0x1b8] sm:$0xff] %v476_v55 }
  0x4c   : > { %479 = vst [vmem:[%s1702_s6 + $0x1c0] sm:$0xff] %v478_v56  ;;  %v480_v57 = vld [vmem:[%s1697_s5 + $0x720] sm:$0xff] }
  0x4d   : > { %v482_v58 = vld [vmem:[%s1697_s5 + $0x740] sm:$0xff]  ;;  %481 = vst [vmem:[%s1702_s6 + $0x1c8] sm:$0xff] %v480_v57 }
  0x4e   : > { %v484_v59 = vld [vmem:[%s1697_s5 + $0x760] sm:$0xff]  ;;  %483 = vst [vmem:[%s1702_s6 + $0x1d0] sm:$0xff] %v482_v58 }
  0x4f   : > { %485 = vst [vmem:[%s1702_s6 + $0x1d8] sm:$0xff] %v484_v59  ;;  %v486_v60 = vld [vmem:[%s1697_s5 + $0x780] sm:$0xff] }
  0x50   : > { %v488_v61 = vld [vmem:[%s1697_s5 + $0x7a0] sm:$0xff]  ;;  %487 = vst [vmem:[%s1702_s6 + $0x1e0] sm:$0xff] %v486_v60 }
  0x51   : > { %v490_v62 = vld [vmem:[%s1697_s5 + $0x7c0] sm:$0xff]  ;;  %489 = vst [vmem:[%s1702_s6 + $0x1e8] sm:$0xff] %v488_v61 }
  0x52   : > { %491 = vst [vmem:[%s1702_s6 + $0x1f0] sm:$0xff] %v490_v62  ;;  %v492_v63 = vld [vmem:[%s1697_s5 + $0x7e0] sm:$0xff] }
  0x53   : > { %493 = vst [vmem:[%s1702_s6 + $0x1f8] sm:$0xff] %v492_v63 }
  0x54 PF: > { %p1355_p8 = scmp.ge.s32.totalorder %s1622_s19, 1  ;;  %p514_p9 = scmp.lt.s32.totalorder %s1622_s19, 5 }
  0x56   : > { %p515_p10 = pnand %p1355_p8, %p514_p9 }
  0x57   : > { %s521_s7 = sand.u32 (!%p515_p10), 1, %s1606_s15   ;;  %s1357_s30 = sshll.u32 (!%p515_p10), %s1614_s17, 1 }
  0x58   : > { %518 = sbr.rel (%p515_p10) target bundleno = 378 (0x17a), region = 70  ;;  %s1356_s8 = sshll.u32 (!%p515_p10), %s521_s7, 9 }
  0x59   : > { %s1840_s13 = scalar_lea.vmem (!%p515_p10), [#allocation3], %s1356_s8  ;;  %p578_p11 = scmp.lt.s32.totalorder (!%p515_p10), %s1357_s30, 7 }
  0x5a   : > { %s1437_s12 = smul.u32 (!%p515_p10), 48, %s521_s7 }
  0x5d   : > { %v1576_v0 = vld [vmem:[%s1962_s0 + $0x4] ss:$16 sps:$4 sm:$0xff]   ;;  %v1579_v1 = vld [vmem:[%s1962_s0 + $0xc] ss:$16 sps:$4 sm:$0xff]   ;;  %v1482_v4 = vld [vmem:[%s1840_s13 + $0x70] ss:$8 sps:$4 sm:$0xff]  }
  0x5e   : > { %v1478_v2 = vld [vmem:[%s1840_s13 + $0x74] ss:$8 sps:$4 sm:$0xff]   ;;  %1061 = vmatprep.mubr.bf16.mxu0 %v1576_v0  ;;  %1112 = vmatprep.mubr.bf16.mxu1 %v1579_v1  ;;  %v1483_v5 = vld [vmem:[%s1840_s13 + $0x170] ss:$8 sps:$4 sm:$0xff]   ;;  %v1484_v6 = vld [vmem:[%s1840_s13 + $0x64] ss:$8 sps:$4 sm:$0xff]  }
  0x5f   : > { %v1480_v3 = vld [vmem:[%s1840_s13 + $0x174] ss:$8 sps:$4 sm:$0xff]   ;;  %1029 = vmatprep.subr.bf16.mxu0 %v1478_v2  ;;  %v1486_v7 = vld [vmem:[%s1840_s13 + $0x164] ss:$8 sps:$4 sm:$0xff]   ;;  %v1488_v8 = vld [vmem:[%s1840_s13 + $0x60] ss:$8 sps:$4 sm:$0xff]  }
  0x60   : > { %1080 = vmatprep.subr.bf16.mxu1 %v1480_v3  ;;  %1030 = vmatpush1.bf16.msra.mxu0 %v1482_v4  ;;  %v1489_v9 = vld [vmem:[%s1840_s13 + $0x160] ss:$8 sps:$4 sm:$0xff]   ;;  %v1490_v10 = vld [vmem:[%s1840_s13 + $0x54] ss:$8 sps:$4 sm:$0xff]   ;;  %v1494_v12 = vld [vmem:[%s1840_s13 + $0x50] ss:$8 sps:$4 sm:$0xff]  }
  0x61   : > { %1081 = vmatpush1.bf16.msra.mxu1 %v1483_v5  ;;  %1031 = vmatprep.subr.bf16.mxu0 %v1484_v6  ;;  %v1492_v11 = vld [vmem:[%s1840_s13 + $0x154] ss:$8 sps:$4 sm:$0xff]   ;;  %v1495_v13 = vld [vmem:[%s1840_s13 + $0x150] ss:$8 sps:$4 sm:$0xff]   ;;  %v1496_v14 = vld [vmem:[%s1840_s13 + $0x44] ss:$8 sps:$4 sm:$0xff]  }
  0x62   : > { %1082 = vmatprep.subr.bf16.mxu1 %v1486_v7  ;;  %v1498_v15 = vld [vmem:[%s1840_s13 + $0x144] ss:$8 sps:$4 sm:$0xff]   ;;  %v1500_v16 = vld [vmem:[%s1840_s13 + $0x40] ss:$8 sps:$4 sm:$0xff]   ;;  %v1502_v18 = vld [vmem:[%s1840_s13 + $0x34] ss:$8 sps:$4 sm:$0xff]  }
  0x63   : > { %v1501_v17 = vld [vmem:[%s1840_s13 + $0x140] ss:$8 sps:$4 sm:$0xff]   ;;  %v1504_v19 = vld [vmem:[%s1840_s13 + $0x134] ss:$8 sps:$4 sm:$0xff]   ;;  %v1506_v20 = vld [vmem:[%s1840_s13 + $0x30] ss:$8 sps:$4 sm:$0xff]  }
  0x64   : > { %1032 = vmatpush1.bf16.msra.mxu0 %v1488_v8  ;;  %v1507_v21 = vld [vmem:[%s1840_s13 + $0x130] ss:$8 sps:$4 sm:$0xff]   ;;  %v1508_v22 = vld [vmem:[%s1840_s13 + $0x24] ss:$8 sps:$4 sm:$0xff]   ;;  %v1512_v24 = vld [vmem:[%s1840_s13 + $0x20] ss:$8 sps:$4 sm:$0xff]  }
  0x65   : > { %1083 = vmatpush1.bf16.msra.mxu1 %v1489_v9  ;;  %1033 = vmatprep.subr.bf16.mxu0 %v1490_v10  ;;  %v1510_v23 = vld [vmem:[%s1840_s13 + $0x124] ss:$8 sps:$4 sm:$0xff]   ;;  %v1513_v25 = vld [vmem:[%s1840_s13 + $0x120] ss:$8 sps:$4 sm:$0xff]   ;;  %v1514_v26 = vld [vmem:[%s1840_s13 + $0x14] ss:$8 sps:$4 sm:$0xff]   ;;  %v1154_v10 = vlaneseq }
  0x66   : > { %1084 = vmatprep.subr.bf16.mxu1 %v1492_v11  ;;  %v1516_v27 = vld [vmem:[%s1840_s13 + $0x114] ss:$8 sps:$4 sm:$0xff]   ;;  %v1518_v28 = vld [vmem:[%s1840_s13 + $0x10] ss:$8 sps:$4 sm:$0xff]   ;;  %v1520_v30 = vld [vmem:[%s1840_s13 + $0x4] ss:$8 sps:$4 sm:$0xff]  }
  0x67   : > { %v1519_v29 = vld [vmem:[%s1840_s13 + $0x110] ss:$8 sps:$4 sm:$0xff]   ;;  %v1522_v31 = vld [vmem:[%s1840_s13 + $0x104] ss:$8 sps:$4 sm:$0xff]   ;;  %v1524_v32 = vld [vmem:[%s1840_s13] ss:$8 sps:$4 sm:$0xff]  }
  0x68   : > { %1034 = vmatpush1.bf16.msra.mxu0 %v1494_v12  ;;  %v1525_v33 = vld [vmem:[%s1840_s13 + $0x100] ss:$8 sps:$4 sm:$0xff]   ;;  %v1526_v34 = vld [vmem:[%s1840_s13 + $0xf4] ss:$8 sps:$4 sm:$0xff]   ;;  %v1530_v36 = vld [vmem:[%s1840_s13 + $0xf0] ss:$8 sps:$4 sm:$0xff]  }
  0x69   : > { %1085 = vmatpush1.bf16.msra.mxu1 %v1495_v13  ;;  %1035 = vmatprep.subr.bf16.mxu0 %v1496_v14  ;;  %v1528_v35 = vld [vmem:[%s1840_s13 + $0x1f4] ss:$8 sps:$4 sm:$0xff]   ;;  %v1531_v37 = vld [vmem:[%s1840_s13 + $0x1f0] ss:$8 sps:$4 sm:$0xff]   ;;  %v1532_v38 = vld [vmem:[%s1840_s13 + $0xe4] ss:$8 sps:$4 sm:$0xff]  }
  0x6a   : > { %1086 = vmatprep.subr.bf16.mxu1 %v1498_v15  ;;  %v1534_v39 = vld [vmem:[%s1840_s13 + $0x1e4] ss:$8 sps:$4 sm:$0xff]   ;;  %v1536_v40 = vld [vmem:[%s1840_s13 + $0xe0] ss:$8 sps:$4 sm:$0xff]   ;;  %v1538_v42 = vld [vmem:[%s1840_s13 + $0xd4] ss:$8 sps:$4 sm:$0xff]  }
  0x6b   : > { %v1537_v41 = vld [vmem:[%s1840_s13 + $0x1e0] ss:$8 sps:$4 sm:$0xff]   ;;  %v1540_v43 = vld [vmem:[%s1840_s13 + $0x1d4] ss:$8 sps:$4 sm:$0xff]   ;;  %v1542_v44 = vld [vmem:[%s1840_s13 + $0xd0] ss:$8 sps:$4 sm:$0xff]  }
  0x6c   : > { %1036 = vmatpush1.bf16.msra.mxu0 %v1500_v16  ;;  %v1543_v45 = vld [vmem:[%s1840_s13 + $0x1d0] ss:$8 sps:$4 sm:$0xff]   ;;  %v1544_v46 = vld [vmem:[%s1840_s13 + $0xc4] ss:$8 sps:$4 sm:$0xff]   ;;  %v1548_v48 = vld [vmem:[%s1840_s13 + $0xc0] ss:$8 sps:$4 sm:$0xff]  }
  0x6d   : > { %1087 = vmatpush1.bf16.msra.mxu1 %v1501_v17  ;;  %1037 = vmatprep.subr.bf16.mxu0 %v1502_v18  ;;  %v1546_v47 = vld [vmem:[%s1840_s13 + $0x1c4] ss:$8 sps:$4 sm:$0xff]   ;;  %v1549_v49 = vld [vmem:[%s1840_s13 + $0x1c0] ss:$8 sps:$4 sm:$0xff]   ;;  %v1550_v50 = vld [vmem:[%s1840_s13 + $0xb4] ss:$8 sps:$4 sm:$0xff]  }
  0x6e   : > { %1088 = vmatprep.subr.bf16.mxu1 %v1504_v19  ;;  %v1552_v51 = vld [vmem:[%s1840_s13 + $0x1b4] ss:$8 sps:$4 sm:$0xff]   ;;  %v1554_v52 = vld [vmem:[%s1840_s13 + $0xb0] ss:$8 sps:$4 sm:$0xff]   ;;  %v1556_v54 = vld [vmem:[%s1840_s13 + $0xa4] ss:$8 sps:$4 sm:$0xff]  }
  0x6f   : > { %v1555_v53 = vld [vmem:[%s1840_s13 + $0x1b0] ss:$8 sps:$4 sm:$0xff]   ;;  %v1558_v55 = vld [vmem:[%s1840_s13 + $0x1a4] ss:$8 sps:$4 sm:$0xff]   ;;  %v1560_v56 = vld [vmem:[%s1840_s13 + $0xa0] ss:$8 sps:$4 sm:$0xff]  }
  0x70   : > { %1038 = vmatpush1.bf16.msra.mxu0 %v1506_v20  ;;  %v1561_v57 = vld [vmem:[%s1840_s13 + $0x1a0] ss:$8 sps:$4 sm:$0xff]   ;;  %v1562_v58 = vld [vmem:[%s1840_s13 + $0x94] ss:$8 sps:$4 sm:$0xff]   ;;  %v1566_v60 = vld [vmem:[%s1840_s13 + $0x90] ss:$8 sps:$4 sm:$0xff]  }
  0x71   : > { %1089 = vmatpush1.bf16.msra.mxu1 %v1507_v21  ;;  %1039 = vmatprep.subr.bf16.mxu0 %v1508_v22  ;;  %v1564_v59 = vld [vmem:[%s1840_s13 + $0x194] ss:$8 sps:$4 sm:$0xff]   ;;  %v1567_v61 = vld [vmem:[%s1840_s13 + $0x190] ss:$8 sps:$4 sm:$0xff]   ;;  %v1568_v62 = vld [vmem:[%s1840_s13 + $0x84] ss:$8 sps:$4 sm:$0xff]  }
  0x72   : > { %1090 = vmatprep.subr.bf16.mxu1 %v1510_v23  ;;  %v1570_v63 = vld [vmem:[%s1840_s13 + $0x184] ss:$8 sps:$4 sm:$0xff]   ;;  %v1572_v0 = vld [vmem:[%s1840_s13 + $0x80] ss:$8 sps:$4 sm:$0xff]   ;;  %s1975_s30 = smov (!%p578_p11, %s1357_s30), 7  ;;  %v1155_v11 = vshrl.u32 %v1154_v10, 7 }
  0x73   : > { %v1573_v1 = vld [vmem:[%s1840_s13 + $0x180] ss:$8 sps:$4 sm:$0xff]   ;;  %s580_s8 = scalar_lea.vmem %s1964_s2, %s1975_s30  ;;  %s585_s11 = scalar_lea.vmem %s1965_s3, %s1975_s30 }
  0x74   : > { %1040 = vmatpush1.bf16.msra.mxu0 %v1512_v24  ;;  %v609_v2 = vld [vmem:[%s1962_s0 + $0x20] sm:$0xff]  ;;  %v610_v3 = vld [vmem:[%s1962_s0 + $0x28] sm:$0xff]  ;;  %v1156_v12 = vsub.s32 0, %v1155_v11  ;;  %v1160_v14 = vsub.s32 1, %v1155_v11  ;;  %s1927_s13 = scalar_lea.vmem [#allocation4], %s1437_s12  ;;  %s1436_s15 = sshll.u32 (%p1684_p6), %s1614_s17, 4 }
  0x75   : > { %1091 = vmatpush1.bf16.msra.mxu1 %v1513_v25  ;;  %1041 = vmatprep.subr.bf16.mxu0 %v1514_v26  ;;  %v1574_v4 = vld [vmem:[%s1962_s0] ss:$16 sps:$4 sm:$0xff]   ;;  %v1577_v5 = vld [vmem:[%s1962_s0 + $0x8] ss:$16 sps:$4 sm:$0xff]   ;;  %v1364_v6 = vcombine.high %v609_v2, %v609_v2  ;;  %v1366_v7 = vcombine.high %v610_v3, %v610_v3  ;;  %v1363_v8 = vcombine.low %v609_v2, %v609_v2  ;;  %s1206_s21 = scalar_lea.vmem (%p1684_p6), %s1966_s4, %s1436_s15 }
  0x76   : > { %1092 = vmatprep.subr.bf16.mxu1 %v1516_v27  ;;  %v1365_v9 = vcombine.low %v610_v3, %v610_v3  ;;  %v1152_v13 = vld [vmem:[%s580_s8] sm:$0x3] }
  0x77   : > { %v1170_v15 = vld [vmem:[%s585_s11] sm:$0x3]  ;;  %v1157_v16 = vrot.slane %v1152_v13, %v1156_v12  ;;  %v1161_v21 = vrot.slane %v1152_v13, %v1160_v14 }
  0x78   : > { %1042 = vmatpush1.bf16.msra.mxu0 %v1518_v28  ;;  %v1175_v20 = vrot.slane %v1170_v15, %v1156_v12  ;;  %v1179_v26 = vrot.slane %v1170_v15, %v1160_v14 }
  0x79   : > { %1093 = vmatpush1.bf16.msra.mxu1 %v1519_v29  ;;  %1043 = vmatprep.subr.bf16.mxu0 %v1520_v30 }
  0x7a   : > { %1094 = vmatprep.subr.bf16.mxu1 %v1522_v31 }
  0x7c   : > { %1044 = vmatpush1.bf16.msra.mxu0 %v1524_v32 }
  0x7d   : > { %1095 = vmatpush1.bf16.msra.mxu1 %v1525_v33  ;;  %1045 = vmatprep.subr.bf16.mxu0 %v1526_v34 }
  0x7e   : > { %1096 = vmatprep.subr.bf16.mxu1 %v1528_v35 }
  0x80   : > { %1046 = vmatpush2.bf16.msra.mxu0 %v1530_v36 }
  0x81   : > { %1097 = vmatpush2.bf16.msra.mxu1 %v1531_v37  ;;  %1047 = vmatprep.subr.bf16.mxu0 %v1532_v38 }
  0x82   : > { %1098 = vmatprep.subr.bf16.mxu1 %v1534_v39 }
  0x84   : > { %1048 = vmatpush2.bf16.msra.mxu0 %v1536_v40 }
  0x85   : > { %1099 = vmatpush2.bf16.msra.mxu1 %v1537_v41  ;;  %1049 = vmatprep.subr.bf16.mxu0 %v1538_v42 }
  0x86   : > { %1100 = vmatprep.subr.bf16.mxu1 %v1540_v43 }
  0x88   : > { %1050 = vmatpush2.bf16.msra.mxu0 %v1542_v44 }
  0x89   : > { %1101 = vmatpush2.bf16.msra.mxu1 %v1543_v45  ;;  %1051 = vmatprep.subr.bf16.mxu0 %v1544_v46 }
  0x8a   : > { %1102 = vmatprep.subr.bf16.mxu1 %v1546_v47 }
  0x8c   : > { %1052 = vmatpush2.bf16.msra.mxu0 %v1548_v48 }
  0x8d   : > { %1103 = vmatpush2.bf16.msra.mxu1 %v1549_v49  ;;  %1053 = vmatprep.subr.bf16.mxu0 %v1550_v50 }
  0x8e   : > { %1104 = vmatprep.subr.bf16.mxu1 %v1552_v51 }
  0x90   : > { %1054 = vmatpush2.bf16.msra.mxu0 %v1554_v52 }
  0x91   : > { %1105 = vmatpush2.bf16.msra.mxu1 %v1555_v53  ;;  %1055 = vmatprep.subr.bf16.mxu0 %v1556_v54 }
  0x92   : > { %1106 = vmatprep.subr.bf16.mxu1 %v1558_v55 }
  0x94   : > { %1056 = vmatpush2.bf16.msra.mxu0 %v1560_v56 }
  0x95   : > { %1107 = vmatpush2.bf16.msra.mxu1 %v1561_v57  ;;  %1057 = vmatprep.subr.bf16.mxu0 %v1562_v58 }
  0x96   : > { %1108 = vmatprep.subr.bf16.mxu1 %v1564_v59 }
  0x98   : > { %1058 = vmatpush2.bf16.msra.mxu0 %v1566_v60 }
  0x99   : > { %1109 = vmatpush2.bf16.msra.mxu1 %v1567_v61  ;;  %1059 = vmatprep.subr.bf16.mxu0 %v1568_v62 }
  0x9a   : > { %1110 = vmatprep.subr.bf16.mxu1 %v1570_v63 }
  0x9c   : > { %1060 = vmatpush2.bf16.msra.mxu0 %v1572_v0 }
  0x9d   : > { %1111 = vmatpush2.bf16.msra.mxu1 %v1573_v1 }
  0x9f   : > { %1062 = vmatmul.mubr.bf16.vlgmr.msra.gmra.mxu0 %v1574_v4 }
  0xa0   : > { %1113 = vmatmul.mubr.bf16.vlgmr.msra.gmra.mxu1 %v1577_v5  ;;  %1071 = vmatprep.mubr.bf16.mxu0 %v1364_v6 }
  0xa1   : > { %1122 = vmatprep.mubr.bf16.mxu1 %v1366_v7 }
  0xa7   : > { %1072 = vmatmul.mubr.bf16.gmra.mxu0 %v1363_v8 }
  0xa8   : > { %1123 = vmatmul.mubr.bf16.gmra.mxu1 %v1365_v9 }
 0x15f   : > { %v1063_v17 = vpop.f32.mrf.mxu0 }
 0x160   : > { %v1114_v18 = vpop.f32.mrf.mxu1 }
 0x161   : > { %v1115_v19 = vadd.f32 %v1114_v18, %v1063_v17  ;;  %v1065_v22 = vpop.f32.mrf.mxu0 }
 0x162   : > { %v1116_v23 = vpop.f32.mrf.mxu1 }
 0x163   : > { %v1164_v24 = vmul.f32 %v1157_v16, %v1115_v19  ;;  %v1117_v25 = vadd.f32 %v1116_v23, %v1065_v22  ;;  %v1067_v27 = vpop.f32.mrf.mxu0 }
 0x164   : > { %v1118_v28 = vpop.f32.mrf.mxu1 }
 0x165   : > { %v1182_v29 = vadd.f32 %v1175_v20, %v1164_v24  ;;  %v1165_v30 = vmul.f32 %v1161_v21, %v1117_v25  ;;  %v1119_v31 = vadd.f32 %v1118_v28, %v1067_v27  ;;  %v1069_v32 = vpop.f32.mrf.mxu0 }
 0x166   : > { %v1120_v33 = vpop.f32.mrf.mxu1 }
 0x167   : > { %1188 = vst [vmem:[%s1927_s13] sm:$0xff] %v1182_v29  ;;  %v1183_v34 = vadd.f32 %v1179_v26, %v1165_v30  ;;  %v1166_v35 = vmul.f32 %v1157_v16, %v1119_v31  ;;  %v1121_v36 = vadd.f32 %v1120_v33, %v1069_v32  ;;  %v1073_v37 = vpop.f32.mrf.mxu0 }
 0x168   : > { %v1124_v38 = vpop.f32.mrf.mxu1 }
 0x169   : > { %1189 = vst [vmem:[%s1927_s13 + $0x8] sm:$0xff] %v1183_v34  ;;  %v1184_v39 = vadd.f32 %v1175_v20, %v1166_v35  ;;  %v1167_v40 = vmul.f32 %v1161_v21, %v1121_v36  ;;  %v1125_v41 = vadd.f32 %v1124_v38, %v1073_v37  ;;  %v1075_v42 = vpop.f32.mrf.mxu0 }
 0x16a   : > { %v1126_v43 = vpop.f32.mrf.mxu1 }
 0x16b   : > { %1190 = vst [vmem:[%s1927_s13 + $0x10] sm:$0xff] %v1184_v39  ;;  %v1185_v44 = vadd.f32 %v1179_v26, %v1167_v40  ;;  %v1168_v45 = vmul.f32 %v1157_v16, %v1125_v41  ;;  %v1127_v46 = vadd.f32 %v1126_v43, %v1075_v42  ;;  %v1077_v47 = vpop.f32.mrf.mxu0 }
 0x16c   : > { %v1128_v48 = vpop.f32.mrf.mxu1 }
 0x16d   : > { %1191 = vst [vmem:[%s1927_s13 + $0x18] sm:$0xff] %v1185_v44  ;;  %v1186_v49 = vadd.f32 %v1175_v20, %v1168_v45  ;;  %v1169_v50 = vmul.f32 %v1161_v21, %v1127_v46  ;;  %v1078_v51 = vpop.f32.mrf.mxu0  ;;  %1200 = sbr.rel (!%p1684_p6) target bundleno = 378 (0x17a), region = 86 }
 0x16e   : > { %v1129_v52 = vpop.f32.mrf.mxu1  ;;  %v1219_v54 = vld [vmem:[%s1927_s13] sm:$0xff] (%p1684_p6) }
 0x16f   : > { %1192 = vst [vmem:[%s1927_s13 + $0x20] sm:$0xff] %v1186_v49  ;;  %v1187_v53 = vadd.f32 %v1179_v26, %v1169_v50  ;;  %1220 = vst [vmem:[%s1206_s21] sm:$0xff] (%p1684_p6), %v1219_v54 }
 0x170   : > { %v1221_v55 = vld [vmem:[%s1927_s13 + $0x8] sm:$0xff] (%p1684_p6) }
 0x171   : > { %1193 = vst [vmem:[%s1927_s13 + $0x28] sm:$0xff] %v1187_v53  ;;  %1222 = vst [vmem:[%s1206_s21 + $0x8] sm:$0xff] (%p1684_p6), %v1221_v55 }
 0x172   : > { %v1223_v56 = vld [vmem:[%s1927_s13 + $0x10] sm:$0xff] }
 0x173   : > { %1224 = vst [vmem:[%s1206_s21 + $0x40] sm:$0xff] %v1223_v56 }
 0x174   : > { %v1225_v57 = vld [vmem:[%s1927_s13 + $0x18] sm:$0xff] }
 0x175   : > { %1226 = vst [vmem:[%s1206_s21 + $0x48] sm:$0xff] %v1225_v57 }
 0x176   : > { %v1227_v58 = vld [vmem:[%s1927_s13 + $0x20] sm:$0xff] }
 0x177   : > { %1228 = vst [vmem:[%s1206_s21 + $0x80] sm:$0xff] %v1227_v58 }
 0x178   : > { %v1229_v59 = vld [vmem:[%s1927_s13 + $0x28] sm:$0xff] }
 0x179   : > { %1230 = vst [vmem:[%s1206_s21 + $0x88] sm:$0xff] %v1229_v59 }
 0x17a PF: > { %s14_s19 = sadd.s32 1, %s1622_s19   ;;  %s1968_s15 = smov %s1610_s16 }
 0x17b   : > { %p11_p12 = scmp.ge.s32.totalorder %s14_s19, 6   ;;  %s1969_s16 = smov %s1689_s25 }
 0x17c   : > { %s1970_s17 = smov %s1618_s18  ;;  %s1971_s18 = smov %s1973_s20 }
 0x17d   :  { %13 = sbr.rel (!%p11_p12) target bundleno = 3 (0x3), region = 149 }

// kernel: forward.33
= control target key start
LH: loop header
LB: loop body
LE: loop exit
PB: predicated region body
PF: predicated region fallthrough
CT: control target
= control target key end

     0   :  { %s1333_s18 = smov 0   ;;  %s1335_s19 = smov 0   ;;  %s1558_s0 = inlined_call_operand.vmem [shape: bf16[24,256], index: 0, kind: input, shape index: {}]   ;;  %s1559_s1 = inlined_call_operand.vmem [shape: bf16[256,1024], index: 1, kind: input, shape index: {}]   ;;  %s1560_s2 = inlined_call_operand.vmem [shape: f32[1,1024], index: 2, kind: input, shape index: {}]   ;;  %s1561_s3 = inlined_call_operand.vmem [shape: f32[1,1024], index: 3, kind: input, shape index: {}]   ;;  %s1562_s4 = inlined_call_operand.vmem [shape: f32[24,1024], index: 4, kind: input, shape index: {}]   ;;  %s1563_s5 = inlined_call_operand.vmem [shape: f32[24,1024], index: 5, kind: output, shape index: {}]  }
   0x1   :  { %s1337_s20 = smov 0   ;;  %s1339_s21 = smov 0  }
   0x2   :  { %s1341_s22 = smov 0  }
   0x3 LB: > { %s30_s23 = sadd.s32 1, %s1297_s21  ;;  %s1079_s24 = sadd.s32 4294967295, %s1301_s22   ;;  %s1301_s22 = sphi %s1341_s22, %s15_s22   ;;  %s1297_s21 = sphi %s1339_s21, %s1569_s21   ;;  %s1293_s20 = sphi %s1337_s20, %s1568_s20   ;;  %s1289_s19 = sphi %s1335_s19, %s1567_s19   ;;  %s1285_s18 = sphi %s1333_s18, %s1566_s18  }
   0x4   : > { %p32_p0 = scmp.ge.s32.totalorder %s30_s23, 4  ;;  %p78_p1 = scmp.ne.s32.totalorder %s1289_s19, %s1285_s18 }
   0x5   : > { %p79_p2 = scmp.eq.s32.totalorder %s1301_s22, 0  ;;  %p190_p4 = scmp.eq.s32.totalorder %s1079_s24, 3 }
   0x6   : > { %s1571_s23 = smov (%p32_p0, %s30_s23), 0  ;;  %s71_s27 = sadd.s32 1, %s1289_s19 }
   0x7   : > { %p1365_p3 = por %p79_p2, %p78_p1  ;;  %s67_s26 = ssub.s32 %s1297_s21, %s1571_s23 }
   0x8   : > { %p69_p5 = scmp.eq.s32.totalorder %s67_s26, 0  ;;  %p1372_p6 = por %p190_p4, %p78_p1 }
   0x9   : > { %p1083_p7 = scmp.ge.s32.totalorder %s1301_s22, 4 }
   0xa   : > { %s1377_s29 = scalar_select %p69_p5, %s1289_s19, %s71_s27  }
   0xb   : > { %227 = sbr.rel (%p1083_p7) target bundleno = 59 (0x3b), region = 20 }
  0x10   : > { %230 = sbr.rel (!%p1365_p3) target bundleno = 52 (0x34), region = 24  ;;  %s232_s30 = sand.u32 (%p1365_p3), 1, %s1289_s19  }
  0x11   : > { %s1133_s6 = sshll.u32 (%p1365_p3), %s1297_s21, 3  ;;  %s1084_s7 = sshll.u32 (%p1365_p3), %s232_s30, 8 }
  0x12   : > { %s1387_s10 = scalar_lea.vmem (%p1365_p3), %s1559_s1, %s1133_s6  ;;  %s1392_s11 = scalar_lea.vmem (%p1365_p3), [#allocation3], %s1084_s7 }
  0x13   : > { %v331_v0 = vld [vmem:[%s1387_s10] sm:$0xff] (%p1365_p3) }
  0x14   : > { %v333_v1 = vld [vmem:[%s1387_s10 + $0x20] sm:$0xff] (%p1365_p3)  ;;  %332 = vst [vmem:[%s1392_s11] sm:$0xff] (%p1365_p3), %v331_v0 }
  0x15   : > { %v335_v2 = vld [vmem:[%s1387_s10 + $0x40] sm:$0xff]  ;;  %334 = vst [vmem:[%s1392_s11 + $0x8] sm:$0xff] %v333_v1 }
  0x16   : > { %336 = vst [vmem:[%s1392_s11 + $0x10] sm:$0xff] %v335_v2  ;;  %v337_v3 = vld [vmem:[%s1387_s10 + $0x60] sm:$0xff] }
  0x17   : > { %v339_v4 = vld [vmem:[%s1387_s10 + $0x80] sm:$0xff]  ;;  %338 = vst [vmem:[%s1392_s11 + $0x18] sm:$0xff] %v337_v3 }
  0x18   : > { %v341_v5 = vld [vmem:[%s1387_s10 + $0xa0] sm:$0xff]  ;;  %340 = vst [vmem:[%s1392_s11 + $0x20] sm:$0xff] %v339_v4 }
  0x19   : > { %342 = vst [vmem:[%s1392_s11 + $0x28] sm:$0xff] %v341_v5  ;;  %v343_v6 = vld [vmem:[%s1387_s10 + $0xc0] sm:$0xff] }
  0x1a   : > { %v345_v7 = vld [vmem:[%s1387_s10 + $0xe0] sm:$0xff]  ;;  %344 = vst [vmem:[%s1392_s11 + $0x30] sm:$0xff] %v343_v6 }
  0x1b   : > { %v347_v8 = vld [vmem:[%s1387_s10 + $0x100] sm:$0xff]  ;;  %346 = vst [vmem:[%s1392_s11 + $0x38] sm:$0xff] %v345_v7 }
  0x1c   : > { %348 = vst [vmem:[%s1392_s11 + $0x40] sm:$0xff] %v347_v8  ;;  %v349_v9 = vld [vmem:[%s1387_s10 + $0x120] sm:$0xff] }
  0x1d   : > { %v351_v10 = vld [vmem:[%s1387_s10 + $0x140] sm:$0xff]  ;;  %350 = vst [vmem:[%s1392_s11 + $0x48] sm:$0xff] %v349_v9 }
  0x1e   : > { %v353_v11 = vld [vmem:[%s1387_s10 + $0x160] sm:$0xff]  ;;  %352 = vst [vmem:[%s1392_s11 + $0x50] sm:$0xff] %v351_v10 }
  0x1f   : > { %354 = vst [vmem:[%s1392_s11 + $0x58] sm:$0xff] %v353_v11  ;;  %v355_v12 = vld [vmem:[%s1387_s10 + $0x180] sm:$0xff] }
  0x20   : > { %v357_v13 = vld [vmem:[%s1387_s10 + $0x1a0] sm:$0xff]  ;;  %356 = vst [vmem:[%s1392_s11 + $0x60] sm:$0xff] %v355_v12 }
  0x21   : > { %v359_v14 = vld [vmem:[%s1387_s10 + $0x1c0] sm:$0xff]  ;;  %358 = vst [vmem:[%s1392_s11 + $0x68] sm:$0xff] %v357_v13 }
  0x22   : > { %360 = vst [vmem:[%s1392_s11 + $0x70] sm:$0xff] %v359_v14  ;;  %v361_v15 = vld [vmem:[%s1387_s10 + $0x1e0] sm:$0xff] }
  0x23   : > { %v363_v16 = vld [vmem:[%s1387_s10 + $0x200] sm:$0xff]  ;;  %362 = vst [vmem:[%s1392_s11 + $0x78] sm:$0xff] %v361_v15 }
  0x24   : > { %v365_v17 = vld [vmem:[%s1387_s10 + $0x220] sm:$0xff]  ;;  %364 = vst [vmem:[%s1392_s11 + $0x80] sm:$0xff] %v363_v16 }
  0x25   : > { %366 = vst [vmem:[%s1392_s11 + $0x88] sm:$0xff] %v365_v17  ;;  %v367_v18 = vld [vmem:[%s1387_s10 + $0x240] sm:$0xff] }
  0x26   : > { %v369_v19 = vld [vmem:[%s1387_s10 + $0x260] sm:$0xff]  ;;  %368 = vst [vmem:[%s1392_s11 + $0x90] sm:$0xff] %v367_v18 }
  0x27   : > { %v371_v20 = vld [vmem:[%s1387_s10 + $0x280] sm:$0xff]  ;;  %370 = vst [vmem:[%s1392_s11 + $0x98] sm:$0xff] %v369_v19 }
  0x28   : > { %372 = vst [vmem:[%s1392_s11 + $0xa0] sm:$0xff] %v371_v20  ;;  %v373_v21 = vld [vmem:[%s1387_s10 + $0x2a0] sm:$0xff] }
  0x29   : > { %v375_v22 = vld [vmem:[%s1387_s10 + $0x2c0] sm:$0xff]  ;;  %374 = vst [vmem:[%s1392_s11 + $0xa8] sm:$0xff] %v373_v21 }
  0x2a   : > { %v377_v23 = vld [vmem:[%s1387_s10 + $0x2e0] sm:$0xff]  ;;  %376 = vst [vmem:[%s1392_s11 + $0xb0] sm:$0xff] %v375_v22 }
  0x2b   : > { %378 = vst [vmem:[%s1392_s11 + $0xb8] sm:$0xff] %v377_v23  ;;  %v379_v24 = vld [vmem:[%s1387_s10 + $0x300] sm:$0xff] }
  0x2c   : > { %v381_v25 = vld [vmem:[%s1387_s10 + $0x320] sm:$0xff]  ;;  %380 = vst [vmem:[%s1392_s11 + $0xc0] sm:$0xff] %v379_v24 }
  0x2d   : > { %v383_v26 = vld [vmem:[%s1387_s10 + $0x340] sm:$0xff]  ;;  %382 = vst [vmem:[%s1392_s11 + $0xc8] sm:$0xff] %v381_v25 }
  0x2e   : > { %384 = vst [vmem:[%s1392_s11 + $0xd0] sm:$0xff] %v383_v26  ;;  %v385_v27 = vld [vmem:[%s1387_s10 + $0x360] sm:$0xff] }
  0x2f   : > { %v387_v28 = vld [vmem:[%s1387_s10 + $0x380] sm:$0xff]  ;;  %386 = vst [vmem:[%s1392_s11 + $0xd8] sm:$0xff] %v385_v27 }
  0x30   : > { %v389_v29 = vld [vmem:[%s1387_s10 + $0x3a0] sm:$0xff]  ;;  %388 = vst [vmem:[%s1392_s11 + $0xe0] sm:$0xff] %v387_v28 }
  0x31   : > { %390 = vst [vmem:[%s1392_s11 + $0xe8] sm:$0xff] %v389_v29  ;;  %v391_v30 = vld [vmem:[%s1387_s10 + $0x3c0] sm:$0xff] }
  0x32   : > { %v393_v31 = vld [vmem:[%s1387_s10 + $0x3e0] sm:$0xff]  ;;  %392 = vst [vmem:[%s1392_s11 + $0xf0] sm:$0xff] %v391_v30 }
  0x33   : > { %394 = vst [vmem:[%s1392_s11 + $0xf8] sm:$0xff] %v393_v31 }
  0x34 PF: > { %416 = sbr.rel (!%p1365_p3) target bundleno = 59 (0x3b), region = 70  ;;  %s418_s12 = sand.u32 (%p1365_p3), 1, %s1289_s19  }
  0x35   : > { %s1134_s13 = sshll.u32 (%p1365_p3), %s1297_s21, 4  ;;  %s1168_s14 = smul.u32 (%p1365_p3), 48, %s418_s12 }
  0x36   : > { %s426_s17 = scalar_lea.vmem (%p1365_p3), %s1562_s4, %s1134_s13 }
  0x37   : > { %v439_v32 = vld [vmem:[%s426_s17] sm:$0xff] (%p1365_p3)  ;;  %v441_v33 = vld [vmem:[%s426_s17 + $0x8] sm:$0xff] (%p1365_p3)  ;;  %s420_s24 = scalar_lea.vmem (%p1365_p3), [#allocation4], %s1168_s14 }
  0x38   : > { %v443_v34 = vld [vmem:[%s426_s17 + $0x40] sm:$0xff] (%p1365_p3)  ;;  %v445_v35 = vld [vmem:[%s426_s17 + $0x48] sm:$0xff] (%p1365_p3)  ;;  %440 = vst [vmem:[%s420_s24] sm:$0xff] (%p1365_p3), %v439_v32  ;;  %442 = vst [vmem:[%s420_s24 + $0x8] sm:$0xff] (%p1365_p3), %v441_v33 }
  0x39   : > { %v447_v36 = vld [vmem:[%s426_s17 + $0x80] sm:$0xff]  ;;  %v449_v37 = vld [vmem:[%s426_s17 + $0x88] sm:$0xff]  ;;  %444 = vst [vmem:[%s420_s24 + $0x10] sm:$0xff] %v443_v34  ;;  %446 = vst [vmem:[%s420_s24 + $0x18] sm:$0xff] %v445_v35 }
  0x3a   : > { %448 = vst [vmem:[%s420_s24 + $0x20] sm:$0xff] %v447_v36  ;;  %450 = vst [vmem:[%s420_s24 + $0x28] sm:$0xff] %v449_v37 }
  0x3b PF: > { %p1089_p8 = scmp.ge.s32.totalorder %s1301_s22, 1  ;;  %p455_p9 = scmp.lt.s32.totalorder %s1301_s22, 5 }
  0x3d   : > { %p456_p10 = pnand %p1089_p8, %p455_p9 }
  0x3e   : > { %s462_s25 = sand.u32 (!%p456_p10), 1, %s1285_s18   ;;  %s1091_s11 = sshll.u32 (!%p456_p10), %s1293_s20, 1 }
  0x3f   : > { %459 = sbr.rel (%p456_p10) target bundleno = 350 (0x15e), region = 93  ;;  %s1090_s26 = sshll.u32 (!%p456_p10), %s462_s25, 8 }
  0x40   : > { %s1477_s8 = scalar_lea.vmem (!%p456_p10), [#allocation3], %s1090_s26  ;;  %p532_p11 = scmp.lt.s32.totalorder (!%p456_p10), %s1091_s11, 7 }
  0x41   : > { %s1525_s24 = smul.u32 (!%p456_p10), 48, %s462_s25 }
  0x43   : > { %s1528_s26 = scalar_lea.vmem (!%p456_p10), [#allocation4], %s1525_s24  ;;  %s516_s18 = scalar_lea.vmem (!%p456_p10), [#allocation5], %s1525_s24 }
  0x44   : > { %v1260_v38 = vld [vmem:[%s1558_s0 + $0x4] ss:$8 sps:$4 sm:$0xff]   ;;  %v1473_v39 = vld [vmem:[%s1558_s0 + $0x10] sm:$0xff]  ;;  %v1215_v44 = vld [vmem:[%s1477_s8 + $0x60] ss:$8 sps:$4 sm:$0xff]   ;;  %v847_v11 = vlaneseq  ;;  %s1573_s11 = smov (!%p532_p11, %s1091_s11), 7 }
  0x45   : > { %v1096_v40 = vcombine.high %v1473_v39, %v1473_v39  ;;  %v1210_v41 = vld [vmem:[%s1477_s8 + $0x74] ss:$8 sps:$4 sm:$0xff]   ;;  %805 = vmatprep.mubr.bf16.mxu0 %v1260_v38  ;;  %v1212_v42 = vld [vmem:[%s1477_s8 + $0x70] ss:$8 sps:$4 sm:$0xff]   ;;  %v1213_v43 = vld [vmem:[%s1477_s8 + $0x64] ss:$8 sps:$4 sm:$0xff]   ;;  %v1095_v10 = vcombine.low %v1473_v39, %v1473_v39  ;;  %s534_s14 = scalar_lea.vmem %s1560_s2, %s1573_s11  ;;  %s539_s17 = scalar_lea.vmem %s1561_s3, %s1573_s11 }
  0x46   : > { %773 = vmatprep.subr.bf16.mxu0 %v1210_v41  ;;  %1136 = vmatprep.subr.bf16.mxu1 %v1210_v41  ;;  %v1216_v45 = vld [vmem:[%s1477_s8 + $0x54] ss:$8 sps:$4 sm:$0xff]   ;;  %v1218_v46 = vld [vmem:[%s1477_s8 + $0x50] ss:$8 sps:$4 sm:$0xff]   ;;  %v1219_v47 = vld [vmem:[%s1477_s8 + $0x44] ss:$8 sps:$4 sm:$0xff]  }
  0x47   : > { %815 = vmatprep.mubr.bf16.mxu1 %v1096_v40  ;;  %774 = vmatpush1.bf16.msra.mxu0 %v1212_v42  ;;  %v1221_v48 = vld [vmem:[%s1477_s8 + $0x40] ss:$8 sps:$4 sm:$0xff]   ;;  %v1222_v49 = vld [vmem:[%s1477_s8 + $0x34] ss:$8 sps:$4 sm:$0xff]   ;;  %v1224_v50 = vld [vmem:[%s1477_s8 + $0x30] ss:$8 sps:$4 sm:$0xff]  }
  0x48   : > { %1152 = vmatpush1.bf16.msra.mxu1 %v1212_v42  ;;  %775 = vmatprep.subr.bf16.mxu0 %v1213_v43  ;;  %v1225_v51 = vld [vmem:[%s1477_s8 + $0x24] ss:$8 sps:$4 sm:$0xff]   ;;  %v1227_v52 = vld [vmem:[%s1477_s8 + $0x20] ss:$8 sps:$4 sm:$0xff]   ;;  %v1228_v53 = vld [vmem:[%s1477_s8 + $0x14] ss:$8 sps:$4 sm:$0xff]  }
  0x49   : > { %1137 = vmatprep.subr.bf16.mxu1 %v1213_v43  ;;  %v1230_v54 = vld [vmem:[%s1477_s8 + $0x10] ss:$8 sps:$4 sm:$0xff]   ;;  %v1231_v55 = vld [vmem:[%s1477_s8 + $0x4] ss:$8 sps:$4 sm:$0xff]   ;;  %v1233_v56 = vld [vmem:[%s1477_s8] ss:$8 sps:$4 sm:$0xff]  }
  0x4a   : > { %v1234_v57 = vld [vmem:[%s1477_s8 + $0xf4] ss:$8 sps:$4 sm:$0xff]   ;;  %v1236_v58 = vld [vmem:[%s1477_s8 + $0xf0] ss:$8 sps:$4 sm:$0xff]   ;;  %v1237_v59 = vld [vmem:[%s1477_s8 + $0xe4] ss:$8 sps:$4 sm:$0xff]  }
  0x4b   : > { %776 = vmatpush1.bf16.msra.mxu0 %v1215_v44  ;;  %v1239_v60 = vld [vmem:[%s1477_s8 + $0xe0] ss:$8 sps:$4 sm:$0xff]   ;;  %v1240_v61 = vld [vmem:[%s1477_s8 + $0xd4] ss:$8 sps:$4 sm:$0xff]   ;;  %v1242_v62 = vld [vmem:[%s1477_s8 + $0xd0] ss:$8 sps:$4 sm:$0xff]  }
  0x4c   : > { %1153 = vmatpush1.bf16.msra.mxu1 %v1215_v44  ;;  %777 = vmatprep.subr.bf16.mxu0 %v1216_v45  ;;  %v1243_v63 = vld [vmem:[%s1477_s8 + $0xc4] ss:$8 sps:$4 sm:$0xff]   ;;  %v1245_v0 = vld [vmem:[%s1477_s8 + $0xc0] ss:$8 sps:$4 sm:$0xff]   ;;  %v1246_v1 = vld [vmem:[%s1477_s8 + $0xb4] ss:$8 sps:$4 sm:$0xff]  }
  0x4d   : > { %1138 = vmatprep.subr.bf16.mxu1 %v1216_v45  ;;  %v1248_v2 = vld [vmem:[%s1477_s8 + $0xb0] ss:$8 sps:$4 sm:$0xff]   ;;  %v1249_v3 = vld [vmem:[%s1477_s8 + $0xa4] ss:$8 sps:$4 sm:$0xff]   ;;  %v1251_v4 = vld [vmem:[%s1477_s8 + $0xa0] ss:$8 sps:$4 sm:$0xff]  }
  0x4e   : > { %v1252_v5 = vld [vmem:[%s1477_s8 + $0x94] ss:$8 sps:$4 sm:$0xff]   ;;  %v1254_v6 = vld [vmem:[%s1477_s8 + $0x90] ss:$8 sps:$4 sm:$0xff]   ;;  %v1255_v7 = vld [vmem:[%s1477_s8 + $0x84] ss:$8 sps:$4 sm:$0xff]  }
  0x4f   : > { %778 = vmatpush1.bf16.msra.mxu0 %v1218_v46  ;;  %v1257_v8 = vld [vmem:[%s1477_s8 + $0x80] ss:$8 sps:$4 sm:$0xff]   ;;  %v848_v12 = vshrl.u32 %v847_v11, 7  ;;  %s1135_s25 = sshll.u32 (%p1372_p6), %s1293_s20, 4 }
  0x50   : > { %1154 = vmatpush1.bf16.msra.mxu1 %v1218_v46  ;;  %779 = vmatprep.subr.bf16.mxu0 %v1219_v47  ;;  %v1258_v9 = vld [vmem:[%s1558_s0] ss:$8 sps:$4 sm:$0xff]   ;;  %s917_s6 = scalar_lea.vmem (%p1372_p6), %s1563_s5, %s1135_s25 }
  0x51   : > { %1139 = vmatprep.subr.bf16.mxu1 %v1219_v47  ;;  %v849_v13 = vsub.s32 0, %v848_v12  ;;  %v845_v14 = vld [vmem:[%s534_s14] sm:$0x3]  ;;  %v853_v15 = vsub.s32 1, %v848_v12  ;;  %v882_v33 = vld [vmem:[%s1528_s26 + $0x8] sm:$0xff] }
  0x52   : > { %v863_v16 = vld [vmem:[%s539_s17] sm:$0x3]  ;;  %v886_v34 = vld [vmem:[%s1528_s26 + $0x28] sm:$0xff] }
  0x53   : > { %780 = vmatpush1.bf16.msra.mxu0 %v1221_v48  ;;  %v850_v17 = vrot.slane %v845_v14, %v849_v13  ;;  %v868_v18 = vrot.slane %v863_v16, %v849_v13  ;;  %v854_v19 = vrot.slane %v845_v14, %v853_v15  ;;  %v872_v24 = vrot.slane %v863_v16, %v853_v15  ;;  %v881_v25 = vld [vmem:[%s1528_s26] sm:$0xff] }
  0x54   : > { %1155 = vmatpush1.bf16.msra.mxu1 %v1221_v48  ;;  %781 = vmatprep.subr.bf16.mxu0 %v1222_v49  ;;  %v885_v26 = vld [vmem:[%s1528_s26 + $0x20] sm:$0xff]  ;;  %v883_v48 = vld [vmem:[%s1528_s26 + $0x10] sm:$0xff] }
  0x55   : > { %1140 = vmatprep.subr.bf16.mxu1 %v1222_v49 }
  0x57   : > { %782 = vmatpush1.bf16.msra.mxu0 %v1224_v50 }
  0x58   : > { %1156 = vmatpush1.bf16.msra.mxu1 %v1224_v50  ;;  %783 = vmatprep.subr.bf16.mxu0 %v1225_v51 }
  0x59   : > { %1141 = vmatprep.subr.bf16.mxu1 %v1225_v51 }
  0x5b   : > { %784 = vmatpush1.bf16.msra.mxu0 %v1227_v52 }
  0x5c   : > { %1157 = vmatpush1.bf16.msra.mxu1 %v1227_v52  ;;  %785 = vmatprep.subr.bf16.mxu0 %v1228_v53 }
  0x5d   : > { %1142 = vmatprep.subr.bf16.mxu1 %v1228_v53  ;;  %v884_v53 = vld [vmem:[%s1528_s26 + $0x18] sm:$0xff] }
  0x5f   : > { %786 = vmatpush1.bf16.msra.mxu0 %v1230_v54 }
  0x60   : > { %1158 = vmatpush1.bf16.msra.mxu1 %v1230_v54  ;;  %787 = vmatprep.subr.bf16.mxu0 %v1231_v55 }
  0x61   : > { %1143 = vmatprep.subr.bf16.mxu1 %v1231_v55 }
  0x63   : > { %788 = vmatpush1.bf16.msra.mxu0 %v1233_v56 }
  0x64   : > { %1159 = vmatpush1.bf16.msra.mxu1 %v1233_v56  ;;  %789 = vmatprep.subr.bf16.mxu0 %v1234_v57 }
  0x65   : > { %1144 = vmatprep.subr.bf16.mxu1 %v1234_v57 }
  0x67   : > { %790 = vmatpush2.bf16.msra.mxu0 %v1236_v58 }
  0x68   : > { %1160 = vmatpush2.bf16.msra.mxu1 %v1236_v58  ;;  %791 = vmatprep.subr.bf16.mxu0 %v1237_v59 }
  0x69   : > { %1145 = vmatprep.subr.bf16.mxu1 %v1237_v59 }
  0x6b   : > { %792 = vmatpush2.bf16.msra.mxu0 %v1239_v60 }
  0x6c   : > { %1161 = vmatpush2.bf16.msra.mxu1 %v1239_v60  ;;  %793 = vmatprep.subr.bf16.mxu0 %v1240_v61 }
  0x6d   : > { %1146 = vmatprep.subr.bf16.mxu1 %v1240_v61 }
  0x6f   : > { %794 = vmatpush2.bf16.msra.mxu0 %v1242_v62 }
  0x70   : > { %1162 = vmatpush2.bf16.msra.mxu1 %v1242_v62  ;;  %795 = vmatprep.subr.bf16.mxu0 %v1243_v63 }
  0x71   : > { %1147 = vmatprep.subr.bf16.mxu1 %v1243_v63 }
  0x73   : > { %796 = vmatpush2.bf16.msra.mxu0 %v1245_v0 }
  0x74   : > { %1163 = vmatpush2.bf16.msra.mxu1 %v1245_v0  ;;  %797 = vmatprep.subr.bf16.mxu0 %v1246_v1 }
  0x75   : > { %1148 = vmatprep.subr.bf16.mxu1 %v1246_v1 }
  0x77   : > { %798 = vmatpush2.bf16.msra.mxu0 %v1248_v2 }
  0x78   : > { %1164 = vmatpush2.bf16.msra.mxu1 %v1248_v2  ;;  %799 = vmatprep.subr.bf16.mxu0 %v1249_v3 }
  0x79   : > { %1149 = vmatprep.subr.bf16.mxu1 %v1249_v3 }
  0x7b   : > { %800 = vmatpush2.bf16.msra.mxu0 %v1251_v4 }
  0x7c   : > { %1165 = vmatpush2.bf16.msra.mxu1 %v1251_v4  ;;  %801 = vmatprep.subr.bf16.mxu0 %v1252_v5 }
  0x7d   : > { %1150 = vmatprep.subr.bf16.mxu1 %v1252_v5 }
  0x7f   : > { %802 = vmatpush2.bf16.msra.mxu0 %v1254_v6 }
  0x80   : > { %1166 = vmatpush2.bf16.msra.mxu1 %v1254_v6  ;;  %803 = vmatprep.subr.bf16.mxu0 %v1255_v7 }
  0x81   : > { %1151 = vmatprep.subr.bf16.mxu1 %v1255_v7 }
  0x83   : > { %804 = vmatpush2.bf16.msra.mxu0 %v1257_v8 }
  0x84   : > { %1167 = vmatpush2.bf16.msra.mxu1 %v1257_v8 }
  0x86   : > { %806 = vmatmul.mubr.bf16.vlgmr.msra.gmra.mxu0 %v1258_v9 }
  0x87   : > { %816 = vmatmul.mubr.bf16.vlgmr.msra.gmra.mxu1 %v1095_v10 }
 0x146   : > { %v807_v20 = vpop.f32.mrf.mxu0 }
 0x147   : > { %v817_v21 = vpop.f32.mrf.mxu1  ;;  %v857_v22 = vmul.f32 %v850_v17, %v807_v20 }
 0x148   : > { %v861_v23 = vmul.f32 %v850_v17, %v817_v21  ;;  %v809_v27 = vpop.f32.mrf.mxu0 }
 0x149   : > { %v819_v28 = vpop.f32.mrf.mxu1  ;;  %v875_v29 = vadd.f32 %v868_v18, %v857_v22  ;;  %v858_v31 = vmul.f32 %v854_v19, %v809_v27 }
 0x14a   : > { %v879_v30 = vadd.f32 %v868_v18, %v861_v23  ;;  %v862_v32 = vmul.f32 %v854_v19, %v819_v28  ;;  %v811_v35 = vpop.f32.mrf.mxu0 }
 0x14b   : > { %v821_v36 = vpop.f32.mrf.mxu1  ;;  %v887_v37 = vadd.f32 %v881_v25, %v875_v29  ;;  %v876_v39 = vadd.f32 %v872_v24, %v858_v31  ;;  %v859_v41 = vmul.f32 %v850_v17, %v811_v35 }
 0x14c   : > { %v891_v38 = vadd.f32 %v885_v26, %v879_v30  ;;  %v880_v40 = vadd.f32 %v872_v24, %v862_v32  ;;  %v813_v42 = vpop.f32.mrf.mxu0 }
 0x14d   : > { %v822_v43 = vpop.f32.mrf.mxu1  ;;  %v893_v44 = vmax.f32 %v887_v37, 0.0  ;;  %v888_v46 = vadd.f32 %v882_v33, %v876_v39  ;;  %v877_v49 = vadd.f32 %v868_v18, %v859_v41  ;;  %v860_v50 = vmul.f32 %v854_v19, %v813_v42 }
 0x14e   : > { %v897_v45 = vmax.f32 %v891_v38, 0.0  ;;  %v892_v47 = vadd.f32 %v886_v34, %v880_v40 }
 0x14f   : > { %899 = vst [vmem:[%s516_s18] sm:$0xff] %v893_v44  ;;  %v894_v51 = vmax.f32 %v888_v46, 0.0  ;;  %v889_v54 = vadd.f32 %v883_v48, %v877_v49  ;;  %v878_v55 = vadd.f32 %v872_v24, %v860_v50 }
 0x150   : > { %903 = vst [vmem:[%s516_s18 + $0x20] sm:$0xff] %v897_v45  ;;  %v898_v52 = vmax.f32 %v892_v47, 0.0 }
 0x151   : > { %900 = vst [vmem:[%s516_s18 + $0x8] sm:$0xff] %v894_v51  ;;  %v895_v56 = vmax.f32 %v889_v54, 0.0  ;;  %v890_v57 = vadd.f32 %v884_v53, %v878_v55  ;;  %911 = sbr.rel (!%p1372_p6) target bundleno = 350 (0x15e), region = 113 }
 0x152   : > { %904 = vst [vmem:[%s516_s18 + $0x28] sm:$0xff] %v898_v52 }
 0x153   : > { %901 = vst [vmem:[%s516_s18 + $0x10] sm:$0xff] %v895_v56  ;;  %v896_v58 = vmax.f32 %v890_v57, 0.0 }
 0x155   : > { %902 = vst [vmem:[%s516_s18 + $0x18] sm:$0xff] %v896_v58 }
 0x156   : > { %v930_v59 = vld [vmem:[%s516_s18] sm:$0xff] }
 0x157   : > { %v938_v63 = vld [vmem:[%s516_s18 + $0x20] sm:$0xff]  ;;  %931 = vst [vmem:[%s917_s6] sm:$0xff] %v930_v59 }
 0x158   : > { %v932_v60 = vld [vmem:[%s516_s18 + $0x8] sm:$0xff]  ;;  %939 = vst [vmem:[%s917_s6 + $0x80] sm:$0xff] %v938_v63 }
 0x159   : > { %v940_v0 = vld [vmem:[%s516_s18 + $0x28] sm:$0xff]  ;;  %933 = vst [vmem:[%s917_s6 + $0x8] sm:$0xff] %v932_v60 }
 0x15a   : > { %v934_v61 = vld [vmem:[%s516_s18 + $0x10] sm:$0xff]  ;;  %941 = vst [vmem:[%s917_s6 + $0x88] sm:$0xff] %v940_v0 }
 0x15b   : > { %935 = vst [vmem:[%s917_s6 + $0x40] sm:$0xff] %v934_v61 }
 0x15c   : > { %v936_v62 = vld [vmem:[%s516_s18 + $0x18] sm:$0xff] }
 0x15d   : > { %937 = vst [vmem:[%s917_s6 + $0x48] sm:$0xff] %v936_v62 }
 0x15e PF: > { %s15_s22 = sadd.s32 1, %s1301_s22   ;;  %s1566_s18 = smov %s1289_s19 }
 0x15f   : > { %p12_p12 = scmp.ge.s32.totalorder %s15_s22, 6   ;;  %s1567_s19 = smov %s1377_s29 }
 0x160   : > { %s1568_s20 = smov %s1297_s21  ;;  %s1569_s21 = smov %s1571_s23 }
 0x161   :  { %14 = sbr.rel (!%p12_p12) target bundleno = 3 (0x3), region = 184 }

// kernel: forward.35
= control target key start
LH: loop header
LB: loop body
LE: loop exit
PB: predicated region body
PF: predicated region fallthrough
CT: control target
= control target key end

     0   :  { %s2182_s0 = inlined_call_operand.vmem [shape: bf16[24,1024], index: 0, kind: input, shape index: {}]   ;;  %s2183_s1 = inlined_call_operand.vmem [shape: bf16[1024,512], index: 1, kind: input, shape index: {}]   ;;  %s2184_s2 = inlined_call_operand.vmem [shape: f32[1,512], index: 2, kind: input, shape index: {}]   ;;  %s2185_s3 = inlined_call_operand.vmem [shape: f32[1,512], index: 3, kind: input, shape index: {}]   ;;  %s2186_s4 = inlined_call_operand.vmem [shape: f32[24,512], index: 4, kind: output, shape index: {}]  }
   0x1   :  { %2189 = sst [smem:[#allocation8_spill]] %s2182_s0 }
   0x2   :  { %2190 = sst [smem:[#allocation9_spill]] %s2183_s1 }
   0x3   :  { %s1781_s15 = smov 0   ;;  %s1783_s16 = smov 0  }
   0x4   :  { %s1785_s17 = smov 0   ;;  %s1787_s18 = smov 0  }
   0x5   :  { %s1789_s19 = smov 0   ;;  %s1791_s20 = smov 0  }
   0x6   :  { %s1793_s21 = smov 0   ;;  %s1795_s22 = smov 0  }
   0x7   :  { %s1797_s23 = smov 0   ;;  %s1799_s24 = smov 0  }
   0x8   :  { %s1801_s25 = smov 0  }
   0x9 LB: > { %s1373_s26 = sadd.s32 4294967295, %s1753_s25   ;;  %s26_s27 = sadd.s32 1, %s1745_s23  ;;  %s1753_s25 = sphi %s1801_s25, %s14_s25   ;;  %s1749_s24 = sphi %s1799_s24, %s2209_s24   ;;  %s1745_s23 = sphi %s1797_s23, %s2208_s23   ;;  %s1741_s22 = sphi %s1795_s22, %s2207_s22   ;;  %s1737_s21 = sphi %s1793_s21, %s2206_s21   ;;  %s1733_s20 = sphi %s1791_s20, %s2205_s20   ;;  %s1729_s19 = sphi %s1789_s19, %s2204_s19   ;;  %s1725_s18 = sphi %s1787_s18, %s2203_s18   ;;  %s1721_s17 = sphi %s1785_s17, %s2202_s17   ;;  %s1717_s16 = sphi %s1783_s16, %s2201_s16   ;;  %s1713_s15 = sphi %s1781_s15, %s2200_s15  }
   0xa   : > { %p27_p0 = scmp.ge.s32.totalorder %s26_s27, 2  ;;  %s29_s28 = sadd.s32 1, %s1749_s24 }
   0xb   : > { %s42_s29 = sadd.s32 1, %s1733_s20  ;;  %p49_p1 = scmp.ne.s32.totalorder %s1733_s20, %s1729_s19 }
   0xc   : > { %s2211_s27 = smov (%p27_p0, %s26_s27), 0  ;;  %s2213_s28 = smov (!%p27_p0, %s29_s28), %s1749_s24 }
   0xd   : > { %2191 = sst [smem:[#allocation6_spill]] %s2211_s27  ;;  %s38_s30 = ssub.s32 %s1745_s23, %s2211_s27 }
   0xe   : > { %p50_p2 = scmp.eq.s32.totalorder %s1753_s25, 0  ;;  %p31_p3 = scmp.ge.s32.totalorder %s2213_s28, 2 }
   0xf   : > { %p40_p4 = scmp.eq.s32.totalorder %s38_s30, 0  ;;  %s70_s6 = sadd.s32 1, %s1725_s18 }
  0x10   : > { %p1848_p5 = por %p50_p2, %p49_p1  ;;  %s2215_s28 = smov (%p31_p3, %s2213_s28), 0 }
  0x11   : > { %2193 = sst [smem:[#allocation7_spill]] %s2215_s28  ;;  %s66_s8 = ssub.s32 %s1749_s24, %s2215_s28 }
  0x12   : > { %s1856_s7 = scalar_select %p40_p4, %s1733_s20, %s42_s29  }
  0x13   : > { %p77_p6 = scmp.ne.s32.totalorder %s1725_s18, %s1721_s17  ;;  %s67_s9 = sor.u32 %s66_s8, %s38_s30 }
  0x14   : > { %p148_p7 = scmp.eq.s32.totalorder %s66_s8, 0  ;;  %p68_p8 = scmp.eq.s32.totalorder %s67_s9, 0 }
  0x15   : > { %p1862_p9 = por %p77_p6, %p50_p2  ;;  %s150_s11 = sadd.s32 1, %s1717_s16 }
  0x16   : > { %p160_p10 = scmp.ne.s32.totalorder %s1717_s16, %s1713_s15  ;;  %p161_p11 = scmp.eq.s32.totalorder %s1373_s26, 3 }
  0x17   : > { %s1870_s12 = scalar_select %p68_p8, %s1725_s18, %s70_s6  }
  0x18   : > { %s1873_s13 = scalar_select %p148_p7, %s1717_s16, %s150_s11  }
  0x19   : > { %p1875_p12 = por %p161_p11, %p160_p10  ;;  %p1376_p13 = scmp.ge.s32.totalorder %s1753_s25, 4 }
  0x1b   : > { %183 = sbr.rel (%p1376_p13) target bundleno = 87 (0x57), region = 16 }
  0x20   : > { %186 = sbr.rel (!%p1848_p5) target bundleno = 45 (0x2d), region = 20  ;;  %s188_s29 = sand.u32 (%p1848_p5), 1, %s1733_s20  }
  0x21   : > { %s1466_s30 = sshll.u32 (%p1848_p5), %s1745_s23, 4  ;;  %s1469_s8 = smul.u32 (%p1848_p5), 48, %s188_s29 }
  0x22   : > { %s2196_s0 = sld [smem:[#allocation8_spill]] (%p1848_p5) }
  0x23   : > { %s190_s26 = scalar_lea.vmem (%p1848_p5), [#allocation3], %s1469_s8 }
  0x28   : > { %s196_s11 = scalar_lea.vmem %s2196_s0, %s1466_s30 }
  0x29   : > { %v209_v0 = vld [vmem:[%s196_s11] sm:$0xff]  ;;  %v211_v1 = vld [vmem:[%s196_s11 + $0x8] sm:$0xff] }
  0x2a   : > { %v213_v2 = vld [vmem:[%s196_s11 + $0x20] sm:$0xff]  ;;  %v215_v3 = vld [vmem:[%s196_s11 + $0x28] sm:$0xff]  ;;  %210 = vst [vmem:[%s190_s26] sm:$0xff] %v209_v0  ;;  %212 = vst [vmem:[%s190_s26 + $0x8] sm:$0xff] %v211_v1 }
  0x2b   : > { %v217_v4 = vld [vmem:[%s196_s11 + $0x40] sm:$0xff]  ;;  %v219_v5 = vld [vmem:[%s196_s11 + $0x48] sm:$0xff]  ;;  %214 = vst [vmem:[%s190_s26 + $0x10] sm:$0xff] %v213_v2  ;;  %216 = vst [vmem:[%s190_s26 + $0x18] sm:$0xff] %v215_v3 }
  0x2c   : > { %218 = vst [vmem:[%s190_s26 + $0x20] sm:$0xff] %v217_v4  ;;  %220 = vst [vmem:[%s190_s26 + $0x28] sm:$0xff] %v219_v5 }
  0x2d PF: > { %226 = sbr.rel (!%p1862_p9) target bundleno = 87 (0x57), region = 43  ;;  %s228_s5 = sand.u32 (%p1862_p9), 1, %s1725_s18  }
  0x2e   : > { %s1381_s29 = sshll.u32 (%p1862_p9), %s1749_s24, 1  ;;  %s1379_s30 = sshll.u32 (%p1862_p9), %s228_s5, 9 }
  0x2f   : > { %s1467_s6 = sshll.u32 (%p1862_p9), %s1745_s23, 8  ;;  %s2197_s1 = sld [smem:[#allocation9_spill]] (%p1862_p9) }
  0x30   : > { %s234_s9 = sadd.s32 (%p1862_p9), %s1467_s6, %s1381_s29  ;;  %s1900_s10 = scalar_lea.vmem (%p1862_p9), [#allocation4], %s1379_s30 }
  0x31   : > { %s1383_s11 = sshll.u32 (%p1862_p9), %s234_s9, 2 }
  0x35   : > { %s1895_s28 = scalar_lea.vmem %s2197_s1, %s1383_s11 }
  0x36   : > { %v391_v6 = vld [vmem:[%s1895_s28] sm:$0xff]  ;;  %v393_v7 = vld [vmem:[%s1895_s28 + $0x10] sm:$0xff] }
  0x37   : > { %v395_v8 = vld [vmem:[%s1895_s28 + $0x20] sm:$0xff]  ;;  %392 = vst [vmem:[%s1900_s10] sm:$0xff] %v391_v6  ;;  %394 = vst [vmem:[%s1900_s10 + $0x8] sm:$0xff] %v393_v7  ;;  %v397_v9 = vld [vmem:[%s1895_s28 + $0x30] sm:$0xff] }
  0x38   : > { %396 = vst [vmem:[%s1900_s10 + $0x10] sm:$0xff] %v395_v8  ;;  %v399_v10 = vld [vmem:[%s1895_s28 + $0x40] sm:$0xff]  ;;  %v401_v11 = vld [vmem:[%s1895_s28 + $0x50] sm:$0xff]  ;;  %398 = vst [vmem:[%s1900_s10 + $0x18] sm:$0xff] %v397_v9 }
  0x39   : > { %400 = vst [vmem:[%s1900_s10 + $0x20] sm:$0xff] %v399_v10  ;;  %402 = vst [vmem:[%s1900_s10 + $0x28] sm:$0xff] %v401_v11  ;;  %v403_v12 = vld [vmem:[%s1895_s28 + $0x60] sm:$0xff]  ;;  %v405_v13 = vld [vmem:[%s1895_s28 + $0x70] sm:$0xff] }
  0x3a   : > { %v407_v14 = vld [vmem:[%s1895_s28 + $0x80] sm:$0xff]  ;;  %404 = vst [vmem:[%s1900_s10 + $0x30] sm:$0xff] %v403_v12  ;;  %406 = vst [vmem:[%s1900_s10 + $0x38] sm:$0xff] %v405_v13  ;;  %v409_v15 = vld [vmem:[%s1895_s28 + $0x90] sm:$0xff] }
  0x3b   : > { %408 = vst [vmem:[%s1900_s10 + $0x40] sm:$0xff] %v407_v14  ;;  %v411_v16 = vld [vmem:[%s1895_s28 + $0xa0] sm:$0xff]  ;;  %v413_v17 = vld [vmem:[%s1895_s28 + $0xb0] sm:$0xff]  ;;  %410 = vst [vmem:[%s1900_s10 + $0x48] sm:$0xff] %v409_v15 }
  0x3c   : > { %412 = vst [vmem:[%s1900_s10 + $0x50] sm:$0xff] %v411_v16  ;;  %414 = vst [vmem:[%s1900_s10 + $0x58] sm:$0xff] %v413_v17  ;;  %v415_v18 = vld [vmem:[%s1895_s28 + $0xc0] sm:$0xff]  ;;  %v417_v19 = vld [vmem:[%s1895_s28 + $0xd0] sm:$0xff] }
  0x3d   : > { %v419_v20 = vld [vmem:[%s1895_s28 + $0xe0] sm:$0xff]  ;;  %416 = vst [vmem:[%s1900_s10 + $0x60] sm:$0xff] %v415_v18  ;;  %418 = vst [vmem:[%s1900_s10 + $0x68] sm:$0xff] %v417_v19  ;;  %v421_v21 = vld [vmem:[%s1895_s28 + $0xf0] sm:$0xff] }
  0x3e   : > { %420 = vst [vmem:[%s1900_s10 + $0x70] sm:$0xff] %v419_v20  ;;  %v423_v22 = vld [vmem:[%s1895_s28 + $0x100] sm:$0xff]  ;;  %v425_v23 = vld [vmem:[%s1895_s28 + $0x110] sm:$0xff]  ;;  %422 = vst [vmem:[%s1900_s10 + $0x78] sm:$0xff] %v421_v21 }
  0x3f   : > { %424 = vst [vmem:[%s1900_s10 + $0x80] sm:$0xff] %v423_v22  ;;  %426 = vst [vmem:[%s1900_s10 + $0x88] sm:$0xff] %v425_v23  ;;  %v427_v24 = vld [vmem:[%s1895_s28 + $0x120] sm:$0xff]  ;;  %v429_v25 = vld [vmem:[%s1895_s28 + $0x130] sm:$0xff] }
  0x40   : > { %v431_v26 = vld [vmem:[%s1895_s28 + $0x140] sm:$0xff]  ;;  %428 = vst [vmem:[%s1900_s10 + $0x90] sm:$0xff] %v427_v24  ;;  %430 = vst [vmem:[%s1900_s10 + $0x98] sm:$0xff] %v429_v25  ;;  %v433_v27 = vld [vmem:[%s1895_s28 + $0x150] sm:$0xff] }
  0x41   : > { %432 = vst [vmem:[%s1900_s10 + $0xa0] sm:$0xff] %v431_v26  ;;  %v435_v28 = vld [vmem:[%s1895_s28 + $0x160] sm:$0xff]  ;;  %v437_v29 = vld [vmem:[%s1895_s28 + $0x170] sm:$0xff]  ;;  %434 = vst [vmem:[%s1900_s10 + $0xa8] sm:$0xff] %v433_v27 }
  0x42   : > { %436 = vst [vmem:[%s1900_s10 + $0xb0] sm:$0xff] %v435_v28  ;;  %438 = vst [vmem:[%s1900_s10 + $0xb8] sm:$0xff] %v437_v29  ;;  %v439_v30 = vld [vmem:[%s1895_s28 + $0x180] sm:$0xff]  ;;  %v441_v31 = vld [vmem:[%s1895_s28 + $0x190] sm:$0xff] }
  0x43   : > { %v443_v32 = vld [vmem:[%s1895_s28 + $0x1a0] sm:$0xff]  ;;  %440 = vst [vmem:[%s1900_s10 + $0xc0] sm:$0xff] %v439_v30  ;;  %442 = vst [vmem:[%s1900_s10 + $0xc8] sm:$0xff] %v441_v31  ;;  %v445_v33 = vld [vmem:[%s1895_s28 + $0x1b0] sm:$0xff] }
  0x44   : > { %444 = vst [vmem:[%s1900_s10 + $0xd0] sm:$0xff] %v443_v32  ;;  %v447_v34 = vld [vmem:[%s1895_s28 + $0x1c0] sm:$0xff]  ;;  %v449_v35 = vld [vmem:[%s1895_s28 + $0x1d0] sm:$0xff]  ;;  %446 = vst [vmem:[%s1900_s10 + $0xd8] sm:$0xff] %v445_v33 }
  0x45   : > { %448 = vst [vmem:[%s1900_s10 + $0xe0] sm:$0xff] %v447_v34  ;;  %450 = vst [vmem:[%s1900_s10 + $0xe8] sm:$0xff] %v449_v35  ;;  %v451_v36 = vld [vmem:[%s1895_s28 + $0x1e0] sm:$0xff]  ;;  %v453_v37 = vld [vmem:[%s1895_s28 + $0x1f0] sm:$0xff] }
  0x46   : > { %v455_v38 = vld [vmem:[%s1895_s28 + $0x200] sm:$0xff]  ;;  %452 = vst [vmem:[%s1900_s10 + $0xf0] sm:$0xff] %v451_v36  ;;  %454 = vst [vmem:[%s1900_s10 + $0xf8] sm:$0xff] %v453_v37  ;;  %v457_v39 = vld [vmem:[%s1895_s28 + $0x210] sm:$0xff] }
  0x47   : > { %456 = vst [vmem:[%s1900_s10 + $0x100] sm:$0xff] %v455_v38  ;;  %v459_v40 = vld [vmem:[%s1895_s28 + $0x220] sm:$0xff]  ;;  %v461_v41 = vld [vmem:[%s1895_s28 + $0x230] sm:$0xff]  ;;  %458 = vst [vmem:[%s1900_s10 + $0x108] sm:$0xff] %v457_v39 }
  0x48   : > { %460 = vst [vmem:[%s1900_s10 + $0x110] sm:$0xff] %v459_v40  ;;  %462 = vst [vmem:[%s1900_s10 + $0x118] sm:$0xff] %v461_v41  ;;  %v463_v42 = vld [vmem:[%s1895_s28 + $0x240] sm:$0xff]  ;;  %v465_v43 = vld [vmem:[%s1895_s28 + $0x250] sm:$0xff] }
  0x49   : > { %v467_v44 = vld [vmem:[%s1895_s28 + $0x260] sm:$0xff]  ;;  %464 = vst [vmem:[%s1900_s10 + $0x120] sm:$0xff] %v463_v42  ;;  %466 = vst [vmem:[%s1900_s10 + $0x128] sm:$0xff] %v465_v43  ;;  %v469_v45 = vld [vmem:[%s1895_s28 + $0x270] sm:$0xff] }
  0x4a   : > { %468 = vst [vmem:[%s1900_s10 + $0x130] sm:$0xff] %v467_v44  ;;  %v471_v46 = vld [vmem:[%s1895_s28 + $0x280] sm:$0xff]  ;;  %v473_v47 = vld [vmem:[%s1895_s28 + $0x290] sm:$0xff]  ;;  %470 = vst [vmem:[%s1900_s10 + $0x138] sm:$0xff] %v469_v45 }
  0x4b   : > { %472 = vst [vmem:[%s1900_s10 + $0x140] sm:$0xff] %v471_v46  ;;  %474 = vst [vmem:[%s1900_s10 + $0x148] sm:$0xff] %v473_v47  ;;  %v475_v48 = vld [vmem:[%s1895_s28 + $0x2a0] sm:$0xff]  ;;  %v477_v49 = vld [vmem:[%s1895_s28 + $0x2b0] sm:$0xff] }
  0x4c   : > { %v479_v50 = vld [vmem:[%s1895_s28 + $0x2c0] sm:$0xff]  ;;  %476 = vst [vmem:[%s1900_s10 + $0x150] sm:$0xff] %v475_v48  ;;  %478 = vst [vmem:[%s1900_s10 + $0x158] sm:$0xff] %v477_v49  ;;  %v481_v51 = vld [vmem:[%s1895_s28 + $0x2d0] sm:$0xff] }
  0x4d   : > { %480 = vst [vmem:[%s1900_s10 + $0x160] sm:$0xff] %v479_v50  ;;  %v483_v52 = vld [vmem:[%s1895_s28 + $0x2e0] sm:$0xff]  ;;  %v485_v53 = vld [vmem:[%s1895_s28 + $0x2f0] sm:$0xff]  ;;  %482 = vst [vmem:[%s1900_s10 + $0x168] sm:$0xff] %v481_v51 }
  0x4e   : > { %484 = vst [vmem:[%s1900_s10 + $0x170] sm:$0xff] %v483_v52  ;;  %486 = vst [vmem:[%s1900_s10 + $0x178] sm:$0xff] %v485_v53  ;;  %v487_v54 = vld [vmem:[%s1895_s28 + $0x300] sm:$0xff]  ;;  %v489_v55 = vld [vmem:[%s1895_s28 + $0x310] sm:$0xff] }
  0x4f   : > { %v491_v56 = vld [vmem:[%s1895_s28 + $0x320] sm:$0xff]  ;;  %488 = vst [vmem:[%s1900_s10 + $0x180] sm:$0xff] %v487_v54  ;;  %490 = vst [vmem:[%s1900_s10 + $0x188] sm:$0xff] %v489_v55  ;;  %v493_v57 = vld [vmem:[%s1895_s28 + $0x330] sm:$0xff] }
  0x50   : > { %492 = vst [vmem:[%s1900_s10 + $0x190] sm:$0xff] %v491_v56  ;;  %v495_v58 = vld [vmem:[%s1895_s28 + $0x340] sm:$0xff]  ;;  %v497_v59 = vld [vmem:[%s1895_s28 + $0x350] sm:$0xff]  ;;  %494 = vst [vmem:[%s1900_s10 + $0x198] sm:$0xff] %v493_v57 }
  0x51   : > { %496 = vst [vmem:[%s1900_s10 + $0x1a0] sm:$0xff] %v495_v58  ;;  %498 = vst [vmem:[%s1900_s10 + $0x1a8] sm:$0xff] %v497_v59  ;;  %v499_v60 = vld [vmem:[%s1895_s28 + $0x360] sm:$0xff]  ;;  %v501_v61 = vld [vmem:[%s1895_s28 + $0x370] sm:$0xff] }
  0x52   : > { %v503_v62 = vld [vmem:[%s1895_s28 + $0x380] sm:$0xff]  ;;  %500 = vst [vmem:[%s1900_s10 + $0x1b0] sm:$0xff] %v499_v60  ;;  %502 = vst [vmem:[%s1900_s10 + $0x1b8] sm:$0xff] %v501_v61  ;;  %v505_v63 = vld [vmem:[%s1895_s28 + $0x390] sm:$0xff] }
  0x53   : > { %504 = vst [vmem:[%s1900_s10 + $0x1c0] sm:$0xff] %v503_v62  ;;  %v507_v0 = vld [vmem:[%s1895_s28 + $0x3a0] sm:$0xff]  ;;  %v509_v1 = vld [vmem:[%s1895_s28 + $0x3b0] sm:$0xff]  ;;  %506 = vst [vmem:[%s1900_s10 + $0x1c8] sm:$0xff] %v505_v63 }
  0x54   : > { %508 = vst [vmem:[%s1900_s10 + $0x1d0] sm:$0xff] %v507_v0  ;;  %510 = vst [vmem:[%s1900_s10 + $0x1d8] sm:$0xff] %v509_v1  ;;  %v511_v2 = vld [vmem:[%s1895_s28 + $0x3c0] sm:$0xff]  ;;  %v513_v3 = vld [vmem:[%s1895_s28 + $0x3d0] sm:$0xff] }
  0x55   : > { %v515_v4 = vld [vmem:[%s1895_s28 + $0x3e0] sm:$0xff]  ;;  %512 = vst [vmem:[%s1900_s10 + $0x1e0] sm:$0xff] %v511_v2  ;;  %514 = vst [vmem:[%s1900_s10 + $0x1e8] sm:$0xff] %v513_v3  ;;  %v517_v5 = vld [vmem:[%s1895_s28 + $0x3f0] sm:$0xff] }
  0x56   : > { %516 = vst [vmem:[%s1900_s10 + $0x1f0] sm:$0xff] %v515_v4  ;;  %518 = vst [vmem:[%s1900_s10 + $0x1f8] sm:$0xff] %v517_v5 }
  0x57 PF: > { %p1384_p0 = scmp.ge.s32.totalorder %s1753_s25, 1  ;;  %p539_p1 = scmp.lt.s32.totalorder %s1753_s25, 5 }
  0x59   : > { %p540_p2 = pnand %p1384_p0, %p539_p1 }
  0x5a   : > { %s546_s0 = sand.u32 (!%p540_p2), 1, %s1729_s19   ;;  %s553_s26 = sand.u32 (!%p540_p2), 1, %s1721_s17  }
  0x5b   : > { %543 = sbr.rel (%p540_p2) target bundleno = 406 (0x196), region = 89  ;;  %s1385_s29 = sshll.u32 (!%p540_p2), %s553_s26, 9 }
  0x5c   : > { %s1470_s5 = smul.u32 (!%p540_p2), 48, %s546_s0  ;;  %s586_s30 = sand.u32 (!%p540_p2), 1, %s1713_s15  }
  0x5d   : > { %s1471_s6 = smul.u32 (!%p540_p2), 48, %s586_s30  ;;  %s1386_s28 = sshll.u32 (!%p540_p2), %s1741_s22, 1 }
  0x5e   : > { %p594_p3 = scmp.lt.s32.totalorder (!%p540_p2), %s1386_s28, 3  ;;  %s2043_s19 = scalar_lea.vmem (!%p540_p2), [#allocation3], %s1470_s5 }
  0x5f   : > { %s2045_s17 = scalar_lea.vmem (!%p540_p2), [#allocation4], %s1385_s29  ;;  %s2047_s15 = scalar_lea.vmem (!%p540_p2), [#allocation5], %s1471_s6 }
  0x60   : > { %s2217_s28 = smov (!%p594_p3, %s1386_s28), 3  ;;  %p1388_p4 = scmp.ne.s32.totalorder %s1737_s21, 0 }
  0x61   : > { %s596_s8 = scalar_lea.vmem %s2184_s2, %s2217_s28  ;;  %s601_s27 = scalar_lea.vmem %s2185_s3, %s2217_s28 }
  0x62   : > { %608 = sbr.rel (%p1388_p4) target bundleno = 107 (0x6b), region = 101 }
  0x67   : > { %v1755_v6 = vmov 0.0  }
  0x68   : > { %609 = vst [vmem:[#allocation2 + $0x28] sm:$0xff] %v1755_v6  ;;  %610 = vst [vmem:[#allocation2 + $0x10] sm:$0xff] %v1755_v6 }
  0x69   : > { %611 = vst [vmem:[#allocation2 + $0x8] sm:$0xff] %v1755_v6  ;;  %612 = vst [vmem:[#allocation2] sm:$0xff] %v1755_v6 }
  0x6a   : > { %613 = vst [vmem:[#allocation2 + $0x18] sm:$0xff] %v1755_v6  ;;  %614 = vst [vmem:[#allocation2 + $0x20] sm:$0xff] %v1755_v6 }
  0x6b PF: > { %v1561_v7 = vld [vmem:[%s2045_s17 + $0x74] ss:$8 sps:$4 sm:$0xff]   ;;  %v1565_v9 = vld [vmem:[%s2045_s17 + $0x70] ss:$8 sps:$4 sm:$0xff]   ;;  %v1567_v11 = vld [vmem:[%s2045_s17 + $0x64] ss:$8 sps:$4 sm:$0xff]  }
  0x6c   : > { %v1563_v8 = vld [vmem:[%s2045_s17 + $0x174] ss:$8 sps:$4 sm:$0xff]   ;;  %1045 = vmatprep.subr.bf16.mxu0 %v1561_v7  ;;  %v1566_v10 = vld [vmem:[%s2045_s17 + $0x170] ss:$8 sps:$4 sm:$0xff]   ;;  %v1569_v12 = vld [vmem:[%s2045_s17 + $0x164] ss:$8 sps:$4 sm:$0xff]  }
  0x6d   : > { %1096 = vmatprep.subr.bf16.mxu1 %v1563_v8  ;;  %1046 = vmatpush1.bf16.msra.mxu0 %v1565_v9  ;;  %v1571_v13 = vld [vmem:[%s2045_s17 + $0x60] ss:$8 sps:$4 sm:$0xff]   ;;  %v1573_v15 = vld [vmem:[%s2045_s17 + $0x54] ss:$8 sps:$4 sm:$0xff]   ;;  %v1577_v17 = vld [vmem:[%s2045_s17 + $0x50] ss:$8 sps:$4 sm:$0xff]  }
  0x6e   : > { %1097 = vmatpush1.bf16.msra.mxu1 %v1566_v10  ;;  %1047 = vmatprep.subr.bf16.mxu0 %v1567_v11  ;;  %v1572_v14 = vld [vmem:[%s2045_s17 + $0x160] ss:$8 sps:$4 sm:$0xff]   ;;  %v1575_v16 = vld [vmem:[%s2045_s17 + $0x154] ss:$8 sps:$4 sm:$0xff]   ;;  %v1578_v18 = vld [vmem:[%s2045_s17 + $0x150] ss:$8 sps:$4 sm:$0xff]  }
  0x6f   : > { %1098 = vmatprep.subr.bf16.mxu1 %v1569_v12  ;;  %v1579_v19 = vld [vmem:[%s2045_s17 + $0x44] ss:$8 sps:$4 sm:$0xff]   ;;  %v1583_v21 = vld [vmem:[%s2045_s17 + $0x40] ss:$8 sps:$4 sm:$0xff]   ;;  %v1585_v23 = vld [vmem:[%s2045_s17 + $0x34] ss:$8 sps:$4 sm:$0xff]  }
  0x70   : > { %v1581_v20 = vld [vmem:[%s2045_s17 + $0x144] ss:$8 sps:$4 sm:$0xff]   ;;  %v1584_v22 = vld [vmem:[%s2045_s17 + $0x140] ss:$8 sps:$4 sm:$0xff]   ;;  %v1587_v24 = vld [vmem:[%s2045_s17 + $0x134] ss:$8 sps:$4 sm:$0xff]  }
  0x71   : > { %1048 = vmatpush1.bf16.msra.mxu0 %v1571_v13  ;;  %v1589_v25 = vld [vmem:[%s2045_s17 + $0x30] ss:$8 sps:$4 sm:$0xff]   ;;  %v1591_v27 = vld [vmem:[%s2045_s17 + $0x24] ss:$8 sps:$4 sm:$0xff]   ;;  %v1595_v29 = vld [vmem:[%s2045_s17 + $0x20] ss:$8 sps:$4 sm:$0xff]  }
  0x72   : > { %1099 = vmatpush1.bf16.msra.mxu1 %v1572_v14  ;;  %1049 = vmatprep.subr.bf16.mxu0 %v1573_v15  ;;  %v1590_v26 = vld [vmem:[%s2045_s17 + $0x130] ss:$8 sps:$4 sm:$0xff]   ;;  %v1593_v28 = vld [vmem:[%s2045_s17 + $0x124] ss:$8 sps:$4 sm:$0xff]   ;;  %v1596_v30 = vld [vmem:[%s2045_s17 + $0x120] ss:$8 sps:$4 sm:$0xff]  }
  0x73   : > { %1100 = vmatprep.subr.bf16.mxu1 %v1575_v16  ;;  %v1597_v31 = vld [vmem:[%s2045_s17 + $0x14] ss:$8 sps:$4 sm:$0xff]   ;;  %v1601_v33 = vld [vmem:[%s2045_s17 + $0x10] ss:$8 sps:$4 sm:$0xff]   ;;  %v1603_v35 = vld [vmem:[%s2045_s17 + $0x4] ss:$8 sps:$4 sm:$0xff]  }
  0x74   : > { %v1599_v32 = vld [vmem:[%s2045_s17 + $0x114] ss:$8 sps:$4 sm:$0xff]   ;;  %v1602_v34 = vld [vmem:[%s2045_s17 + $0x110] ss:$8 sps:$4 sm:$0xff]   ;;  %v1605_v36 = vld [vmem:[%s2045_s17 + $0x104] ss:$8 sps:$4 sm:$0xff]  }
  0x75   : > { %1050 = vmatpush1.bf16.msra.mxu0 %v1577_v17  ;;  %v1607_v37 = vld [vmem:[%s2045_s17] ss:$8 sps:$4 sm:$0xff]   ;;  %v1609_v39 = vld [vmem:[%s2045_s17 + $0xf4] ss:$8 sps:$4 sm:$0xff]   ;;  %v1613_v41 = vld [vmem:[%s2045_s17 + $0xf0] ss:$8 sps:$4 sm:$0xff]  }
  0x76   : > { %1101 = vmatpush1.bf16.msra.mxu1 %v1578_v18  ;;  %1051 = vmatprep.subr.bf16.mxu0 %v1579_v19  ;;  %v1608_v38 = vld [vmem:[%s2045_s17 + $0x100] ss:$8 sps:$4 sm:$0xff]   ;;  %v1611_v40 = vld [vmem:[%s2045_s17 + $0x1f4] ss:$8 sps:$4 sm:$0xff]   ;;  %v1614_v42 = vld [vmem:[%s2045_s17 + $0x1f0] ss:$8 sps:$4 sm:$0xff]  }
  0x77   : > { %1102 = vmatprep.subr.bf16.mxu1 %v1581_v20  ;;  %v1615_v43 = vld [vmem:[%s2045_s17 + $0xe4] ss:$8 sps:$4 sm:$0xff]   ;;  %v1619_v45 = vld [vmem:[%s2045_s17 + $0xe0] ss:$8 sps:$4 sm:$0xff]   ;;  %v1621_v47 = vld [vmem:[%s2045_s17 + $0xd4] ss:$8 sps:$4 sm:$0xff]  }
  0x78   : > { %v1617_v44 = vld [vmem:[%s2045_s17 + $0x1e4] ss:$8 sps:$4 sm:$0xff]   ;;  %v1620_v46 = vld [vmem:[%s2045_s17 + $0x1e0] ss:$8 sps:$4 sm:$0xff]   ;;  %v1623_v48 = vld [vmem:[%s2045_s17 + $0x1d4] ss:$8 sps:$4 sm:$0xff]  }
  0x79   : > { %1052 = vmatpush1.bf16.msra.mxu0 %v1583_v21  ;;  %v1625_v49 = vld [vmem:[%s2045_s17 + $0xd0] ss:$8 sps:$4 sm:$0xff]   ;;  %v1627_v51 = vld [vmem:[%s2045_s17 + $0xc4] ss:$8 sps:$4 sm:$0xff]   ;;  %v1631_v53 = vld [vmem:[%s2045_s17 + $0xc0] ss:$8 sps:$4 sm:$0xff]  }
  0x7a   : > { %1103 = vmatpush1.bf16.msra.mxu1 %v1584_v22  ;;  %1053 = vmatprep.subr.bf16.mxu0 %v1585_v23  ;;  %v1626_v50 = vld [vmem:[%s2045_s17 + $0x1d0] ss:$8 sps:$4 sm:$0xff]   ;;  %v1629_v52 = vld [vmem:[%s2045_s17 + $0x1c4] ss:$8 sps:$4 sm:$0xff]   ;;  %v1632_v55 = vld [vmem:[%s2045_s17 + $0x1c0] ss:$8 sps:$4 sm:$0xff]  }
  0x7b   : > { %1104 = vmatprep.subr.bf16.mxu1 %v1587_v24  ;;  %v1659_v54 = vld [vmem:[%s2043_s19 + $0x4] ss:$16 sps:$4 sm:$0xff]   ;;  %v1662_v58 = vld [vmem:[%s2043_s19 + $0xc] ss:$16 sps:$4 sm:$0xff]   ;;  %v1637_v59 = vld [vmem:[%s2045_s17 + $0xb0] ss:$8 sps:$4 sm:$0xff]  }
  0x7c   : > { %v1633_v56 = vld [vmem:[%s2045_s17 + $0xb4] ss:$8 sps:$4 sm:$0xff]   ;;  %1077 = vmatprep.mubr.bf16.mxu0 %v1659_v54  ;;  %1128 = vmatprep.mubr.bf16.mxu1 %v1662_v58  ;;  %v1638_v60 = vld [vmem:[%s2045_s17 + $0x1b0] ss:$8 sps:$4 sm:$0xff]   ;;  %v1639_v61 = vld [vmem:[%s2045_s17 + $0xa4] ss:$8 sps:$4 sm:$0xff]  }
  0x7d   : > { %1054 = vmatpush1.bf16.msra.mxu0 %v1589_v25  ;;  %v1635_v57 = vld [vmem:[%s2045_s17 + $0x1b4] ss:$8 sps:$4 sm:$0xff]   ;;  %v1641_v62 = vld [vmem:[%s2045_s17 + $0x1a4] ss:$8 sps:$4 sm:$0xff]   ;;  %v1643_v63 = vld [vmem:[%s2045_s17 + $0xa0] ss:$8 sps:$4 sm:$0xff]  }
  0x7e   : > { %1105 = vmatpush1.bf16.msra.mxu1 %v1590_v26  ;;  %1055 = vmatprep.subr.bf16.mxu0 %v1591_v27  ;;  %v1644_v0 = vld [vmem:[%s2045_s17 + $0x1a0] ss:$8 sps:$4 sm:$0xff]   ;;  %v1645_v1 = vld [vmem:[%s2045_s17 + $0x94] ss:$8 sps:$4 sm:$0xff]   ;;  %v1649_v3 = vld [vmem:[%s2045_s17 + $0x90] ss:$8 sps:$4 sm:$0xff]  }
  0x7f   : > { %1106 = vmatprep.subr.bf16.mxu1 %v1593_v28  ;;  %v1647_v2 = vld [vmem:[%s2045_s17 + $0x194] ss:$8 sps:$4 sm:$0xff]   ;;  %v1650_v4 = vld [vmem:[%s2045_s17 + $0x190] ss:$8 sps:$4 sm:$0xff]   ;;  %v1651_v5 = vld [vmem:[%s2045_s17 + $0x84] ss:$8 sps:$4 sm:$0xff]  }
  0x80   : > { %v1653_v6 = vld [vmem:[%s2045_s17 + $0x184] ss:$8 sps:$4 sm:$0xff]   ;;  %v1655_v7 = vld [vmem:[%s2045_s17 + $0x80] ss:$8 sps:$4 sm:$0xff]   ;;  %v615_v18 = vld [vmem:[#allocation2 + $0x28] sm:$0xff]  ;;  %p1461_p5 = scmp.ne.s32.totalorder %s1737_s21, 1 }
  0x81   : > { %1056 = vmatpush1.bf16.msra.mxu0 %v1595_v29  ;;  %v1656_v8 = vld [vmem:[%s2045_s17 + $0x180] ss:$8 sps:$4 sm:$0xff]   ;;  %v617_v27 = vld [vmem:[#allocation2 + $0x8] sm:$0xff] }
  0x82   : > { %1107 = vmatpush1.bf16.msra.mxu1 %v1596_v30  ;;  %1057 = vmatprep.subr.bf16.mxu0 %v1597_v31  ;;  %v625_v9 = vld [vmem:[%s2043_s19 + $0x20] sm:$0xff]  ;;  %v626_v10 = vld [vmem:[%s2043_s19 + $0x28] sm:$0xff] }
  0x83   : > { %1108 = vmatprep.subr.bf16.mxu1 %v1599_v32  ;;  %v1657_v11 = vld [vmem:[%s2043_s19] ss:$16 sps:$4 sm:$0xff]   ;;  %v1660_v12 = vld [vmem:[%s2043_s19 + $0x8] ss:$16 sps:$4 sm:$0xff]   ;;  %v1394_v13 = vcombine.high %v625_v9, %v625_v9  ;;  %v1396_v14 = vcombine.high %v626_v10, %v626_v10  ;;  %v1393_v15 = vcombine.low %v625_v9, %v625_v9  ;;  %v1395_v16 = vcombine.low %v626_v10, %v626_v10 }
  0x84   : > { %v616_v22 = vld [vmem:[#allocation2 + $0x10] sm:$0xff]  ;;  %v618_v32 = vld [vmem:[#allocation2] sm:$0xff] }
  0x85   : > { %1058 = vmatpush1.bf16.msra.mxu0 %v1601_v33 }
  0x86   : > { %1109 = vmatpush1.bf16.msra.mxu1 %v1602_v34  ;;  %1059 = vmatprep.subr.bf16.mxu0 %v1603_v35 }
  0x87   : > { %1110 = vmatprep.subr.bf16.mxu1 %v1605_v36 }
  0x89   : > { %1060 = vmatpush1.bf16.msra.mxu0 %v1607_v37  ;;  %v619_v37 = vld [vmem:[#allocation2 + $0x18] sm:$0xff] }
  0x8a   : > { %1111 = vmatpush1.bf16.msra.mxu1 %v1608_v38  ;;  %1061 = vmatprep.subr.bf16.mxu0 %v1609_v39 }
  0x8b   : > { %1112 = vmatprep.subr.bf16.mxu1 %v1611_v40 }
  0x8d   : > { %1062 = vmatpush2.bf16.msra.mxu0 %v1613_v41 }
  0x8e   : > { %1113 = vmatpush2.bf16.msra.mxu1 %v1614_v42  ;;  %1063 = vmatprep.subr.bf16.mxu0 %v1615_v43  ;;  %v620_v42 = vld [vmem:[#allocation2 + $0x20] sm:$0xff] }
  0x8f   : > { %1114 = vmatprep.subr.bf16.mxu1 %v1617_v44 }
  0x91   : > { %1064 = vmatpush2.bf16.msra.mxu0 %v1619_v45 }
  0x92   : > { %1115 = vmatpush2.bf16.msra.mxu1 %v1620_v46  ;;  %1065 = vmatprep.subr.bf16.mxu0 %v1621_v47 }
  0x93   : > { %1116 = vmatprep.subr.bf16.mxu1 %v1623_v48 }
  0x95   : > { %1066 = vmatpush2.bf16.msra.mxu0 %v1625_v49 }
  0x96   : > { %1117 = vmatpush2.bf16.msra.mxu1 %v1626_v50  ;;  %1067 = vmatprep.subr.bf16.mxu0 %v1627_v51 }
  0x97   : > { %1118 = vmatprep.subr.bf16.mxu1 %v1629_v52 }
  0x99   : > { %1068 = vmatpush2.bf16.msra.mxu0 %v1631_v53 }
  0x9a   : > { %1119 = vmatpush2.bf16.msra.mxu1 %v1632_v55  ;;  %1069 = vmatprep.subr.bf16.mxu0 %v1633_v56 }
  0x9b   : > { %1120 = vmatprep.subr.bf16.mxu1 %v1635_v57 }
  0x9d   : > { %1070 = vmatpush2.bf16.msra.mxu0 %v1637_v59 }
  0x9e   : > { %1121 = vmatpush2.bf16.msra.mxu1 %v1638_v60  ;;  %1071 = vmatprep.subr.bf16.mxu0 %v1639_v61 }
  0x9f   : > { %1122 = vmatprep.subr.bf16.mxu1 %v1641_v62 }
  0xa1   : > { %1072 = vmatpush2.bf16.msra.mxu0 %v1643_v63 }
  0xa2   : > { %1123 = vmatpush2.bf16.msra.mxu1 %v1644_v0  ;;  %1073 = vmatprep.subr.bf16.mxu0 %v1645_v1 }
  0xa3   : > { %1124 = vmatprep.subr.bf16.mxu1 %v1647_v2 }
  0xa5   : > { %1074 = vmatpush2.bf16.msra.mxu0 %v1649_v3 }
  0xa6   : > { %1125 = vmatpush2.bf16.msra.mxu1 %v1650_v4  ;;  %1075 = vmatprep.subr.bf16.mxu0 %v1651_v5 }
  0xa7   : > { %1126 = vmatprep.subr.bf16.mxu1 %v1653_v6 }
  0xa9   : > { %1076 = vmatpush2.bf16.msra.mxu0 %v1655_v7 }
  0xaa   : > { %1127 = vmatpush2.bf16.msra.mxu1 %v1656_v8 }
  0xac   : > { %1078 = vmatmul.mubr.bf16.vlgmr.msra.gmra.mxu0 %v1657_v11 }
  0xad   : > { %1129 = vmatmul.mubr.bf16.vlgmr.msra.gmra.mxu1 %v1660_v12  ;;  %1087 = vmatprep.mubr.bf16.mxu0 %v1394_v13 }
  0xae   : > { %1138 = vmatprep.mubr.bf16.mxu1 %v1396_v14 }
  0xb4   : > { %1088 = vmatmul.mubr.bf16.gmra.mxu0 %v1393_v15 }
  0xb5   : > { %1139 = vmatmul.mubr.bf16.gmra.mxu1 %v1395_v16 }
 0x16c   : > { %v1079_v17 = vpop.f32.mrf.mxu0 }
 0x16d   : > { %v1130_v19 = vpop.f32.mrf.mxu1 }
 0x16e   : > { %v1131_v20 = vadd.f32 %v1130_v19, %v1079_v17  ;;  %v1081_v21 = vpop.f32.mrf.mxu0 }
 0x16f   : > { %v1132_v23 = vpop.f32.mrf.mxu1 }
 0x170   : > { %v1147_v24 = vadd.f32 %v1131_v20, %v615_v18  ;;  %v1133_v25 = vadd.f32 %v1132_v23, %v1081_v21  ;;  %v1083_v26 = vpop.f32.mrf.mxu0 }
 0x171   : > { %v1134_v28 = vpop.f32.mrf.mxu1 }
 0x172   : > { %1153 = vst [vmem:[#allocation2 + $0x28] sm:$0xff] %v1147_v24  ;;  %v1148_v29 = vadd.f32 %v1133_v25, %v616_v22  ;;  %v1135_v30 = vadd.f32 %v1134_v28, %v1083_v26  ;;  %v1085_v31 = vpop.f32.mrf.mxu0 }
 0x173   : > { %v1136_v33 = vpop.f32.mrf.mxu1 }
 0x174   : > { %1154 = vst [vmem:[#allocation2 + $0x10] sm:$0xff] %v1148_v29  ;;  %v1149_v34 = vadd.f32 %v1135_v30, %v617_v27  ;;  %v1137_v35 = vadd.f32 %v1136_v33, %v1085_v31  ;;  %v1089_v36 = vpop.f32.mrf.mxu0 }
 0x175   : > { %v1140_v38 = vpop.f32.mrf.mxu1 }
 0x176   : > { %1155 = vst [vmem:[#allocation2 + $0x8] sm:$0xff] %v1149_v34  ;;  %v1150_v39 = vadd.f32 %v1137_v35, %v618_v32  ;;  %v1141_v40 = vadd.f32 %v1140_v38, %v1089_v36  ;;  %v1091_v41 = vpop.f32.mrf.mxu0 }
 0x177   : > { %v1142_v43 = vpop.f32.mrf.mxu1 }
 0x178   : > { %1156 = vst [vmem:[#allocation2] sm:$0xff] %v1150_v39  ;;  %v1151_v44 = vadd.f32 %v1141_v40, %v619_v37  ;;  %v1143_v45 = vadd.f32 %v1142_v43, %v1091_v41  ;;  %v1093_v46 = vpop.f32.mrf.mxu0  ;;  %1162 = sbr.rel (%p1461_p5) target bundleno = 398 (0x18e), region = 105 }
 0x179   : > { %v1144_v47 = vpop.f32.mrf.mxu1 }
 0x17a   : > { %1157 = vst [vmem:[#allocation2 + $0x18] sm:$0xff] %v1151_v44  ;;  %v1152_v48 = vadd.f32 %v1143_v45, %v620_v42  ;;  %v1094_v49 = vpop.f32.mrf.mxu0 }
 0x17b   : > { %v1145_v50 = vpop.f32.mrf.mxu1 }
 0x17c   : > { %1158 = vst [vmem:[#allocation2 + $0x20] sm:$0xff] %v1152_v48 }
 0x17d   : > { %v1171_v51 = vlaneseq  ;;  %v1169_v53 = vld [vmem:[%s596_s8] sm:$0x3]  ;;  %v1163_v55 = vld [vmem:[#allocation2 + $0x28] sm:$0xff]  ;;  %v1164_v58 = vld [vmem:[#allocation2 + $0x10] sm:$0xff] }
 0x17e   : > { %v1187_v54 = vld [vmem:[%s601_s27] sm:$0x3]  ;;  %v1165_v59 = vld [vmem:[#allocation2 + $0x8] sm:$0xff] }
 0x17f   : > { %v1172_v52 = vshrl.u32 %v1171_v51, 7  ;;  %v1166_v60 = vld [vmem:[#allocation2] sm:$0xff] }
 0x181   : > { %v1173_v56 = vsub.s32 0, %v1172_v52  ;;  %v1177_v57 = vsub.s32 1, %v1172_v52  ;;  %v1167_v1 = vld [vmem:[#allocation2 + $0x18] sm:$0xff] }
 0x183   : > { %v1174_v61 = vrot.slane %v1169_v53, %v1173_v56  ;;  %v1192_v62 = vrot.slane %v1187_v54, %v1173_v56  ;;  %v1178_v63 = vrot.slane %v1169_v53, %v1177_v57  ;;  %v1196_v0 = vrot.slane %v1187_v54, %v1177_v57  ;;  %v1168_v2 = vld [vmem:[#allocation2 + $0x20] sm:$0xff] }
 0x185   : > { %v1181_v3 = vmul.f32 %v1174_v61, %v1163_v55  ;;  %v1182_v4 = vmul.f32 %v1178_v63, %v1164_v58  ;;  %v1183_v5 = vmul.f32 %v1174_v61, %v1165_v59  ;;  %v1184_v6 = vmul.f32 %v1178_v63, %v1166_v60 }
 0x186   : > { %v1185_v7 = vmul.f32 %v1174_v61, %v1167_v1  ;;  %v1186_v8 = vmul.f32 %v1178_v63, %v1168_v2 }
 0x187   : > { %v1199_v9 = vadd.f32 %v1192_v62, %v1181_v3  ;;  %v1200_v10 = vadd.f32 %v1196_v0, %v1182_v4  ;;  %v1201_v11 = vadd.f32 %v1192_v62, %v1183_v5  ;;  %v1202_v12 = vadd.f32 %v1196_v0, %v1184_v6 }
 0x188   : > { %v1203_v13 = vadd.f32 %v1192_v62, %v1185_v7  ;;  %v1204_v14 = vadd.f32 %v1196_v0, %v1186_v8 }
 0x189   : > { %v1205_v15 = vmax.f32 %v1199_v9, 0.0  ;;  %v1206_v16 = vmax.f32 %v1200_v10, 0.0  ;;  %v1207_v17 = vmax.f32 %v1201_v11, 0.0  ;;  %v1208_v18 = vmax.f32 %v1202_v12, 0.0 }
 0x18a   : > { %v1209_v19 = vmax.f32 %v1203_v13, 0.0  ;;  %v1210_v20 = vmax.f32 %v1204_v14, 0.0 }
 0x18b   : > { %1211 = vst [vmem:[%s2047_s15] sm:$0xff] %v1205_v15  ;;  %1212 = vst [vmem:[%s2047_s15 + $0x8] sm:$0xff] %v1206_v16 }
 0x18c   : > { %1213 = vst [vmem:[%s2047_s15 + $0x10] sm:$0xff] %v1207_v17  ;;  %1214 = vst [vmem:[%s2047_s15 + $0x18] sm:$0xff] %v1208_v18 }
 0x18d   : > { %1215 = vst [vmem:[%s2047_s15 + $0x20] sm:$0xff] %v1209_v19  ;;  %1216 = vst [vmem:[%s2047_s15 + $0x28] sm:$0xff] %v1210_v20 }
 0x18e PF: > { %1223 = sbr.rel (!%p1875_p12) target bundleno = 406 (0x196), region = 109  ;;  %s1468_s21 = sshll.u32 (%p1875_p12), %s1741_s22, 4 }
 0x18f   : > { %s1229_s30 = scalar_lea.vmem (%p1875_p12), %s2186_s4, %s1468_s21 }
 0x192   : > { %v1242_v21 = vld [vmem:[%s2047_s15] sm:$0xff] (%p1875_p12)  ;;  %v1244_v22 = vld [vmem:[%s2047_s15 + $0x8] sm:$0xff] (%p1875_p12) }
 0x193   : > { %v1246_v23 = vld [vmem:[%s2047_s15 + $0x10] sm:$0xff]  ;;  %v1248_v24 = vld [vmem:[%s2047_s15 + $0x18] sm:$0xff]  ;;  %1243 = vst [vmem:[%s1229_s30] sm:$0xff] %v1242_v21  ;;  %1245 = vst [vmem:[%s1229_s30 + $0x8] sm:$0xff] %v1244_v22 }
 0x194   : > { %v1250_v25 = vld [vmem:[%s2047_s15 + $0x20] sm:$0xff]  ;;  %v1252_v26 = vld [vmem:[%s2047_s15 + $0x28] sm:$0xff]  ;;  %1247 = vst [vmem:[%s1229_s30 + $0x20] sm:$0xff] %v1246_v23  ;;  %1249 = vst [vmem:[%s1229_s30 + $0x28] sm:$0xff] %v1248_v24 }
 0x195   : > { %1251 = vst [vmem:[%s1229_s30 + $0x40] sm:$0xff] %v1250_v25  ;;  %1253 = vst [vmem:[%s1229_s30 + $0x48] sm:$0xff] %v1252_v26 }
 0x196 PF: > { %s14_s25 = sadd.s32 1, %s1753_s25   ;;  %s2198_s14 = sld [smem:[#allocation6_spill]] }
 0x197   : > { %p11_p6 = scmp.ge.s32.totalorder %s14_s25, 6   ;;  %s2199_s6 = sld [smem:[#allocation7_spill]] }
 0x198   : > { %s2200_s15 = smov %s1717_s16  ;;  %s2201_s16 = smov %s1873_s13 }
 0x199   : > { %s2202_s17 = smov %s1725_s18  ;;  %s2203_s18 = smov %s1870_s12 }
 0x19a   : > { %s2204_s19 = smov %s1733_s20  ;;  %s2205_s20 = smov %s1856_s7 }
 0x19b   : > { %s2206_s21 = smov %s1745_s23  ;;  %s2207_s22 = smov %s1749_s24 }
 0x19c   : > { %s2208_s23 = smov %s2198_s14  ;;  %13 = sbr.rel (!%p11_p6) target bundleno = 9 (0x9), region = 177 }
 0x19d   : > { %s2209_s24 = smov %s2199_s6 }

// kernel: forward.36
= control target key start
LH: loop header
LB: loop body
LE: loop exit
PB: predicated region body
PF: predicated region fallthrough
CT: control target
= control target key end

     0   :  { %s1649_s15 = smov 0   ;;  %s1651_s16 = smov 0   ;;  %s1962_s0 = inlined_call_operand.vmem [shape: bf16[24,512], index: 0, kind: input, shape index: {}]   ;;  %s1963_s1 = inlined_call_operand.vmem [shape: bf16[512,1536], index: 1, kind: input, shape index: {}]   ;;  %s1964_s2 = inlined_call_operand.vmem [shape: f32[1,1536], index: 2, kind: input, shape index: {}]   ;;  %s1965_s3 = inlined_call_operand.vmem [shape: f32[1,1536], index: 3, kind: input, shape index: {}]   ;;  %s1966_s4 = inlined_call_operand.vmem [shape: f32[24,1536], index: 4, kind: output, shape index: {}]  }
   0x1   :  { %s1653_s17 = smov 0   ;;  %s1655_s18 = smov 0  }
   0x2   :  { %s1657_s19 = smov 0  }
   0x3 LB: > { %s29_s20 = sadd.s32 1, %s1618_s18  ;;  %s1347_s21 = sadd.s32 4294967295, %s1622_s19   ;;  %s1622_s19 = sphi %s1657_s19, %s14_s19   ;;  %s1618_s18 = sphi %s1655_s18, %s1971_s18   ;;  %s1614_s17 = sphi %s1653_s17, %s1970_s17   ;;  %s1610_s16 = sphi %s1651_s16, %s1969_s16   ;;  %s1606_s15 = sphi %s1649_s15, %s1968_s15  }
   0x4   : > { %p31_p0 = scmp.ge.s32.totalorder %s29_s20, 6  ;;  %p77_p1 = scmp.ne.s32.totalorder %s1610_s16, %s1606_s15 }
   0x5   : > { %p78_p2 = scmp.eq.s32.totalorder %s1622_s19, 0  ;;  %p161_p4 = scmp.eq.s32.totalorder %s1347_s21, 5 }
   0x6   : > { %s1973_s20 = smov (%p31_p0, %s29_s20), 0  ;;  %s70_s23 = sadd.s32 1, %s1610_s16 }
   0x7   : > { %p79_p3 = por %p78_p2, %p77_p1  ;;  %s66_s22 = ssub.s32 %s1618_s18, %s1973_s20 }
   0x8   : > { %p68_p5 = scmp.eq.s32.totalorder %s66_s22, 0  ;;  %p1684_p6 = por %p161_p4, %p77_p1 }
   0x9   : > { %p1351_p7 = scmp.ge.s32.totalorder %s1622_s19, 6 }
   0xa   : > { %s1689_s25 = scalar_select %p68_p5, %s1610_s16, %s70_s23  }
   0xb   : > { %198 = sbr.rel (%p1351_p7) target bundleno = 52 (0x34), region = 20 }
  0x10   : > { %201 = sbr.rel (!%p79_p3) target bundleno = 52 (0x34), region = 24  ;;  %s203_s26 = sand.u32 (%p79_p3), 1, %s1610_s16  }
  0x11   : > { %s1435_s27 = sshll.u32 (%p79_p3), %s1618_s18, 3  ;;  %s1352_s28 = sshll.u32 (%p79_p3), %s203_s26, 9 }
  0x12   : > { %s1697_s5 = scalar_lea.vmem (%p79_p3), %s1963_s1, %s1435_s27  ;;  %s1702_s6 = scalar_lea.vmem (%p79_p3), [#allocation3], %s1352_s28 }
  0x13   : > { %v366_v0 = vld [vmem:[%s1697_s5] sm:$0xff] (%p79_p3)  ;;  %v368_v1 = vld [vmem:[%s1697_s5 + $0x30] sm:$0xff] (%p79_p3) }
  0x14   : > { %v370_v2 = vld [vmem:[%s1697_s5 + $0x60] sm:$0xff] (%p79_p3)  ;;  %367 = vst [vmem:[%s1702_s6] sm:$0xff] (%p79_p3), %v366_v0  ;;  %369 = vst [vmem:[%s1702_s6 + $0x8] sm:$0xff] (%p79_p3), %v368_v1  ;;  %v372_v3 = vld [vmem:[%s1697_s5 + $0x90] sm:$0xff] (%p79_p3) }
  0x15   : > { %371 = vst [vmem:[%s1702_s6 + $0x10] sm:$0xff] %v370_v2  ;;  %v374_v4 = vld [vmem:[%s1697_s5 + $0xc0] sm:$0xff]  ;;  %v376_v5 = vld [vmem:[%s1697_s5 + $0xf0] sm:$0xff]  ;;  %373 = vst [vmem:[%s1702_s6 + $0x18] sm:$0xff] %v372_v3 }
  0x16   : > { %375 = vst [vmem:[%s1702_s6 + $0x20] sm:$0xff] %v374_v4  ;;  %377 = vst [vmem:[%s1702_s6 + $0x28] sm:$0xff] %v376_v5  ;;  %v378_v6 = vld [vmem:[%s1697_s5 + $0x120] sm:$0xff]  ;;  %v380_v7 = vld [vmem:[%s1697_s5 + $0x150] sm:$0xff] }
  0x17   : > { %v382_v8 = vld [vmem:[%s1697_s5 + $0x180] sm:$0xff]  ;;  %379 = vst [vmem:[%s1702_s6 + $0x30] sm:$0xff] %v378_v6  ;;  %381 = vst [vmem:[%s1702_s6 + $0x38] sm:$0xff] %v380_v7  ;;  %v384_v9 = vld [vmem:[%s1697_s5 + $0x1b0] sm:$0xff] }
  0x18   : > { %383 = vst [vmem:[%s1702_s6 + $0x40] sm:$0xff] %v382_v8  ;;  %v386_v10 = vld [vmem:[%s1697_s5 + $0x1e0] sm:$0xff]  ;;  %v388_v11 = vld [vmem:[%s1697_s5 + $0x210] sm:$0xff]  ;;  %385 = vst [vmem:[%s1702_s6 + $0x48] sm:$0xff] %v384_v9 }
  0x19   : > { %387 = vst [vmem:[%s1702_s6 + $0x50] sm:$0xff] %v386_v10  ;;  %389 = vst [vmem:[%s1702_s6 + $0x58] sm:$0xff] %v388_v11  ;;  %v390_v12 = vld [vmem:[%s1697_s5 + $0x240] sm:$0xff]  ;;  %v392_v13 = vld [vmem:[%s1697_s5 + $0x270] sm:$0xff] }
  0x1a   : > { %v394_v14 = vld [vmem:[%s1697_s5 + $0x2a0] sm:$0xff]  ;;  %391 = vst [vmem:[%s1702_s6 + $0x60] sm:$0xff] %v390_v12  ;;  %393 = vst [vmem:[%s1702_s6 + $0x68] sm:$0xff] %v392_v13  ;;  %v396_v15 = vld [vmem:[%s1697_s5 + $0x2d0] sm:$0xff] }
  0x1b   : > { %395 = vst [vmem:[%s1702_s6 + $0x70] sm:$0xff] %v394_v14  ;;  %v398_v16 = vld [vmem:[%s1697_s5 + $0x300] sm:$0xff]  ;;  %v400_v17 = vld [vmem:[%s1697_s5 + $0x330] sm:$0xff]  ;;  %397 = vst [vmem:[%s1702_s6 + $0x78] sm:$0xff] %v396_v15 }
  0x1c   : > { %399 = vst [vmem:[%s1702_s6 + $0x80] sm:$0xff] %v398_v16  ;;  %401 = vst [vmem:[%s1702_s6 + $0x88] sm:$0xff] %v400_v17  ;;  %v402_v18 = vld [vmem:[%s1697_s5 + $0x360] sm:$0xff]  ;;  %v404_v19 = vld [vmem:[%s1697_s5 + $0x390] sm:$0xff] }
  0x1d   : > { %v406_v20 = vld [vmem:[%s1697_s5 + $0x3c0] sm:$0xff]  ;;  %403 = vst [vmem:[%s1702_s6 + $0x90] sm:$0xff] %v402_v18  ;;  %405 = vst [vmem:[%s1702_s6 + $0x98] sm:$0xff] %v404_v19  ;;  %v408_v21 = vld [vmem:[%s1697_s5 + $0x3f0] sm:$0xff] }
  0x1e   : > { %407 = vst [vmem:[%s1702_s6 + $0xa0] sm:$0xff] %v406_v20  ;;  %v410_v22 = vld [vmem:[%s1697_s5 + $0x420] sm:$0xff]  ;;  %v412_v23 = vld [vmem:[%s1697_s5 + $0x450] sm:$0xff]  ;;  %409 = vst [vmem:[%s1702_s6 + $0xa8] sm:$0xff] %v408_v21 }
  0x1f   : > { %411 = vst [vmem:[%s1702_s6 + $0xb0] sm:$0xff] %v410_v22  ;;  %413 = vst [vmem:[%s1702_s6 + $0xb8] sm:$0xff] %v412_v23  ;;  %v414_v24 = vld [vmem:[%s1697_s5 + $0x480] sm:$0xff]  ;;  %v416_v25 = vld [vmem:[%s1697_s5 + $0x4b0] sm:$0xff] }
  0x20   : > { %v418_v26 = vld [vmem:[%s1697_s5 + $0x4e0] sm:$0xff]  ;;  %415 = vst [vmem:[%s1702_s6 + $0xc0] sm:$0xff] %v414_v24  ;;  %417 = vst [vmem:[%s1702_s6 + $0xc8] sm:$0xff] %v416_v25  ;;  %v420_v27 = vld [vmem:[%s1697_s5 + $0x510] sm:$0xff] }
  0x21   : > { %419 = vst [vmem:[%s1702_s6 + $0xd0] sm:$0xff] %v418_v26  ;;  %v422_v28 = vld [vmem:[%s1697_s5 + $0x540] sm:$0xff]  ;;  %v424_v29 = vld [vmem:[%s1697_s5 + $0x570] sm:$0xff]  ;;  %421 = vst [vmem:[%s1702_s6 + $0xd8] sm:$0xff] %v420_v27 }
  0x22   : > { %423 = vst [vmem:[%s1702_s6 + $0xe0] sm:$0xff] %v422_v28  ;;  %425 = vst [vmem:[%s1702_s6 + $0xe8] sm:$0xff] %v424_v29  ;;  %v426_v30 = vld [vmem:[%s1697_s5 + $0x5a0] sm:$0xff]  ;;  %v428_v31 = vld [vmem:[%s1697_s5 + $0x5d0] sm:$0xff] }
  0x23   : > { %v430_v32 = vld [vmem:[%s1697_s5 + $0x600] sm:$0xff]  ;;  %427 = vst [vmem:[%s1702_s6 + $0xf0] sm:$0xff] %v426_v30  ;;  %429 = vst [vmem:[%s1702_s6 + $0xf8] sm:$0xff] %v428_v31  ;;  %v432_v33 = vld [vmem:[%s1697_s5 + $0x630] sm:$0xff] }
  0x24   : > { %431 = vst [vmem:[%s1702_s6 + $0x100] sm:$0xff] %v430_v32  ;;  %v434_v34 = vld [vmem:[%s1697_s5 + $0x660] sm:$0xff]  ;;  %v436_v35 = vld [vmem:[%s1697_s5 + $0x690] sm:$0xff]  ;;  %433 = vst [vmem:[%s1702_s6 + $0x108] sm:$0xff] %v432_v33 }
  0x25   : > { %435 = vst [vmem:[%s1702_s6 + $0x110] sm:$0xff] %v434_v34  ;;  %437 = vst [vmem:[%s1702_s6 + $0x118] sm:$0xff] %v436_v35  ;;  %v438_v36 = vld [vmem:[%s1697_s5 + $0x6c0] sm:$0xff]  ;;  %v440_v37 = vld [vmem:[%s1697_s5 + $0x6f0] sm:$0xff] }
  0x26   : > { %v442_v38 = vld [vmem:[%s1697_s5 + $0x720] sm:$0xff]  ;;  %439 = vst [vmem:[%s1702_s6 + $0x120] sm:$0xff] %v438_v36  ;;  %441 = vst [vmem:[%s1702_s6 + $0x128] sm:$0xff] %v440_v37  ;;  %v444_v39 = vld [vmem:[%s1697_s5 + $0x750] sm:$0xff] }
  0x27   : > { %443 = vst [vmem:[%s1702_s6 + $0x130] sm:$0xff] %v442_v38  ;;  %v446_v40 = vld [vmem:[%s1697_s5 + $0x780] sm:$0xff]  ;;  %v448_v41 = vld [vmem:[%s1697_s5 + $0x7b0] sm:$0xff]  ;;  %445 = vst [vmem:[%s1702_s6 + $0x138] sm:$0xff] %v444_v39 }
  0x28   : > { %447 = vst [vmem:[%s1702_s6 + $0x140] sm:$0xff] %v446_v40  ;;  %449 = vst [vmem:[%s1702_s6 + $0x148] sm:$0xff] %v448_v41  ;;  %v450_v42 = vld [vmem:[%s1697_s5 + $0x7e0] sm:$0xff]  ;;  %v452_v43 = vld [vmem:[%s1697_s5 + $0x810] sm:$0xff] }
  0x29   : > { %v454_v44 = vld [vmem:[%s1697_s5 + $0x840] sm:$0xff]  ;;  %451 = vst [vmem:[%s1702_s6 + $0x150] sm:$0xff] %v450_v42  ;;  %453 = vst [vmem:[%s1702_s6 + $0x158] sm:$0xff] %v452_v43  ;;  %v456_v45 = vld [vmem:[%s1697_s5 + $0x870] sm:$0xff] }
  0x2a   : > { %455 = vst [vmem:[%s1702_s6 + $0x160] sm:$0xff] %v454_v44  ;;  %v458_v46 = vld [vmem:[%s1697_s5 + $0x8a0] sm:$0xff]  ;;  %v460_v47 = vld [vmem:[%s1697_s5 + $0x8d0] sm:$0xff]  ;;  %457 = vst [vmem:[%s1702_s6 + $0x168] sm:$0xff] %v456_v45 }
  0x2b   : > { %459 = vst [vmem:[%s1702_s6 + $0x170] sm:$0xff] %v458_v46  ;;  %461 = vst [vmem:[%s1702_s6 + $0x178] sm:$0xff] %v460_v47  ;;  %v462_v48 = vld [vmem:[%s1697_s5 + $0x900] sm:$0xff]  ;;  %v464_v49 = vld [vmem:[%s1697_s5 + $0x930] sm:$0xff] }
  0x2c   : > { %v466_v50 = vld [vmem:[%s1697_s5 + $0x960] sm:$0xff]  ;;  %463 = vst [vmem:[%s1702_s6 + $0x180] sm:$0xff] %v462_v48  ;;  %465 = vst [vmem:[%s1702_s6 + $0x188] sm:$0xff] %v464_v49  ;;  %v468_v51 = vld [vmem:[%s1697_s5 + $0x990] sm:$0xff] }
  0x2d   : > { %467 = vst [vmem:[%s1702_s6 + $0x190] sm:$0xff] %v466_v50  ;;  %v470_v52 = vld [vmem:[%s1697_s5 + $0x9c0] sm:$0xff]  ;;  %v472_v53 = vld [vmem:[%s1697_s5 + $0x9f0] sm:$0xff]  ;;  %469 = vst [vmem:[%s1702_s6 + $0x198] sm:$0xff] %v468_v51 }
  0x2e   : > { %471 = vst [vmem:[%s1702_s6 + $0x1a0] sm:$0xff] %v470_v52  ;;  %473 = vst [vmem:[%s1702_s6 + $0x1a8] sm:$0xff] %v472_v53  ;;  %v474_v54 = vld [vmem:[%s1697_s5 + $0xa20] sm:$0xff]  ;;  %v476_v55 = vld [vmem:[%s1697_s5 + $0xa50] sm:$0xff] }
  0x2f   : > { %v478_v56 = vld [vmem:[%s1697_s5 + $0xa80] sm:$0xff]  ;;  %475 = vst [vmem:[%s1702_s6 + $0x1b0] sm:$0xff] %v474_v54  ;;  %477 = vst [vmem:[%s1702_s6 + $0x1b8] sm:$0xff] %v476_v55  ;;  %v480_v57 = vld [vmem:[%s1697_s5 + $0xab0] sm:$0xff] }
  0x30   : > { %479 = vst [vmem:[%s1702_s6 + $0x1c0] sm:$0xff] %v478_v56  ;;  %v482_v58 = vld [vmem:[%s1697_s5 + $0xae0] sm:$0xff]  ;;  %v484_v59 = vld [vmem:[%s1697_s5 + $0xb10] sm:$0xff]  ;;  %481 = vst [vmem:[%s1702_s6 + $0x1c8] sm:$0xff] %v480_v57 }
  0x31   : > { %483 = vst [vmem:[%s1702_s6 + $0x1d0] sm:$0xff] %v482_v58  ;;  %485 = vst [vmem:[%s1702_s6 + $0x1d8] sm:$0xff] %v484_v59  ;;  %v486_v60 = vld [vmem:[%s1697_s5 + $0xb40] sm:$0xff]  ;;  %v488_v61 = vld [vmem:[%s1697_s5 + $0xb70] sm:$0xff] }
  0x32   : > { %v490_v62 = vld [vmem:[%s1697_s5 + $0xba0] sm:$0xff]  ;;  %487 = vst [vmem:[%s1702_s6 + $0x1e0] sm:$0xff] %v486_v60  ;;  %489 = vst [vmem:[%s1702_s6 + $0x1e8] sm:$0xff] %v488_v61  ;;  %v492_v63 = vld [vmem:[%s1697_s5 + $0xbd0] sm:$0xff] }
  0x33   : > { %491 = vst [vmem:[%s1702_s6 + $0x1f0] sm:$0xff] %v490_v62  ;;  %493 = vst [vmem:[%s1702_s6 + $0x1f8] sm:$0xff] %v492_v63 }
  0x34 PF: > { %p1355_p8 = scmp.ge.s32.totalorder %s1622_s19, 1  ;;  %p514_p9 = scmp.lt.s32.totalorder %s1622_s19, 7 }
  0x36   : > { %p515_p10 = pnand %p1355_p8, %p514_p9 }
  0x37   : > { %s521_s7 = sand.u32 (!%p515_p10), 1, %s1606_s15   ;;  %s1357_s30 = sshll.u32 (!%p515_p10), %s1614_s17, 1 }
  0x38   : > { %518 = sbr.rel (%p515_p10) target bundleno = 346 (0x15a), region = 70  ;;  %s1356_s8 = sshll.u32 (!%p515_p10), %s521_s7, 9 }
  0x39   : > { %s1840_s13 = scalar_lea.vmem (!%p515_p10), [#allocation3], %s1356_s8  ;;  %p578_p11 = scmp.lt.s32.totalorder (!%p515_p10), %s1357_s30, 11 }
  0x3a   : > { %s1437_s12 = smul.u32 (!%p515_p10), 48, %s521_s7 }
  0x3d   : > { %v1576_v0 = vld [vmem:[%s1962_s0 + $0x4] ss:$16 sps:$4 sm:$0xff]   ;;  %v1579_v1 = vld [vmem:[%s1962_s0 + $0xc] ss:$16 sps:$4 sm:$0xff]   ;;  %v1482_v4 = vld [vmem:[%s1840_s13 + $0x70] ss:$8 sps:$4 sm:$0xff]  }
  0x3e   : > { %v1478_v2 = vld [vmem:[%s1840_s13 + $0x74] ss:$8 sps:$4 sm:$0xff]   ;;  %1061 = vmatprep.mubr.bf16.mxu0 %v1576_v0  ;;  %1112 = vmatprep.mubr.bf16.mxu1 %v1579_v1  ;;  %v1483_v5 = vld [vmem:[%s1840_s13 + $0x170] ss:$8 sps:$4 sm:$0xff]   ;;  %v1484_v6 = vld [vmem:[%s1840_s13 + $0x64] ss:$8 sps:$4 sm:$0xff]  }
  0x3f   : > { %v1480_v3 = vld [vmem:[%s1840_s13 + $0x174] ss:$8 sps:$4 sm:$0xff]   ;;  %1029 = vmatprep.subr.bf16.mxu0 %v1478_v2  ;;  %v1486_v7 = vld [vmem:[%s1840_s13 + $0x164] ss:$8 sps:$4 sm:$0xff]   ;;  %v1488_v8 = vld [vmem:[%s1840_s13 + $0x60] ss:$8 sps:$4 sm:$0xff]  }
  0x40   : > { %1080 = vmatprep.subr.bf16.mxu1 %v1480_v3  ;;  %1030 = vmatpush1.bf16.msra.mxu0 %v1482_v4  ;;  %v1489_v9 = vld [vmem:[%s1840_s13 + $0x160] ss:$8 sps:$4 sm:$0xff]   ;;  %v1490_v10 = vld [vmem:[%s1840_s13 + $0x54] ss:$8 sps:$4 sm:$0xff]   ;;  %v1494_v12 = vld [vmem:[%s1840_s13 + $0x50] ss:$8 sps:$4 sm:$0xff]  }
  0x41   : > { %1081 = vmatpush1.bf16.msra.mxu1 %v1483_v5  ;;  %1031 = vmatprep.subr.bf16.mxu0 %v1484_v6  ;;  %v1492_v11 = vld [vmem:[%s1840_s13 + $0x154] ss:$8 sps:$4 sm:$0xff]   ;;  %v1495_v13 = vld [vmem:[%s1840_s13 + $0x150] ss:$8 sps:$4 sm:$0xff]   ;;  %v1496_v14 = vld [vmem:[%s1840_s13 + $0x44] ss:$8 sps:$4 sm:$0xff]  }
  0x42   : > { %1082 = vmatprep.subr.bf16.mxu1 %v1486_v7  ;;  %v1498_v15 = vld [vmem:[%s1840_s13 + $0x144] ss:$8 sps:$4 sm:$0xff]   ;;  %v1500_v16 = vld [vmem:[%s1840_s13 + $0x40] ss:$8 sps:$4 sm:$0xff]   ;;  %v1502_v18 = vld [vmem:[%s1840_s13 + $0x34] ss:$8 sps:$4 sm:$0xff]  }
  0x43   : > { %v1501_v17 = vld [vmem:[%s1840_s13 + $0x140] ss:$8 sps:$4 sm:$0xff]   ;;  %v1504_v19 = vld [vmem:[%s1840_s13 + $0x134] ss:$8 sps:$4 sm:$0xff]   ;;  %v1506_v20 = vld [vmem:[%s1840_s13 + $0x30] ss:$8 sps:$4 sm:$0xff]  }
  0x44   : > { %1032 = vmatpush1.bf16.msra.mxu0 %v1488_v8  ;;  %v1507_v21 = vld [vmem:[%s1840_s13 + $0x130] ss:$8 sps:$4 sm:$0xff]   ;;  %v1508_v22 = vld [vmem:[%s1840_s13 + $0x24] ss:$8 sps:$4 sm:$0xff]   ;;  %v1512_v24 = vld [vmem:[%s1840_s13 + $0x20] ss:$8 sps:$4 sm:$0xff]  }
  0x45   : > { %1083 = vmatpush1.bf16.msra.mxu1 %v1489_v9  ;;  %1033 = vmatprep.subr.bf16.mxu0 %v1490_v10  ;;  %v1510_v23 = vld [vmem:[%s1840_s13 + $0x124] ss:$8 sps:$4 sm:$0xff]   ;;  %v1513_v25 = vld [vmem:[%s1840_s13 + $0x120] ss:$8 sps:$4 sm:$0xff]   ;;  %v1514_v26 = vld [vmem:[%s1840_s13 + $0x14] ss:$8 sps:$4 sm:$0xff]   ;;  %v1154_v10 = vlaneseq }
  0x46   : > { %1084 = vmatprep.subr.bf16.mxu1 %v1492_v11  ;;  %v1516_v27 = vld [vmem:[%s1840_s13 + $0x114] ss:$8 sps:$4 sm:$0xff]   ;;  %v1518_v28 = vld [vmem:[%s1840_s13 + $0x10] ss:$8 sps:$4 sm:$0xff]   ;;  %v1520_v30 = vld [vmem:[%s1840_s13 + $0x4] ss:$8 sps:$4 sm:$0xff]  }
  0x47   : > { %v1519_v29 = vld [vmem:[%s1840_s13 + $0x110] ss:$8 sps:$4 sm:$0xff]   ;;  %v1522_v31 = vld [vmem:[%s1840_s13 + $0x104] ss:$8 sps:$4 sm:$0xff]   ;;  %v1524_v32 = vld [vmem:[%s1840_s13] ss:$8 sps:$4 sm:$0xff]  }
  0x48   : > { %1034 = vmatpush1.bf16.msra.mxu0 %v1494_v12  ;;  %v1525_v33 = vld [vmem:[%s1840_s13 + $0x100] ss:$8 sps:$4 sm:$0xff]   ;;  %v1526_v34 = vld [vmem:[%s1840_s13 + $0xf4] ss:$8 sps:$4 sm:$0xff]   ;;  %v1530_v36 = vld [vmem:[%s1840_s13 + $0xf0] ss:$8 sps:$4 sm:$0xff]  }
  0x49   : > { %1085 = vmatpush1.bf16.msra.mxu1 %v1495_v13  ;;  %1035 = vmatprep.subr.bf16.mxu0 %v1496_v14  ;;  %v1528_v35 = vld [vmem:[%s1840_s13 + $0x1f4] ss:$8 sps:$4 sm:$0xff]   ;;  %v1531_v37 = vld [vmem:[%s1840_s13 + $0x1f0] ss:$8 sps:$4 sm:$0xff]   ;;  %v1532_v38 = vld [vmem:[%s1840_s13 + $0xe4] ss:$8 sps:$4 sm:$0xff]  }
  0x4a   : > { %1086 = vmatprep.subr.bf16.mxu1 %v1498_v15  ;;  %v1534_v39 = vld [vmem:[%s1840_s13 + $0x1e4] ss:$8 sps:$4 sm:$0xff]   ;;  %v1536_v40 = vld [vmem:[%s1840_s13 + $0xe0] ss:$8 sps:$4 sm:$0xff]   ;;  %v1538_v42 = vld [vmem:[%s1840_s13 + $0xd4] ss:$8 sps:$4 sm:$0xff]  }
  0x4b   : > { %v1537_v41 = vld [vmem:[%s1840_s13 + $0x1e0] ss:$8 sps:$4 sm:$0xff]   ;;  %v1540_v43 = vld [vmem:[%s1840_s13 + $0x1d4] ss:$8 sps:$4 sm:$0xff]   ;;  %v1542_v44 = vld [vmem:[%s1840_s13 + $0xd0] ss:$8 sps:$4 sm:$0xff]  }
  0x4c   : > { %1036 = vmatpush1.bf16.msra.mxu0 %v1500_v16  ;;  %v1543_v45 = vld [vmem:[%s1840_s13 + $0x1d0] ss:$8 sps:$4 sm:$0xff]   ;;  %v1544_v46 = vld [vmem:[%s1840_s13 + $0xc4] ss:$8 sps:$4 sm:$0xff]   ;;  %v1548_v48 = vld [vmem:[%s1840_s13 + $0xc0] ss:$8 sps:$4 sm:$0xff]  }
  0x4d   : > { %1087 = vmatpush1.bf16.msra.mxu1 %v1501_v17  ;;  %1037 = vmatprep.subr.bf16.mxu0 %v1502_v18  ;;  %v1546_v47 = vld [vmem:[%s1840_s13 + $0x1c4] ss:$8 sps:$4 sm:$0xff]   ;;  %v1549_v49 = vld [vmem:[%s1840_s13 + $0x1c0] ss:$8 sps:$4 sm:$0xff]   ;;  %v1550_v50 = vld [vmem:[%s1840_s13 + $0xb4] ss:$8 sps:$4 sm:$0xff]  }
  0x4e   : > { %1088 = vmatprep.subr.bf16.mxu1 %v1504_v19  ;;  %v1552_v51 = vld [vmem:[%s1840_s13 + $0x1b4] ss:$8 sps:$4 sm:$0xff]   ;;  %v1554_v52 = vld [vmem:[%s1840_s13 + $0xb0] ss:$8 sps:$4 sm:$0xff]   ;;  %v1556_v54 = vld [vmem:[%s1840_s13 + $0xa4] ss:$8 sps:$4 sm:$0xff]  }
  0x4f   : > { %v1555_v53 = vld [vmem:[%s1840_s13 + $0x1b0] ss:$8 sps:$4 sm:$0xff]   ;;  %v1558_v55 = vld [vmem:[%s1840_s13 + $0x1a4] ss:$8 sps:$4 sm:$0xff]   ;;  %v1560_v56 = vld [vmem:[%s1840_s13 + $0xa0] ss:$8 sps:$4 sm:$0xff]  }
  0x50   : > { %1038 = vmatpush1.bf16.msra.mxu0 %v1506_v20  ;;  %v1561_v57 = vld [vmem:[%s1840_s13 + $0x1a0] ss:$8 sps:$4 sm:$0xff]   ;;  %v1562_v58 = vld [vmem:[%s1840_s13 + $0x94] ss:$8 sps:$4 sm:$0xff]   ;;  %v1566_v60 = vld [vmem:[%s1840_s13 + $0x90] ss:$8 sps:$4 sm:$0xff]  }
  0x51   : > { %1089 = vmatpush1.bf16.msra.mxu1 %v1507_v21  ;;  %1039 = vmatprep.subr.bf16.mxu0 %v1508_v22  ;;  %v1564_v59 = vld [vmem:[%s1840_s13 + $0x194] ss:$8 sps:$4 sm:$0xff]   ;;  %v1567_v61 = vld [vmem:[%s1840_s13 + $0x190] ss:$8 sps:$4 sm:$0xff]   ;;  %v1568_v62 = vld [vmem:[%s1840_s13 + $0x84] ss:$8 sps:$4 sm:$0xff]  }
  0x52   : > { %1090 = vmatprep.subr.bf16.mxu1 %v1510_v23  ;;  %v1570_v63 = vld [vmem:[%s1840_s13 + $0x184] ss:$8 sps:$4 sm:$0xff]   ;;  %v1572_v0 = vld [vmem:[%s1840_s13 + $0x80] ss:$8 sps:$4 sm:$0xff]   ;;  %s1975_s30 = smov (!%p578_p11, %s1357_s30), 11  ;;  %v1155_v11 = vshrl.u32 %v1154_v10, 7 }
  0x53   : > { %v1573_v1 = vld [vmem:[%s1840_s13 + $0x180] ss:$8 sps:$4 sm:$0xff]   ;;  %s580_s8 = scalar_lea.vmem %s1964_s2, %s1975_s30  ;;  %s585_s11 = scalar_lea.vmem %s1965_s3, %s1975_s30 }
  0x54   : > { %1040 = vmatpush1.bf16.msra.mxu0 %v1512_v24  ;;  %v609_v2 = vld [vmem:[%s1962_s0 + $0x20] sm:$0xff]  ;;  %v610_v3 = vld [vmem:[%s1962_s0 + $0x28] sm:$0xff]  ;;  %v1156_v12 = vsub.s32 0, %v1155_v11  ;;  %v1160_v14 = vsub.s32 1, %v1155_v11  ;;  %s1927_s13 = scalar_lea.vmem [#allocation4], %s1437_s12  ;;  %s1436_s15 = sshll.u32 (%p1684_p6), %s1614_s17, 4 }
  0x55   : > { %1091 = vmatpush1.bf16.msra.mxu1 %v1513_v25  ;;  %1041 = vmatprep.subr.bf16.mxu0 %v1514_v26  ;;  %v1574_v4 = vld [vmem:[%s1962_s0] ss:$16 sps:$4 sm:$0xff]   ;;  %v1577_v5 = vld [vmem:[%s1962_s0 + $0x8] ss:$16 sps:$4 sm:$0xff]   ;;  %v1364_v6 = vcombine.high %v609_v2, %v609_v2  ;;  %v1366_v7 = vcombine.high %v610_v3, %v610_v3  ;;  %v1363_v8 = vcombine.low %v609_v2, %v609_v2  ;;  %s1206_s21 = scalar_lea.vmem (%p1684_p6), %s1966_s4, %s1436_s15 }
  0x56   : > { %1092 = vmatprep.subr.bf16.mxu1 %v1516_v27  ;;  %v1365_v9 = vcombine.low %v610_v3, %v610_v3  ;;  %v1152_v13 = vld [vmem:[%s580_s8] sm:$0x3] }
  0x57   : > { %v1170_v15 = vld [vmem:[%s585_s11] sm:$0x3]  ;;  %v1157_v16 = vrot.slane %v1152_v13, %v1156_v12  ;;  %v1161_v21 = vrot.slane %v1152_v13, %v1160_v14 }
  0x58   : > { %1042 = vmatpush1.bf16.msra.mxu0 %v1518_v28  ;;  %v1175_v20 = vrot.slane %v1170_v15, %v1156_v12  ;;  %v1179_v26 = vrot.slane %v1170_v15, %v1160_v14 }
  0x59   : > { %1093 = vmatpush1.bf16.msra.mxu1 %v1519_v29  ;;  %1043 = vmatprep.subr.bf16.mxu0 %v1520_v30 }
  0x5a   : > { %1094 = vmatprep.subr.bf16.mxu1 %v1522_v31 }
  0x5c   : > { %1044 = vmatpush1.bf16.msra.mxu0 %v1524_v32 }
  0x5d   : > { %1095 = vmatpush1.bf16.msra.mxu1 %v1525_v33  ;;  %1045 = vmatprep.subr.bf16.mxu0 %v1526_v34 }
  0x5e   : > { %1096 = vmatprep.subr.bf16.mxu1 %v1528_v35 }
  0x60   : > { %1046 = vmatpush2.bf16.msra.mxu0 %v1530_v36 }
  0x61   : > { %1097 = vmatpush2.bf16.msra.mxu1 %v1531_v37  ;;  %1047 = vmatprep.subr.bf16.mxu0 %v1532_v38 }
  0x62   : > { %1098 = vmatprep.subr.bf16.mxu1 %v1534_v39 }
  0x64   : > { %1048 = vmatpush2.bf16.msra.mxu0 %v1536_v40 }
  0x65   : > { %1099 = vmatpush2.bf16.msra.mxu1 %v1537_v41  ;;  %1049 = vmatprep.subr.bf16.mxu0 %v1538_v42 }
  0x66   : > { %1100 = vmatprep.subr.bf16.mxu1 %v1540_v43 }
  0x68   : > { %1050 = vmatpush2.bf16.msra.mxu0 %v1542_v44 }
  0x69   : > { %1101 = vmatpush2.bf16.msra.mxu1 %v1543_v45  ;;  %1051 = vmatprep.subr.bf16.mxu0 %v1544_v46 }
  0x6a   : > { %1102 = vmatprep.subr.bf16.mxu1 %v1546_v47 }
  0x6c   : > { %1052 = vmatpush2.bf16.msra.mxu0 %v1548_v48 }
  0x6d   : > { %1103 = vmatpush2.bf16.msra.mxu1 %v1549_v49  ;;  %1053 = vmatprep.subr.bf16.mxu0 %v1550_v50 }
  0x6e   : > { %1104 = vmatprep.subr.bf16.mxu1 %v1552_v51 }
  0x70   : > { %1054 = vmatpush2.bf16.msra.mxu0 %v1554_v52 }
  0x71   : > { %1105 = vmatpush2.bf16.msra.mxu1 %v1555_v53  ;;  %1055 = vmatprep.subr.bf16.mxu0 %v1556_v54 }
  0x72   : > { %1106 = vmatprep.subr.bf16.mxu1 %v1558_v55 }
  0x74   : > { %1056 = vmatpush2.bf16.msra.mxu0 %v1560_v56 }
  0x75   : > { %1107 = vmatpush2.bf16.msra.mxu1 %v1561_v57  ;;  %1057 = vmatprep.subr.bf16.mxu0 %v1562_v58 }
  0x76   : > { %1108 = vmatprep.subr.bf16.mxu1 %v1564_v59 }
  0x78   : > { %1058 = vmatpush2.bf16.msra.mxu0 %v1566_v60 }
  0x79   : > { %1109 = vmatpush2.bf16.msra.mxu1 %v1567_v61  ;;  %1059 = vmatprep.subr.bf16.mxu0 %v1568_v62 }
  0x7a   : > { %1110 = vmatprep.subr.bf16.mxu1 %v1570_v63 }
  0x7c   : > { %1060 = vmatpush2.bf16.msra.mxu0 %v1572_v0 }
  0x7d   : > { %1111 = vmatpush2.bf16.msra.mxu1 %v1573_v1 }
  0x7f   : > { %1062 = vmatmul.mubr.bf16.vlgmr.msra.gmra.mxu0 %v1574_v4 }
  0x80   : > { %1113 = vmatmul.mubr.bf16.vlgmr.msra.gmra.mxu1 %v1577_v5  ;;  %1071 = vmatprep.mubr.bf16.mxu0 %v1364_v6 }
  0x81   : > { %1122 = vmatprep.mubr.bf16.mxu1 %v1366_v7 }
  0x87   : > { %1072 = vmatmul.mubr.bf16.gmra.mxu0 %v1363_v8 }
  0x88   : > { %1123 = vmatmul.mubr.bf16.gmra.mxu1 %v1365_v9 }
 0x13f   : > { %v1063_v17 = vpop.f32.mrf.mxu0 }
 0x140   : > { %v1114_v18 = vpop.f32.mrf.mxu1 }
 0x141   : > { %v1115_v19 = vadd.f32 %v1114_v18, %v1063_v17  ;;  %v1065_v22 = vpop.f32.mrf.mxu0 }
 0x142   : > { %v1116_v23 = vpop.f32.mrf.mxu1 }
 0x143   : > { %v1164_v24 = vmul.f32 %v1157_v16, %v1115_v19  ;;  %v1117_v25 = vadd.f32 %v1116_v23, %v1065_v22  ;;  %v1067_v27 = vpop.f32.mrf.mxu0 }
 0x144   : > { %v1118_v28 = vpop.f32.mrf.mxu1 }
 0x145   : > { %v1182_v29 = vadd.f32 %v1175_v20, %v1164_v24  ;;  %v1165_v30 = vmul.f32 %v1161_v21, %v1117_v25  ;;  %v1119_v31 = vadd.f32 %v1118_v28, %v1067_v27  ;;  %v1069_v32 = vpop.f32.mrf.mxu0 }
 0x146   : > { %v1120_v33 = vpop.f32.mrf.mxu1 }
 0x147   : > { %1188 = vst [vmem:[%s1927_s13] sm:$0xff] %v1182_v29  ;;  %v1183_v34 = vadd.f32 %v1179_v26, %v1165_v30  ;;  %v1166_v35 = vmul.f32 %v1157_v16, %v1119_v31  ;;  %v1121_v36 = vadd.f32 %v1120_v33, %v1069_v32  ;;  %v1073_v37 = vpop.f32.mrf.mxu0 }
 0x148   : > { %v1124_v38 = vpop.f32.mrf.mxu1 }
 0x149   : > { %1189 = vst [vmem:[%s1927_s13 + $0x8] sm:$0xff] %v1183_v34  ;;  %v1184_v39 = vadd.f32 %v1175_v20, %v1166_v35  ;;  %v1167_v40 = vmul.f32 %v1161_v21, %v1121_v36  ;;  %v1125_v41 = vadd.f32 %v1124_v38, %v1073_v37  ;;  %v1075_v42 = vpop.f32.mrf.mxu0 }
 0x14a   : > { %v1126_v43 = vpop.f32.mrf.mxu1 }
 0x14b   : > { %1190 = vst [vmem:[%s1927_s13 + $0x10] sm:$0xff] %v1184_v39  ;;  %v1185_v44 = vadd.f32 %v1179_v26, %v1167_v40  ;;  %v1168_v45 = vmul.f32 %v1157_v16, %v1125_v41  ;;  %v1127_v46 = vadd.f32 %v1126_v43, %v1075_v42  ;;  %v1077_v47 = vpop.f32.mrf.mxu0 }
 0x14c   : > { %v1128_v48 = vpop.f32.mrf.mxu1 }
 0x14d   : > { %1191 = vst [vmem:[%s1927_s13 + $0x18] sm:$0xff] %v1185_v44  ;;  %v1186_v49 = vadd.f32 %v1175_v20, %v1168_v45  ;;  %v1169_v50 = vmul.f32 %v1161_v21, %v1127_v46  ;;  %v1078_v51 = vpop.f32.mrf.mxu0  ;;  %1200 = sbr.rel (!%p1684_p6) target bundleno = 346 (0x15a), region = 86 }
 0x14e   : > { %v1129_v52 = vpop.f32.mrf.mxu1  ;;  %v1219_v54 = vld [vmem:[%s1927_s13] sm:$0xff] (%p1684_p6) }
 0x14f   : > { %1192 = vst [vmem:[%s1927_s13 + $0x20] sm:$0xff] %v1186_v49  ;;  %v1187_v53 = vadd.f32 %v1179_v26, %v1169_v50  ;;  %1220 = vst [vmem:[%s1206_s21] sm:$0xff] (%p1684_p6), %v1219_v54 }
 0x150   : > { %v1221_v55 = vld [vmem:[%s1927_s13 + $0x8] sm:$0xff] (%p1684_p6) }
 0x151   : > { %1193 = vst [vmem:[%s1927_s13 + $0x28] sm:$0xff] %v1187_v53  ;;  %1222 = vst [vmem:[%s1206_s21 + $0x8] sm:$0xff] (%p1684_p6), %v1221_v55 }
 0x152   : > { %v1223_v56 = vld [vmem:[%s1927_s13 + $0x10] sm:$0xff] }
 0x153   : > { %1224 = vst [vmem:[%s1206_s21 + $0x60] sm:$0xff] %v1223_v56 }
 0x154   : > { %v1225_v57 = vld [vmem:[%s1927_s13 + $0x18] sm:$0xff] }
 0x155   : > { %1226 = vst [vmem:[%s1206_s21 + $0x68] sm:$0xff] %v1225_v57 }
 0x156   : > { %v1227_v58 = vld [vmem:[%s1927_s13 + $0x20] sm:$0xff] }
 0x157   : > { %1228 = vst [vmem:[%s1206_s21 + $0xc0] sm:$0xff] %v1227_v58 }
 0x158   : > { %v1229_v59 = vld [vmem:[%s1927_s13 + $0x28] sm:$0xff] }
 0x159   : > { %1230 = vst [vmem:[%s1206_s21 + $0xc8] sm:$0xff] %v1229_v59 }
 0x15a PF: > { %s14_s19 = sadd.s32 1, %s1622_s19   ;;  %s1968_s15 = smov %s1610_s16 }
 0x15b   : > { %p11_p12 = scmp.ge.s32.totalorder %s14_s19, 8   ;;  %s1969_s16 = smov %s1689_s25 }
 0x15c   : > { %s1970_s17 = smov %s1618_s18  ;;  %s1971_s18 = smov %s1973_s20 }
 0x15d   :  { %13 = sbr.rel (!%p11_p12) target bundleno = 3 (0x3), region = 149 }

// kernel: forward.37
= control target key start
LH: loop header
LB: loop body
LE: loop exit
PB: predicated region body
PF: predicated region fallthrough
CT: control target
= control target key end

     0   :  { %s1280_s0 = inlined_call_operand.vmem [shape: bf16[2,9,1536], index: 0, kind: input, shape index: {}, may-alias: {0,1,2}]   ;;  %s1281_s1 = inlined_call_operand.vmem [shape: bf16[2,9,1536], index: 1, kind: input, shape index: {}, may-alias: {0,1,2}]   ;;  %s1282_s2 = inlined_call_operand.vmem [shape: bf16[2,9,1536], index: 2, kind: input, shape index: {}, may-alias: {0,1,2}]   ;;  %s1283_s3 = inlined_call_operand.vmem [shape: bf16[4,9,128], index: 3, kind: input, shape index: {}]   ;;  %s1284_s4 = inlined_call_operand.vmem [shape: f32[2,9,512], index: 4, kind: output, shape index: {}]  }
   0x1   :  { %1287 = sst [smem:[#allocation10_spill]] %s1284_s4 }
   0x2   :  { %s1073_s15 = smov 0   ;;  %s1075_s16 = smov 0  }
   0x3   :  { %s1077_s17 = smov 0   ;;  %s1079_s18 = smov 0  }
   0x4   :  { %s1081_s19 = smov 0   ;;  %s1083_s20 = smov 0  }
   0x5   :  { %s1085_s21 = smov 0   ;;  %s1087_s22 = smov 0  }
   0x6   :  { %s1089_s23 = smov 0   ;;  %s1091_s24 = smov 0  }
   0x7   :  { %s1093_s25 = smov 0  }
   0x8 LB: > { %1288 = sst [smem:[#allocation6_spill]] %s1031_s22  ;;  %s23_s27 = sadd.s32 1, %s1035_s23  ;;  %s1043_s25 = sphi %s1093_s25, %s14_s25   ;;  %s1039_s24 = sphi %s1091_s24, %s1311_s24   ;;  %s1035_s23 = sphi %s1089_s23, %s1310_s23   ;;  %s1031_s22 = sphi %s1087_s22, %s1309_s22   ;;  %s1027_s21 = sphi %s1085_s21, %s1308_s21   ;;  %s1023_s20 = sphi %s1083_s20, %s1307_s20   ;;  %s1019_s19 = sphi %s1081_s19, %s1306_s19   ;;  %s1015_s18 = sphi %s1079_s18, %s1305_s18   ;;  %s1011_s17 = sphi %s1077_s17, %s1304_s17   ;;  %s1007_s16 = sphi %s1075_s16, %s1303_s16   ;;  %s1003_s15 = sphi %s1073_s15, %s1302_s15  }
   0x9   : > { %p24_p0 = scmp.ge.s32.totalorder %s23_s27, 4  ;;  %s26_s28 = sadd.s32 1, %s1039_s24 }
   0xa   : > { %s35_s29 = sadd.s32 1, %s1023_s20  ;;  %p42_p1 = scmp.ne.s32.totalorder %s1023_s20, %s1019_s19 }
   0xb   : > { %s1313_s27 = smov (%p24_p0, %s23_s27), 0  ;;  %s1315_s28 = smov (!%p24_p0, %s26_s28), %s1039_s24 }
   0xc   : > { %1289 = sst [smem:[#allocation7_spill]] %s1313_s27  ;;  %s31_s30 = ssub.s32 %s1035_s23, %s1313_s27 }
   0xd   : > { %p43_p2 = scmp.eq.s32.totalorder %s1043_s25, 0  ;;  %p28_p3 = scmp.ge.s32.totalorder %s1315_s28, 2 }
   0xe   : > { %s58_s5 = sadd.s32 4, %s1035_s23  ;;  %s59_s7 = sadd.s32 4, %s1313_s27 }
   0xf   : > { %p1146_p4 = por %p43_p2, %p42_p1  ;;  %s1317_s28 = smov (%p28_p3, %s1315_s28), 0 }
  0x10   : > { %1291 = sst [smem:[#allocation8_spill]] %s1317_s28  ;;  %s61_s8 = ssub.s32 %s58_s5, %s59_s7 }
  0x11   : > { %s65_s9 = sadd.s32 1, %s1015_s18  ;;  %s30_s10 = ssub.s32 %s1039_s24, %s1317_s28 }
  0x12   : > { %p72_p5 = scmp.ne.s32.totalorder %s1015_s18, %s1011_s17  ;;  %s32_s11 = sor.u32 %s31_s30, %s30_s10 }
  0x13   : > { %s62_s12 = sor.u32 %s61_s8, %s30_s10  ;;  %p33_p6 = scmp.eq.s32.totalorder %s32_s11, 0 }
  0x14   : > { %p63_p7 = scmp.eq.s32.totalorder %s62_s12, 0  ;;  %p1160_p8 = por %p72_p5, %p43_p2 }
  0x15   : > { %s88_s14 = sadd.s32 8, %s1035_s23  ;;  %s89_s7 = sadd.s32 8, %s1313_s27 }
  0x16   : > { %s1166_s26 = scalar_select %p33_p6, %s1023_s20, %s35_s29  }
  0x17   : > { %s1169_s5 = scalar_select %p63_p7, %s1015_s18, %s65_s9  }
  0x18   : > { %1293 = sst [smem:[#allocation9_spill]] %s1166_s26  ;;  %s95_s28 = sadd.s32 1, %s1007_s16 }
  0x19   : > { %s91_s4 = ssub.s32 %s88_s14, %s89_s7  ;;  %p102_p9 = scmp.ne.s32.totalorder %s1007_s16, %s1003_s15 }
  0x1a   : > { %s92_s30 = sor.u32 %s91_s4, %s30_s10  ;;  %s1294_s22 = sadd.s32 4294967295, %s1043_s25  }
  0x1b   : > { %p160_p10 = scmp.eq.s32.totalorder %s1294_s22, 7  ;;  %p93_p11 = scmp.eq.s32.totalorder %s92_s30, 0 }
  0x1c   : > { %p1179_p12 = por %p102_p9, %p43_p2  ;;  %p800_p0 = scmp.ge.s32.totalorder %s1043_s25, 8 }
  0x1d   : > { %p1186_p13 = por %p160_p10, %p42_p1 }
  0x1e   : > { %s1191_s29 = scalar_select %p93_p11, %s1007_s16, %s95_s28  }
  0x1f   : > { %182 = sbr.rel (%p800_p0) target bundleno = 60 (0x3c), region = 16 }
  0x24   : > { %185 = sbr.rel (!%p1146_p4) target bundleno = 44 (0x2c), region = 20  ;;  %s187_s4 = sand.u32 (%p1146_p4), 1, %s1023_s20  }
  0x25   : > { %s853_s22 = smul.u32 (%p1146_p4), 24, %s1039_s24  ;;  %s801_s9 = sshll.u32 (%p1146_p4), %s187_s4, 3 }
  0x26   : > { %s189_s28 = scalar_lea.vmem (%p1146_p4), [#allocation2], %s801_s9 }
  0x27   : > { %s191_s10 = sadd.s32 (%p1146_p4), %s1035_s23, %s853_s22 }
  0x28   : > { %s802_s12 = sshll.u32 (%p1146_p4), %s191_s10, 2 }
  0x29   : > { %s193_s30 = scalar_lea.vmem %s1280_s0, %s802_s12 }
  0x2a   : > { %v210_v0 = vld [vmem:[%s193_s30] sm:$0xf]  ;;  %v212_v1 = vld [vmem:[%s193_s30 + $0x30] sm:$0xf] }
  0x2b   : > { %211 = vst [vmem:[%s189_s28] sm:$0xf] %v210_v0  ;;  %213 = vst [vmem:[%s189_s28 + $0x4] sm:$0xf] %v212_v1 }
  0x2c PF: > { %241 = sbr.rel (!%p1160_p8) target bundleno = 52 (0x34), region = 61  ;;  %s243_s6 = sand.u32 (%p1160_p8), 1, %s1015_s18  }
  0x2d   : > { %s691_s4 = smul.u32 (%p1160_p8), 24, %s1039_s24  ;;  %s803_s22 = sshll.u32 (%p1160_p8), %s243_s6, 3 }
  0x2e   : > { %s245_s9 = scalar_lea.vmem (%p1160_p8), [#allocation3], %s803_s22 }
  0x2f   : > { %s692_s10 = sadd.s32 (%p1160_p8), %s1035_s23, %s691_s4 }
  0x30   : > { %s804_s27 = sshll.u32 (%p1160_p8), %s692_s10, 2 }
  0x31   : > { %s694_s12 = scalar_lea.vmem %s1281_s1, %s804_s27 }
  0x32   : > { %v805_v2 = vld [vmem:[%s694_s12 + $0x10] sm:$0xf]  ;;  %v806_v3 = vld [vmem:[%s694_s12 + $0x40] sm:$0xf] }
  0x33   : > { %268 = vst [vmem:[%s245_s9] sm:$0xf] %v805_v2  ;;  %270 = vst [vmem:[%s245_s9 + $0x4] sm:$0xf] %v806_v3 }
  0x34 PF: > { %298 = sbr.rel (!%p1179_p12) target bundleno = 60 (0x3c), region = 102  ;;  %s300_s13 = sand.u32 (%p1179_p12), 1, %s1007_s16  }
  0x35   : > { %s698_s7 = smul.u32 (%p1179_p12), 24, %s1039_s24  ;;  %s807_s30 = sshll.u32 (%p1179_p12), %s300_s13, 3 }
  0x36   : > { %s302_s22 = scalar_lea.vmem (%p1179_p12), [#allocation4], %s807_s30 }
  0x37   : > { %s699_s28 = sadd.s32 (%p1179_p12), %s1035_s23, %s698_s7 }
  0x38   : > { %s808_s6 = sshll.u32 (%p1179_p12), %s699_s28, 2 }
  0x39   : > { %s701_s27 = scalar_lea.vmem %s1282_s2, %s808_s6 }
  0x3a   : > { %v809_v4 = vld [vmem:[%s701_s27 + $0x20] sm:$0xf]  ;;  %v810_v5 = vld [vmem:[%s701_s27 + $0x50] sm:$0xf] }
  0x3b   : > { %325 = vst [vmem:[%s302_s22] sm:$0xf] %v809_v4  ;;  %327 = vst [vmem:[%s302_s22 + $0x4] sm:$0xf] %v810_v5 }
  0x3c PF: > { %p811_p1 = scmp.ge.s32.totalorder %s1043_s25, 1  ;;  %p362_p2 = scmp.lt.s32.totalorder %s1043_s25, 9 }
  0x3e   : > { %p363_p3 = pnand %p811_p1, %p362_p2 }
  0x3f   : > { %s369_s8 = sand.u32 (!%p363_p3), 1, %s1019_s19   ;;  %s376_s10 = sand.u32 (!%p363_p3), 1, %s1011_s17  }
  0x40   : > { %366 = sbr.rel (%p363_p3) target bundleno = 802 (0x322), region = 147  ;;  %s812_s14 = sshll.u32 (!%p363_p3), %s369_s8, 3 }
  0x41   : > { %s813_s12 = sshll.u32 (!%p363_p3), %s376_s10, 3  ;;  %s371_s9 = scalar_lea.vmem (!%p363_p3), [#allocation2], %s812_s14 }
  0x42   : > { %s378_s13 = scalar_lea.vmem (!%p363_p3), [#allocation3], %s813_s12  ;;  %p422_p4 = scmp.lt.s32.totalorder (!%p363_p3), %s1027_s21, 3 }
  0x43   : > { %s383_s4 = sand.u32 (!%p363_p3), 1, %s1003_s15   ;;  %s815_s15 = sshll.u32 (!%p363_p3), %s369_s8, 4 }
  0x44   : > { %s814_s26 = sshll.u32 (!%p363_p3), %s383_s4, 3  ;;  %s419_s22 = scalar_lea.vmem (!%p363_p3), [#allocation5], %s815_s15 }
  0x45   : > { %v1045_v6 = vmov 0.0   ;;  %vm1046_vm0 = vmmov 0   ;;  %v945_v7 = vld [vmem:[%s371_s9] sm:$0x1f]   ;;  %v946_v8 = vld [vmem:[%s378_s13] sm:$0x1f]  }
  0x46   : > { %835 = vmatprep.subr.bf16.mxu0 %v1045_v6  ;;  %841 = vmatprep.subr.bf16.mxu1 %v1045_v6  ;;  %s423_s17 = scalar_select %p422_p4, %s1027_s21, 3  ;;  %vm536_vm1 = vcmask 72704   ;;  %vm540_vm2 = vcmask 65536   ;;  %vm569_vm3 = vcmask 1043456   ;;  %vm570_vm4 = vcmask 1044480  }
  0x47   : > { %837 = vmatprep.mubr.msk.bf16.mxu0 %vm1046_vm0, %v1045_v6  ;;  %843 = vmatprep.mubr.msk.bf16.mxu1 %vm1046_vm0, %v1045_v6  ;;  %s385_s27 = scalar_lea.vmem [#allocation4], %s814_s26  ;;  %v1047_v33 = vmov 65535   ;;  %s1297_s10 = sld [smem:[#allocation6_spill]] (%p1186_p13) }
  0x48   : > { %836 = vmatpush3.bf16.xpose.msra.mxu0 %v945_v7  ;;  %842 = vmatpush3.bf16.xpose.msra.mxu1 %v946_v8  ;;  %s828_s7 = sshll.u32 %s423_s17, 3  ;;  %v948_v32 = vld [vmem:[%s385_s27] sm:$0x1f]   ;;  %v571_v34 = vsel %vm569_vm3, 4294967295, %v1047_v33  ;;  %s1298_s13 = sld [smem:[#allocation10_spill]] (%p1186_p13) }
  0x49   : > { %847 = vmatprep.subr.bf16.mxu0 %v1045_v6  ;;  %s426_s6 = scalar_lea.vmem %s1283_s3, %s828_s7  ;;  %v572_v35 = vsel %vm570_vm4, %v571_v34, 0 }
  0x4a   : > { %v947_v9 = vld [vmem:[%s426_s6] sm:$0x1f]   ;;  %v574_v36 = vand.u32 %v948_v32, %v572_v35 }
  0x4d   : > { %s824_s14 = sshll.u32 (%p1186_p13), %s1297_s10, 3 }
  0x4e   : > { %s631_s12 = sadd.s32 (%p1186_p13), %s1027_s21, %s824_s14 }
  0x4f   : > { %838 = vmatmul.mubr.bf16.vlgmr.msra.gmra.mxu0 %v947_v9  ;;  %844 = vmatmul.mubr.bf16.vlgmr.msra.gmra.mxu1 %v945_v7  ;;  %s825_s19 = sshll.u32 (%p1186_p13), %s631_s12, 3 }
  0x50   : > { %849 = vmatprep.mubr.msk.bf16.mxu0 %vm1046_vm0, %v1045_v6  ;;  %848 = vmatpush3.bf16.msra.mxu0 %v574_v36  ;;  %s633_s17 = scalar_lea.vmem (%p1186_p13), %s1298_s13, %s825_s19 }
 0x10f   : > { %v482_v10 = vpop.f32.mrf.mxu0  ;;  %v529_v11 = vpop.f32.mrf.mxu1 }
 0x110   : > { %v530_v12 = vadd.f32 %v529_v11, %v482_v10 }
 0x111   : > { %v839_v13 = vpop.f32.mrf.mxu0  ;;  %v845_v14 = vpop.f32.mrf.mxu1 }
 0x112   : > { %v537_v15 = vsel %vm536_vm1, %v530_v12, -inf }
 0x113   : > { %v532_v16 = vpop.f32.mrf.mxu1  ;;  %538 = vmax.xlane.f32.xlu0 %v537_v15  ;;  %v485_v17 = vpop.f32.mrf.mxu0 }
 0x114   : > { %v533_v18 = vadd.f32 %v532_v16, %v485_v17 }
 0x115   : > { %v840_v19 = vpop.f32.mrf.mxu0  ;;  %v846_v20 = vpop.f32.mrf.mxu1 }
 0x116   : > { %v541_v21 = vsel %vm540_vm2, %v533_v18, -inf }
 0x117   : > { %542 = vmax.xlane.f32.xlu0 %v541_v21 }
 0x19c   : > { %v539_v22 = vpop.xlane.xlu0 %538 }
 0x19d   : > { %v544_v23 = vsub.f32 %v530_v12, %v539_v22 }
 0x19f   : > { %v546_v24 = vmul.f32 1.442695, %v544_v23 }
 0x1a0   : > { %v543_v25 = vpop.xlane.xlu0 %542 }
 0x1a1   : > { %949 = vpow2.f32 %v546_v24  ;;  %v545_v26 = vsub.f32 %v533_v18, %v543_v25 }
 0x1a3   : > { %v548_v27 = vmul.f32 1.442695, %v545_v26 }
 0x1a5   : > { %951 = vpow2.f32 %v548_v27 }
 0x1ae   : > { %v950_v28 = vpop.eup %949 }
 0x1af   : > { %v550_v29 = vsel %vm536_vm1, %v950_v28, 0.0 }
 0x1b0   : > { %551 = vadd.xlane.f32.xlu1 %v550_v29 }
 0x1b2   : > { %v952_v30 = vpop.eup %951 }
 0x1b3   : > { %v553_v31 = vsel %vm540_vm2, %v952_v30, 0.0 }
 0x1b4   : > { %554 = vadd.xlane.f32.xlu1 %v553_v31 }
 0x239   : > { %v552_v37 = vpop.xlane.xlu1 %551 }
 0x23a   : > { %953 = vrcp.f32 %v552_v37 }
 0x23d   : > { %v555_v38 = vpop.xlane.xlu1 %554 }
 0x23e   : > { %955 = vrcp.f32 %v555_v38 }
 0x247   : > { %v954_v39 = vpop.eup %953 }
 0x248   : > { %v558_v42 = vmul.f32 %v954_v39, %v950_v28 }
 0x24b   : > { %v956_v40 = vpop.eup %955 }
 0x24c   : > { %v559_v41 = vmul.f32 %v956_v40, %v952_v30 }
 0x24e   : > { %v560_v43 = vpack.c.bf16 %v559_v41, %v558_v42 }
 0x250   : > { %850 = vmatmul.mubr.msk.bf16.vlgmr.msra.gmra.mxu0 %vm536_vm1, %v560_v43 }
 0x310   : > { %v610_v44 = vpop.f32.mrf.mxu0 }
 0x311   : > { %v617_v45 = vmul.f32 0.999995, %v610_v44 }
 0x312   : > { %v851_v46 = vpop.f32.mrf.mxu0 }
 0x313   : > { %v619_v47 = vmax.f32 %v617_v45, 0.0 }
 0x314   : > { %v613_v48 = vpop.f32.mrf.mxu0 }
 0x315   : > { %621 = vst [vmem:[%s419_s22] sm:$0xff] %v619_v47  ;;  %v618_v49 = vmul.f32 0.999995, %v613_v48  ;;  %629 = sbr.rel (!%p1186_p13) target bundleno = 802 (0x322), region = 163 }
 0x316   : > { %v852_v50 = vpop.f32.mrf.mxu0 }
 0x317   : > { %v620_v51 = vmax.f32 %v618_v49, 0.0 }
 0x319   : > { %622 = vst [vmem:[%s419_s22 + $0x8] sm:$0x1] %v620_v51 }
 0x31c   : > { %v664_v52 = vld [vmem:[%s419_s22] sm:$0xff] }
 0x31d   : > { %665 = vst [vmem:[%s633_s17] sm:$0xff] %v664_v52 }
 0x320   : > { %v666_v53 = vld [vmem:[%s419_s22 + $0x8] sm:$0xff] }
 0x321   : > { %667 = vst [vmem:[%s633_s17 + $0x20] sm:$0xff] %v666_v53 }
 0x322 PF: > { %s14_s25 = sadd.s32 1, %s1043_s25   ;;  %s1299_s21 = sld [smem:[#allocation9_spill]] }
 0x323   : > { %p11_p5 = scmp.ge.s32.totalorder %s14_s25, 10   ;;  %s1300_s11 = sld [smem:[#allocation7_spill]] }
 0x324   : > { %s1301_s7 = sld [smem:[#allocation8_spill]]  ;;  %s1302_s15 = smov %s1007_s16 }
 0x325   : > { %s1303_s16 = smov %s1191_s29  ;;  %s1304_s17 = smov %s1015_s18 }
 0x326   : > { %s1305_s18 = smov %s1169_s5  ;;  %s1306_s19 = smov %s1023_s20 }
 0x327   : > { %s1309_s22 = smov %s1039_s24  ;;  %13 = sbr.rel (!%p11_p5) target bundleno = 8 (0x8), region = 251 }
 0x328   : > { %s1307_s20 = smov %s1299_s21  ;;  %s1308_s21 = smov %s1035_s23 }
 0x329   : > { %s1310_s23 = smov %s1300_s11 }
 0x32a   : > { %s1311_s24 = smov %s1301_s7 }

// kernel: forward.34
= control target key start
LH: loop header
LB: loop body
LE: loop exit
PB: predicated region body
PF: predicated region fallthrough
CT: control target
= control target key end

     0   :  { %s2176_s0 = inlined_call_operand.vmem [shape: bf16[24,1024], index: 0, kind: input, shape index: {}]   ;;  %s2177_s1 = inlined_call_operand.vmem [shape: bf16[1024,2048], index: 1, kind: input, shape index: {}]   ;;  %s2178_s2 = inlined_call_operand.vmem [shape: f32[1,2048], index: 2, kind: input, shape index: {}]   ;;  %s2179_s3 = inlined_call_operand.vmem [shape: f32[1,2048], index: 3, kind: input, shape index: {}]   ;;  %s2180_s4 = inlined_call_operand.vmem [shape: f32[24,2048], index: 4, kind: output, shape index: {}]  }
   0x1   :  { %2183 = sst [smem:[#allocation8_spill]] %s2176_s0 }
   0x2   :  { %2184 = sst [smem:[#allocation9_spill]] %s2177_s1 }
   0x3   :  { %s1775_s15 = smov 0   ;;  %s1777_s16 = smov 0  }
   0x4   :  { %s1779_s17 = smov 0   ;;  %s1781_s18 = smov 0  }
   0x5   :  { %s1783_s19 = smov 0   ;;  %s1785_s20 = smov 0  }
   0x6   :  { %s1787_s21 = smov 0   ;;  %s1789_s22 = smov 0  }
   0x7   :  { %s1791_s23 = smov 0   ;;  %s1793_s24 = smov 0  }
   0x8   :  { %s1795_s25 = smov 0  }
   0x9 LB: > { %s1367_s26 = sadd.s32 4294967295, %s1747_s25   ;;  %s26_s27 = sadd.s32 1, %s1739_s23  ;;  %s1747_s25 = sphi %s1795_s25, %s14_s25   ;;  %s1743_s24 = sphi %s1793_s24, %s2203_s24   ;;  %s1739_s23 = sphi %s1791_s23, %s2202_s23   ;;  %s1735_s22 = sphi %s1789_s22, %s2201_s22   ;;  %s1731_s21 = sphi %s1787_s21, %s2200_s21   ;;  %s1727_s20 = sphi %s1785_s20, %s2199_s20   ;;  %s1723_s19 = sphi %s1783_s19, %s2198_s19   ;;  %s1719_s18 = sphi %s1781_s18, %s2197_s18   ;;  %s1715_s17 = sphi %s1779_s17, %s2196_s17   ;;  %s1711_s16 = sphi %s1777_s16, %s2195_s16   ;;  %s1707_s15 = sphi %s1775_s15, %s2194_s15  }
   0xa   : > { %p27_p0 = scmp.ge.s32.totalorder %s26_s27, 2  ;;  %s29_s28 = sadd.s32 1, %s1743_s24 }
   0xb   : > { %s42_s29 = sadd.s32 1, %s1727_s20  ;;  %p49_p1 = scmp.ne.s32.totalorder %s1727_s20, %s1723_s19 }
   0xc   : > { %s2205_s27 = smov (%p27_p0, %s26_s27), 0  ;;  %s2207_s28 = smov (!%p27_p0, %s29_s28), %s1743_s24 }
   0xd   : > { %2185 = sst [smem:[#allocation6_spill]] %s2205_s27  ;;  %s38_s30 = ssub.s32 %s1739_s23, %s2205_s27 }
   0xe   : > { %p50_p2 = scmp.eq.s32.totalorder %s1747_s25, 0  ;;  %p31_p3 = scmp.ge.s32.totalorder %s2207_s28, 8 }
   0xf   : > { %p40_p4 = scmp.eq.s32.totalorder %s38_s30, 0  ;;  %s70_s6 = sadd.s32 1, %s1719_s18 }
  0x10   : > { %p1842_p5 = por %p50_p2, %p49_p1  ;;  %s2209_s28 = smov (%p31_p3, %s2207_s28), 0 }
  0x11   : > { %2187 = sst [smem:[#allocation7_spill]] %s2209_s28  ;;  %s66_s8 = ssub.s32 %s1743_s24, %s2209_s28 }
  0x12   : > { %s1850_s7 = scalar_select %p40_p4, %s1727_s20, %s42_s29  }
  0x13   : > { %p77_p6 = scmp.ne.s32.totalorder %s1719_s18, %s1715_s17  ;;  %s67_s9 = sor.u32 %s66_s8, %s38_s30 }
  0x14   : > { %p148_p7 = scmp.eq.s32.totalorder %s66_s8, 0  ;;  %p68_p8 = scmp.eq.s32.totalorder %s67_s9, 0 }
  0x15   : > { %p1856_p9 = por %p77_p6, %p50_p2  ;;  %s150_s11 = sadd.s32 1, %s1711_s16 }
  0x16   : > { %p160_p10 = scmp.ne.s32.totalorder %s1711_s16, %s1707_s15  ;;  %p161_p11 = scmp.eq.s32.totalorder %s1367_s26, 15 }
  0x17   : > { %s1864_s12 = scalar_select %p68_p8, %s1719_s18, %s70_s6  }
  0x18   : > { %s1867_s13 = scalar_select %p148_p7, %s1711_s16, %s150_s11  }
  0x19   : > { %p1869_p12 = por %p161_p11, %p160_p10  ;;  %p1370_p13 = scmp.ge.s32.totalorder %s1747_s25, 16 }
  0x1b   : > { %183 = sbr.rel (%p1370_p13) target bundleno = 119 (0x77), region = 16 }
  0x20   : > { %186 = sbr.rel (!%p1842_p5) target bundleno = 45 (0x2d), region = 20  ;;  %s188_s29 = sand.u32 (%p1842_p5), 1, %s1727_s20  }
  0x21   : > { %s1460_s30 = sshll.u32 (%p1842_p5), %s1739_s23, 4  ;;  %s1463_s8 = smul.u32 (%p1842_p5), 48, %s188_s29 }
  0x22   : > { %s2190_s0 = sld [smem:[#allocation8_spill]] (%p1842_p5) }
  0x23   : > { %s190_s26 = scalar_lea.vmem (%p1842_p5), [#allocation3], %s1463_s8 }
  0x28   : > { %s196_s11 = scalar_lea.vmem %s2190_s0, %s1460_s30 }
  0x29   : > { %v209_v0 = vld [vmem:[%s196_s11] sm:$0xff]  ;;  %v211_v1 = vld [vmem:[%s196_s11 + $0x8] sm:$0xff] }
  0x2a   : > { %v213_v2 = vld [vmem:[%s196_s11 + $0x20] sm:$0xff]  ;;  %v215_v3 = vld [vmem:[%s196_s11 + $0x28] sm:$0xff]  ;;  %210 = vst [vmem:[%s190_s26] sm:$0xff] %v209_v0  ;;  %212 = vst [vmem:[%s190_s26 + $0x8] sm:$0xff] %v211_v1 }
  0x2b   : > { %v217_v4 = vld [vmem:[%s196_s11 + $0x40] sm:$0xff]  ;;  %v219_v5 = vld [vmem:[%s196_s11 + $0x48] sm:$0xff]  ;;  %214 = vst [vmem:[%s190_s26 + $0x10] sm:$0xff] %v213_v2  ;;  %216 = vst [vmem:[%s190_s26 + $0x18] sm:$0xff] %v215_v3 }
  0x2c   : > { %218 = vst [vmem:[%s190_s26 + $0x20] sm:$0xff] %v217_v4  ;;  %220 = vst [vmem:[%s190_s26 + $0x28] sm:$0xff] %v219_v5 }
  0x2d PF: > { %226 = sbr.rel (!%p1856_p9) target bundleno = 119 (0x77), region = 43  ;;  %s228_s5 = sand.u32 (%p1856_p9), 1, %s1719_s18  }
  0x2e   : > { %s1375_s29 = sshll.u32 (%p1856_p9), %s1743_s24, 1  ;;  %s1373_s30 = sshll.u32 (%p1856_p9), %s228_s5, 9 }
  0x2f   : > { %s1461_s6 = sshll.u32 (%p1856_p9), %s1739_s23, 10  ;;  %s2191_s1 = sld [smem:[#allocation9_spill]] (%p1856_p9) }
  0x30   : > { %s234_s9 = sadd.s32 (%p1856_p9), %s1461_s6, %s1375_s29  ;;  %s1894_s10 = scalar_lea.vmem (%p1856_p9), [#allocation4], %s1373_s30 }
  0x31   : > { %s1377_s11 = sshll.u32 (%p1856_p9), %s234_s9, 2 }
  0x35   : > { %s1889_s28 = scalar_lea.vmem %s2191_s1, %s1377_s11 }
  0x36   : > { %v391_v6 = vld [vmem:[%s1889_s28] sm:$0xff] }
  0x37   : > { %v393_v7 = vld [vmem:[%s1889_s28 + $0x40] sm:$0xff]  ;;  %392 = vst [vmem:[%s1894_s10] sm:$0xff] %v391_v6 }
  0x38   : > { %v395_v8 = vld [vmem:[%s1889_s28 + $0x80] sm:$0xff]  ;;  %394 = vst [vmem:[%s1894_s10 + $0x8] sm:$0xff] %v393_v7 }
  0x39   : > { %396 = vst [vmem:[%s1894_s10 + $0x10] sm:$0xff] %v395_v8  ;;  %v397_v9 = vld [vmem:[%s1889_s28 + $0xc0] sm:$0xff] }
  0x3a   : > { %v399_v10 = vld [vmem:[%s1889_s28 + $0x100] sm:$0xff]  ;;  %398 = vst [vmem:[%s1894_s10 + $0x18] sm:$0xff] %v397_v9 }
  0x3b   : > { %v401_v11 = vld [vmem:[%s1889_s28 + $0x140] sm:$0xff]  ;;  %400 = vst [vmem:[%s1894_s10 + $0x20] sm:$0xff] %v399_v10 }
  0x3c   : > { %402 = vst [vmem:[%s1894_s10 + $0x28] sm:$0xff] %v401_v11  ;;  %v403_v12 = vld [vmem:[%s1889_s28 + $0x180] sm:$0xff] }
  0x3d   : > { %v405_v13 = vld [vmem:[%s1889_s28 + $0x1c0] sm:$0xff]  ;;  %404 = vst [vmem:[%s1894_s10 + $0x30] sm:$0xff] %v403_v12 }
  0x3e   : > { %v407_v14 = vld [vmem:[%s1889_s28 + $0x200] sm:$0xff]  ;;  %406 = vst [vmem:[%s1894_s10 + $0x38] sm:$0xff] %v405_v13 }
  0x3f   : > { %408 = vst [vmem:[%s1894_s10 + $0x40] sm:$0xff] %v407_v14  ;;  %v409_v15 = vld [vmem:[%s1889_s28 + $0x240] sm:$0xff] }
  0x40   : > { %v411_v16 = vld [vmem:[%s1889_s28 + $0x280] sm:$0xff]  ;;  %410 = vst [vmem:[%s1894_s10 + $0x48] sm:$0xff] %v409_v15 }
  0x41   : > { %v413_v17 = vld [vmem:[%s1889_s28 + $0x2c0] sm:$0xff]  ;;  %412 = vst [vmem:[%s1894_s10 + $0x50] sm:$0xff] %v411_v16 }
  0x42   : > { %414 = vst [vmem:[%s1894_s10 + $0x58] sm:$0xff] %v413_v17  ;;  %v415_v18 = vld [vmem:[%s1889_s28 + $0x300] sm:$0xff] }
  0x43   : > { %v417_v19 = vld [vmem:[%s1889_s28 + $0x340] sm:$0xff]  ;;  %416 = vst [vmem:[%s1894_s10 + $0x60] sm:$0xff] %v415_v18 }
  0x44   : > { %v419_v20 = vld [vmem:[%s1889_s28 + $0x380] sm:$0xff]  ;;  %418 = vst [vmem:[%s1894_s10 + $0x68] sm:$0xff] %v417_v19 }
  0x45   : > { %420 = vst [vmem:[%s1894_s10 + $0x70] sm:$0xff] %v419_v20  ;;  %v421_v21 = vld [vmem:[%s1889_s28 + $0x3c0] sm:$0xff] }
  0x46   : > { %v423_v22 = vld [vmem:[%s1889_s28 + $0x400] sm:$0xff]  ;;  %422 = vst [vmem:[%s1894_s10 + $0x78] sm:$0xff] %v421_v21 }
  0x47   : > { %v425_v23 = vld [vmem:[%s1889_s28 + $0x440] sm:$0xff]  ;;  %424 = vst [vmem:[%s1894_s10 + $0x80] sm:$0xff] %v423_v22 }
  0x48   : > { %426 = vst [vmem:[%s1894_s10 + $0x88] sm:$0xff] %v425_v23  ;;  %v427_v24 = vld [vmem:[%s1889_s28 + $0x480] sm:$0xff] }
  0x49   : > { %v429_v25 = vld [vmem:[%s1889_s28 + $0x4c0] sm:$0xff]  ;;  %428 = vst [vmem:[%s1894_s10 + $0x90] sm:$0xff] %v427_v24 }
  0x4a   : > { %v431_v26 = vld [vmem:[%s1889_s28 + $0x500] sm:$0xff]  ;;  %430 = vst [vmem:[%s1894_s10 + $0x98] sm:$0xff] %v429_v25 }
  0x4b   : > { %432 = vst [vmem:[%s1894_s10 + $0xa0] sm:$0xff] %v431_v26  ;;  %v433_v27 = vld [vmem:[%s1889_s28 + $0x540] sm:$0xff] }
  0x4c   : > { %v435_v28 = vld [vmem:[%s1889_s28 + $0x580] sm:$0xff]  ;;  %434 = vst [vmem:[%s1894_s10 + $0xa8] sm:$0xff] %v433_v27 }
  0x4d   : > { %v437_v29 = vld [vmem:[%s1889_s28 + $0x5c0] sm:$0xff]  ;;  %436 = vst [vmem:[%s1894_s10 + $0xb0] sm:$0xff] %v435_v28 }
  0x4e   : > { %438 = vst [vmem:[%s1894_s10 + $0xb8] sm:$0xff] %v437_v29  ;;  %v439_v30 = vld [vmem:[%s1889_s28 + $0x600] sm:$0xff] }
  0x4f   : > { %v441_v31 = vld [vmem:[%s1889_s28 + $0x640] sm:$0xff]  ;;  %440 = vst [vmem:[%s1894_s10 + $0xc0] sm:$0xff] %v439_v30 }
  0x50   : > { %v443_v32 = vld [vmem:[%s1889_s28 + $0x680] sm:$0xff]  ;;  %442 = vst [vmem:[%s1894_s10 + $0xc8] sm:$0xff] %v441_v31 }
  0x51   : > { %444 = vst [vmem:[%s1894_s10 + $0xd0] sm:$0xff] %v443_v32  ;;  %v445_v33 = vld [vmem:[%s1889_s28 + $0x6c0] sm:$0xff] }
  0x52   : > { %v447_v34 = vld [vmem:[%s1889_s28 + $0x700] sm:$0xff]  ;;  %446 = vst [vmem:[%s1894_s10 + $0xd8] sm:$0xff] %v445_v33 }
  0x53   : > { %v449_v35 = vld [vmem:[%s1889_s28 + $0x740] sm:$0xff]  ;;  %448 = vst [vmem:[%s1894_s10 + $0xe0] sm:$0xff] %v447_v34 }
  0x54   : > { %450 = vst [vmem:[%s1894_s10 + $0xe8] sm:$0xff] %v449_v35  ;;  %v451_v36 = vld [vmem:[%s1889_s28 + $0x780] sm:$0xff] }
  0x55   : > { %v453_v37 = vld [vmem:[%s1889_s28 + $0x7c0] sm:$0xff]  ;;  %452 = vst [vmem:[%s1894_s10 + $0xf0] sm:$0xff] %v451_v36 }
  0x56   : > { %v455_v38 = vld [vmem:[%s1889_s28 + $0x800] sm:$0xff]  ;;  %454 = vst [vmem:[%s1894_s10 + $0xf8] sm:$0xff] %v453_v37 }
  0x57   : > { %456 = vst [vmem:[%s1894_s10 + $0x100] sm:$0xff] %v455_v38  ;;  %v457_v39 = vld [vmem:[%s1889_s28 + $0x840] sm:$0xff] }
  0x58   : > { %v459_v40 = vld [vmem:[%s1889_s28 + $0x880] sm:$0xff]  ;;  %458 = vst [vmem:[%s1894_s10 + $0x108] sm:$0xff] %v457_v39 }
  0x59   : > { %v461_v41 = vld [vmem:[%s1889_s28 + $0x8c0] sm:$0xff]  ;;  %460 = vst [vmem:[%s1894_s10 + $0x110] sm:$0xff] %v459_v40 }
  0x5a   : > { %462 = vst [vmem:[%s1894_s10 + $0x118] sm:$0xff] %v461_v41  ;;  %v463_v42 = vld [vmem:[%s1889_s28 + $0x900] sm:$0xff] }
  0x5b   : > { %v465_v43 = vld [vmem:[%s1889_s28 + $0x940] sm:$0xff]  ;;  %464 = vst [vmem:[%s1894_s10 + $0x120] sm:$0xff] %v463_v42 }
  0x5c   : > { %v467_v44 = vld [vmem:[%s1889_s28 + $0x980] sm:$0xff]  ;;  %466 = vst [vmem:[%s1894_s10 + $0x128] sm:$0xff] %v465_v43 }
  0x5d   : > { %468 = vst [vmem:[%s1894_s10 + $0x130] sm:$0xff] %v467_v44  ;;  %v469_v45 = vld [vmem:[%s1889_s28 + $0x9c0] sm:$0xff] }
  0x5e   : > { %v471_v46 = vld [vmem:[%s1889_s28 + $0xa00] sm:$0xff]  ;;  %470 = vst [vmem:[%s1894_s10 + $0x138] sm:$0xff] %v469_v45 }
  0x5f   : > { %v473_v47 = vld [vmem:[%s1889_s28 + $0xa40] sm:$0xff]  ;;  %472 = vst [vmem:[%s1894_s10 + $0x140] sm:$0xff] %v471_v46 }
  0x60   : > { %474 = vst [vmem:[%s1894_s10 + $0x148] sm:$0xff] %v473_v47  ;;  %v475_v48 = vld [vmem:[%s1889_s28 + $0xa80] sm:$0xff] }
  0x61   : > { %v477_v49 = vld [vmem:[%s1889_s28 + $0xac0] sm:$0xff]  ;;  %476 = vst [vmem:[%s1894_s10 + $0x150] sm:$0xff] %v475_v48 }
  0x62   : > { %v479_v50 = vld [vmem:[%s1889_s28 + $0xb00] sm:$0xff]  ;;  %478 = vst [vmem:[%s1894_s10 + $0x158] sm:$0xff] %v477_v49 }
  0x63   : > { %480 = vst [vmem:[%s1894_s10 + $0x160] sm:$0xff] %v479_v50  ;;  %v481_v51 = vld [vmem:[%s1889_s28 + $0xb40] sm:$0xff] }
  0x64   : > { %v483_v52 = vld [vmem:[%s1889_s28 + $0xb80] sm:$0xff]  ;;  %482 = vst [vmem:[%s1894_s10 + $0x168] sm:$0xff] %v481_v51 }
  0x65   : > { %v485_v53 = vld [vmem:[%s1889_s28 + $0xbc0] sm:$0xff]  ;;  %484 = vst [vmem:[%s1894_s10 + $0x170] sm:$0xff] %v483_v52 }
  0x66   : > { %486 = vst [vmem:[%s1894_s10 + $0x178] sm:$0xff] %v485_v53  ;;  %v487_v54 = vld [vmem:[%s1889_s28 + $0xc00] sm:$0xff] }
  0x67   : > { %v489_v55 = vld [vmem:[%s1889_s28 + $0xc40] sm:$0xff]  ;;  %488 = vst [vmem:[%s1894_s10 + $0x180] sm:$0xff] %v487_v54 }
  0x68   : > { %v491_v56 = vld [vmem:[%s1889_s28 + $0xc80] sm:$0xff]  ;;  %490 = vst [vmem:[%s1894_s10 + $0x188] sm:$0xff] %v489_v55 }
  0x69   : > { %492 = vst [vmem:[%s1894_s10 + $0x190] sm:$0xff] %v491_v56  ;;  %v493_v57 = vld [vmem:[%s1889_s28 + $0xcc0] sm:$0xff] }
  0x6a   : > { %v495_v58 = vld [vmem:[%s1889_s28 + $0xd00] sm:$0xff]  ;;  %494 = vst [vmem:[%s1894_s10 + $0x198] sm:$0xff] %v493_v57 }
  0x6b   : > { %v497_v59 = vld [vmem:[%s1889_s28 + $0xd40] sm:$0xff]  ;;  %496 = vst [vmem:[%s1894_s10 + $0x1a0] sm:$0xff] %v495_v58 }
  0x6c   : > { %498 = vst [vmem:[%s1894_s10 + $0x1a8] sm:$0xff] %v497_v59  ;;  %v499_v60 = vld [vmem:[%s1889_s28 + $0xd80] sm:$0xff] }
  0x6d   : > { %v501_v61 = vld [vmem:[%s1889_s28 + $0xdc0] sm:$0xff]  ;;  %500 = vst [vmem:[%s1894_s10 + $0x1b0] sm:$0xff] %v499_v60 }
  0x6e   : > { %v503_v62 = vld [vmem:[%s1889_s28 + $0xe00] sm:$0xff]  ;;  %502 = vst [vmem:[%s1894_s10 + $0x1b8] sm:$0xff] %v501_v61 }
  0x6f   : > { %504 = vst [vmem:[%s1894_s10 + $0x1c0] sm:$0xff] %v503_v62  ;;  %v505_v63 = vld [vmem:[%s1889_s28 + $0xe40] sm:$0xff] }
  0x70   : > { %v507_v0 = vld [vmem:[%s1889_s28 + $0xe80] sm:$0xff]  ;;  %506 = vst [vmem:[%s1894_s10 + $0x1c8] sm:$0xff] %v505_v63 }
  0x71   : > { %v509_v1 = vld [vmem:[%s1889_s28 + $0xec0] sm:$0xff]  ;;  %508 = vst [vmem:[%s1894_s10 + $0x1d0] sm:$0xff] %v507_v0 }
  0x72   : > { %510 = vst [vmem:[%s1894_s10 + $0x1d8] sm:$0xff] %v509_v1  ;;  %v511_v2 = vld [vmem:[%s1889_s28 + $0xf00] sm:$0xff] }
  0x73   : > { %v513_v3 = vld [vmem:[%s1889_s28 + $0xf40] sm:$0xff]  ;;  %512 = vst [vmem:[%s1894_s10 + $0x1e0] sm:$0xff] %v511_v2 }
  0x74   : > { %v515_v4 = vld [vmem:[%s1889_s28 + $0xf80] sm:$0xff]  ;;  %514 = vst [vmem:[%s1894_s10 + $0x1e8] sm:$0xff] %v513_v3 }
  0x75   : > { %516 = vst [vmem:[%s1894_s10 + $0x1f0] sm:$0xff] %v515_v4  ;;  %v517_v5 = vld [vmem:[%s1889_s28 + $0xfc0] sm:$0xff] }
  0x76   : > { %518 = vst [vmem:[%s1894_s10 + $0x1f8] sm:$0xff] %v517_v5 }
  0x77 PF: > { %p1378_p0 = scmp.ge.s32.totalorder %s1747_s25, 1  ;;  %p539_p1 = scmp.lt.s32.totalorder %s1747_s25, 17 }
  0x79   : > { %p540_p2 = pnand %p1378_p0, %p539_p1 }
  0x7a   : > { %s546_s0 = sand.u32 (!%p540_p2), 1, %s1723_s19   ;;  %s553_s26 = sand.u32 (!%p540_p2), 1, %s1715_s17  }
  0x7b   : > { %543 = sbr.rel (%p540_p2) target bundleno = 436 (0x1b4), region = 89  ;;  %s1379_s29 = sshll.u32 (!%p540_p2), %s553_s26, 9 }
  0x7c   : > { %s1464_s5 = smul.u32 (!%p540_p2), 48, %s546_s0  ;;  %s586_s30 = sand.u32 (!%p540_p2), 1, %s1707_s15  }
  0x7d   : > { %s1465_s6 = smul.u32 (!%p540_p2), 48, %s586_s30  ;;  %s1380_s28 = sshll.u32 (!%p540_p2), %s1735_s22, 1 }
  0x7e   : > { %p594_p3 = scmp.lt.s32.totalorder (!%p540_p2), %s1380_s28, 15  ;;  %s2037_s19 = scalar_lea.vmem (!%p540_p2), [#allocation3], %s1464_s5 }
  0x7f   : > { %s2039_s17 = scalar_lea.vmem (!%p540_p2), [#allocation4], %s1379_s29  ;;  %s2041_s15 = scalar_lea.vmem (!%p540_p2), [#allocation5], %s1465_s6 }
  0x80   : > { %s2211_s28 = smov (!%p594_p3, %s1380_s28), 15  ;;  %p1382_p4 = scmp.ne.s32.totalorder %s1731_s21, 0 }
  0x81   : > { %s596_s8 = scalar_lea.vmem %s2178_s2, %s2211_s28  ;;  %s601_s27 = scalar_lea.vmem %s2179_s3, %s2211_s28 }
  0x82   : > { %608 = sbr.rel (%p1382_p4) target bundleno = 139 (0x8b), region = 101 }
  0x87   : > { %v1749_v6 = vmov 0.0  }
  0x88   : > { %609 = vst [vmem:[#allocation2 + $0x28] sm:$0xff] %v1749_v6  ;;  %610 = vst [vmem:[#allocation2 + $0x10] sm:$0xff] %v1749_v6 }
  0x89   : > { %611 = vst [vmem:[#allocation2 + $0x8] sm:$0xff] %v1749_v6  ;;  %612 = vst [vmem:[#allocation2] sm:$0xff] %v1749_v6 }
  0x8a   : > { %613 = vst [vmem:[#allocation2 + $0x18] sm:$0xff] %v1749_v6  ;;  %614 = vst [vmem:[#allocation2 + $0x20] sm:$0xff] %v1749_v6 }
  0x8b PF: > { %v1555_v7 = vld [vmem:[%s2039_s17 + $0x74] ss:$8 sps:$4 sm:$0xff]   ;;  %v1559_v9 = vld [vmem:[%s2039_s17 + $0x70] ss:$8 sps:$4 sm:$0xff]   ;;  %v1561_v11 = vld [vmem:[%s2039_s17 + $0x64] ss:$8 sps:$4 sm:$0xff]  }
  0x8c   : > { %v1557_v8 = vld [vmem:[%s2039_s17 + $0x174] ss:$8 sps:$4 sm:$0xff]   ;;  %1045 = vmatprep.subr.bf16.mxu0 %v1555_v7  ;;  %v1560_v10 = vld [vmem:[%s2039_s17 + $0x170] ss:$8 sps:$4 sm:$0xff]   ;;  %v1563_v12 = vld [vmem:[%s2039_s17 + $0x164] ss:$8 sps:$4 sm:$0xff]  }
  0x8d   : > { %1096 = vmatprep.subr.bf16.mxu1 %v1557_v8  ;;  %1046 = vmatpush1.bf16.msra.mxu0 %v1559_v9  ;;  %v1565_v13 = vld [vmem:[%s2039_s17 + $0x60] ss:$8 sps:$4 sm:$0xff]   ;;  %v1567_v15 = vld [vmem:[%s2039_s17 + $0x54] ss:$8 sps:$4 sm:$0xff]   ;;  %v1571_v17 = vld [vmem:[%s2039_s17 + $0x50] ss:$8 sps:$4 sm:$0xff]  }
  0x8e   : > { %1097 = vmatpush1.bf16.msra.mxu1 %v1560_v10  ;;  %1047 = vmatprep.subr.bf16.mxu0 %v1561_v11  ;;  %v1566_v14 = vld [vmem:[%s2039_s17 + $0x160] ss:$8 sps:$4 sm:$0xff]   ;;  %v1569_v16 = vld [vmem:[%s2039_s17 + $0x154] ss:$8 sps:$4 sm:$0xff]   ;;  %v1572_v18 = vld [vmem:[%s2039_s17 + $0x150] ss:$8 sps:$4 sm:$0xff]  }
  0x8f   : > { %1098 = vmatprep.subr.bf16.mxu1 %v1563_v12  ;;  %v1573_v19 = vld [vmem:[%s2039_s17 + $0x44] ss:$8 sps:$4 sm:$0xff]   ;;  %v1577_v21 = vld [vmem:[%s2039_s17 + $0x40] ss:$8 sps:$4 sm:$0xff]   ;;  %v1579_v23 = vld [vmem:[%s2039_s17 + $0x34] ss:$8 sps:$4 sm:$0xff]  }
  0x90   : > { %v1575_v20 = vld [vmem:[%s2039_s17 + $0x144] ss:$8 sps:$4 sm:$0xff]   ;;  %v1578_v22 = vld [vmem:[%s2039_s17 + $0x140] ss:$8 sps:$4 sm:$0xff]   ;;  %v1581_v24 = vld [vmem:[%s2039_s17 + $0x134] ss:$8 sps:$4 sm:$0xff]  }
  0x91   : > { %1048 = vmatpush1.bf16.msra.mxu0 %v1565_v13  ;;  %v1583_v25 = vld [vmem:[%s2039_s17 + $0x30] ss:$8 sps:$4 sm:$0xff]   ;;  %v1585_v27 = vld [vmem:[%s2039_s17 + $0x24] ss:$8 sps:$4 sm:$0xff]   ;;  %v1589_v29 = vld [vmem:[%s2039_s17 + $0x20] ss:$8 sps:$4 sm:$0xff]  }
  0x92   : > { %1099 = vmatpush1.bf16.msra.mxu1 %v1566_v14  ;;  %1049 = vmatprep.subr.bf16.mxu0 %v1567_v15  ;;  %v1584_v26 = vld [vmem:[%s2039_s17 + $0x130] ss:$8 sps:$4 sm:$0xff]   ;;  %v1587_v28 = vld [vmem:[%s2039_s17 + $0x124] ss:$8 sps:$4 sm:$0xff]   ;;  %v1590_v30 = vld [vmem:[%s2039_s17 + $0x120] ss:$8 sps:$4 sm:$0xff]  }
  0x93   : > { %1100 = vmatprep.subr.bf16.mxu1 %v1569_v16  ;;  %v1591_v31 = vld [vmem:[%s2039_s17 + $0x14] ss:$8 sps:$4 sm:$0xff]   ;;  %v1595_v33 = vld [vmem:[%s2039_s17 + $0x10] ss:$8 sps:$4 sm:$0xff]   ;;  %v1597_v35 = vld [vmem:[%s2039_s17 + $0x4] ss:$8 sps:$4 sm:$0xff]  }
  0x94   : > { %v1593_v32 = vld [vmem:[%s2039_s17 + $0x114] ss:$8 sps:$4 sm:$0xff]   ;;  %v1596_v34 = vld [vmem:[%s2039_s17 + $0x110] ss:$8 sps:$4 sm:$0xff]   ;;  %v1599_v36 = vld [vmem:[%s2039_s17 + $0x104] ss:$8 sps:$4 sm:$0xff]  }
  0x95   : > { %1050 = vmatpush1.bf16.msra.mxu0 %v1571_v17  ;;  %v1601_v37 = vld [vmem:[%s2039_s17] ss:$8 sps:$4 sm:$0xff]   ;;  %v1603_v39 = vld [vmem:[%s2039_s17 + $0xf4] ss:$8 sps:$4 sm:$0xff]   ;;  %v1607_v41 = vld [vmem:[%s2039_s17 + $0xf0] ss:$8 sps:$4 sm:$0xff]  }
  0x96   : > { %1101 = vmatpush1.bf16.msra.mxu1 %v1572_v18  ;;  %1051 = vmatprep.subr.bf16.mxu0 %v1573_v19  ;;  %v1602_v38 = vld [vmem:[%s2039_s17 + $0x100] ss:$8 sps:$4 sm:$0xff]   ;;  %v1605_v40 = vld [vmem:[%s2039_s17 + $0x1f4] ss:$8 sps:$4 sm:$0xff]   ;;  %v1608_v42 = vld [vmem:[%s2039_s17 + $0x1f0] ss:$8 sps:$4 sm:$0xff]  }
  0x97   : > { %1102 = vmatprep.subr.bf16.mxu1 %v1575_v20  ;;  %v1609_v43 = vld [vmem:[%s2039_s17 + $0xe4] ss:$8 sps:$4 sm:$0xff]   ;;  %v1613_v45 = vld [vmem:[%s2039_s17 + $0xe0] ss:$8 sps:$4 sm:$0xff]   ;;  %v1615_v47 = vld [vmem:[%s2039_s17 + $0xd4] ss:$8 sps:$4 sm:$0xff]  }
  0x98   : > { %v1611_v44 = vld [vmem:[%s2039_s17 + $0x1e4] ss:$8 sps:$4 sm:$0xff]   ;;  %v1614_v46 = vld [vmem:[%s2039_s17 + $0x1e0] ss:$8 sps:$4 sm:$0xff]   ;;  %v1617_v48 = vld [vmem:[%s2039_s17 + $0x1d4] ss:$8 sps:$4 sm:$0xff]  }
  0x99   : > { %1052 = vmatpush1.bf16.msra.mxu0 %v1577_v21  ;;  %v1619_v49 = vld [vmem:[%s2039_s17 + $0xd0] ss:$8 sps:$4 sm:$0xff]   ;;  %v1621_v51 = vld [vmem:[%s2039_s17 + $0xc4] ss:$8 sps:$4 sm:$0xff]   ;;  %v1625_v53 = vld [vmem:[%s2039_s17 + $0xc0] ss:$8 sps:$4 sm:$0xff]  }
  0x9a   : > { %1103 = vmatpush1.bf16.msra.mxu1 %v1578_v22  ;;  %1053 = vmatprep.subr.bf16.mxu0 %v1579_v23  ;;  %v1620_v50 = vld [vmem:[%s2039_s17 + $0x1d0] ss:$8 sps:$4 sm:$0xff]   ;;  %v1623_v52 = vld [vmem:[%s2039_s17 + $0x1c4] ss:$8 sps:$4 sm:$0xff]   ;;  %v1626_v55 = vld [vmem:[%s2039_s17 + $0x1c0] ss:$8 sps:$4 sm:$0xff]  }
  0x9b   : > { %1104 = vmatprep.subr.bf16.mxu1 %v1581_v24  ;;  %v1653_v54 = vld [vmem:[%s2037_s19 + $0x4] ss:$16 sps:$4 sm:$0xff]   ;;  %v1656_v58 = vld [vmem:[%s2037_s19 + $0xc] ss:$16 sps:$4 sm:$0xff]   ;;  %v1631_v59 = vld [vmem:[%s2039_s17 + $0xb0] ss:$8 sps:$4 sm:$0xff]  }
  0x9c   : > { %v1627_v56 = vld [vmem:[%s2039_s17 + $0xb4] ss:$8 sps:$4 sm:$0xff]   ;;  %1077 = vmatprep.mubr.bf16.mxu0 %v1653_v54  ;;  %1128 = vmatprep.mubr.bf16.mxu1 %v1656_v58  ;;  %v1632_v60 = vld [vmem:[%s2039_s17 + $0x1b0] ss:$8 sps:$4 sm:$0xff]   ;;  %v1633_v61 = vld [vmem:[%s2039_s17 + $0xa4] ss:$8 sps:$4 sm:$0xff]  }
  0x9d   : > { %1054 = vmatpush1.bf16.msra.mxu0 %v1583_v25  ;;  %v1629_v57 = vld [vmem:[%s2039_s17 + $0x1b4] ss:$8 sps:$4 sm:$0xff]   ;;  %v1635_v62 = vld [vmem:[%s2039_s17 + $0x1a4] ss:$8 sps:$4 sm:$0xff]   ;;  %v1637_v63 = vld [vmem:[%s2039_s17 + $0xa0] ss:$8 sps:$4 sm:$0xff]  }
  0x9e   : > { %1105 = vmatpush1.bf16.msra.mxu1 %v1584_v26  ;;  %1055 = vmatprep.subr.bf16.mxu0 %v1585_v27  ;;  %v1638_v0 = vld [vmem:[%s2039_s17 + $0x1a0] ss:$8 sps:$4 sm:$0xff]   ;;  %v1639_v1 = vld [vmem:[%s2039_s17 + $0x94] ss:$8 sps:$4 sm:$0xff]   ;;  %v1643_v3 = vld [vmem:[%s2039_s17 + $0x90] ss:$8 sps:$4 sm:$0xff]  }
  0x9f   : > { %1106 = vmatprep.subr.bf16.mxu1 %v1587_v28  ;;  %v1641_v2 = vld [vmem:[%s2039_s17 + $0x194] ss:$8 sps:$4 sm:$0xff]   ;;  %v1644_v4 = vld [vmem:[%s2039_s17 + $0x190] ss:$8 sps:$4 sm:$0xff]   ;;  %v1645_v5 = vld [vmem:[%s2039_s17 + $0x84] ss:$8 sps:$4 sm:$0xff]  }
  0xa0   : > { %v1647_v6 = vld [vmem:[%s2039_s17 + $0x184] ss:$8 sps:$4 sm:$0xff]   ;;  %v1649_v7 = vld [vmem:[%s2039_s17 + $0x80] ss:$8 sps:$4 sm:$0xff]   ;;  %v615_v18 = vld [vmem:[#allocation2 + $0x28] sm:$0xff]  ;;  %p1455_p5 = scmp.ne.s32.totalorder %s1731_s21, 1 }
  0xa1   : > { %1056 = vmatpush1.bf16.msra.mxu0 %v1589_v29  ;;  %v1650_v8 = vld [vmem:[%s2039_s17 + $0x180] ss:$8 sps:$4 sm:$0xff]   ;;  %v617_v27 = vld [vmem:[#allocation2 + $0x8] sm:$0xff] }
  0xa2   : > { %1107 = vmatpush1.bf16.msra.mxu1 %v1590_v30  ;;  %1057 = vmatprep.subr.bf16.mxu0 %v1591_v31  ;;  %v625_v9 = vld [vmem:[%s2037_s19 + $0x20] sm:$0xff]  ;;  %v626_v10 = vld [vmem:[%s2037_s19 + $0x28] sm:$0xff] }
  0xa3   : > { %1108 = vmatprep.subr.bf16.mxu1 %v1593_v32  ;;  %v1651_v11 = vld [vmem:[%s2037_s19] ss:$16 sps:$4 sm:$0xff]   ;;  %v1654_v12 = vld [vmem:[%s2037_s19 + $0x8] ss:$16 sps:$4 sm:$0xff]   ;;  %v1388_v13 = vcombine.high %v625_v9, %v625_v9  ;;  %v1390_v14 = vcombine.high %v626_v10, %v626_v10  ;;  %v1387_v15 = vcombine.low %v625_v9, %v625_v9  ;;  %v1389_v16 = vcombine.low %v626_v10, %v626_v10 }
  0xa4   : > { %v616_v22 = vld [vmem:[#allocation2 + $0x10] sm:$0xff]  ;;  %v618_v32 = vld [vmem:[#allocation2] sm:$0xff] }
  0xa5   : > { %1058 = vmatpush1.bf16.msra.mxu0 %v1595_v33 }
  0xa6   : > { %1109 = vmatpush1.bf16.msra.mxu1 %v1596_v34  ;;  %1059 = vmatprep.subr.bf16.mxu0 %v1597_v35 }
  0xa7   : > { %1110 = vmatprep.subr.bf16.mxu1 %v1599_v36 }
  0xa9   : > { %1060 = vmatpush1.bf16.msra.mxu0 %v1601_v37  ;;  %v619_v37 = vld [vmem:[#allocation2 + $0x18] sm:$0xff] }
  0xaa   : > { %1111 = vmatpush1.bf16.msra.mxu1 %v1602_v38  ;;  %1061 = vmatprep.subr.bf16.mxu0 %v1603_v39 }
  0xab   : > { %1112 = vmatprep.subr.bf16.mxu1 %v1605_v40 }
  0xad   : > { %1062 = vmatpush2.bf16.msra.mxu0 %v1607_v41 }
  0xae   : > { %1113 = vmatpush2.bf16.msra.mxu1 %v1608_v42  ;;  %1063 = vmatprep.subr.bf16.mxu0 %v1609_v43  ;;  %v620_v42 = vld [vmem:[#allocation2 + $0x20] sm:$0xff] }
  0xaf   : > { %1114 = vmatprep.subr.bf16.mxu1 %v1611_v44 }
  0xb1   : > { %1064 = vmatpush2.bf16.msra.mxu0 %v1613_v45 }
  0xb2   : > { %1115 = vmatpush2.bf16.msra.mxu1 %v1614_v46  ;;  %1065 = vmatprep.subr.bf16.mxu0 %v1615_v47 }
  0xb3   : > { %1116 = vmatprep.subr.bf16.mxu1 %v1617_v48 }
  0xb5   : > { %1066 = vmatpush2.bf16.msra.mxu0 %v1619_v49 }
  0xb6   : > { %1117 = vmatpush2.bf16.msra.mxu1 %v1620_v50  ;;  %1067 = vmatprep.subr.bf16.mxu0 %v1621_v51 }
  0xb7   : > { %1118 = vmatprep.subr.bf16.mxu1 %v1623_v52 }
  0xb9   : > { %1068 = vmatpush2.bf16.msra.mxu0 %v1625_v53 }
  0xba   : > { %1119 = vmatpush2.bf16.msra.mxu1 %v1626_v55  ;;  %1069 = vmatprep.subr.bf16.mxu0 %v1627_v56 }
  0xbb   : > { %1120 = vmatprep.subr.bf16.mxu1 %v1629_v57 }
  0xbd   : > { %1070 = vmatpush2.bf16.msra.mxu0 %v1631_v59 }
  0xbe   : > { %1121 = vmatpush2.bf16.msra.mxu1 %v1632_v60  ;;  %1071 = vmatprep.subr.bf16.mxu0 %v1633_v61 }
  0xbf   : > { %1122 = vmatprep.subr.bf16.mxu1 %v1635_v62 }
  0xc1   : > { %1072 = vmatpush2.bf16.msra.mxu0 %v1637_v63 }
  0xc2   : > { %1123 = vmatpush2.bf16.msra.mxu1 %v1638_v0  ;;  %1073 = vmatprep.subr.bf16.mxu0 %v1639_v1 }
  0xc3   : > { %1124 = vmatprep.subr.bf16.mxu1 %v1641_v2 }
  0xc5   : > { %1074 = vmatpush2.bf16.msra.mxu0 %v1643_v3 }
  0xc6   : > { %1125 = vmatpush2.bf16.msra.mxu1 %v1644_v4  ;;  %1075 = vmatprep.subr.bf16.mxu0 %v1645_v5 }
  0xc7   : > { %1126 = vmatprep.subr.bf16.mxu1 %v1647_v6 }
  0xc9   : > { %1076 = vmatpush2.bf16.msra.mxu0 %v1649_v7 }
  0xca   : > { %1127 = vmatpush2.bf16.msra.mxu1 %v1650_v8 }
  0xcc   : > { %1078 = vmatmul.mubr.bf16.vlgmr.msra.gmra.mxu0 %v1651_v11 }
  0xcd   : > { %1129 = vmatmul.mubr.bf16.vlgmr.msra.gmra.mxu1 %v1654_v12  ;;  %1087 = vmatprep.mubr.bf16.mxu0 %v1388_v13 }
  0xce   : > { %1138 = vmatprep.mubr.bf16.mxu1 %v1390_v14 }
  0xd4   : > { %1088 = vmatmul.mubr.bf16.gmra.mxu0 %v1387_v15 }
  0xd5   : > { %1139 = vmatmul.mubr.bf16.gmra.mxu1 %v1389_v16 }
 0x18c   : > { %v1079_v17 = vpop.f32.mrf.mxu0 }
 0x18d   : > { %v1130_v19 = vpop.f32.mrf.mxu1 }
 0x18e   : > { %v1131_v20 = vadd.f32 %v1130_v19, %v1079_v17  ;;  %v1081_v21 = vpop.f32.mrf.mxu0 }
 0x18f   : > { %v1132_v23 = vpop.f32.mrf.mxu1 }
 0x190   : > { %v1147_v24 = vadd.f32 %v1131_v20, %v615_v18  ;;  %v1133_v25 = vadd.f32 %v1132_v23, %v1081_v21  ;;  %v1083_v26 = vpop.f32.mrf.mxu0 }
 0x191   : > { %v1134_v28 = vpop.f32.mrf.mxu1 }
 0x192   : > { %1153 = vst [vmem:[#allocation2 + $0x28] sm:$0xff] %v1147_v24  ;;  %v1148_v29 = vadd.f32 %v1133_v25, %v616_v22  ;;  %v1135_v30 = vadd.f32 %v1134_v28, %v1083_v26  ;;  %v1085_v31 = vpop.f32.mrf.mxu0 }
 0x193   : > { %v1136_v33 = vpop.f32.mrf.mxu1 }
 0x194   : > { %1154 = vst [vmem:[#allocation2 + $0x10] sm:$0xff] %v1148_v29  ;;  %v1149_v34 = vadd.f32 %v1135_v30, %v617_v27  ;;  %v1137_v35 = vadd.f32 %v1136_v33, %v1085_v31  ;;  %v1089_v36 = vpop.f32.mrf.mxu0 }
 0x195   : > { %v1140_v38 = vpop.f32.mrf.mxu1 }
 0x196   : > { %1155 = vst [vmem:[#allocation2 + $0x8] sm:$0xff] %v1149_v34  ;;  %v1150_v39 = vadd.f32 %v1137_v35, %v618_v32  ;;  %v1141_v40 = vadd.f32 %v1140_v38, %v1089_v36  ;;  %v1091_v41 = vpop.f32.mrf.mxu0 }
 0x197   : > { %v1142_v43 = vpop.f32.mrf.mxu1 }
 0x198   : > { %1156 = vst [vmem:[#allocation2] sm:$0xff] %v1150_v39  ;;  %v1151_v44 = vadd.f32 %v1141_v40, %v619_v37  ;;  %v1143_v45 = vadd.f32 %v1142_v43, %v1091_v41  ;;  %v1093_v46 = vpop.f32.mrf.mxu0  ;;  %1162 = sbr.rel (%p1455_p5) target bundleno = 428 (0x1ac), region = 105 }
 0x199   : > { %v1144_v47 = vpop.f32.mrf.mxu1 }
 0x19a   : > { %1157 = vst [vmem:[#allocation2 + $0x18] sm:$0xff] %v1151_v44  ;;  %v1152_v48 = vadd.f32 %v1143_v45, %v620_v42  ;;  %v1094_v49 = vpop.f32.mrf.mxu0 }
 0x19b   : > { %v1145_v50 = vpop.f32.mrf.mxu1 }
 0x19c   : > { %1158 = vst [vmem:[#allocation2 + $0x20] sm:$0xff] %v1152_v48 }
 0x19d   : > { %v1171_v51 = vlaneseq  ;;  %v1169_v53 = vld [vmem:[%s596_s8] sm:$0x3]  ;;  %v1163_v55 = vld [vmem:[#allocation2 + $0x28] sm:$0xff]  ;;  %v1164_v58 = vld [vmem:[#allocation2 + $0x10] sm:$0xff] }
 0x19e   : > { %v1187_v54 = vld [vmem:[%s601_s27] sm:$0x3]  ;;  %v1165_v59 = vld [vmem:[#allocation2 + $0x8] sm:$0xff] }
 0x19f   : > { %v1172_v52 = vshrl.u32 %v1171_v51, 7  ;;  %v1166_v60 = vld [vmem:[#allocation2] sm:$0xff] }
 0x1a1   : > { %v1173_v56 = vsub.s32 0, %v1172_v52  ;;  %v1177_v57 = vsub.s32 1, %v1172_v52  ;;  %v1167_v1 = vld [vmem:[#allocation2 + $0x18] sm:$0xff] }
 0x1a3   : > { %v1174_v61 = vrot.slane %v1169_v53, %v1173_v56  ;;  %v1192_v62 = vrot.slane %v1187_v54, %v1173_v56  ;;  %v1178_v63 = vrot.slane %v1169_v53, %v1177_v57  ;;  %v1196_v0 = vrot.slane %v1187_v54, %v1177_v57  ;;  %v1168_v2 = vld [vmem:[#allocation2 + $0x20] sm:$0xff] }
 0x1a5   : > { %v1181_v3 = vmul.f32 %v1174_v61, %v1163_v55  ;;  %v1182_v4 = vmul.f32 %v1178_v63, %v1164_v58  ;;  %v1183_v5 = vmul.f32 %v1174_v61, %v1165_v59  ;;  %v1184_v6 = vmul.f32 %v1178_v63, %v1166_v60 }
 0x1a6   : > { %v1185_v7 = vmul.f32 %v1174_v61, %v1167_v1  ;;  %v1186_v8 = vmul.f32 %v1178_v63, %v1168_v2 }
 0x1a7   : > { %v1199_v9 = vadd.f32 %v1192_v62, %v1181_v3  ;;  %v1200_v10 = vadd.f32 %v1196_v0, %v1182_v4  ;;  %v1201_v11 = vadd.f32 %v1192_v62, %v1183_v5  ;;  %v1202_v12 = vadd.f32 %v1196_v0, %v1184_v6 }
 0x1a8   : > { %v1203_v13 = vadd.f32 %v1192_v62, %v1185_v7  ;;  %v1204_v14 = vadd.f32 %v1196_v0, %v1186_v8 }
 0x1a9   : > { %1205 = vst [vmem:[%s2041_s15] sm:$0xff] %v1199_v9  ;;  %1206 = vst [vmem:[%s2041_s15 + $0x8] sm:$0xff] %v1200_v10 }
 0x1aa   : > { %1207 = vst [vmem:[%s2041_s15 + $0x10] sm:$0xff] %v1201_v11  ;;  %1208 = vst [vmem:[%s2041_s15 + $0x18] sm:$0xff] %v1202_v12 }
 0x1ab   : > { %1209 = vst [vmem:[%s2041_s15 + $0x20] sm:$0xff] %v1203_v13  ;;  %1210 = vst [vmem:[%s2041_s15 + $0x28] sm:$0xff] %v1204_v14 }
 0x1ac PF: > { %1217 = sbr.rel (!%p1869_p12) target bundleno = 436 (0x1b4), region = 109  ;;  %s1462_s21 = sshll.u32 (%p1869_p12), %s1735_s22, 4 }
 0x1ad   : > { %s1223_s30 = scalar_lea.vmem (%p1869_p12), %s2180_s4, %s1462_s21 }
 0x1b0   : > { %v1236_v15 = vld [vmem:[%s2041_s15] sm:$0xff] (%p1869_p12)  ;;  %v1238_v16 = vld [vmem:[%s2041_s15 + $0x8] sm:$0xff] (%p1869_p12) }
 0x1b1   : > { %v1240_v17 = vld [vmem:[%s2041_s15 + $0x10] sm:$0xff]  ;;  %v1242_v18 = vld [vmem:[%s2041_s15 + $0x18] sm:$0xff]  ;;  %1237 = vst [vmem:[%s1223_s30] sm:$0xff] %v1236_v15  ;;  %1239 = vst [vmem:[%s1223_s30 + $0x8] sm:$0xff] %v1238_v16 }
 0x1b2   : > { %v1244_v19 = vld [vmem:[%s2041_s15 + $0x20] sm:$0xff]  ;;  %v1246_v20 = vld [vmem:[%s2041_s15 + $0x28] sm:$0xff]  ;;  %1241 = vst [vmem:[%s1223_s30 + $0x80] sm:$0xff] %v1240_v17  ;;  %1243 = vst [vmem:[%s1223_s30 + $0x88] sm:$0xff] %v1242_v18 }
 0x1b3   : > { %1245 = vst [vmem:[%s1223_s30 + $0x100] sm:$0xff] %v1244_v19  ;;  %1247 = vst [vmem:[%s1223_s30 + $0x108] sm:$0xff] %v1246_v20 }
 0x1b4 PF: > { %s14_s25 = sadd.s32 1, %s1747_s25   ;;  %s2192_s14 = sld [smem:[#allocation6_spill]] }
 0x1b5   : > { %p11_p6 = scmp.ge.s32.totalorder %s14_s25, 18   ;;  %s2193_s6 = sld [smem:[#allocation7_spill]] }
 0x1b6   : > { %s2194_s15 = smov %s1711_s16  ;;  %s2195_s16 = smov %s1867_s13 }
 0x1b7   : > { %s2196_s17 = smov %s1719_s18  ;;  %s2197_s18 = smov %s1864_s12 }
 0x1b8   : > { %s2198_s19 = smov %s1727_s20  ;;  %s2199_s20 = smov %s1850_s7 }
 0x1b9   : > { %s2200_s21 = smov %s1739_s23  ;;  %s2201_s22 = smov %s1743_s24 }
 0x1ba   : > { %s2202_s23 = smov %s2192_s14  ;;  %13 = sbr.rel (!%p11_p6) target bundleno = 9 (0x9), region = 177 }
 0x1bb   : > { %s2203_s24 = smov %s2193_s6 }

// kernel: forward.38
= control target key start
LH: loop header
LB: loop body
LE: loop exit
PB: predicated region body
PF: predicated region fallthrough
CT: control target
= control target key end

     0   :  { %s1781_s18 = smov 0   ;;  %s1783_s19 = smov 0   ;;  %s2119_s0 = inlined_call_operand.vmem [shape: bf16[24,512], index: 0, kind: input, shape index: {}]   ;;  %s2120_s1 = inlined_call_operand.vmem [shape: bf16[512,2048], index: 1, kind: input, shape index: {}]   ;;  %s2121_s2 = inlined_call_operand.vmem [shape: f32[1,2048], index: 2, kind: input, shape index: {}]   ;;  %s2122_s3 = inlined_call_operand.vmem [shape: f32[1,2048], index: 3, kind: input, shape index: {}]   ;;  %s2123_s4 = inlined_call_operand.vmem [shape: f32[24,2048], index: 4, kind: input, shape index: {}]   ;;  %s2124_s5 = inlined_call_operand.vmem [shape: f32[24,2048], index: 5, kind: output, shape index: {}]  }
   0x1   :  { %s1785_s20 = smov 0   ;;  %s1787_s21 = smov 0  }
   0x2   :  { %s1789_s22 = smov 0  }
   0x3 LB: > { %s30_s23 = sadd.s32 1, %s1745_s21  ;;  %s1470_s24 = sadd.s32 4294967295, %s1749_s22   ;;  %s1749_s22 = sphi %s1789_s22, %s15_s22   ;;  %s1745_s21 = sphi %s1787_s21, %s2130_s21   ;;  %s1741_s20 = sphi %s1785_s20, %s2129_s20   ;;  %s1737_s19 = sphi %s1783_s19, %s2128_s19   ;;  %s1733_s18 = sphi %s1781_s18, %s2127_s18  }
   0x4   : > { %p32_p0 = scmp.ge.s32.totalorder %s30_s23, 8  ;;  %p78_p1 = scmp.ne.s32.totalorder %s1737_s19, %s1733_s18 }
   0x5   : > { %p79_p2 = scmp.eq.s32.totalorder %s1749_s22, 0  ;;  %p190_p4 = scmp.eq.s32.totalorder %s1470_s24, 7 }
   0x6   : > { %s2132_s23 = smov (%p32_p0, %s30_s23), 0  ;;  %s71_s27 = sadd.s32 1, %s1737_s19 }
   0x7   : > { %p1813_p3 = por %p79_p2, %p78_p1  ;;  %s67_s26 = ssub.s32 %s1745_s21, %s2132_s23 }
   0x8   : > { %p69_p5 = scmp.eq.s32.totalorder %s67_s26, 0  ;;  %p1820_p6 = por %p190_p4, %p78_p1 }
   0x9   : > { %p1474_p7 = scmp.ge.s32.totalorder %s1749_s22, 8 }
   0xa   : > { %s1825_s29 = scalar_select %p69_p5, %s1737_s19, %s71_s27  }
   0xb   : > { %227 = sbr.rel (%p1474_p7) target bundleno = 91 (0x5b), region = 20 }
  0x10   : > { %230 = sbr.rel (!%p1813_p3) target bundleno = 84 (0x54), region = 24  ;;  %s232_s30 = sand.u32 (%p1813_p3), 1, %s1737_s19  }
  0x11   : > { %s1560_s6 = sshll.u32 (%p1813_p3), %s1745_s21, 3  ;;  %s1475_s7 = sshll.u32 (%p1813_p3), %s232_s30, 9 }
  0x12   : > { %s1835_s10 = scalar_lea.vmem (%p1813_p3), %s2120_s1, %s1560_s6  ;;  %s1840_s11 = scalar_lea.vmem (%p1813_p3), [#allocation3], %s1475_s7 }
  0x13   : > { %v395_v0 = vld [vmem:[%s1835_s10] sm:$0xff] (%p1813_p3) }
  0x14   : > { %v397_v1 = vld [vmem:[%s1835_s10 + $0x40] sm:$0xff] (%p1813_p3)  ;;  %396 = vst [vmem:[%s1840_s11] sm:$0xff] (%p1813_p3), %v395_v0 }
  0x15   : > { %v399_v2 = vld [vmem:[%s1835_s10 + $0x80] sm:$0xff]  ;;  %398 = vst [vmem:[%s1840_s11 + $0x8] sm:$0xff] %v397_v1 }
  0x16   : > { %400 = vst [vmem:[%s1840_s11 + $0x10] sm:$0xff] %v399_v2  ;;  %v401_v3 = vld [vmem:[%s1835_s10 + $0xc0] sm:$0xff] }
  0x17   : > { %v403_v4 = vld [vmem:[%s1835_s10 + $0x100] sm:$0xff]  ;;  %402 = vst [vmem:[%s1840_s11 + $0x18] sm:$0xff] %v401_v3 }
  0x18   : > { %v405_v5 = vld [vmem:[%s1835_s10 + $0x140] sm:$0xff]  ;;  %404 = vst [vmem:[%s1840_s11 + $0x20] sm:$0xff] %v403_v4 }
  0x19   : > { %406 = vst [vmem:[%s1840_s11 + $0x28] sm:$0xff] %v405_v5  ;;  %v407_v6 = vld [vmem:[%s1835_s10 + $0x180] sm:$0xff] }
  0x1a   : > { %v409_v7 = vld [vmem:[%s1835_s10 + $0x1c0] sm:$0xff]  ;;  %408 = vst [vmem:[%s1840_s11 + $0x30] sm:$0xff] %v407_v6 }
  0x1b   : > { %v411_v8 = vld [vmem:[%s1835_s10 + $0x200] sm:$0xff]  ;;  %410 = vst [vmem:[%s1840_s11 + $0x38] sm:$0xff] %v409_v7 }
  0x1c   : > { %412 = vst [vmem:[%s1840_s11 + $0x40] sm:$0xff] %v411_v8  ;;  %v413_v9 = vld [vmem:[%s1835_s10 + $0x240] sm:$0xff] }
  0x1d   : > { %v415_v10 = vld [vmem:[%s1835_s10 + $0x280] sm:$0xff]  ;;  %414 = vst [vmem:[%s1840_s11 + $0x48] sm:$0xff] %v413_v9 }
  0x1e   : > { %v417_v11 = vld [vmem:[%s1835_s10 + $0x2c0] sm:$0xff]  ;;  %416 = vst [vmem:[%s1840_s11 + $0x50] sm:$0xff] %v415_v10 }
  0x1f   : > { %418 = vst [vmem:[%s1840_s11 + $0x58] sm:$0xff] %v417_v11  ;;  %v419_v12 = vld [vmem:[%s1835_s10 + $0x300] sm:$0xff] }
  0x20   : > { %v421_v13 = vld [vmem:[%s1835_s10 + $0x340] sm:$0xff]  ;;  %420 = vst [vmem:[%s1840_s11 + $0x60] sm:$0xff] %v419_v12 }
  0x21   : > { %v423_v14 = vld [vmem:[%s1835_s10 + $0x380] sm:$0xff]  ;;  %422 = vst [vmem:[%s1840_s11 + $0x68] sm:$0xff] %v421_v13 }
  0x22   : > { %424 = vst [vmem:[%s1840_s11 + $0x70] sm:$0xff] %v423_v14  ;;  %v425_v15 = vld [vmem:[%s1835_s10 + $0x3c0] sm:$0xff] }
  0x23   : > { %v427_v16 = vld [vmem:[%s1835_s10 + $0x400] sm:$0xff]  ;;  %426 = vst [vmem:[%s1840_s11 + $0x78] sm:$0xff] %v425_v15 }
  0x24   : > { %v429_v17 = vld [vmem:[%s1835_s10 + $0x440] sm:$0xff]  ;;  %428 = vst [vmem:[%s1840_s11 + $0x80] sm:$0xff] %v427_v16 }
  0x25   : > { %430 = vst [vmem:[%s1840_s11 + $0x88] sm:$0xff] %v429_v17  ;;  %v431_v18 = vld [vmem:[%s1835_s10 + $0x480] sm:$0xff] }
  0x26   : > { %v433_v19 = vld [vmem:[%s1835_s10 + $0x4c0] sm:$0xff]  ;;  %432 = vst [vmem:[%s1840_s11 + $0x90] sm:$0xff] %v431_v18 }
  0x27   : > { %v435_v20 = vld [vmem:[%s1835_s10 + $0x500] sm:$0xff]  ;;  %434 = vst [vmem:[%s1840_s11 + $0x98] sm:$0xff] %v433_v19 }
  0x28   : > { %436 = vst [vmem:[%s1840_s11 + $0xa0] sm:$0xff] %v435_v20  ;;  %v437_v21 = vld [vmem:[%s1835_s10 + $0x540] sm:$0xff] }
  0x29   : > { %v439_v22 = vld [vmem:[%s1835_s10 + $0x580] sm:$0xff]  ;;  %438 = vst [vmem:[%s1840_s11 + $0xa8] sm:$0xff] %v437_v21 }
  0x2a   : > { %v441_v23 = vld [vmem:[%s1835_s10 + $0x5c0] sm:$0xff]  ;;  %440 = vst [vmem:[%s1840_s11 + $0xb0] sm:$0xff] %v439_v22 }
  0x2b   : > { %442 = vst [vmem:[%s1840_s11 + $0xb8] sm:$0xff] %v441_v23  ;;  %v443_v24 = vld [vmem:[%s1835_s10 + $0x600] sm:$0xff] }
  0x2c   : > { %v445_v25 = vld [vmem:[%s1835_s10 + $0x640] sm:$0xff]  ;;  %444 = vst [vmem:[%s1840_s11 + $0xc0] sm:$0xff] %v443_v24 }
  0x2d   : > { %v447_v26 = vld [vmem:[%s1835_s10 + $0x680] sm:$0xff]  ;;  %446 = vst [vmem:[%s1840_s11 + $0xc8] sm:$0xff] %v445_v25 }
  0x2e   : > { %448 = vst [vmem:[%s1840_s11 + $0xd0] sm:$0xff] %v447_v26  ;;  %v449_v27 = vld [vmem:[%s1835_s10 + $0x6c0] sm:$0xff] }
  0x2f   : > { %v451_v28 = vld [vmem:[%s1835_s10 + $0x700] sm:$0xff]  ;;  %450 = vst [vmem:[%s1840_s11 + $0xd8] sm:$0xff] %v449_v27 }
  0x30   : > { %v453_v29 = vld [vmem:[%s1835_s10 + $0x740] sm:$0xff]  ;;  %452 = vst [vmem:[%s1840_s11 + $0xe0] sm:$0xff] %v451_v28 }
  0x31   : > { %454 = vst [vmem:[%s1840_s11 + $0xe8] sm:$0xff] %v453_v29  ;;  %v455_v30 = vld [vmem:[%s1835_s10 + $0x780] sm:$0xff] }
  0x32   : > { %v457_v31 = vld [vmem:[%s1835_s10 + $0x7c0] sm:$0xff]  ;;  %456 = vst [vmem:[%s1840_s11 + $0xf0] sm:$0xff] %v455_v30 }
  0x33   : > { %v459_v32 = vld [vmem:[%s1835_s10 + $0x800] sm:$0xff]  ;;  %458 = vst [vmem:[%s1840_s11 + $0xf8] sm:$0xff] %v457_v31 }
  0x34   : > { %460 = vst [vmem:[%s1840_s11 + $0x100] sm:$0xff] %v459_v32  ;;  %v461_v33 = vld [vmem:[%s1835_s10 + $0x840] sm:$0xff] }
  0x35   : > { %v463_v34 = vld [vmem:[%s1835_s10 + $0x880] sm:$0xff]  ;;  %462 = vst [vmem:[%s1840_s11 + $0x108] sm:$0xff] %v461_v33 }
  0x36   : > { %v465_v35 = vld [vmem:[%s1835_s10 + $0x8c0] sm:$0xff]  ;;  %464 = vst [vmem:[%s1840_s11 + $0x110] sm:$0xff] %v463_v34 }
  0x37   : > { %466 = vst [vmem:[%s1840_s11 + $0x118] sm:$0xff] %v465_v35  ;;  %v467_v36 = vld [vmem:[%s1835_s10 + $0x900] sm:$0xff] }
  0x38   : > { %v469_v37 = vld [vmem:[%s1835_s10 + $0x940] sm:$0xff]  ;;  %468 = vst [vmem:[%s1840_s11 + $0x120] sm:$0xff] %v467_v36 }
  0x39   : > { %v471_v38 = vld [vmem:[%s1835_s10 + $0x980] sm:$0xff]  ;;  %470 = vst [vmem:[%s1840_s11 + $0x128] sm:$0xff] %v469_v37 }
  0x3a   : > { %472 = vst [vmem:[%s1840_s11 + $0x130] sm:$0xff] %v471_v38  ;;  %v473_v39 = vld [vmem:[%s1835_s10 + $0x9c0] sm:$0xff] }
  0x3b   : > { %v475_v40 = vld [vmem:[%s1835_s10 + $0xa00] sm:$0xff]  ;;  %474 = vst [vmem:[%s1840_s11 + $0x138] sm:$0xff] %v473_v39 }
  0x3c   : > { %v477_v41 = vld [vmem:[%s1835_s10 + $0xa40] sm:$0xff]  ;;  %476 = vst [vmem:[%s1840_s11 + $0x140] sm:$0xff] %v475_v40 }
  0x3d   : > { %478 = vst [vmem:[%s1840_s11 + $0x148] sm:$0xff] %v477_v41  ;;  %v479_v42 = vld [vmem:[%s1835_s10 + $0xa80] sm:$0xff] }
  0x3e   : > { %v481_v43 = vld [vmem:[%s1835_s10 + $0xac0] sm:$0xff]  ;;  %480 = vst [vmem:[%s1840_s11 + $0x150] sm:$0xff] %v479_v42 }
  0x3f   : > { %v483_v44 = vld [vmem:[%s1835_s10 + $0xb00] sm:$0xff]  ;;  %482 = vst [vmem:[%s1840_s11 + $0x158] sm:$0xff] %v481_v43 }
  0x40   : > { %484 = vst [vmem:[%s1840_s11 + $0x160] sm:$0xff] %v483_v44  ;;  %v485_v45 = vld [vmem:[%s1835_s10 + $0xb40] sm:$0xff] }
  0x41   : > { %v487_v46 = vld [vmem:[%s1835_s10 + $0xb80] sm:$0xff]  ;;  %486 = vst [vmem:[%s1840_s11 + $0x168] sm:$0xff] %v485_v45 }
  0x42   : > { %v489_v47 = vld [vmem:[%s1835_s10 + $0xbc0] sm:$0xff]  ;;  %488 = vst [vmem:[%s1840_s11 + $0x170] sm:$0xff] %v487_v46 }
  0x43   : > { %490 = vst [vmem:[%s1840_s11 + $0x178] sm:$0xff] %v489_v47  ;;  %v491_v48 = vld [vmem:[%s1835_s10 + $0xc00] sm:$0xff] }
  0x44   : > { %v493_v49 = vld [vmem:[%s1835_s10 + $0xc40] sm:$0xff]  ;;  %492 = vst [vmem:[%s1840_s11 + $0x180] sm:$0xff] %v491_v48 }
  0x45   : > { %v495_v50 = vld [vmem:[%s1835_s10 + $0xc80] sm:$0xff]  ;;  %494 = vst [vmem:[%s1840_s11 + $0x188] sm:$0xff] %v493_v49 }
  0x46   : > { %496 = vst [vmem:[%s1840_s11 + $0x190] sm:$0xff] %v495_v50  ;;  %v497_v51 = vld [vmem:[%s1835_s10 + $0xcc0] sm:$0xff] }
  0x47   : > { %v499_v52 = vld [vmem:[%s1835_s10 + $0xd00] sm:$0xff]  ;;  %498 = vst [vmem:[%s1840_s11 + $0x198] sm:$0xff] %v497_v51 }
  0x48   : > { %v501_v53 = vld [vmem:[%s1835_s10 + $0xd40] sm:$0xff]  ;;  %500 = vst [vmem:[%s1840_s11 + $0x1a0] sm:$0xff] %v499_v52 }
  0x49   : > { %502 = vst [vmem:[%s1840_s11 + $0x1a8] sm:$0xff] %v501_v53  ;;  %v503_v54 = vld [vmem:[%s1835_s10 + $0xd80] sm:$0xff] }
  0x4a   : > { %v505_v55 = vld [vmem:[%s1835_s10 + $0xdc0] sm:$0xff]  ;;  %504 = vst [vmem:[%s1840_s11 + $0x1b0] sm:$0xff] %v503_v54 }
  0x4b   : > { %v507_v56 = vld [vmem:[%s1835_s10 + $0xe00] sm:$0xff]  ;;  %506 = vst [vmem:[%s1840_s11 + $0x1b8] sm:$0xff] %v505_v55 }
  0x4c   : > { %508 = vst [vmem:[%s1840_s11 + $0x1c0] sm:$0xff] %v507_v56  ;;  %v509_v57 = vld [vmem:[%s1835_s10 + $0xe40] sm:$0xff] }
  0x4d   : > { %v511_v58 = vld [vmem:[%s1835_s10 + $0xe80] sm:$0xff]  ;;  %510 = vst [vmem:[%s1840_s11 + $0x1c8] sm:$0xff] %v509_v57 }
  0x4e   : > { %v513_v59 = vld [vmem:[%s1835_s10 + $0xec0] sm:$0xff]  ;;  %512 = vst [vmem:[%s1840_s11 + $0x1d0] sm:$0xff] %v511_v58 }
  0x4f   : > { %514 = vst [vmem:[%s1840_s11 + $0x1d8] sm:$0xff] %v513_v59  ;;  %v515_v60 = vld [vmem:[%s1835_s10 + $0xf00] sm:$0xff] }
  0x50   : > { %v517_v61 = vld [vmem:[%s1835_s10 + $0xf40] sm:$0xff]  ;;  %516 = vst [vmem:[%s1840_s11 + $0x1e0] sm:$0xff] %v515_v60 }
  0x51   : > { %v519_v62 = vld [vmem:[%s1835_s10 + $0xf80] sm:$0xff]  ;;  %518 = vst [vmem:[%s1840_s11 + $0x1e8] sm:$0xff] %v517_v61 }
  0x52   : > { %520 = vst [vmem:[%s1840_s11 + $0x1f0] sm:$0xff] %v519_v62  ;;  %v521_v63 = vld [vmem:[%s1835_s10 + $0xfc0] sm:$0xff] }
  0x53   : > { %522 = vst [vmem:[%s1840_s11 + $0x1f8] sm:$0xff] %v521_v63 }
  0x54 PF: > { %544 = sbr.rel (!%p1813_p3) target bundleno = 91 (0x5b), region = 70  ;;  %s546_s12 = sand.u32 (%p1813_p3), 1, %s1737_s19  }
  0x55   : > { %s1561_s13 = sshll.u32 (%p1813_p3), %s1745_s21, 4  ;;  %s1563_s14 = smul.u32 (%p1813_p3), 48, %s546_s12 }
  0x56   : > { %s554_s17 = scalar_lea.vmem (%p1813_p3), %s2123_s4, %s1561_s13 }
  0x57   : > { %v567_v0 = vld [vmem:[%s554_s17] sm:$0xff] (%p1813_p3)  ;;  %v569_v1 = vld [vmem:[%s554_s17 + $0x8] sm:$0xff] (%p1813_p3)  ;;  %s548_s24 = scalar_lea.vmem (%p1813_p3), [#allocation4], %s1563_s14 }
  0x58   : > { %v571_v2 = vld [vmem:[%s554_s17 + $0x80] sm:$0xff] (%p1813_p3)  ;;  %v573_v3 = vld [vmem:[%s554_s17 + $0x88] sm:$0xff] (%p1813_p3)  ;;  %568 = vst [vmem:[%s548_s24] sm:$0xff] (%p1813_p3), %v567_v0  ;;  %570 = vst [vmem:[%s548_s24 + $0x8] sm:$0xff] (%p1813_p3), %v569_v1 }
  0x59   : > { %v575_v4 = vld [vmem:[%s554_s17 + $0x100] sm:$0xff]  ;;  %v577_v5 = vld [vmem:[%s554_s17 + $0x108] sm:$0xff]  ;;  %572 = vst [vmem:[%s548_s24 + $0x10] sm:$0xff] %v571_v2  ;;  %574 = vst [vmem:[%s548_s24 + $0x18] sm:$0xff] %v573_v3 }
  0x5a   : > { %576 = vst [vmem:[%s548_s24 + $0x20] sm:$0xff] %v575_v4  ;;  %578 = vst [vmem:[%s548_s24 + $0x28] sm:$0xff] %v577_v5 }
  0x5b PF: > { %p1480_p8 = scmp.ge.s32.totalorder %s1749_s22, 1  ;;  %p583_p9 = scmp.lt.s32.totalorder %s1749_s22, 9 }
  0x5d   : > { %p584_p10 = pnand %p1480_p8, %p583_p9 }
  0x5e   : > { %s590_s25 = sand.u32 (!%p584_p10), 1, %s1733_s18   ;;  %s1482_s17 = sshll.u32 (!%p584_p10), %s1741_s20, 1 }
  0x5f   : > { %587 = sbr.rel (%p584_p10) target bundleno = 389 (0x185), region = 93  ;;  %s1481_s26 = sshll.u32 (!%p584_p10), %s590_s25, 9 }
  0x60   : > { %s1985_s8 = scalar_lea.vmem (!%p584_p10), [#allocation3], %s1481_s26  ;;  %p660_p11 = scmp.lt.s32.totalorder (!%p584_p10), %s1482_s17, 15 }
  0x64   : > { %v1703_v6 = vld [vmem:[%s2119_s0 + $0x4] ss:$16 sps:$4 sm:$0xff]   ;;  %v1706_v7 = vld [vmem:[%s2119_s0 + $0xc] ss:$16 sps:$4 sm:$0xff]   ;;  %v1609_v10 = vld [vmem:[%s1985_s8 + $0x70] ss:$8 sps:$4 sm:$0xff]  }
  0x65   : > { %v1605_v8 = vld [vmem:[%s1985_s8 + $0x74] ss:$8 sps:$4 sm:$0xff]   ;;  %1145 = vmatprep.mubr.bf16.mxu0 %v1703_v6  ;;  %1196 = vmatprep.mubr.bf16.mxu1 %v1706_v7  ;;  %v1610_v11 = vld [vmem:[%s1985_s8 + $0x170] ss:$8 sps:$4 sm:$0xff]   ;;  %v1611_v12 = vld [vmem:[%s1985_s8 + $0x64] ss:$8 sps:$4 sm:$0xff]  }
  0x66   : > { %v1607_v9 = vld [vmem:[%s1985_s8 + $0x174] ss:$8 sps:$4 sm:$0xff]   ;;  %1113 = vmatprep.subr.bf16.mxu0 %v1605_v8  ;;  %v1613_v13 = vld [vmem:[%s1985_s8 + $0x164] ss:$8 sps:$4 sm:$0xff]   ;;  %v1615_v14 = vld [vmem:[%s1985_s8 + $0x60] ss:$8 sps:$4 sm:$0xff]  }
  0x67   : > { %1164 = vmatprep.subr.bf16.mxu1 %v1607_v9  ;;  %1114 = vmatpush1.bf16.msra.mxu0 %v1609_v10  ;;  %v1616_v15 = vld [vmem:[%s1985_s8 + $0x160] ss:$8 sps:$4 sm:$0xff]   ;;  %v1617_v16 = vld [vmem:[%s1985_s8 + $0x54] ss:$8 sps:$4 sm:$0xff]   ;;  %v1621_v18 = vld [vmem:[%s1985_s8 + $0x50] ss:$8 sps:$4 sm:$0xff]  }
  0x68   : > { %1165 = vmatpush1.bf16.msra.mxu1 %v1610_v11  ;;  %1115 = vmatprep.subr.bf16.mxu0 %v1611_v12  ;;  %v1619_v17 = vld [vmem:[%s1985_s8 + $0x154] ss:$8 sps:$4 sm:$0xff]   ;;  %v1622_v19 = vld [vmem:[%s1985_s8 + $0x150] ss:$8 sps:$4 sm:$0xff]   ;;  %v1623_v20 = vld [vmem:[%s1985_s8 + $0x44] ss:$8 sps:$4 sm:$0xff]  }
  0x69   : > { %1166 = vmatprep.subr.bf16.mxu1 %v1613_v13  ;;  %v1625_v21 = vld [vmem:[%s1985_s8 + $0x144] ss:$8 sps:$4 sm:$0xff]   ;;  %v1627_v22 = vld [vmem:[%s1985_s8 + $0x40] ss:$8 sps:$4 sm:$0xff]   ;;  %v1629_v24 = vld [vmem:[%s1985_s8 + $0x34] ss:$8 sps:$4 sm:$0xff]  }
  0x6a   : > { %v1628_v23 = vld [vmem:[%s1985_s8 + $0x140] ss:$8 sps:$4 sm:$0xff]   ;;  %v1631_v25 = vld [vmem:[%s1985_s8 + $0x134] ss:$8 sps:$4 sm:$0xff]   ;;  %v1633_v26 = vld [vmem:[%s1985_s8 + $0x30] ss:$8 sps:$4 sm:$0xff]  }
  0x6b   : > { %1116 = vmatpush1.bf16.msra.mxu0 %v1615_v14  ;;  %v1634_v27 = vld [vmem:[%s1985_s8 + $0x130] ss:$8 sps:$4 sm:$0xff]   ;;  %v1635_v28 = vld [vmem:[%s1985_s8 + $0x24] ss:$8 sps:$4 sm:$0xff]   ;;  %v1639_v30 = vld [vmem:[%s1985_s8 + $0x20] ss:$8 sps:$4 sm:$0xff]  }
  0x6c   : > { %1167 = vmatpush1.bf16.msra.mxu1 %v1616_v15  ;;  %1117 = vmatprep.subr.bf16.mxu0 %v1617_v16  ;;  %v1637_v29 = vld [vmem:[%s1985_s8 + $0x124] ss:$8 sps:$4 sm:$0xff]   ;;  %v1640_v31 = vld [vmem:[%s1985_s8 + $0x120] ss:$8 sps:$4 sm:$0xff]   ;;  %v1641_v32 = vld [vmem:[%s1985_s8 + $0x14] ss:$8 sps:$4 sm:$0xff]   ;;  %v1238_v16 = vlaneseq }
  0x6d   : > { %1168 = vmatprep.subr.bf16.mxu1 %v1619_v17  ;;  %v1643_v33 = vld [vmem:[%s1985_s8 + $0x114] ss:$8 sps:$4 sm:$0xff]   ;;  %v1645_v34 = vld [vmem:[%s1985_s8 + $0x10] ss:$8 sps:$4 sm:$0xff]   ;;  %v1647_v36 = vld [vmem:[%s1985_s8 + $0x4] ss:$8 sps:$4 sm:$0xff]  }
  0x6e   : > { %v1646_v35 = vld [vmem:[%s1985_s8 + $0x110] ss:$8 sps:$4 sm:$0xff]   ;;  %v1649_v37 = vld [vmem:[%s1985_s8 + $0x104] ss:$8 sps:$4 sm:$0xff]   ;;  %v1651_v38 = vld [vmem:[%s1985_s8] ss:$8 sps:$4 sm:$0xff]  }
  0x6f   : > { %1118 = vmatpush1.bf16.msra.mxu0 %v1621_v18  ;;  %v1652_v39 = vld [vmem:[%s1985_s8 + $0x100] ss:$8 sps:$4 sm:$0xff]   ;;  %v1653_v40 = vld [vmem:[%s1985_s8 + $0xf4] ss:$8 sps:$4 sm:$0xff]   ;;  %v1657_v42 = vld [vmem:[%s1985_s8 + $0xf0] ss:$8 sps:$4 sm:$0xff]  }
  0x70   : > { %1169 = vmatpush1.bf16.msra.mxu1 %v1622_v19  ;;  %1119 = vmatprep.subr.bf16.mxu0 %v1623_v20  ;;  %v1655_v41 = vld [vmem:[%s1985_s8 + $0x1f4] ss:$8 sps:$4 sm:$0xff]   ;;  %v1658_v43 = vld [vmem:[%s1985_s8 + $0x1f0] ss:$8 sps:$4 sm:$0xff]   ;;  %v1659_v44 = vld [vmem:[%s1985_s8 + $0xe4] ss:$8 sps:$4 sm:$0xff]  }
  0x71   : > { %1170 = vmatprep.subr.bf16.mxu1 %v1625_v21  ;;  %v1661_v45 = vld [vmem:[%s1985_s8 + $0x1e4] ss:$8 sps:$4 sm:$0xff]   ;;  %v1663_v46 = vld [vmem:[%s1985_s8 + $0xe0] ss:$8 sps:$4 sm:$0xff]   ;;  %v1665_v48 = vld [vmem:[%s1985_s8 + $0xd4] ss:$8 sps:$4 sm:$0xff]  }
  0x72   : > { %v1664_v47 = vld [vmem:[%s1985_s8 + $0x1e0] ss:$8 sps:$4 sm:$0xff]   ;;  %v1667_v49 = vld [vmem:[%s1985_s8 + $0x1d4] ss:$8 sps:$4 sm:$0xff]   ;;  %v1669_v50 = vld [vmem:[%s1985_s8 + $0xd0] ss:$8 sps:$4 sm:$0xff]  }
  0x73   : > { %1120 = vmatpush1.bf16.msra.mxu0 %v1627_v22  ;;  %v1670_v51 = vld [vmem:[%s1985_s8 + $0x1d0] ss:$8 sps:$4 sm:$0xff]   ;;  %v1671_v52 = vld [vmem:[%s1985_s8 + $0xc4] ss:$8 sps:$4 sm:$0xff]   ;;  %v1675_v54 = vld [vmem:[%s1985_s8 + $0xc0] ss:$8 sps:$4 sm:$0xff]  }
  0x74   : > { %1171 = vmatpush1.bf16.msra.mxu1 %v1628_v23  ;;  %1121 = vmatprep.subr.bf16.mxu0 %v1629_v24  ;;  %v1673_v53 = vld [vmem:[%s1985_s8 + $0x1c4] ss:$8 sps:$4 sm:$0xff]   ;;  %v1676_v55 = vld [vmem:[%s1985_s8 + $0x1c0] ss:$8 sps:$4 sm:$0xff]   ;;  %v1677_v56 = vld [vmem:[%s1985_s8 + $0xb4] ss:$8 sps:$4 sm:$0xff]  }
  0x75   : > { %1172 = vmatprep.subr.bf16.mxu1 %v1631_v25  ;;  %v1679_v57 = vld [vmem:[%s1985_s8 + $0x1b4] ss:$8 sps:$4 sm:$0xff]   ;;  %v1681_v58 = vld [vmem:[%s1985_s8 + $0xb0] ss:$8 sps:$4 sm:$0xff]   ;;  %v1683_v60 = vld [vmem:[%s1985_s8 + $0xa4] ss:$8 sps:$4 sm:$0xff]  }
  0x76   : > { %v1682_v59 = vld [vmem:[%s1985_s8 + $0x1b0] ss:$8 sps:$4 sm:$0xff]   ;;  %v1685_v61 = vld [vmem:[%s1985_s8 + $0x1a4] ss:$8 sps:$4 sm:$0xff]   ;;  %v1687_v62 = vld [vmem:[%s1985_s8 + $0xa0] ss:$8 sps:$4 sm:$0xff]  }
  0x77   : > { %1122 = vmatpush1.bf16.msra.mxu0 %v1633_v26  ;;  %v1688_v63 = vld [vmem:[%s1985_s8 + $0x1a0] ss:$8 sps:$4 sm:$0xff]   ;;  %v1689_v0 = vld [vmem:[%s1985_s8 + $0x94] ss:$8 sps:$4 sm:$0xff]   ;;  %v1693_v2 = vld [vmem:[%s1985_s8 + $0x90] ss:$8 sps:$4 sm:$0xff]  }
  0x78   : > { %1173 = vmatpush1.bf16.msra.mxu1 %v1634_v27  ;;  %1123 = vmatprep.subr.bf16.mxu0 %v1635_v28  ;;  %v1691_v1 = vld [vmem:[%s1985_s8 + $0x194] ss:$8 sps:$4 sm:$0xff]   ;;  %v1694_v3 = vld [vmem:[%s1985_s8 + $0x190] ss:$8 sps:$4 sm:$0xff]   ;;  %v1695_v4 = vld [vmem:[%s1985_s8 + $0x84] ss:$8 sps:$4 sm:$0xff]  }
  0x79   : > { %1174 = vmatprep.subr.bf16.mxu1 %v1637_v29  ;;  %v1697_v5 = vld [vmem:[%s1985_s8 + $0x184] ss:$8 sps:$4 sm:$0xff]   ;;  %v1699_v6 = vld [vmem:[%s1985_s8 + $0x80] ss:$8 sps:$4 sm:$0xff]   ;;  %s2134_s17 = smov (!%p660_p11, %s1482_s17), 15  ;;  %v1239_v17 = vshrl.u32 %v1238_v16, 7 }
  0x7a   : > { %v1700_v7 = vld [vmem:[%s1985_s8 + $0x180] ss:$8 sps:$4 sm:$0xff]   ;;  %s662_s27 = scalar_lea.vmem %s2121_s2, %s2134_s17  ;;  %s667_s7 = scalar_lea.vmem %s2122_s3, %s2134_s17 }
  0x7b   : > { %1124 = vmatpush1.bf16.msra.mxu0 %v1639_v30  ;;  %v693_v8 = vld [vmem:[%s2119_s0 + $0x20] sm:$0xff]  ;;  %v694_v9 = vld [vmem:[%s2119_s0 + $0x28] sm:$0xff]  ;;  %v1240_v18 = vsub.s32 0, %v1239_v17  ;;  %s2072_s8 = smul.u32 48, %s590_s25  ;;  %v1244_v20 = vsub.s32 1, %v1239_v17  ;;  %s1562_s25 = sshll.u32 (%p1820_p6), %s1741_s20, 4 }
  0x7c   : > { %1175 = vmatpush1.bf16.msra.mxu1 %v1640_v31  ;;  %1125 = vmatprep.subr.bf16.mxu0 %v1641_v32  ;;  %v1701_v10 = vld [vmem:[%s2119_s0] ss:$16 sps:$4 sm:$0xff]   ;;  %v1704_v11 = vld [vmem:[%s2119_s0 + $0x8] ss:$16 sps:$4 sm:$0xff]   ;;  %v1489_v12 = vcombine.high %v693_v8, %v693_v8  ;;  %v1491_v13 = vcombine.high %v694_v9, %v694_v9  ;;  %v1488_v14 = vcombine.low %v693_v8, %v693_v8  ;;  %s1308_s12 = scalar_lea.vmem (%p1820_p6), %s2124_s5, %s1562_s25 }
  0x7d   : > { %1176 = vmatprep.subr.bf16.mxu1 %v1643_v33  ;;  %v1490_v15 = vcombine.low %v694_v9, %v694_v9  ;;  %v1236_v19 = vld [vmem:[%s662_s27] sm:$0x3]  ;;  %s2075_s9 = scalar_lea.vmem [#allocation4], %s2072_s8  ;;  %s2082_s18 = scalar_lea.vmem [#allocation5], %s2072_s8 }
  0x7e   : > { %v1254_v21 = vld [vmem:[%s667_s7] sm:$0x3]  ;;  %v1241_v22 = vrot.slane %v1236_v19, %v1240_v18  ;;  %v1245_v27 = vrot.slane %v1236_v19, %v1244_v20 }
  0x7f   : > { %1126 = vmatpush1.bf16.msra.mxu0 %v1645_v34  ;;  %v1259_v26 = vrot.slane %v1254_v21, %v1240_v18  ;;  %v1263_v32 = vrot.slane %v1254_v21, %v1244_v20  ;;  %v1272_v33 = vld [vmem:[%s2075_s9] sm:$0xff] }
  0x80   : > { %1177 = vmatpush1.bf16.msra.mxu1 %v1646_v35  ;;  %1127 = vmatprep.subr.bf16.mxu0 %v1647_v36 }
  0x81   : > { %1178 = vmatprep.subr.bf16.mxu1 %v1649_v37 }
  0x83   : > { %1128 = vmatpush1.bf16.msra.mxu0 %v1651_v38 }
  0x84   : > { %1179 = vmatpush1.bf16.msra.mxu1 %v1652_v39  ;;  %1129 = vmatprep.subr.bf16.mxu0 %v1653_v40  ;;  %v1273_v39 = vld [vmem:[%s2075_s9 + $0x8] sm:$0xff] }
  0x85   : > { %1180 = vmatprep.subr.bf16.mxu1 %v1655_v41 }
  0x87   : > { %1130 = vmatpush2.bf16.msra.mxu0 %v1657_v42 }
  0x88   : > { %1181 = vmatpush2.bf16.msra.mxu1 %v1658_v43  ;;  %1131 = vmatprep.subr.bf16.mxu0 %v1659_v44 }
  0x89   : > { %1182 = vmatprep.subr.bf16.mxu1 %v1661_v45 }
  0x8b   : > { %1132 = vmatpush2.bf16.msra.mxu0 %v1663_v46  ;;  %v1274_v46 = vld [vmem:[%s2075_s9 + $0x10] sm:$0xff] }
  0x8c   : > { %1183 = vmatpush2.bf16.msra.mxu1 %v1664_v47  ;;  %1133 = vmatprep.subr.bf16.mxu0 %v1665_v48 }
  0x8d   : > { %1184 = vmatprep.subr.bf16.mxu1 %v1667_v49 }
  0x8f   : > { %1134 = vmatpush2.bf16.msra.mxu0 %v1669_v50 }
  0x90   : > { %1185 = vmatpush2.bf16.msra.mxu1 %v1670_v51  ;;  %1135 = vmatprep.subr.bf16.mxu0 %v1671_v52 }
  0x91   : > { %1186 = vmatprep.subr.bf16.mxu1 %v1673_v53  ;;  %v1275_v53 = vld [vmem:[%s2075_s9 + $0x18] sm:$0xff] }
  0x93   : > { %1136 = vmatpush2.bf16.msra.mxu0 %v1675_v54 }
  0x94   : > { %1187 = vmatpush2.bf16.msra.mxu1 %v1676_v55  ;;  %1137 = vmatprep.subr.bf16.mxu0 %v1677_v56 }
  0x95   : > { %1188 = vmatprep.subr.bf16.mxu1 %v1679_v57 }
  0x97   : > { %1138 = vmatpush2.bf16.msra.mxu0 %v1681_v58 }
  0x98   : > { %1189 = vmatpush2.bf16.msra.mxu1 %v1682_v59  ;;  %1139 = vmatprep.subr.bf16.mxu0 %v1683_v60 }
  0x99   : > { %1190 = vmatprep.subr.bf16.mxu1 %v1685_v61 }
  0x9b   : > { %1140 = vmatpush2.bf16.msra.mxu0 %v1687_v62 }
  0x9c   : > { %1191 = vmatpush2.bf16.msra.mxu1 %v1688_v63  ;;  %1141 = vmatprep.subr.bf16.mxu0 %v1689_v0 }
  0x9d   : > { %1192 = vmatprep.subr.bf16.mxu1 %v1691_v1 }
  0x9f   : > { %1142 = vmatpush2.bf16.msra.mxu0 %v1693_v2  ;;  %v1276_v2 = vld [vmem:[%s2075_s9 + $0x20] sm:$0xff] }
  0xa0   : > { %1193 = vmatpush2.bf16.msra.mxu1 %v1694_v3  ;;  %1143 = vmatprep.subr.bf16.mxu0 %v1695_v4 }
  0xa1   : > { %1194 = vmatprep.subr.bf16.mxu1 %v1697_v5  ;;  %v1277_v5 = vld [vmem:[%s2075_s9 + $0x28] sm:$0xff] }
  0xa3   : > { %1144 = vmatpush2.bf16.msra.mxu0 %v1699_v6 }
  0xa4   : > { %1195 = vmatpush2.bf16.msra.mxu1 %v1700_v7 }
  0xa6   : > { %1146 = vmatmul.mubr.bf16.vlgmr.msra.gmra.mxu0 %v1701_v10 }
  0xa7   : > { %1197 = vmatmul.mubr.bf16.vlgmr.msra.gmra.mxu1 %v1704_v11  ;;  %1155 = vmatprep.mubr.bf16.mxu0 %v1489_v12 }
  0xa8   : > { %1206 = vmatprep.mubr.bf16.mxu1 %v1491_v13 }
  0xae   : > { %1156 = vmatmul.mubr.bf16.gmra.mxu0 %v1488_v14 }
  0xaf   : > { %1207 = vmatmul.mubr.bf16.gmra.mxu1 %v1490_v15 }
 0x166   : > { %v1147_v23 = vpop.f32.mrf.mxu0 }
 0x167   : > { %v1198_v24 = vpop.f32.mrf.mxu1 }
 0x168   : > { %v1199_v25 = vadd.f32 %v1198_v24, %v1147_v23  ;;  %v1149_v28 = vpop.f32.mrf.mxu0 }
 0x169   : > { %v1200_v29 = vpop.f32.mrf.mxu1 }
 0x16a   : > { %v1248_v30 = vmul.f32 %v1241_v22, %v1199_v25  ;;  %v1201_v31 = vadd.f32 %v1200_v29, %v1149_v28  ;;  %v1151_v34 = vpop.f32.mrf.mxu0 }
 0x16b   : > { %v1202_v35 = vpop.f32.mrf.mxu1 }
 0x16c   : > { %v1266_v36 = vadd.f32 %v1259_v26, %v1248_v30  ;;  %v1249_v37 = vmul.f32 %v1245_v27, %v1201_v31  ;;  %v1203_v38 = vadd.f32 %v1202_v35, %v1151_v34  ;;  %v1153_v40 = vpop.f32.mrf.mxu0 }
 0x16d   : > { %v1204_v41 = vpop.f32.mrf.mxu1 }
 0x16e   : > { %v1278_v42 = vadd.f32 %v1272_v33, %v1266_v36  ;;  %v1267_v43 = vadd.f32 %v1263_v32, %v1249_v37  ;;  %v1250_v44 = vmul.f32 %v1241_v22, %v1203_v38  ;;  %v1205_v45 = vadd.f32 %v1204_v41, %v1153_v40  ;;  %v1157_v47 = vpop.f32.mrf.mxu0 }
 0x16f   : > { %v1208_v48 = vpop.f32.mrf.mxu1 }
 0x170   : > { %v1284_v49 = vmax.f32 %v1278_v42, 0.0  ;;  %v1279_v50 = vadd.f32 %v1273_v39, %v1267_v43  ;;  %v1268_v51 = vadd.f32 %v1259_v26, %v1250_v44  ;;  %v1251_v52 = vmul.f32 %v1245_v27, %v1205_v45  ;;  %v1159_v55 = vpop.f32.mrf.mxu0 }
 0x171   : > { %v1209_v54 = vadd.f32 %v1208_v48, %v1157_v47  ;;  %v1210_v56 = vpop.f32.mrf.mxu1 }
 0x172   : > { %1290 = vst [vmem:[%s2082_s18] sm:$0xff] %v1284_v49  ;;  %v1285_v57 = vmax.f32 %v1279_v50, 0.0  ;;  %v1280_v58 = vadd.f32 %v1274_v46, %v1268_v51  ;;  %v1269_v59 = vadd.f32 %v1263_v32, %v1251_v52  ;;  %v1211_v60 = vadd.f32 %v1210_v56, %v1159_v55  ;;  %v1161_v62 = vpop.f32.mrf.mxu0 }
 0x173   : > { %v1252_v61 = vmul.f32 %v1241_v22, %v1209_v54  ;;  %v1212_v63 = vpop.f32.mrf.mxu1 }
 0x174   : > { %1291 = vst [vmem:[%s2082_s18 + $0x8] sm:$0xff] %v1285_v57  ;;  %v1286_v0 = vmax.f32 %v1280_v58, 0.0  ;;  %v1281_v1 = vadd.f32 %v1275_v53, %v1269_v59  ;;  %v1253_v3 = vmul.f32 %v1245_v27, %v1211_v60  ;;  %v1162_v6 = vpop.f32.mrf.mxu0 }
 0x175   : > { %v1270_v4 = vadd.f32 %v1259_v26, %v1252_v61  ;;  %v1213_v7 = vpop.f32.mrf.mxu1 }
 0x176   : > { %1292 = vst [vmem:[%s2082_s18 + $0x10] sm:$0xff] %v1286_v0  ;;  %v1287_v8 = vmax.f32 %v1281_v1, 0.0  ;;  %v1271_v9 = vadd.f32 %v1263_v32, %v1253_v3 }
 0x177   : > { %v1282_v10 = vadd.f32 %v1276_v2, %v1270_v4 }
 0x178   : > { %1293 = vst [vmem:[%s2082_s18 + $0x18] sm:$0xff] %v1287_v8  ;;  %v1283_v11 = vadd.f32 %v1277_v5, %v1271_v9  ;;  %1302 = sbr.rel (!%p1820_p6) target bundleno = 389 (0x185), region = 113 }
 0x179   : > { %v1288_v12 = vmax.f32 %v1282_v10, 0.0  ;;  %v1321_v14 = vld [vmem:[%s2082_s18] sm:$0xff] (%p1820_p6) }
 0x17a   : > { %v1289_v13 = vmax.f32 %v1283_v11, 0.0  ;;  %1322 = vst [vmem:[%s1308_s12] sm:$0xff] (%p1820_p6), %v1321_v14 }
 0x17b   : > { %1294 = vst [vmem:[%s2082_s18 + $0x20] sm:$0xff] %v1288_v12  ;;  %v1323_v15 = vld [vmem:[%s2082_s18 + $0x8] sm:$0xff] (%p1820_p6) }
 0x17c   : > { %1295 = vst [vmem:[%s2082_s18 + $0x28] sm:$0xff] %v1289_v13  ;;  %1324 = vst [vmem:[%s1308_s12 + $0x8] sm:$0xff] (%p1820_p6), %v1323_v15 }
 0x17d   : > { %v1325_v16 = vld [vmem:[%s2082_s18 + $0x10] sm:$0xff] }
 0x17e   : > { %1326 = vst [vmem:[%s1308_s12 + $0x80] sm:$0xff] %v1325_v16 }
 0x17f   : > { %v1327_v17 = vld [vmem:[%s2082_s18 + $0x18] sm:$0xff] }
 0x180   : > { %1328 = vst [vmem:[%s1308_s12 + $0x88] sm:$0xff] %v1327_v17 }
 0x182   : > { %v1329_v18 = vld [vmem:[%s2082_s18 + $0x20] sm:$0xff] }
 0x183   : > { %v1331_v19 = vld [vmem:[%s2082_s18 + $0x28] sm:$0xff]  ;;  %1330 = vst [vmem:[%s1308_s12 + $0x100] sm:$0xff] %v1329_v18 }
 0x184   : > { %1332 = vst [vmem:[%s1308_s12 + $0x108] sm:$0xff] %v1331_v19 }
 0x185 PF: > { %s15_s22 = sadd.s32 1, %s1749_s22   ;;  %s2127_s18 = smov %s1737_s19 }
 0x186   : > { %p12_p12 = scmp.ge.s32.totalorder %s15_s22, 10   ;;  %s2128_s19 = smov %s1825_s29 }
 0x187   : > { %s2129_s20 = smov %s1745_s21  ;;  %s2130_s21 = smov %s2132_s23 }
 0x188   :  { %14 = sbr.rel (!%p12_p12) target bundleno = 3 (0x3), region = 184 }

// kernel: forward.39
= control target key start
LH: loop header
LB: loop body
LE: loop exit
PB: predicated region body
PF: predicated region fallthrough
CT: control target
= control target key end

     0   :  { %s1152_s15 = smov 0   ;;  %s1154_s16 = smov 0   ;;  %s1276_s0 = inlined_call_operand.vmem [shape: bf16[24,2048], index: 0, kind: input, shape index: {}]   ;;  %s1277_s1 = inlined_call_operand.vmem [shape: bf16[2048,128], index: 1, kind: input, shape index: {}]   ;;  %s1278_s2 = inlined_call_operand.vmem [shape: f32[1,128], index: 2, kind: input, shape index: {}]   ;;  %s1279_s3 = inlined_call_operand.vmem [shape: f32[1,128], index: 3, kind: input, shape index: {}]   ;;  %s1280_s4 = inlined_call_operand.vmem [shape: f32[24,128], index: 4, kind: output, shape index: {}]  }
   0x1   :  { %s1156_s17 = smov 0   ;;  %s1158_s18 = smov 0  }
   0x2   :  { %s1160_s19 = smov 0  }
   0x3 LB: > { %s26_s20 = sadd.s32 1, %s1120_s18  ;;  %p49_p1 = scmp.ne.s32.totalorder %s1112_s16, %s1108_s15  ;;  %s1124_s19 = sphi %s1160_s19, %s14_s19   ;;  %s1120_s18 = sphi %s1158_s18, %s1284_s18   ;;  %s1116_s17 = sphi %s1156_s17, %s1283_s17   ;;  %s1112_s16 = sphi %s1154_s16, %s1282_s16   ;;  %s1108_s15 = sphi %s1152_s15, %s1281_s15  }
   0x4   : > { %p27_p0 = scmp.ge.s32.totalorder %s26_s20, 4  ;;  %p50_p2 = scmp.eq.s32.totalorder %s1124_s19, 0 }
   0x5   : > { %s42_s22 = sadd.s32 1, %s1112_s16  ;;  %p890_p5 = scmp.ge.s32.totalorder %s1124_s19, 4 }
   0x6   : > { %s1286_s20 = smov (%p27_p0, %s26_s20), 0  ;;  %p51_p3 = por %p50_p2, %p49_p1 }
   0x7   : > { %s38_s21 = ssub.s32 %s1120_s18, %s1286_s20  ;;  %195 = sbr.rel (%p890_p5) target bundleno = 19 (0x13), region = 24 }
   0x8   : > { %p40_p4 = scmp.eq.s32.totalorder %s38_s21, 0 }
   0xa   : > { %s1187_s23 = scalar_select %p40_p4, %s1112_s16, %s42_s22  }
   0xc   : > { %198 = sbr.rel (!%p51_p3) target bundleno = 19 (0x13), region = 28  ;;  %s200_s24 = sand.u32 (%p51_p3), 1, %s1112_s16  }
   0xd   : > { %s944_s25 = sshll.u32 (%p51_p3), %s1120_s18, 4  ;;  %s1001_s26 = smul.u32 (%p51_p3), 48, %s200_s24 }
   0xe   : > { %s208_s29 = scalar_lea.vmem (%p51_p3), %s1276_s0, %s944_s25 }
   0xf   : > { %v221_v0 = vld [vmem:[%s208_s29] sm:$0xff] (%p51_p3)  ;;  %v223_v1 = vld [vmem:[%s208_s29 + $0x8] sm:$0xff] (%p51_p3)  ;;  %s202_s30 = scalar_lea.vmem (%p51_p3), [#allocation3], %s1001_s26 }
  0x10   : > { %v225_v2 = vld [vmem:[%s208_s29 + $0x40] sm:$0xff] (%p51_p3)  ;;  %v227_v3 = vld [vmem:[%s208_s29 + $0x48] sm:$0xff] (%p51_p3)  ;;  %222 = vst [vmem:[%s202_s30] sm:$0xff] (%p51_p3), %v221_v0  ;;  %224 = vst [vmem:[%s202_s30 + $0x8] sm:$0xff] (%p51_p3), %v223_v1 }
  0x11   : > { %v229_v4 = vld [vmem:[%s208_s29 + $0x80] sm:$0xff]  ;;  %v231_v5 = vld [vmem:[%s208_s29 + $0x88] sm:$0xff]  ;;  %226 = vst [vmem:[%s202_s30 + $0x10] sm:$0xff] %v225_v2  ;;  %228 = vst [vmem:[%s202_s30 + $0x18] sm:$0xff] %v227_v3 }
  0x12   : > { %230 = vst [vmem:[%s202_s30 + $0x20] sm:$0xff] %v229_v4  ;;  %232 = vst [vmem:[%s202_s30 + $0x28] sm:$0xff] %v231_v5 }
  0x13 PF: > { %p893_p6 = scmp.ge.s32.totalorder %s1124_s19, 1  ;;  %p249_p7 = scmp.lt.s32.totalorder %s1124_s19, 5 }
  0x15   : > { %p250_p8 = pnand %p893_p6, %p249_p7 }
  0x16   : > { %s256_s5 = sand.u32 (!%p250_p8), 1, %s1108_s15   ;;  %s894_s6 = sshll.u32 (!%p250_p8), %s1116_s17, 6 }
  0x17   : > { %253 = sbr.rel (%p250_p8) target bundleno = 293 (0x125), region = 55  ;;  %p301_p9 = scmp.lt.s32.totalorder (!%p250_p8), %s894_s6, 255 }
  0x18   : > { %s1002_s7 = smul.u32 (!%p250_p8), 48, %s256_s5  ;;  %p896_p10 = scmp.ne.s32.totalorder (!%p250_p8), %s1116_s17, 0 }
  0x1a   : > { %s1204_s12 = scalar_lea.vmem (!%p250_p8), [#allocation3], %s1002_s7 }
  0x1c   : > { %s1288_s6 = smov (!%p301_p9, %s894_s6), 255  ;;  %328 = sbr.rel (%p896_p10) target bundleno = 36 (0x24), region = 63 }
  0x1d   : > { %s895_s8 = sshll.u32 %s1288_s6, 2 }
  0x1e   : > { %s1202_s11 = scalar_lea.vmem %s1277_s1, %s895_s8 }
  0x21   : > { %v1126_v6 = vmov 0.0  }
  0x22   : > { %329 = vst [vmem:[#allocation2 + $0x10] sm:$0xff] %v1126_v6  ;;  %330 = vst [vmem:[#allocation2] sm:$0xff] %v1126_v6 }
  0x23   : > { %331 = vst [vmem:[#allocation2 + $0x8] sm:$0xff] %v1126_v6 }
  0x24 PF: > { %v1044_v7 = vld [vmem:[%s1202_s11 + $0x78] sm:$0xff]   ;;  %v1048_v11 = vld [vmem:[%s1202_s11 + $0x70] sm:$0xff]   ;;  %v1052_v15 = vld [vmem:[%s1202_s11 + $0x68] sm:$0xff]   ;;  %p937_p11 = scmp.ne.s32.totalorder %s1116_s17, 3 }
  0x25   : > { %v1045_v8 = vld [vmem:[%s1202_s11 + $0xf8] sm:$0xff]   ;;  %945 = vmatprep.subr.bf16.mxu0 %v1044_v7  ;;  %v1049_v12 = vld [vmem:[%s1202_s11 + $0xf0] sm:$0xff]   ;;  %v1053_v16 = vld [vmem:[%s1202_s11 + $0xe8] sm:$0xff]  }
  0x26   : > { %v1046_v9 = vld [vmem:[%s1202_s11 + $0x38] sm:$0xff]   ;;  %973 = vmatprep.subr.bf16.mxu1 %v1045_v8  ;;  %v1050_v13 = vld [vmem:[%s1202_s11 + $0x30] sm:$0xff]   ;;  %v1054_v17 = vld [vmem:[%s1202_s11 + $0x28] sm:$0xff]  }
  0x27   : > { %v1047_v10 = vld [vmem:[%s1202_s11 + $0xb8] sm:$0xff]   ;;  %946 = vmatpush3.bf16.msra.mxu0 %v1046_v9  ;;  %v1051_v14 = vld [vmem:[%s1202_s11 + $0xb0] sm:$0xff]   ;;  %v1055_v18 = vld [vmem:[%s1202_s11 + $0xa8] sm:$0xff]  }
  0x28   : > { %974 = vmatpush3.bf16.msra.mxu1 %v1047_v10  ;;  %947 = vmatprep.subr.bf16.mxu0 %v1048_v11  ;;  %v1056_v19 = vld [vmem:[%s1202_s11 + $0x60] sm:$0xff]   ;;  %v1060_v23 = vld [vmem:[%s1202_s11 + $0x58] sm:$0xff]   ;;  %v1064_v27 = vld [vmem:[%s1202_s11 + $0x50] sm:$0xff]  }
  0x29   : > { %975 = vmatprep.subr.bf16.mxu1 %v1049_v12  ;;  %v1057_v20 = vld [vmem:[%s1202_s11 + $0xe0] sm:$0xff]   ;;  %v1061_v24 = vld [vmem:[%s1202_s11 + $0xd8] sm:$0xff]   ;;  %v1065_v28 = vld [vmem:[%s1202_s11 + $0xd0] sm:$0xff]  }
  0x2a   : > { %v1058_v21 = vld [vmem:[%s1202_s11 + $0x20] sm:$0xff]   ;;  %v1062_v25 = vld [vmem:[%s1202_s11 + $0x18] sm:$0xff]   ;;  %v1066_v29 = vld [vmem:[%s1202_s11 + $0x10] sm:$0xff]  }
  0x2b   : > { %948 = vmatpush3.bf16.msra.mxu0 %v1050_v13  ;;  %v1059_v22 = vld [vmem:[%s1202_s11 + $0xa0] sm:$0xff]   ;;  %v1063_v26 = vld [vmem:[%s1202_s11 + $0x98] sm:$0xff]   ;;  %v1067_v30 = vld [vmem:[%s1202_s11 + $0x90] sm:$0xff]  }
  0x2c   : > { %976 = vmatpush3.bf16.msra.mxu1 %v1051_v14  ;;  %949 = vmatprep.subr.bf16.mxu0 %v1052_v15  ;;  %v1068_v31 = vld [vmem:[%s1202_s11 + $0x48] sm:$0xff]   ;;  %v1072_v35 = vld [vmem:[%s1202_s11 + $0x40] sm:$0xff]   ;;  %v332_v56 = vld [vmem:[#allocation2 + $0x10] sm:$0xff] }
  0x2d   : > { %977 = vmatprep.subr.bf16.mxu1 %v1053_v16  ;;  %v1069_v32 = vld [vmem:[%s1202_s11 + $0xc8] sm:$0xff]   ;;  %v1073_v36 = vld [vmem:[%s1202_s11 + $0xc0] sm:$0xff]  }
  0x2e   : > { %v1070_v33 = vld [vmem:[%s1202_s11 + $0x8] sm:$0xff]   ;;  %v1074_v37 = vld [vmem:[%s1202_s11] sm:$0xff]  }
  0x2f   : > { %950 = vmatpush3.bf16.msra.mxu0 %v1054_v17  ;;  %v1071_v34 = vld [vmem:[%s1202_s11 + $0x88] sm:$0xff]   ;;  %v1075_v38 = vld [vmem:[%s1202_s11 + $0x80] sm:$0xff]  }
  0x30   : > { %978 = vmatpush3.bf16.msra.mxu1 %v1055_v18  ;;  %951 = vmatprep.subr.bf16.mxu0 %v1056_v19  ;;  %v1076_v39 = vld [vmem:[%s1204_s12] ss:$16 sps:$4 sm:$0xff]   ;;  %v1078_v40 = vld [vmem:[%s1204_s12 + $0x4] ss:$16 sps:$4 sm:$0xff]   ;;  %v1079_v41 = vld [vmem:[%s1204_s12 + $0x8] ss:$16 sps:$4 sm:$0xff]  }
  0x31   : > { %979 = vmatprep.subr.bf16.mxu1 %v1057_v20  ;;  %v1081_v42 = vld [vmem:[%s1204_s12 + $0xc] ss:$16 sps:$4 sm:$0xff]   ;;  %v339_v43 = vld [vmem:[%s1204_s12 + $0x20] sm:$0xff]  ;;  %663 = vmatprep.mubr.bf16.mxu0 %v1078_v40 }
  0x32   : > { %v902_v44 = vcombine.high %v339_v43, %v339_v43  ;;  %v340_v45 = vld [vmem:[%s1204_s12 + $0x28] sm:$0xff]  ;;  %711 = vmatprep.mubr.bf16.mxu1 %v1081_v42  ;;  %v901_v47 = vcombine.low %v339_v43, %v339_v43  ;;  %v334_v10 = vld [vmem:[#allocation2 + $0x8] sm:$0xff] }
  0x33   : > { %952 = vmatpush3.bf16.msra.mxu0 %v1058_v21  ;;  %v904_v46 = vcombine.high %v340_v45, %v340_v45  ;;  %v903_v48 = vcombine.low %v340_v45, %v340_v45  ;;  %v333_v1 = vld [vmem:[#allocation2] sm:$0xff] }
  0x34   : > { %980 = vmatpush3.bf16.msra.mxu1 %v1059_v22  ;;  %953 = vmatprep.subr.bf16.mxu0 %v1060_v23 }
  0x35   : > { %981 = vmatprep.subr.bf16.mxu1 %v1061_v24 }
  0x37   : > { %954 = vmatpush3.bf16.msra.mxu0 %v1062_v25 }
  0x38   : > { %982 = vmatpush3.bf16.msra.mxu1 %v1063_v26  ;;  %955 = vmatprep.subr.bf16.mxu0 %v1064_v27 }
  0x39   : > { %983 = vmatprep.subr.bf16.mxu1 %v1065_v28 }
  0x3b   : > { %956 = vmatpush3.bf16.msra.mxu0 %v1066_v29 }
  0x3c   : > { %984 = vmatpush3.bf16.msra.mxu1 %v1067_v30  ;;  %957 = vmatprep.subr.bf16.mxu0 %v1068_v31 }
  0x3d   : > { %985 = vmatprep.subr.bf16.mxu1 %v1069_v32 }
  0x3f   : > { %958 = vmatpush3.bf16.msra.mxu0 %v1070_v33 }
  0x40   : > { %986 = vmatpush3.bf16.msra.mxu1 %v1071_v34  ;;  %959 = vmatprep.subr.bf16.mxu0 %v1072_v35 }
  0x41   : > { %987 = vmatprep.subr.bf16.mxu1 %v1073_v36 }
  0x43   : > { %960 = vmatpush3.bf16.msra.mxu0 %v1074_v37 }
  0x44   : > { %988 = vmatpush3.bf16.msra.mxu1 %v1075_v38 }
  0x46   : > { %664 = vmatmul.mubr.bf16.vlgmr.msra.gmra.mxu0 %v1076_v39 }
  0x47   : > { %712 = vmatmul.mubr.bf16.vlgmr.msra.gmra.mxu1 %v1079_v41  ;;  %671 = vmatprep.mubr.bf16.mxu0 %v902_v44 }
  0x48   : > { %719 = vmatprep.mubr.bf16.mxu1 %v904_v46 }
  0x4e   : > { %672 = vmatmul.mubr.bf16.gmra.mxu0 %v901_v47 }
  0x4f   : > { %720 = vmatmul.mubr.bf16.gmra.mxu1 %v903_v48 }
 0x106   : > { %v961_v49 = vpop.f32.mrf.mxu0 }
 0x107   : > { %v989_v50 = vpop.f32.mrf.mxu1 }
 0x108   : > { %v962_v51 = vpop.f32.mrf.mxu0 }
 0x109   : > { %v963_v52 = vadd.f32 %v962_v51, %v961_v49  ;;  %v990_v53 = vpop.f32.mrf.mxu1 }
 0x10a   : > { %v991_v54 = vadd.f32 %v990_v53, %v989_v50  ;;  %v964_v55 = vpop.f32.mrf.mxu0 }
 0x10b   : > { %v992_v57 = vpop.f32.mrf.mxu1 }
 0x10c   : > { %v714_v58 = vadd.f32 %v991_v54, %v963_v52  ;;  %v965_v59 = vpop.f32.mrf.mxu0 }
 0x10d   : > { %v966_v60 = vadd.f32 %v965_v59, %v964_v55  ;;  %v993_v61 = vpop.f32.mrf.mxu1 }
 0x10e   : > { %v727_v62 = vadd.f32 %v714_v58, %v332_v56  ;;  %v994_v63 = vadd.f32 %v993_v61, %v992_v57  ;;  %v967_v0 = vpop.f32.mrf.mxu0 }
 0x10f   : > { %v995_v2 = vpop.f32.mrf.mxu1 }
 0x110   : > { %730 = vst [vmem:[#allocation2 + $0x10] sm:$0xff] %v727_v62  ;;  %v717_v3 = vadd.f32 %v994_v63, %v966_v60  ;;  %v968_v4 = vpop.f32.mrf.mxu0 }
 0x111   : > { %v969_v5 = vadd.f32 %v968_v4, %v967_v0  ;;  %v996_v6 = vpop.f32.mrf.mxu1 }
 0x112   : > { %v728_v7 = vadd.f32 %v717_v3, %v333_v1  ;;  %v997_v8 = vadd.f32 %v996_v6, %v995_v2  ;;  %v970_v9 = vpop.f32.mrf.mxu0 }
 0x113   : > { %v998_v11 = vpop.f32.mrf.mxu1 }
 0x114   : > { %731 = vst [vmem:[#allocation2] sm:$0xff] %v728_v7  ;;  %v722_v12 = vadd.f32 %v997_v8, %v969_v5  ;;  %v971_v13 = vpop.f32.mrf.mxu0  ;;  %736 = sbr.rel (%p937_p11) target bundleno = 293 (0x125), region = 67 }
 0x115   : > { %v999_v14 = vpop.f32.mrf.mxu1 }
 0x116   : > { %v729_v15 = vadd.f32 %v722_v12, %v334_v10 }
 0x118   : > { %732 = vst [vmem:[#allocation2 + $0x8] sm:$0xff] %v729_v15 }
 0x119   : > { %v737_v16 = vld [vmem:[#allocation2 + $0x10] sm:$0xff]  ;;  %v938_v17 = vld [vmem:[%s1278_s2] ss:$0 sm:$0xff] }
 0x11a   : > { %v939_v18 = vld [vmem:[%s1279_s3] ss:$0 sm:$0xff]  ;;  %v747_v19 = vmul.f32 %v938_v17, %v737_v16 }
 0x11b   : > { %v738_v20 = vld [vmem:[#allocation2] sm:$0xff] }
 0x11c   : > { %v748_v22 = vmul.f32 %v938_v17, %v738_v20  ;;  %v757_v24 = vadd.f32 %v939_v18, %v747_v19 }
 0x11e   : > { %v758_v25 = vadd.f32 %v939_v18, %v748_v22  ;;  %760 = vst [vmem:[%s1280_s4] sm:$0xff] %v757_v24 }
 0x11f   : > { %v739_v21 = vld [vmem:[#allocation2 + $0x8] sm:$0xff] }
 0x120   : > { %v749_v23 = vmul.f32 %v938_v17, %v739_v21  ;;  %761 = vst [vmem:[%s1280_s4 + $0x8] sm:$0xff] %v758_v25 }
 0x122   : > { %v759_v26 = vadd.f32 %v939_v18, %v749_v23 }
 0x124   : > { %762 = vst [vmem:[%s1280_s4 + $0x10] sm:$0xff] %v759_v26 }
 0x125 PF: > { %s14_s19 = sadd.s32 1, %s1124_s19   ;;  %s1281_s15 = smov %s1112_s16 }
 0x126   : > { %p11_p12 = scmp.ge.s32.totalorder %s14_s19, 6   ;;  %s1282_s16 = smov %s1187_s23 }
 0x127   : > { %s1283_s17 = smov %s1120_s18  ;;  %s1284_s18 = smov %s1286_s20 }
 0x128   :  { %13 = sbr.rel (!%p11_p12) target bundleno = 3 (0x3), region = 111 }

</bundles_post_ra>
